<compile_context>
chip_gen: v5e
topology: v5e:2x2
jax: 0.10.0
libtpu: 0.0.40
codegen_flags: <defaults>
</compile_context>

<pallas_src>
import math
import functools

import jax
import jax.numpy as jnp
from jax import lax
from jax.experimental import pallas as pl
from jax.experimental.pallas import tpu as pltpu


# ----------------------------------------------------------------------------
# Fused kernel: dwconv 7x7 + LN + MLP + layer-scale + residual (one H-tile).
# ----------------------------------------------------------------------------
def cx_block_kernel(x_ref, wdw_ref, bdw_ref, w1_ref, b1_ref, w2_ref, b2_ref,
                    out_ref, *, eps):
    # x_ref   : (1, 1, TH+6, W+6, C)  padded NHWC slab (6-row / 6-col halo), f32
    # wdw_ref : (7, 7, C)  depthwise weights        bdw_ref: (1, C)
    # w1_ref  : (C, 4C)  bf16  (LN weight folded)   b1_ref : (1, 4C) f32 (LN bias folded)
    # w2_ref  : (4C, C)  bf16  (gamma folded)       b2_ref : (1, C)  f32 (gamma folded)
    # out_ref : (TH*W, C) f32 tokens of this tile
    TH = x_ref.shape[2] - 6
    W = x_ref.shape[3] - 6
    C = x_ref.shape[4]

    wdw = wdw_ref[...]                                   # (7, 7, C)

    # Depthwise 7x7 conv.  One sublane-offset load per kw (7 loads); the kh
    # offsets are leading-(untiled-)dim slices of that load, which are cheap.
    acc = jnp.zeros((TH, W, C), jnp.float32)
    for kw in range(7):
        xw = x_ref[0, 0, :, kw:kw + W, :]                # (TH+6, W, C)
        for kh in range(7):
            acc = acc + xw[kh:kh + TH] * wdw[kh, kw]
    y = (acc + bdw_ref[...]).reshape(TH * W, C)          # tokens (TH*W, C)

    # LayerNorm (affine folded into w1/b1 on the host): just normalize.
    mu = jnp.mean(y, axis=-1, keepdims=True)
    var = jnp.mean((y - mu) ** 2, axis=-1, keepdims=True)
    yn = (y - mu) * lax.rsqrt(var + eps)

    # pwconv1 -> exact GELU -> pwconv2.  bf16 MXU operands, f32 accumulation.
    h = jnp.dot(yn.astype(w1_ref.dtype), w1_ref[...],
                preferred_element_type=jnp.float32) + b1_ref[...]
    # exact GELU (nn.GELU default, approximate='none'); erf keeps semantics.
    h = 0.5 * h * (1.0 + lax.erf(h * (1.0 / math.sqrt(2.0))))
    o = jnp.dot(h.astype(w2_ref.dtype), w2_ref[...],
                preferred_element_type=jnp.float32) + b2_ref[...]

    # Residual comes straight from the interior of the padded slab.
    resid = x_ref[0, 0, 3:3 + TH, 3:3 + W, :].reshape(TH * W, C)
    out_ref[...] = resid + o


# ----------------------------------------------------------------------------
# Wrapper: layout prep, host-side param folding, single pallas_call.
# ----------------------------------------------------------------------------
def cx_block(x_nchw, params, *, h_tile=8, eps=1e-6, mxu_dtype=jnp.bfloat16):
    wdw, bdw, lnw, lnb, w1, b1, w2, b2, gamma = params
    B, C, H, W = x_nchw.shape
    C4 = 4 * C

    # --- host-side algebraic folding (pure preprocessing) ---
    # LN(x)*lnw + lnb then @w1 + b1  ==  LNnorm(x) @ (lnw[:,None]*w1) + (lnb@w1 + b1)
    w1f = (lnw.reshape(C, 1) * w1).astype(mxu_dtype)                    # (C, 4C)
    b1f = (b1.reshape(1, C4) + lnb.reshape(1, C) @ w1).astype(jnp.float32)
    # gamma * (h@w2 + b2)  ==  h @ (w2*gamma) + gamma*b2
    w2f = (w2 * gamma.reshape(1, C)).astype(mxu_dtype)                  # (4C, C)
    b2f = (b2 * gamma).reshape(1, C).astype(jnp.float32)
    bdw2 = bdw.reshape(1, C).astype(jnp.float32)

    # --- layout: NCHW -> NHWC, pad, split H into halo'd tiles ---
    x_nhwc = jnp.transpose(x_nchw, (0, 2, 3, 1)).astype(jnp.float32)    # (B,H,W,C)
    xpad = jnp.pad(x_nhwc, ((0, 0), (3, 3), (3, 3), (0, 0)))            # (B,H+6,W+6,C)

    TH = max(1, min(h_tile, H))
    while H % TH:
        TH -= 1
    nT = H // TH
    # Overlapping (halo) H tiles; small duplication, keeps BlockSpec pipelining.
    x_tiles = jnp.stack([xpad[:, i * TH:i * TH + TH + 6] for i in range(nT)],
                        axis=1)                                         # (B,nT,TH+6,W+6,C)

    N = B * H * W
    tok = TH * W

    cost = pl.CostEstimate(
        flops=int(2 * N * C * 49 + 2 * 2 * N * C * C4),
        transcendentals=int(N * C4),
        bytes_accessed=int(4 * (B * nT * (TH + 6) * (W + 6) * C + N * C
                                + 49 * C + C + C4 + C)
                           + 2 * (C * C4 + C4 * C)),
    )

    out_flat = pl.pallas_call(
        functools.partial(cx_block_kernel, eps=eps),
        out_shape=jax.ShapeDtypeStruct((N, C), jnp.float32),
        grid_spec=pltpu.PrefetchScalarGridSpec(
            num_scalar_prefetch=0,
            grid=(B, nT),
            in_specs=[
                pl.BlockSpec((1, 1, TH + 6, W + 6, C),
                             lambda b, t: (b, t, 0, 0, 0)),   # padded slab (+halo)
                pl.BlockSpec((7, 7, C), lambda b, t: (0, 0, 0)),   # dw weight
                pl.BlockSpec((1, C), lambda b, t: (0, 0)),         # dw bias
                pl.BlockSpec((C, C4), lambda b, t: (0, 0)),        # pwconv1 w (bf16, LN folded)
                pl.BlockSpec((1, C4), lambda b, t: (0, 0)),        # pwconv1 b (folded)
                pl.BlockSpec((C4, C), lambda b, t: (0, 0)),        # pwconv2 w (bf16, gamma folded)
                pl.BlockSpec((1, C), lambda b, t: (0, 0)),         # pwconv2 b (folded)
            ],
            out_specs=pl.BlockSpec((tok, C), lambda b, t: (b * nT + t, 0)),
        ),
        compiler_params=pltpu.CompilerParams(
            dimension_semantics=("parallel", "parallel")),
        cost_estimate=cost,
    )(x_tiles, wdw, bdw2, w1f, b1f, w2f, b2f)

    out = out_flat.reshape(B, H, W, C).transpose(0, 3, 1, 2)            # back to NCHW
    return out


# ----------------------------------------------------------------------------
# Pure-JAX f32 reference (matches the PyTorch module math).
# ----------------------------------------------------------------------------
def cx_block_ref(x_nchw, params, eps=1e-6):
    wdw, bdw, lnw, lnb, w1, b1, w2, b2, gamma = params
    B, C, H, W = x_nchw.shape
    x_nhwc = jnp.transpose(x_nchw, (0, 2, 3, 1))
    xpad = jnp.pad(x_nhwc, ((0, 0), (3, 3), (3, 3), (0, 0)))
    dw = jnp.zeros((B, H, W, C), jnp.float32)
    for kh in range(7):
        for kw in range(7):
            dw = dw + xpad[:, kh:kh + H, kw:kw + W, :] * wdw[kh, kw]
    dw = dw + bdw.reshape(1, 1, 1, C)
    mu = jnp.mean(dw, axis=-1, keepdims=True)
    var = jnp.mean((dw - mu) ** 2, axis=-1, keepdims=True)
    t = (dw - mu) / jnp.sqrt(var + eps) * lnw.reshape(C) + lnb.reshape(C)
    h = t @ w1 + b1.reshape(4 * C)
    h = 0.5 * h * (1.0 + lax.erf(h / math.sqrt(2.0)))
    o = (h @ w2 + b2.reshape(C)) * gamma.reshape(C)
    return x_nchw + jnp.transpose(o, (0, 3, 1, 2))


# ----------------------------------------------------------------------------
# Main
# ----------------------------------------------------------------------------
if __name__ == "__main__":
    B, C, H, W = 2, 32, 16, 16            # dim = 32 -> hidden = 4*dim = 128
    key = jax.random.PRNGKey(0)
    ks = jax.random.split(key, 10)

    x = jax.random.normal(ks[0], (B, C, H, W), jnp.float32)

    # Synthetic parameters with shapes matching the PyTorch module
    # (Linear weights stored as (in, out)).
    wdw = 0.05 * jax.random.normal(ks[1], (7, 7, C), jnp.float32)     # depthwise 7x7
    bdw = 0.01 * jax.random.normal(ks[2], (C,), jnp.float32)
    lnw = 1.0 + 0.1 * jax.random.normal(ks[3], (C,), jnp.float32)     # LayerNorm weight
    lnb = 0.05 * jax.random.normal(ks[4], (C,), jnp.float32)          # LayerNorm bias
    w1 = 0.05 * jax.random.normal(ks[5], (C, 4 * C), jnp.float32)     # pwconv1
    b1 = 0.01 * jax.random.normal(ks[6], (4 * C,), jnp.float32)
    w2 = 0.05 * jax.random.normal(ks[7], (4 * C, C), jnp.float32)     # pwconv2
    b2 = 0.01 * jax.random.normal(ks[8], (C,), jnp.float32)
    gamma = 0.1 * jnp.ones((C,), jnp.float32)   # non-trivial layer scale so the
                                                # MLP branch is actually checked

    params = (wdw, bdw, lnw, lnb, w1, b1, w2, b2, gamma)

    out = jax.block_until_ready(cx_block(x, params))
    ref = jax.block_until_ready(cx_block_ref(x, params))

    assert out.shape == (B, C, H, W)
    err = float(jnp.max(jnp.abs(out - ref)))
    # bf16 MXU operands (f32 accumulation) vs a pure-f32 reference.
    assert err < 2e-3, f"mismatch vs reference: max abs err = {err}"

    print("KERNEL_OK")
</pallas_src>

<mosaic_0001>
module attributes {stable_mosaic.version = 11 : i64} {
  func.func @cx_block_kernel(%arg0: i32, %arg1: i32, %arg2: memref<1x1x14x22x32xf32, #tpu.memory_space<vmem>>, %arg3: memref<7x7x32xf32, #tpu.memory_space<vmem>>, %arg4: memref<1x32xf32, #tpu.memory_space<vmem>>, %arg5: memref<32x128xbf16, #tpu.memory_space<vmem>>, %arg6: memref<1x128xf32, #tpu.memory_space<vmem>>, %arg7: memref<128x32xbf16, #tpu.memory_space<vmem>>, %arg8: memref<1x32xf32, #tpu.memory_space<vmem>>, %arg9: memref<128x32xf32, #tpu.memory_space<vmem>>) attributes {dimension_semantics = [#tpu.dimension_semantics<parallel>, #tpu.dimension_semantics<parallel>], iteration_bounds = array<i64: 2, 2>, scalar_prefetch = 0 : i64, scratch_operands = 0 : i64, tpu.core_type = #tpu.core_type<tc>, window_params = [{transform_indices = @transform_0, window_bounds = array<i64: 1, 1, 14, 22, 32>}, {pipeline_mode = #tpu.pipeline_mode<synchronous>, transform_indices = @transform_1, window_bounds = array<i64: 7, 7, 32>}, {pipeline_mode = #tpu.pipeline_mode<synchronous>, transform_indices = @transform_2, window_bounds = array<i64: 1, 32>}, {pipeline_mode = #tpu.pipeline_mode<synchronous>, transform_indices = @transform_3, window_bounds = array<i64: 32, 128>}, {pipeline_mode = #tpu.pipeline_mode<synchronous>, transform_indices = @transform_4, window_bounds = array<i64: 1, 128>}, {pipeline_mode = #tpu.pipeline_mode<synchronous>, transform_indices = @transform_5, window_bounds = array<i64: 128, 32>}, {pipeline_mode = #tpu.pipeline_mode<synchronous>, transform_indices = @transform_6, window_bounds = array<i64: 1, 32>}, {transform_indices = @transform_7, window_bounds = array<i64: 128, 32>}]} {
    %c0 = arith.constant 0 : index
    %c0_0 = arith.constant 0 : index
    %c0_1 = arith.constant 0 : index
    %0 = vector.load %arg3[%c0, %c0_0, %c0_1] : memref<7x7x32xf32, #tpu.memory_space<vmem>>, vector<7x7x32xf32>
    %cst = arith.constant 0.000000e+00 : f32
    %1 = vector.broadcast %cst : f32 to vector<8x16x32xf32>
    %c0_2 = arith.constant 0 : index
    %c0_3 = arith.constant 0 : index
    %c0_4 = arith.constant 0 : index
    %c0_5 = arith.constant 0 : index
    %c0_6 = arith.constant 0 : index
    %2 = vector.load %arg2[%c0_2, %c0_3, %c0_4, %c0_5, %c0_6] : memref<1x1x14x22x32xf32, #tpu.memory_space<vmem>>, vector<1x1x14x16x32xf32>
    %3 = vector.shape_cast %2 : vector<1x1x14x16x32xf32> to vector<14x16x32xf32>
    %4 = vector.extract_strided_slice %3 {offsets = [0, 0, 0], sizes = [8, 16, 32], strides = [1, 1, 1]} : vector<14x16x32xf32> to vector<8x16x32xf32>
    %5 = vector.extract_strided_slice %0 {offsets = [0, 0, 0], sizes = [1, 1, 32], strides = [1, 1, 1]} : vector<7x7x32xf32> to vector<1x1x32xf32>
    %6 = vector.shape_cast %5 : vector<1x1x32xf32> to vector<32xf32>
    %7 = vector.shape_cast %6 : vector<32xf32> to vector<1x1x32xf32>
    %8 = vector.broadcast %7 : vector<1x1x32xf32> to vector<8x16x32xf32>
    %9 = arith.mulf %4, %8 : vector<8x16x32xf32>
    %10 = arith.addf %1, %9 : vector<8x16x32xf32>
    %11 = vector.extract_strided_slice %3 {offsets = [1, 0, 0], sizes = [8, 16, 32], strides = [1, 1, 1]} : vector<14x16x32xf32> to vector<8x16x32xf32>
    %12 = vector.extract_strided_slice %0 {offsets = [1, 0, 0], sizes = [1, 1, 32], strides = [1, 1, 1]} : vector<7x7x32xf32> to vector<1x1x32xf32>
    %13 = vector.shape_cast %12 : vector<1x1x32xf32> to vector<32xf32>
    %14 = vector.shape_cast %13 : vector<32xf32> to vector<1x1x32xf32>
    %15 = vector.broadcast %14 : vector<1x1x32xf32> to vector<8x16x32xf32>
    %16 = arith.mulf %11, %15 : vector<8x16x32xf32>
    %17 = arith.addf %10, %16 : vector<8x16x32xf32>
    %18 = vector.extract_strided_slice %3 {offsets = [2, 0, 0], sizes = [8, 16, 32], strides = [1, 1, 1]} : vector<14x16x32xf32> to vector<8x16x32xf32>
    %19 = vector.extract_strided_slice %0 {offsets = [2, 0, 0], sizes = [1, 1, 32], strides = [1, 1, 1]} : vector<7x7x32xf32> to vector<1x1x32xf32>
    %20 = vector.shape_cast %19 : vector<1x1x32xf32> to vector<32xf32>
    %21 = vector.shape_cast %20 : vector<32xf32> to vector<1x1x32xf32>
    %22 = vector.broadcast %21 : vector<1x1x32xf32> to vector<8x16x32xf32>
    %23 = arith.mulf %18, %22 : vector<8x16x32xf32>
    %24 = arith.addf %17, %23 : vector<8x16x32xf32>
    %25 = vector.extract_strided_slice %3 {offsets = [3, 0, 0], sizes = [8, 16, 32], strides = [1, 1, 1]} : vector<14x16x32xf32> to vector<8x16x32xf32>
    %26 = vector.extract_strided_slice %0 {offsets = [3, 0, 0], sizes = [1, 1, 32], strides = [1, 1, 1]} : vector<7x7x32xf32> to vector<1x1x32xf32>
    %27 = vector.shape_cast %26 : vector<1x1x32xf32> to vector<32xf32>
    %28 = vector.shape_cast %27 : vector<32xf32> to vector<1x1x32xf32>
    %29 = vector.broadcast %28 : vector<1x1x32xf32> to vector<8x16x32xf32>
    %30 = arith.mulf %25, %29 : vector<8x16x32xf32>
    %31 = arith.addf %24, %30 : vector<8x16x32xf32>
    %32 = vector.extract_strided_slice %3 {offsets = [4, 0, 0], sizes = [8, 16, 32], strides = [1, 1, 1]} : vector<14x16x32xf32> to vector<8x16x32xf32>
    %33 = vector.extract_strided_slice %0 {offsets = [4, 0, 0], sizes = [1, 1, 32], strides = [1, 1, 1]} : vector<7x7x32xf32> to vector<1x1x32xf32>
    %34 = vector.shape_cast %33 : vector<1x1x32xf32> to vector<32xf32>
    %35 = vector.shape_cast %34 : vector<32xf32> to vector<1x1x32xf32>
    %36 = vector.broadcast %35 : vector<1x1x32xf32> to vector<8x16x32xf32>
    %37 = arith.mulf %32, %36 : vector<8x16x32xf32>
    %38 = arith.addf %31, %37 : vector<8x16x32xf32>
    %39 = vector.extract_strided_slice %3 {offsets = [5, 0, 0], sizes = [8, 16, 32], strides = [1, 1, 1]} : vector<14x16x32xf32> to vector<8x16x32xf32>
    %40 = vector.extract_strided_slice %0 {offsets = [5, 0, 0], sizes = [1, 1, 32], strides = [1, 1, 1]} : vector<7x7x32xf32> to vector<1x1x32xf32>
    %41 = vector.shape_cast %40 : vector<1x1x32xf32> to vector<32xf32>
    %42 = vector.shape_cast %41 : vector<32xf32> to vector<1x1x32xf32>
    %43 = vector.broadcast %42 : vector<1x1x32xf32> to vector<8x16x32xf32>
    %44 = arith.mulf %39, %43 : vector<8x16x32xf32>
    %45 = arith.addf %38, %44 : vector<8x16x32xf32>
    %46 = vector.extract_strided_slice %3 {offsets = [6, 0, 0], sizes = [8, 16, 32], strides = [1, 1, 1]} : vector<14x16x32xf32> to vector<8x16x32xf32>
    %47 = vector.extract_strided_slice %0 {offsets = [6, 0, 0], sizes = [1, 1, 32], strides = [1, 1, 1]} : vector<7x7x32xf32> to vector<1x1x32xf32>
    %48 = vector.shape_cast %47 : vector<1x1x32xf32> to vector<32xf32>
    %49 = vector.shape_cast %48 : vector<32xf32> to vector<1x1x32xf32>
    %50 = vector.broadcast %49 : vector<1x1x32xf32> to vector<8x16x32xf32>
    %51 = arith.mulf %46, %50 : vector<8x16x32xf32>
    %52 = arith.addf %45, %51 : vector<8x16x32xf32>
    %c0_7 = arith.constant 0 : index
    %c0_8 = arith.constant 0 : index
    %c0_9 = arith.constant 0 : index
    %c1 = arith.constant 1 : index
    %c0_10 = arith.constant 0 : index
    %53 = vector.load %arg2[%c0_7, %c0_8, %c0_9, %c1, %c0_10] : memref<1x1x14x22x32xf32, #tpu.memory_space<vmem>>, vector<1x1x14x16x32xf32>
    %54 = vector.shape_cast %53 : vector<1x1x14x16x32xf32> to vector<14x16x32xf32>
    %55 = vector.extract_strided_slice %54 {offsets = [0, 0, 0], sizes = [8, 16, 32], strides = [1, 1, 1]} : vector<14x16x32xf32> to vector<8x16x32xf32>
    %56 = vector.extract_strided_slice %0 {offsets = [0, 1, 0], sizes = [1, 1, 32], strides = [1, 1, 1]} : vector<7x7x32xf32> to vector<1x1x32xf32>
    %57 = vector.shape_cast %56 : vector<1x1x32xf32> to vector<32xf32>
    %58 = vector.shape_cast %57 : vector<32xf32> to vector<1x1x32xf32>
    %59 = vector.broadcast %58 : vector<1x1x32xf32> to vector<8x16x32xf32>
    %60 = arith.mulf %55, %59 : vector<8x16x32xf32>
    %61 = arith.addf %52, %60 : vector<8x16x32xf32>
    %62 = vector.extract_strided_slice %54 {offsets = [1, 0, 0], sizes = [8, 16, 32], strides = [1, 1, 1]} : vector<14x16x32xf32> to vector<8x16x32xf32>
    %63 = vector.extract_strided_slice %0 {offsets = [1, 1, 0], sizes = [1, 1, 32], strides = [1, 1, 1]} : vector<7x7x32xf32> to vector<1x1x32xf32>
    %64 = vector.shape_cast %63 : vector<1x1x32xf32> to vector<32xf32>
    %65 = vector.shape_cast %64 : vector<32xf32> to vector<1x1x32xf32>
    %66 = vector.broadcast %65 : vector<1x1x32xf32> to vector<8x16x32xf32>
    %67 = arith.mulf %62, %66 : vector<8x16x32xf32>
    %68 = arith.addf %61, %67 : vector<8x16x32xf32>
    %69 = vector.extract_strided_slice %54 {offsets = [2, 0, 0], sizes = [8, 16, 32], strides = [1, 1, 1]} : vector<14x16x32xf32> to vector<8x16x32xf32>
    %70 = vector.extract_strided_slice %0 {offsets = [2, 1, 0], sizes = [1, 1, 32], strides = [1, 1, 1]} : vector<7x7x32xf32> to vector<1x1x32xf32>
    %71 = vector.shape_cast %70 : vector<1x1x32xf32> to vector<32xf32>
    %72 = vector.shape_cast %71 : vector<32xf32> to vector<1x1x32xf32>
    %73 = vector.broadcast %72 : vector<1x1x32xf32> to vector<8x16x32xf32>
    %74 = arith.mulf %69, %73 : vector<8x16x32xf32>
    %75 = arith.addf %68, %74 : vector<8x16x32xf32>
    %76 = vector.extract_strided_slice %54 {offsets = [3, 0, 0], sizes = [8, 16, 32], strides = [1, 1, 1]} : vector<14x16x32xf32> to vector<8x16x32xf32>
    %77 = vector.extract_strided_slice %0 {offsets = [3, 1, 0], sizes = [1, 1, 32], strides = [1, 1, 1]} : vector<7x7x32xf32> to vector<1x1x32xf32>
    %78 = vector.shape_cast %77 : vector<1x1x32xf32> to vector<32xf32>
    %79 = vector.shape_cast %78 : vector<32xf32> to vector<1x1x32xf32>
    %80 = vector.broadcast %79 : vector<1x1x32xf32> to vector<8x16x32xf32>
    %81 = arith.mulf %76, %80 : vector<8x16x32xf32>
    %82 = arith.addf %75, %81 : vector<8x16x32xf32>
    %83 = vector.extract_strided_slice %54 {offsets = [4, 0, 0], sizes = [8, 16, 32], strides = [1, 1, 1]} : vector<14x16x32xf32> to vector<8x16x32xf32>
    %84 = vector.extract_strided_slice %0 {offsets = [4, 1, 0], sizes = [1, 1, 32], strides = [1, 1, 1]} : vector<7x7x32xf32> to vector<1x1x32xf32>
    %85 = vector.shape_cast %84 : vector<1x1x32xf32> to vector<32xf32>
    %86 = vector.shape_cast %85 : vector<32xf32> to vector<1x1x32xf32>
    %87 = vector.broadcast %86 : vector<1x1x32xf32> to vector<8x16x32xf32>
    %88 = arith.mulf %83, %87 : vector<8x16x32xf32>
    %89 = arith.addf %82, %88 : vector<8x16x32xf32>
    %90 = vector.extract_strided_slice %54 {offsets = [5, 0, 0], sizes = [8, 16, 32], strides = [1, 1, 1]} : vector<14x16x32xf32> to vector<8x16x32xf32>
    %91 = vector.extract_strided_slice %0 {offsets = [5, 1, 0], sizes = [1, 1, 32], strides = [1, 1, 1]} : vector<7x7x32xf32> to vector<1x1x32xf32>
    %92 = vector.shape_cast %91 : vector<1x1x32xf32> to vector<32xf32>
    %93 = vector.shape_cast %92 : vector<32xf32> to vector<1x1x32xf32>
    %94 = vector.broadcast %93 : vector<1x1x32xf32> to vector<8x16x32xf32>
    %95 = arith.mulf %90, %94 : vector<8x16x32xf32>
    %96 = arith.addf %89, %95 : vector<8x16x32xf32>
    %97 = vector.extract_strided_slice %54 {offsets = [6, 0, 0], sizes = [8, 16, 32], strides = [1, 1, 1]} : vector<14x16x32xf32> to vector<8x16x32xf32>
    %98 = vector.extract_strided_slice %0 {offsets = [6, 1, 0], sizes = [1, 1, 32], strides = [1, 1, 1]} : vector<7x7x32xf32> to vector<1x1x32xf32>
    %99 = vector.shape_cast %98 : vector<1x1x32xf32> to vector<32xf32>
    %100 = vector.shape_cast %99 : vector<32xf32> to vector<1x1x32xf32>
    %101 = vector.broadcast %100 : vector<1x1x32xf32> to vector<8x16x32xf32>
    %102 = arith.mulf %97, %101 : vector<8x16x32xf32>
    %103 = arith.addf %96, %102 : vector<8x16x32xf32>
    %c0_11 = arith.constant 0 : index
    %c0_12 = arith.constant 0 : index
    %c0_13 = arith.constant 0 : index
    %c2 = arith.constant 2 : index
    %c0_14 = arith.constant 0 : index
    %104 = vector.load %arg2[%c0_11, %c0_12, %c0_13, %c2, %c0_14] : memref<1x1x14x22x32xf32, #tpu.memory_space<vmem>>, vector<1x1x14x16x32xf32>
    %105 = vector.shape_cast %104 : vector<1x1x14x16x32xf32> to vector<14x16x32xf32>
    %106 = vector.extract_strided_slice %105 {offsets = [0, 0, 0], sizes = [8, 16, 32], strides = [1, 1, 1]} : vector<14x16x32xf32> to vector<8x16x32xf32>
    %107 = vector.extract_strided_slice %0 {offsets = [0, 2, 0], sizes = [1, 1, 32], strides = [1, 1, 1]} : vector<7x7x32xf32> to vector<1x1x32xf32>
    %108 = vector.shape_cast %107 : vector<1x1x32xf32> to vector<32xf32>
    %109 = vector.shape_cast %108 : vector<32xf32> to vector<1x1x32xf32>
    %110 = vector.broadcast %109 : vector<1x1x32xf32> to vector<8x16x32xf32>
    %111 = arith.mulf %106, %110 : vector<8x16x32xf32>
    %112 = arith.addf %103, %111 : vector<8x16x32xf32>
    %113 = vector.extract_strided_slice %105 {offsets = [1, 0, 0], sizes = [8, 16, 32], strides = [1, 1, 1]} : vector<14x16x32xf32> to vector<8x16x32xf32>
    %114 = vector.extract_strided_slice %0 {offsets = [1, 2, 0], sizes = [1, 1, 32], strides = [1, 1, 1]} : vector<7x7x32xf32> to vector<1x1x32xf32>
    %115 = vector.shape_cast %114 : vector<1x1x32xf32> to vector<32xf32>
    %116 = vector.shape_cast %115 : vector<32xf32> to vector<1x1x32xf32>
    %117 = vector.broadcast %116 : vector<1x1x32xf32> to vector<8x16x32xf32>
    %118 = arith.mulf %113, %117 : vector<8x16x32xf32>
    %119 = arith.addf %112, %118 : vector<8x16x32xf32>
    %120 = vector.extract_strided_slice %105 {offsets = [2, 0, 0], sizes = [8, 16, 32], strides = [1, 1, 1]} : vector<14x16x32xf32> to vector<8x16x32xf32>
    %121 = vector.extract_strided_slice %0 {offsets = [2, 2, 0], sizes = [1, 1, 32], strides = [1, 1, 1]} : vector<7x7x32xf32> to vector<1x1x32xf32>
    %122 = vector.shape_cast %121 : vector<1x1x32xf32> to vector<32xf32>
    %123 = vector.shape_cast %122 : vector<32xf32> to vector<1x1x32xf32>
    %124 = vector.broadcast %123 : vector<1x1x32xf32> to vector<8x16x32xf32>
    %125 = arith.mulf %120, %124 : vector<8x16x32xf32>
    %126 = arith.addf %119, %125 : vector<8x16x32xf32>
    %127 = vector.extract_strided_slice %105 {offsets = [3, 0, 0], sizes = [8, 16, 32], strides = [1, 1, 1]} : vector<14x16x32xf32> to vector<8x16x32xf32>
    %128 = vector.extract_strided_slice %0 {offsets = [3, 2, 0], sizes = [1, 1, 32], strides = [1, 1, 1]} : vector<7x7x32xf32> to vector<1x1x32xf32>
    %129 = vector.shape_cast %128 : vector<1x1x32xf32> to vector<32xf32>
    %130 = vector.shape_cast %129 : vector<32xf32> to vector<1x1x32xf32>
    %131 = vector.broadcast %130 : vector<1x1x32xf32> to vector<8x16x32xf32>
    %132 = arith.mulf %127, %131 : vector<8x16x32xf32>
    %133 = arith.addf %126, %132 : vector<8x16x32xf32>
    %134 = vector.extract_strided_slice %105 {offsets = [4, 0, 0], sizes = [8, 16, 32], strides = [1, 1, 1]} : vector<14x16x32xf32> to vector<8x16x32xf32>
    %135 = vector.extract_strided_slice %0 {offsets = [4, 2, 0], sizes = [1, 1, 32], strides = [1, 1, 1]} : vector<7x7x32xf32> to vector<1x1x32xf32>
    %136 = vector.shape_cast %135 : vector<1x1x32xf32> to vector<32xf32>
    %137 = vector.shape_cast %136 : vector<32xf32> to vector<1x1x32xf32>
    %138 = vector.broadcast %137 : vector<1x1x32xf32> to vector<8x16x32xf32>
    %139 = arith.mulf %134, %138 : vector<8x16x32xf32>
    %140 = arith.addf %133, %139 : vector<8x16x32xf32>
    %141 = vector.extract_strided_slice %105 {offsets = [5, 0, 0], sizes = [8, 16, 32], strides = [1, 1, 1]} : vector<14x16x32xf32> to vector<8x16x32xf32>
    %142 = vector.extract_strided_slice %0 {offsets = [5, 2, 0], sizes = [1, 1, 32], strides = [1, 1, 1]} : vector<7x7x32xf32> to vector<1x1x32xf32>
    %143 = vector.shape_cast %142 : vector<1x1x32xf32> to vector<32xf32>
    %144 = vector.shape_cast %143 : vector<32xf32> to vector<1x1x32xf32>
    %145 = vector.broadcast %144 : vector<1x1x32xf32> to vector<8x16x32xf32>
    %146 = arith.mulf %141, %145 : vector<8x16x32xf32>
    %147 = arith.addf %140, %146 : vector<8x16x32xf32>
    %148 = vector.extract_strided_slice %105 {offsets = [6, 0, 0], sizes = [8, 16, 32], strides = [1, 1, 1]} : vector<14x16x32xf32> to vector<8x16x32xf32>
    %149 = vector.extract_strided_slice %0 {offsets = [6, 2, 0], sizes = [1, 1, 32], strides = [1, 1, 1]} : vector<7x7x32xf32> to vector<1x1x32xf32>
    %150 = vector.shape_cast %149 : vector<1x1x32xf32> to vector<32xf32>
    %151 = vector.shape_cast %150 : vector<32xf32> to vector<1x1x32xf32>
    %152 = vector.broadcast %151 : vector<1x1x32xf32> to vector<8x16x32xf32>
    %153 = arith.mulf %148, %152 : vector<8x16x32xf32>
    %154 = arith.addf %147, %153 : vector<8x16x32xf32>
    %c0_15 = arith.constant 0 : index
    %c0_16 = arith.constant 0 : index
    %c0_17 = arith.constant 0 : index
    %c3 = arith.constant 3 : index
    %c0_18 = arith.constant 0 : index
    %155 = vector.load %arg2[%c0_15, %c0_16, %c0_17, %c3, %c0_18] : memref<1x1x14x22x32xf32, #tpu.memory_space<vmem>>, vector<1x1x14x16x32xf32>
    %156 = vector.shape_cast %155 : vector<1x1x14x16x32xf32> to vector<14x16x32xf32>
    %157 = vector.extract_strided_slice %156 {offsets = [0, 0, 0], sizes = [8, 16, 32], strides = [1, 1, 1]} : vector<14x16x32xf32> to vector<8x16x32xf32>
    %158 = vector.extract_strided_slice %0 {offsets = [0, 3, 0], sizes = [1, 1, 32], strides = [1, 1, 1]} : vector<7x7x32xf32> to vector<1x1x32xf32>
    %159 = vector.shape_cast %158 : vector<1x1x32xf32> to vector<32xf32>
    %160 = vector.shape_cast %159 : vector<32xf32> to vector<1x1x32xf32>
    %161 = vector.broadcast %160 : vector<1x1x32xf32> to vector<8x16x32xf32>
    %162 = arith.mulf %157, %161 : vector<8x16x32xf32>
    %163 = arith.addf %154, %162 : vector<8x16x32xf32>
    %164 = vector.extract_strided_slice %156 {offsets = [1, 0, 0], sizes = [8, 16, 32], strides = [1, 1, 1]} : vector<14x16x32xf32> to vector<8x16x32xf32>
    %165 = vector.extract_strided_slice %0 {offsets = [1, 3, 0], sizes = [1, 1, 32], strides = [1, 1, 1]} : vector<7x7x32xf32> to vector<1x1x32xf32>
    %166 = vector.shape_cast %165 : vector<1x1x32xf32> to vector<32xf32>
    %167 = vector.shape_cast %166 : vector<32xf32> to vector<1x1x32xf32>
    %168 = vector.broadcast %167 : vector<1x1x32xf32> to vector<8x16x32xf32>
    %169 = arith.mulf %164, %168 : vector<8x16x32xf32>
    %170 = arith.addf %163, %169 : vector<8x16x32xf32>
    %171 = vector.extract_strided_slice %156 {offsets = [2, 0, 0], sizes = [8, 16, 32], strides = [1, 1, 1]} : vector<14x16x32xf32> to vector<8x16x32xf32>
    %172 = vector.extract_strided_slice %0 {offsets = [2, 3, 0], sizes = [1, 1, 32], strides = [1, 1, 1]} : vector<7x7x32xf32> to vector<1x1x32xf32>
    %173 = vector.shape_cast %172 : vector<1x1x32xf32> to vector<32xf32>
    %174 = vector.shape_cast %173 : vector<32xf32> to vector<1x1x32xf32>
    %175 = vector.broadcast %174 : vector<1x1x32xf32> to vector<8x16x32xf32>
    %176 = arith.mulf %171, %175 : vector<8x16x32xf32>
    %177 = arith.addf %170, %176 : vector<8x16x32xf32>
    %178 = vector.extract_strided_slice %156 {offsets = [3, 0, 0], sizes = [8, 16, 32], strides = [1, 1, 1]} : vector<14x16x32xf32> to vector<8x16x32xf32>
    %179 = vector.extract_strided_slice %0 {offsets = [3, 3, 0], sizes = [1, 1, 32], strides = [1, 1, 1]} : vector<7x7x32xf32> to vector<1x1x32xf32>
    %180 = vector.shape_cast %179 : vector<1x1x32xf32> to vector<32xf32>
    %181 = vector.shape_cast %180 : vector<32xf32> to vector<1x1x32xf32>
    %182 = vector.broadcast %181 : vector<1x1x32xf32> to vector<8x16x32xf32>
    %183 = arith.mulf %178, %182 : vector<8x16x32xf32>
    %184 = arith.addf %177, %183 : vector<8x16x32xf32>
    %185 = vector.extract_strided_slice %156 {offsets = [4, 0, 0], sizes = [8, 16, 32], strides = [1, 1, 1]} : vector<14x16x32xf32> to vector<8x16x32xf32>
    %186 = vector.extract_strided_slice %0 {offsets = [4, 3, 0], sizes = [1, 1, 32], strides = [1, 1, 1]} : vector<7x7x32xf32> to vector<1x1x32xf32>
    %187 = vector.shape_cast %186 : vector<1x1x32xf32> to vector<32xf32>
    %188 = vector.shape_cast %187 : vector<32xf32> to vector<1x1x32xf32>
    %189 = vector.broadcast %188 : vector<1x1x32xf32> to vector<8x16x32xf32>
    %190 = arith.mulf %185, %189 : vector<8x16x32xf32>
    %191 = arith.addf %184, %190 : vector<8x16x32xf32>
    %192 = vector.extract_strided_slice %156 {offsets = [5, 0, 0], sizes = [8, 16, 32], strides = [1, 1, 1]} : vector<14x16x32xf32> to vector<8x16x32xf32>
    %193 = vector.extract_strided_slice %0 {offsets = [5, 3, 0], sizes = [1, 1, 32], strides = [1, 1, 1]} : vector<7x7x32xf32> to vector<1x1x32xf32>
    %194 = vector.shape_cast %193 : vector<1x1x32xf32> to vector<32xf32>
    %195 = vector.shape_cast %194 : vector<32xf32> to vector<1x1x32xf32>
    %196 = vector.broadcast %195 : vector<1x1x32xf32> to vector<8x16x32xf32>
    %197 = arith.mulf %192, %196 : vector<8x16x32xf32>
    %198 = arith.addf %191, %197 : vector<8x16x32xf32>
    %199 = vector.extract_strided_slice %156 {offsets = [6, 0, 0], sizes = [8, 16, 32], strides = [1, 1, 1]} : vector<14x16x32xf32> to vector<8x16x32xf32>
    %200 = vector.extract_strided_slice %0 {offsets = [6, 3, 0], sizes = [1, 1, 32], strides = [1, 1, 1]} : vector<7x7x32xf32> to vector<1x1x32xf32>
    %201 = vector.shape_cast %200 : vector<1x1x32xf32> to vector<32xf32>
    %202 = vector.shape_cast %201 : vector<32xf32> to vector<1x1x32xf32>
    %203 = vector.broadcast %202 : vector<1x1x32xf32> to vector<8x16x32xf32>
    %204 = arith.mulf %199, %203 : vector<8x16x32xf32>
    %205 = arith.addf %198, %204 : vector<8x16x32xf32>
    %c0_19 = arith.constant 0 : index
    %c0_20 = arith.constant 0 : index
    %c0_21 = arith.constant 0 : index
    %c4 = arith.constant 4 : index
    %c0_22 = arith.constant 0 : index
    %206 = vector.load %arg2[%c0_19, %c0_20, %c0_21, %c4, %c0_22] : memref<1x1x14x22x32xf32, #tpu.memory_space<vmem>>, vector<1x1x14x16x32xf32>
    %207 = vector.shape_cast %206 : vector<1x1x14x16x32xf32> to vector<14x16x32xf32>
    %208 = vector.extract_strided_slice %207 {offsets = [0, 0, 0], sizes = [8, 16, 32], strides = [1, 1, 1]} : vector<14x16x32xf32> to vector<8x16x32xf32>
    %209 = vector.extract_strided_slice %0 {offsets = [0, 4, 0], sizes = [1, 1, 32], strides = [1, 1, 1]} : vector<7x7x32xf32> to vector<1x1x32xf32>
    %210 = vector.shape_cast %209 : vector<1x1x32xf32> to vector<32xf32>
    %211 = vector.shape_cast %210 : vector<32xf32> to vector<1x1x32xf32>
    %212 = vector.broadcast %211 : vector<1x1x32xf32> to vector<8x16x32xf32>
    %213 = arith.mulf %208, %212 : vector<8x16x32xf32>
    %214 = arith.addf %205, %213 : vector<8x16x32xf32>
    %215 = vector.extract_strided_slice %207 {offsets = [1, 0, 0], sizes = [8, 16, 32], strides = [1, 1, 1]} : vector<14x16x32xf32> to vector<8x16x32xf32>
    %216 = vector.extract_strided_slice %0 {offsets = [1, 4, 0], sizes = [1, 1, 32], strides = [1, 1, 1]} : vector<7x7x32xf32> to vector<1x1x32xf32>
    %217 = vector.shape_cast %216 : vector<1x1x32xf32> to vector<32xf32>
    %218 = vector.shape_cast %217 : vector<32xf32> to vector<1x1x32xf32>
    %219 = vector.broadcast %218 : vector<1x1x32xf32> to vector<8x16x32xf32>
    %220 = arith.mulf %215, %219 : vector<8x16x32xf32>
    %221 = arith.addf %214, %220 : vector<8x16x32xf32>
    %222 = vector.extract_strided_slice %207 {offsets = [2, 0, 0], sizes = [8, 16, 32], strides = [1, 1, 1]} : vector<14x16x32xf32> to vector<8x16x32xf32>
    %223 = vector.extract_strided_slice %0 {offsets = [2, 4, 0], sizes = [1, 1, 32], strides = [1, 1, 1]} : vector<7x7x32xf32> to vector<1x1x32xf32>
    %224 = vector.shape_cast %223 : vector<1x1x32xf32> to vector<32xf32>
    %225 = vector.shape_cast %224 : vector<32xf32> to vector<1x1x32xf32>
    %226 = vector.broadcast %225 : vector<1x1x32xf32> to vector<8x16x32xf32>
    %227 = arith.mulf %222, %226 : vector<8x16x32xf32>
    %228 = arith.addf %221, %227 : vector<8x16x32xf32>
    %229 = vector.extract_strided_slice %207 {offsets = [3, 0, 0], sizes = [8, 16, 32], strides = [1, 1, 1]} : vector<14x16x32xf32> to vector<8x16x32xf32>
    %230 = vector.extract_strided_slice %0 {offsets = [3, 4, 0], sizes = [1, 1, 32], strides = [1, 1, 1]} : vector<7x7x32xf32> to vector<1x1x32xf32>
    %231 = vector.shape_cast %230 : vector<1x1x32xf32> to vector<32xf32>
    %232 = vector.shape_cast %231 : vector<32xf32> to vector<1x1x32xf32>
    %233 = vector.broadcast %232 : vector<1x1x32xf32> to vector<8x16x32xf32>
    %234 = arith.mulf %229, %233 : vector<8x16x32xf32>
    %235 = arith.addf %228, %234 : vector<8x16x32xf32>
    %236 = vector.extract_strided_slice %207 {offsets = [4, 0, 0], sizes = [8, 16, 32], strides = [1, 1, 1]} : vector<14x16x32xf32> to vector<8x16x32xf32>
    %237 = vector.extract_strided_slice %0 {offsets = [4, 4, 0], sizes = [1, 1, 32], strides = [1, 1, 1]} : vector<7x7x32xf32> to vector<1x1x32xf32>
    %238 = vector.shape_cast %237 : vector<1x1x32xf32> to vector<32xf32>
    %239 = vector.shape_cast %238 : vector<32xf32> to vector<1x1x32xf32>
    %240 = vector.broadcast %239 : vector<1x1x32xf32> to vector<8x16x32xf32>
    %241 = arith.mulf %236, %240 : vector<8x16x32xf32>
    %242 = arith.addf %235, %241 : vector<8x16x32xf32>
    %243 = vector.extract_strided_slice %207 {offsets = [5, 0, 0], sizes = [8, 16, 32], strides = [1, 1, 1]} : vector<14x16x32xf32> to vector<8x16x32xf32>
    %244 = vector.extract_strided_slice %0 {offsets = [5, 4, 0], sizes = [1, 1, 32], strides = [1, 1, 1]} : vector<7x7x32xf32> to vector<1x1x32xf32>
    %245 = vector.shape_cast %244 : vector<1x1x32xf32> to vector<32xf32>
    %246 = vector.shape_cast %245 : vector<32xf32> to vector<1x1x32xf32>
    %247 = vector.broadcast %246 : vector<1x1x32xf32> to vector<8x16x32xf32>
    %248 = arith.mulf %243, %247 : vector<8x16x32xf32>
    %249 = arith.addf %242, %248 : vector<8x16x32xf32>
    %250 = vector.extract_strided_slice %207 {offsets = [6, 0, 0], sizes = [8, 16, 32], strides = [1, 1, 1]} : vector<14x16x32xf32> to vector<8x16x32xf32>
    %251 = vector.extract_strided_slice %0 {offsets = [6, 4, 0], sizes = [1, 1, 32], strides = [1, 1, 1]} : vector<7x7x32xf32> to vector<1x1x32xf32>
    %252 = vector.shape_cast %251 : vector<1x1x32xf32> to vector<32xf32>
    %253 = vector.shape_cast %252 : vector<32xf32> to vector<1x1x32xf32>
    %254 = vector.broadcast %253 : vector<1x1x32xf32> to vector<8x16x32xf32>
    %255 = arith.mulf %250, %254 : vector<8x16x32xf32>
    %256 = arith.addf %249, %255 : vector<8x16x32xf32>
    %c0_23 = arith.constant 0 : index
    %c0_24 = arith.constant 0 : index
    %c0_25 = arith.constant 0 : index
    %c5 = arith.constant 5 : index
    %c0_26 = arith.constant 0 : index
    %257 = vector.load %arg2[%c0_23, %c0_24, %c0_25, %c5, %c0_26] : memref<1x1x14x22x32xf32, #tpu.memory_space<vmem>>, vector<1x1x14x16x32xf32>
    %258 = vector.shape_cast %257 : vector<1x1x14x16x32xf32> to vector<14x16x32xf32>
    %259 = vector.extract_strided_slice %258 {offsets = [0, 0, 0], sizes = [8, 16, 32], strides = [1, 1, 1]} : vector<14x16x32xf32> to vector<8x16x32xf32>
    %260 = vector.extract_strided_slice %0 {offsets = [0, 5, 0], sizes = [1, 1, 32], strides = [1, 1, 1]} : vector<7x7x32xf32> to vector<1x1x32xf32>
    %261 = vector.shape_cast %260 : vector<1x1x32xf32> to vector<32xf32>
    %262 = vector.shape_cast %261 : vector<32xf32> to vector<1x1x32xf32>
    %263 = vector.broadcast %262 : vector<1x1x32xf32> to vector<8x16x32xf32>
    %264 = arith.mulf %259, %263 : vector<8x16x32xf32>
    %265 = arith.addf %256, %264 : vector<8x16x32xf32>
    %266 = vector.extract_strided_slice %258 {offsets = [1, 0, 0], sizes = [8, 16, 32], strides = [1, 1, 1]} : vector<14x16x32xf32> to vector<8x16x32xf32>
    %267 = vector.extract_strided_slice %0 {offsets = [1, 5, 0], sizes = [1, 1, 32], strides = [1, 1, 1]} : vector<7x7x32xf32> to vector<1x1x32xf32>
    %268 = vector.shape_cast %267 : vector<1x1x32xf32> to vector<32xf32>
    %269 = vector.shape_cast %268 : vector<32xf32> to vector<1x1x32xf32>
    %270 = vector.broadcast %269 : vector<1x1x32xf32> to vector<8x16x32xf32>
    %271 = arith.mulf %266, %270 : vector<8x16x32xf32>
    %272 = arith.addf %265, %271 : vector<8x16x32xf32>
    %273 = vector.extract_strided_slice %258 {offsets = [2, 0, 0], sizes = [8, 16, 32], strides = [1, 1, 1]} : vector<14x16x32xf32> to vector<8x16x32xf32>
    %274 = vector.extract_strided_slice %0 {offsets = [2, 5, 0], sizes = [1, 1, 32], strides = [1, 1, 1]} : vector<7x7x32xf32> to vector<1x1x32xf32>
    %275 = vector.shape_cast %274 : vector<1x1x32xf32> to vector<32xf32>
    %276 = vector.shape_cast %275 : vector<32xf32> to vector<1x1x32xf32>
    %277 = vector.broadcast %276 : vector<1x1x32xf32> to vector<8x16x32xf32>
    %278 = arith.mulf %273, %277 : vector<8x16x32xf32>
    %279 = arith.addf %272, %278 : vector<8x16x32xf32>
    %280 = vector.extract_strided_slice %258 {offsets = [3, 0, 0], sizes = [8, 16, 32], strides = [1, 1, 1]} : vector<14x16x32xf32> to vector<8x16x32xf32>
    %281 = vector.extract_strided_slice %0 {offsets = [3, 5, 0], sizes = [1, 1, 32], strides = [1, 1, 1]} : vector<7x7x32xf32> to vector<1x1x32xf32>
    %282 = vector.shape_cast %281 : vector<1x1x32xf32> to vector<32xf32>
    %283 = vector.shape_cast %282 : vector<32xf32> to vector<1x1x32xf32>
    %284 = vector.broadcast %283 : vector<1x1x32xf32> to vector<8x16x32xf32>
    %285 = arith.mulf %280, %284 : vector<8x16x32xf32>
    %286 = arith.addf %279, %285 : vector<8x16x32xf32>
    %287 = vector.extract_strided_slice %258 {offsets = [4, 0, 0], sizes = [8, 16, 32], strides = [1, 1, 1]} : vector<14x16x32xf32> to vector<8x16x32xf32>
    %288 = vector.extract_strided_slice %0 {offsets = [4, 5, 0], sizes = [1, 1, 32], strides = [1, 1, 1]} : vector<7x7x32xf32> to vector<1x1x32xf32>
    %289 = vector.shape_cast %288 : vector<1x1x32xf32> to vector<32xf32>
    %290 = vector.shape_cast %289 : vector<32xf32> to vector<1x1x32xf32>
    %291 = vector.broadcast %290 : vector<1x1x32xf32> to vector<8x16x32xf32>
    %292 = arith.mulf %287, %291 : vector<8x16x32xf32>
    %293 = arith.addf %286, %292 : vector<8x16x32xf32>
    %294 = vector.extract_strided_slice %258 {offsets = [5, 0, 0], sizes = [8, 16, 32], strides = [1, 1, 1]} : vector<14x16x32xf32> to vector<8x16x32xf32>
    %295 = vector.extract_strided_slice %0 {offsets = [5, 5, 0], sizes = [1, 1, 32], strides = [1, 1, 1]} : vector<7x7x32xf32> to vector<1x1x32xf32>
    %296 = vector.shape_cast %295 : vector<1x1x32xf32> to vector<32xf32>
    %297 = vector.shape_cast %296 : vector<32xf32> to vector<1x1x32xf32>
    %298 = vector.broadcast %297 : vector<1x1x32xf32> to vector<8x16x32xf32>
    %299 = arith.mulf %294, %298 : vector<8x16x32xf32>
    %300 = arith.addf %293, %299 : vector<8x16x32xf32>
    %301 = vector.extract_strided_slice %258 {offsets = [6, 0, 0], sizes = [8, 16, 32], strides = [1, 1, 1]} : vector<14x16x32xf32> to vector<8x16x32xf32>
    %302 = vector.extract_strided_slice %0 {offsets = [6, 5, 0], sizes = [1, 1, 32], strides = [1, 1, 1]} : vector<7x7x32xf32> to vector<1x1x32xf32>
    %303 = vector.shape_cast %302 : vector<1x1x32xf32> to vector<32xf32>
    %304 = vector.shape_cast %303 : vector<32xf32> to vector<1x1x32xf32>
    %305 = vector.broadcast %304 : vector<1x1x32xf32> to vector<8x16x32xf32>
    %306 = arith.mulf %301, %305 : vector<8x16x32xf32>
    %307 = arith.addf %300, %306 : vector<8x16x32xf32>
    %c0_27 = arith.constant 0 : index
    %c0_28 = arith.constant 0 : index
    %c0_29 = arith.constant 0 : index
    %c6 = arith.constant 6 : index
    %c0_30 = arith.constant 0 : index
    %308 = vector.load %arg2[%c0_27, %c0_28, %c0_29, %c6, %c0_30] : memref<1x1x14x22x32xf32, #tpu.memory_space<vmem>>, vector<1x1x14x16x32xf32>
    %309 = vector.shape_cast %308 : vector<1x1x14x16x32xf32> to vector<14x16x32xf32>
    %310 = vector.extract_strided_slice %309 {offsets = [0, 0, 0], sizes = [8, 16, 32], strides = [1, 1, 1]} : vector<14x16x32xf32> to vector<8x16x32xf32>
    %311 = vector.extract_strided_slice %0 {offsets = [0, 6, 0], sizes = [1, 1, 32], strides = [1, 1, 1]} : vector<7x7x32xf32> to vector<1x1x32xf32>
    %312 = vector.shape_cast %311 : vector<1x1x32xf32> to vector<32xf32>
    %313 = vector.shape_cast %312 : vector<32xf32> to vector<1x1x32xf32>
    %314 = vector.broadcast %313 : vector<1x1x32xf32> to vector<8x16x32xf32>
    %315 = arith.mulf %310, %314 : vector<8x16x32xf32>
    %316 = arith.addf %307, %315 : vector<8x16x32xf32>
    %317 = vector.extract_strided_slice %309 {offsets = [1, 0, 0], sizes = [8, 16, 32], strides = [1, 1, 1]} : vector<14x16x32xf32> to vector<8x16x32xf32>
    %318 = vector.extract_strided_slice %0 {offsets = [1, 6, 0], sizes = [1, 1, 32], strides = [1, 1, 1]} : vector<7x7x32xf32> to vector<1x1x32xf32>
    %319 = vector.shape_cast %318 : vector<1x1x32xf32> to vector<32xf32>
    %320 = vector.shape_cast %319 : vector<32xf32> to vector<1x1x32xf32>
    %321 = vector.broadcast %320 : vector<1x1x32xf32> to vector<8x16x32xf32>
    %322 = arith.mulf %317, %321 : vector<8x16x32xf32>
    %323 = arith.addf %316, %322 : vector<8x16x32xf32>
    %324 = vector.extract_strided_slice %309 {offsets = [2, 0, 0], sizes = [8, 16, 32], strides = [1, 1, 1]} : vector<14x16x32xf32> to vector<8x16x32xf32>
    %325 = vector.extract_strided_slice %0 {offsets = [2, 6, 0], sizes = [1, 1, 32], strides = [1, 1, 1]} : vector<7x7x32xf32> to vector<1x1x32xf32>
    %326 = vector.shape_cast %325 : vector<1x1x32xf32> to vector<32xf32>
    %327 = vector.shape_cast %326 : vector<32xf32> to vector<1x1x32xf32>
    %328 = vector.broadcast %327 : vector<1x1x32xf32> to vector<8x16x32xf32>
    %329 = arith.mulf %324, %328 : vector<8x16x32xf32>
    %330 = arith.addf %323, %329 : vector<8x16x32xf32>
    %331 = vector.extract_strided_slice %309 {offsets = [3, 0, 0], sizes = [8, 16, 32], strides = [1, 1, 1]} : vector<14x16x32xf32> to vector<8x16x32xf32>
    %332 = vector.extract_strided_slice %0 {offsets = [3, 6, 0], sizes = [1, 1, 32], strides = [1, 1, 1]} : vector<7x7x32xf32> to vector<1x1x32xf32>
    %333 = vector.shape_cast %332 : vector<1x1x32xf32> to vector<32xf32>
    %334 = vector.shape_cast %333 : vector<32xf32> to vector<1x1x32xf32>
    %335 = vector.broadcast %334 : vector<1x1x32xf32> to vector<8x16x32xf32>
    %336 = arith.mulf %331, %335 : vector<8x16x32xf32>
    %337 = arith.addf %330, %336 : vector<8x16x32xf32>
    %338 = vector.extract_strided_slice %309 {offsets = [4, 0, 0], sizes = [8, 16, 32], strides = [1, 1, 1]} : vector<14x16x32xf32> to vector<8x16x32xf32>
    %339 = vector.extract_strided_slice %0 {offsets = [4, 6, 0], sizes = [1, 1, 32], strides = [1, 1, 1]} : vector<7x7x32xf32> to vector<1x1x32xf32>
    %340 = vector.shape_cast %339 : vector<1x1x32xf32> to vector<32xf32>
    %341 = vector.shape_cast %340 : vector<32xf32> to vector<1x1x32xf32>
    %342 = vector.broadcast %341 : vector<1x1x32xf32> to vector<8x16x32xf32>
    %343 = arith.mulf %338, %342 : vector<8x16x32xf32>
    %344 = arith.addf %337, %343 : vector<8x16x32xf32>
    %345 = vector.extract_strided_slice %309 {offsets = [5, 0, 0], sizes = [8, 16, 32], strides = [1, 1, 1]} : vector<14x16x32xf32> to vector<8x16x32xf32>
    %346 = vector.extract_strided_slice %0 {offsets = [5, 6, 0], sizes = [1, 1, 32], strides = [1, 1, 1]} : vector<7x7x32xf32> to vector<1x1x32xf32>
    %347 = vector.shape_cast %346 : vector<1x1x32xf32> to vector<32xf32>
    %348 = vector.shape_cast %347 : vector<32xf32> to vector<1x1x32xf32>
    %349 = vector.broadcast %348 : vector<1x1x32xf32> to vector<8x16x32xf32>
    %350 = arith.mulf %345, %349 : vector<8x16x32xf32>
    %351 = arith.addf %344, %350 : vector<8x16x32xf32>
    %352 = vector.extract_strided_slice %309 {offsets = [6, 0, 0], sizes = [8, 16, 32], strides = [1, 1, 1]} : vector<14x16x32xf32> to vector<8x16x32xf32>
    %353 = vector.extract_strided_slice %0 {offsets = [6, 6, 0], sizes = [1, 1, 32], strides = [1, 1, 1]} : vector<7x7x32xf32> to vector<1x1x32xf32>
    %354 = vector.shape_cast %353 : vector<1x1x32xf32> to vector<32xf32>
    %355 = vector.shape_cast %354 : vector<32xf32> to vector<1x1x32xf32>
    %356 = vector.broadcast %355 : vector<1x1x32xf32> to vector<8x16x32xf32>
    %357 = arith.mulf %352, %356 : vector<8x16x32xf32>
    %358 = arith.addf %351, %357 : vector<8x16x32xf32>
    %c0_31 = arith.constant 0 : index
    %c0_32 = arith.constant 0 : index
    %359 = vector.load %arg4[%c0_31, %c0_32] : memref<1x32xf32, #tpu.memory_space<vmem>>, vector<1x32xf32>
    %360 = vector.shape_cast %359 : vector<1x32xf32> to vector<1x1x32xf32>
    %361 = vector.broadcast %360 : vector<1x1x32xf32> to vector<8x16x32xf32>
    %362 = arith.addf %358, %361 : vector<8x16x32xf32>
    %363 = vector.shape_cast %362 : vector<8x16x32xf32> to vector<128x32xf32>
    %cst_33 = arith.constant dense<0.000000e+00> : vector<128xf32>
    %364 = vector.multi_reduction <add>, %363, %cst_33 [1] : vector<128x32xf32> to vector<128xf32>
    %365 = vector.shape_cast %364 : vector<128xf32> to vector<128x1xf32>
    %cst_34 = arith.constant 3.200000e+01 : f32
    %366 = vector.broadcast %cst_34 : f32 to vector<128x1xf32>
    %367 = arith.divf %365, %366 : vector<128x1xf32>
    %368 = vector.broadcast %367 : vector<128x1xf32> to vector<128x32xf32>
    %369 = arith.subf %363, %368 : vector<128x32xf32>
    %370 = arith.mulf %369, %369 : vector<128x32xf32>
    %cst_35 = arith.constant dense<0.000000e+00> : vector<128xf32>
    %371 = vector.multi_reduction <add>, %370, %cst_35 [1] : vector<128x32xf32> to vector<128xf32>
    %372 = vector.shape_cast %371 : vector<128xf32> to vector<128x1xf32>
    %cst_36 = arith.constant 3.200000e+01 : f32
    %373 = vector.broadcast %cst_36 : f32 to vector<128x1xf32>
    %374 = arith.divf %372, %373 : vector<128x1xf32>
    %375 = vector.broadcast %367 : vector<128x1xf32> to vector<128x32xf32>
    %376 = arith.subf %363, %375 : vector<128x32xf32>
    %cst_37 = arith.constant 9.99999997E-7 : f32
    %377 = vector.broadcast %cst_37 : f32 to vector<128x1xf32>
    %378 = arith.addf %374, %377 : vector<128x1xf32>
    %379 = math.rsqrt %378 : vector<128x1xf32>
    %380 = vector.broadcast %379 : vector<128x1xf32> to vector<128x32xf32>
    %381 = arith.mulf %376, %380 : vector<128x32xf32>
    %382 = arith.truncf %381 : vector<128x32xf32> to vector<128x32xbf16>
    %c0_38 = arith.constant 0 : index
    %c0_39 = arith.constant 0 : index
    %383 = vector.load %arg5[%c0_38, %c0_39] : memref<32x128xbf16, #tpu.memory_space<vmem>>, vector<32x128xbf16>
    %cst_40 = arith.constant dense<0.000000e+00> : vector<128x128xf32>
    %384 = tpu.matmul %382, %383, %cst_40 {dimension_numbers = #tpu.dot_dimension_numbers<[1], [0], [0], [1], [0, 0, 1, 1], [], []>} : vector<128x32xbf16>, vector<32x128xbf16>, vector<128x128xf32> -> vector<128x128xf32>
    %c0_41 = arith.constant 0 : index
    %c0_42 = arith.constant 0 : index
    %385 = vector.load %arg6[%c0_41, %c0_42] : memref<1x128xf32, #tpu.memory_space<vmem>>, vector<1x128xf32>
    %386 = vector.broadcast %385 : vector<1x128xf32> to vector<128x128xf32>
    %387 = arith.addf %384, %386 : vector<128x128xf32>
    %cst_43 = arith.constant 5.000000e-01 : f32
    %388 = vector.broadcast %cst_43 : f32 to vector<128x128xf32>
    %389 = arith.mulf %388, %387 : vector<128x128xf32>
    %cst_44 = arith.constant 0.707106769 : f32
    %390 = vector.broadcast %cst_44 : f32 to vector<128x128xf32>
    %391 = arith.mulf %387, %390 : vector<128x128xf32>
    %392 = math.erf %391 : vector<128x128xf32>
    %cst_45 = arith.constant 1.000000e+00 : f32
    %393 = vector.broadcast %cst_45 : f32 to vector<128x128xf32>
    %394 = arith.addf %393, %392 : vector<128x128xf32>
    %395 = arith.mulf %389, %394 : vector<128x128xf32>
    %396 = arith.truncf %395 : vector<128x128xf32> to vector<128x128xbf16>
    %c0_46 = arith.constant 0 : index
    %c0_47 = arith.constant 0 : index
    %397 = vector.load %arg7[%c0_46, %c0_47] : memref<128x32xbf16, #tpu.memory_space<vmem>>, vector<128x32xbf16>
    %cst_48 = arith.constant dense<0.000000e+00> : vector<128x32xf32>
    %398 = tpu.matmul %396, %397, %cst_48 {dimension_numbers = #tpu.dot_dimension_numbers<[1], [0], [0], [1], [0, 0, 1, 1], [], []>} : vector<128x128xbf16>, vector<128x32xbf16>, vector<128x32xf32> -> vector<128x32xf32>
    %c0_49 = arith.constant 0 : index
    %c0_50 = arith.constant 0 : index
    %399 = vector.load %arg8[%c0_49, %c0_50] : memref<1x32xf32, #tpu.memory_space<vmem>>, vector<1x32xf32>
    %400 = vector.broadcast %399 : vector<1x32xf32> to vector<128x32xf32>
    %401 = arith.addf %398, %400 : vector<128x32xf32>
    %c0_51 = arith.constant 0 : index
    %c0_52 = arith.constant 0 : index
    %c3_53 = arith.constant 3 : index
    %c3_54 = arith.constant 3 : index
    %c0_55 = arith.constant 0 : index
    %402 = vector.load %arg2[%c0_51, %c0_52, %c3_53, %c3_54, %c0_55] : memref<1x1x14x22x32xf32, #tpu.memory_space<vmem>>, vector<1x1x8x16x32xf32>
    %403 = vector.shape_cast %402 : vector<1x1x8x16x32xf32> to vector<8x16x32xf32>
    %404 = vector.shape_cast %403 : vector<8x16x32xf32> to vector<128x32xf32>
    %405 = arith.addf %404, %401 : vector<128x32xf32>
    %c0_56 = arith.constant 0 : index
    %c0_57 = arith.constant 0 : index
    %406 = vector.load %arg9[%c0_56, %c0_57] : memref<128x32xf32, #tpu.memory_space<vmem>>, vector<128x32xf32>
    tpu.vector_store %arg9[%c0_56, %c0_57], %405 {strides = array<i32>} : memref<128x32xf32, #tpu.memory_space<vmem>>, vector<128x32xf32>,
    return
  }
  func.func @transform_0(%arg0: i32, %arg1: i32) -> (i32, i32, i32, i32, i32) {
    %c0_i32 = arith.constant 0 : i32
    %c0_i32_0 = arith.constant 0 : i32
    %c0_i32_1 = arith.constant 0 : i32
    %c0_i32_2 = arith.constant 0 : i32
    return %arg0, %arg1, %c0_i32, %c0_i32_0, %c0_i32_1 : i32, i32, i32, i32, i32
  }
  func.func @transform_1(%arg0: i32, %arg1: i32) -> (i32, i32, i32) {
    %c0_i32 = arith.constant 0 : i32
    %c0_i32_0 = arith.constant 0 : i32
    %c0_i32_1 = arith.constant 0 : i32
    %c0_i32_2 = arith.constant 0 : i32
    return %c0_i32, %c0_i32_0, %c0_i32_1 : i32, i32, i32
  }
  func.func @transform_2(%arg0: i32, %arg1: i32) -> (i32, i32) {
    %c0_i32 = arith.constant 0 : i32
    %c0_i32_0 = arith.constant 0 : i32
    %c0_i32_1 = arith.constant 0 : i32
    return %c0_i32, %c0_i32_0 : i32, i32
  }
  func.func @transform_3(%arg0: i32, %arg1: i32) -> (i32, i32) {
    %c0_i32 = arith.constant 0 : i32
    %c0_i32_0 = arith.constant 0 : i32
    %c0_i32_1 = arith.constant 0 : i32
    return %c0_i32, %c0_i32_0 : i32, i32
  }
  func.func @transform_4(%arg0: i32, %arg1: i32) -> (i32, i32) {
    %c0_i32 = arith.constant 0 : i32
    %c0_i32_0 = arith.constant 0 : i32
    %c0_i32_1 = arith.constant 0 : i32
    return %c0_i32, %c0_i32_0 : i32, i32
  }
  func.func @transform_5(%arg0: i32, %arg1: i32) -> (i32, i32) {
    %c0_i32 = arith.constant 0 : i32
    %c0_i32_0 = arith.constant 0 : i32
    %c0_i32_1 = arith.constant 0 : i32
    return %c0_i32, %c0_i32_0 : i32, i32
  }
  func.func @transform_6(%arg0: i32, %arg1: i32) -> (i32, i32) {
    %c0_i32 = arith.constant 0 : i32
    %c0_i32_0 = arith.constant 0 : i32
    %c0_i32_1 = arith.constant 0 : i32
    return %c0_i32, %c0_i32_0 : i32, i32
  }
  func.func @transform_7(%arg0: i32, %arg1: i32) -> (i32, i32) {
    %c2_i32 = arith.constant 2 : i32
    %0 = arith.muli %arg0, %c2_i32 : i32
    %1 = arith.addi %0, %arg1 : i32
    %c0_i32 = arith.constant 0 : i32
    %c0_i32_0 = arith.constant 0 : i32
    return %1, %c0_i32 : i32, i32
  }
}

</mosaic_0001>

<bundles_post_ra>
// kernel: tpu_custom_call.1
= control target key start
LH: loop header
LB: loop body
LE: loop exit
PB: predicated region body
PF: predicated region fallthrough
CT: control target
= control target key end

     0   :  { %s4030_s24 = smov 0   ;;  %s4032_s25 = smov 0   ;;  %s7870_s0 = inlined_call_operand.vmem [shape: f32[2,2,14,22,32], index: 0, kind: input, shape index: {}]   ;;  %s7871_s1 = inlined_call_operand.vmem [shape: f32[7,7,32], index: 1, kind: input, shape index: {}]   ;;  %s7872_s2 = inlined_call_operand.vmem [shape: f32[1,32], index: 2, kind: input, shape index: {}]   ;;  %s7873_s3 = inlined_call_operand.vmem [shape: bf16[32,128], index: 3, kind: input, shape index: {}]   ;;  %s7874_s4 = inlined_call_operand.vmem [shape: f32[1,128], index: 4, kind: input, shape index: {}]   ;;  %s7875_s5 = inlined_call_operand.vmem [shape: bf16[128,32], index: 5, kind: input, shape index: {}]   ;;  %s7876_s6 = inlined_call_operand.vmem [shape: f32[1,32], index: 6, kind: input, shape index: {}]   ;;  %s7877_s7 = inlined_call_operand.vmem [shape: f32[512,32], index: 7, kind: output, shape index: {}]  }
   0x1   :  { %s4034_s26 = smov 0   ;;  %s4036_s27 = smov 0  }
   0x2   :  { %s4038_s28 = smov 0  }
   0x3 LB: > { %s26_s29 = sadd.s32 1, %s3979_s26  ;;  %s29_s30 = sadd.s32 1, %s3983_s27  ;;  %s3987_s28 = sphi %s4038_s28, %s17_s28   ;;  %s3983_s27 = sphi %s4036_s27, %s9332_s27   ;;  %s3979_s26 = sphi %s4034_s26, %s9331_s26   ;;  %s3975_s25 = sphi %s4032_s25, %s9330_s25   ;;  %s3971_s24 = sphi %s4030_s24, %s9329_s24  }
   0x4   : > { %p27_p0 = scmp.ge.s32.totalorder %s26_s29, 2  ;;  %p3585_p1 = scmp.ge.s32.totalorder %s3987_s28, 1 }
   0x5   : > { %p259_p2 = scmp.lt.s32.totalorder %s3987_s28, 5 }
   0x6   : > { %s9334_s29 = smov (%p27_p0, %s26_s29), 0  ;;  %s9336_s30 = smov (!%p27_p0, %s29_s30), %s3983_s27 }
   0x7   : > { %p260_p3 = pnand %p3585_p1, %p259_p2  ;;  %p31_p4 = scmp.ge.s32.totalorder %s9336_s30, 2 }
   0x9   : > { %s9338_s30 = smov (%p31_p4, %s9336_s30), 0  ;;  %263 = sbr.rel (%p260_p3) target bundleno = 1181 (0x49d), region = 48 }
   0xe   : > { %p297_p5 = scmp.lt.s32.totalorder %s3975_s25, 1  ;;  %p299_p6 = scmp.lt.s32.totalorder %s3971_s24, 1  ;;  %v4071_v0 = vld [vmem:[%s7871_s1] sm:$0x7f]  ;;  %v4076_v1 = vld [vmem:[%s7871_s1 + $0x8] sm:$0x7f] }
   0xf   : > { %8453 = vst [vmem:[#allocation2_spill] sm:$0xff] %v4071_v0  ;;  %v4081_v2 = vld [vmem:[%s7871_s1 + $0x10] sm:$0x7f]  ;;  %v4086_v3 = vld [vmem:[%s7871_s1 + $0x18] sm:$0x7f]  ;;  %v4089_v4 = vperm.slane %v4071_v0, 0 }
  0x10   : > { %s298_s8 = scalar_select %p297_p5, %s3975_s25, 1  ;;  %v4092_v5 = vperm.slane %v4076_v1, 0  ;;  %v4095_v6 = vperm.slane %v4081_v2, 0  ;;  %v4100_v7 = vld [vmem:[%s7871_s1 + $0x20] sm:$0x7f]  ;;  %v4113_v9 = vperm.slane %v4086_v3, 0 }
  0x11   : > { %s300_s9 = scalar_select %p299_p6, %s3971_s24, 1  ;;  %8454 = vst [vmem:[#allocation3_spill] sm:$0xff] %v4089_v4  ;;  %v4110_v8 = vld [vmem:[%s7871_s1 + $0x28] sm:$0x7f]  ;;  %v4131_v17 = vperm.slane %v4100_v7, 0  ;;  %v4161_v31 = vperm.slane %v4071_v0, 1 }
  0x12   : > { %s3693_s12 = smul.u32 84, %s298_s8  ;;  %8455 = vst [vmem:[#allocation4_spill] sm:$0xff] %v4092_v5  ;;  %v4136_v18 = vld [vmem:[%s7871_s1 + $0x30] sm:$0x7f]  ;;  %v4144_v22 = vperm.slane %v4110_v8, 0  ;;  %v4168_v34 = vperm.slane %v4076_v1, 1 }
  0x13   : > { %s3692_s17 = smul.u32 42, %s300_s9  ;;  %8456 = vst [vmem:[#allocation5_spill] sm:$0xff] %v4095_v6  ;;  %v4152_v26 = vperm.slane %v4136_v18, 0  ;;  %v4171_v35 = vperm.slane %v4081_v2, 1  ;;  %v4179_v40 = vperm.slane %v4086_v3, 1  ;;  %v4182_v41 = vperm.slane %v4100_v7, 1 }
  0x14   : > { %8457 = vst [vmem:[#allocation6_spill] sm:$0xff] %v4113_v9  ;;  %v4191_v44 = vperm.slane %v4110_v8, 1  ;;  %v4194_v45 = vperm.slane %v4136_v18, 1  ;;  %v4207_v52 = vperm.slane %v4071_v0, 2  ;;  %v4210_v53 = vperm.slane %v4076_v1, 2  ;;  %s3587_s15 = sshll.u32 %s3975_s25, 1 }
  0x15   : > { %s303_s20 = sadd.s32 %s3693_s12, %s3692_s17  ;;  %8461 = vst [vmem:[#allocation10_spill] sm:$0xff] %v4131_v17  ;;  %v4219_v56 = vperm.slane %v4081_v2, 2  ;;  %v4222_v57 = vperm.slane %v4086_v3, 2  ;;  %vm2157_vm0 = vcmask 261120   ;;  %s7587_s16 = sadd.s32 %s3971_s24, %s3587_s15 }
  0x16   : > { %s3586_s21 = sshll.u32 %s303_s20, 3  ;;  %8463 = vst [vmem:[#allocation12_spill] sm:$0xff] %v4144_v22  ;;  %s3588_s25 = sshll.u32 %s7587_s16, 4 }
  0x17   : > { %s4105_s10 = scalar_lea.vmem %s7870_s0, %s3586_s21  ;;  %8465 = vst [vmem:[#allocation14_spill] sm:$0xff] %v4152_v26  ;;  %p7604_p7 = scmp.lt.s32.totalorder %s3588_s25, 63 }
  0x18   : > { %v326_v10 = vld [vmem:[%s4105_s10 + $0x18] sm:$0xff]  ;;  %v4117_v11 = vld [vmem:[%s4105_s10 + $0x30] sm:$0xff]  ;;  %v4120_v12 = vld [vmem:[%s4105_s10 + $0x48] sm:$0xff]  ;;  %8467 = vst [vmem:[#allocation16_spill] sm:$0xff] %v4161_v31 }
  0x19   : > { %8458 = vst [vmem:[#allocation7_spill] sm:$0xff] %v4117_v11  ;;  %v4123_v13 = vld [vmem:[%s4105_s10 + $0x60] sm:$0xff]  ;;  %v355_v14 = vmul.f32 %v4089_v4, %v326_v10  ;;  %v388_v15 = vmul.f32 %v4092_v5, %v4117_v11  ;;  %v421_v16 = vmul.f32 %v4095_v6, %v4120_v12  ;;  %v4139_v19 = vld [vmem:[%s4105_s10 + $0x78] sm:$0xff]  ;;  %v4147_v23 = vld [vmem:[%s4105_s10 + $0x90] sm:$0xff]  ;;  %v386_v28 = vmul.f32 %v4092_v5, %v326_v10  ;;  %s9340_s25 = smov (!%p7604_p7, %s3588_s25), 63 }
  0x1a   : > { %8459 = vst [vmem:[#allocation8_spill] sm:$0xff] %v4120_v12  ;;  %v454_v21 = vmul.f32 %v4113_v9, %v4123_v13  ;;  %v487_v25 = vmul.f32 %v4131_v17, %v4139_v19  ;;  %v4155_v27 = vld [vmem:[%s4105_s10 + $0xa8] sm:$0xff]  ;;  %v520_v30 = vmul.f32 %v4144_v22, %v4147_v23  ;;  %v324_v32 = vld [vmem:[%s4105_s10] sm:$0xff]  ;;  %v419_v37 = vmul.f32 %v4095_v6, %v4117_v11  ;;  %v4185_v42 = vld [vmem:[%s4105_s10 + $0x31] sm:$0xff]  ;;  %s3589_s19 = sshll.u32 %s9340_s25, 3 }
  0x1b   : > { %8460 = vst [vmem:[#allocation9_spill] sm:$0xff] %v4123_v13  ;;  %v404_v20 = vadd.f32 %v388_v15, %v355_v14  ;;  %v4165_v33 = vld [vmem:[%s4105_s10 + $0x19] sm:$0xff]  ;;  %v353_v36 = vmul.f32 %v4089_v4, %v324_v32  ;;  %v553_v39 = vmul.f32 %v4152_v26, %v4155_v27  ;;  %v4188_v43 = vld [vmem:[%s4105_s10 + $0x49] sm:$0xff]  ;;  %v452_v47 = vmul.f32 %v4113_v9, %v4120_v12  ;;  %v4199_v49 = vld [vmem:[%s4105_s10 + $0x61] sm:$0xff]  ;;  %s7655_s22 = scalar_lea.vmem %s7877_s7, %s3589_s19 }
  0x1c   : > { %8462 = vst [vmem:[#allocation11_spill] sm:$0xff] %v4139_v19  ;;  %v4202_v50 = vld [vmem:[%s4105_s10 + $0x79] sm:$0xff]  ;;  %v614_v51 = vmul.f32 %v4161_v31, %v4165_v33  ;;  %v4213_v54 = vld [vmem:[%s4105_s10 + $0x91] sm:$0xff]  ;;  %v4216_v55 = vld [vmem:[%s4105_s10 + $0xa9] sm:$0xff]  ;;  %v485_v59 = vmul.f32 %v4131_v17, %v4123_v13  ;;  %v647_v61 = vmul.f32 %v4168_v34, %v4185_v42  ;;  %v680_v62 = vmul.f32 %v4171_v35, %v4188_v43 }
  0x1d   : > { %8464 = vst [vmem:[#allocation13_spill] sm:$0xff] %v4147_v23  ;;  %v437_v24 = vadd.f32 %v421_v16, %v404_v20  ;;  %v402_v46 = vadd.f32 %v386_v28, %v353_v36  ;;  %v4231_v63 = vld [vmem:[%s4105_s10 + $0x1a] sm:$0xff]  ;;  %v4234_v10 = vld [vmem:[%s4105_s10 + $0x32] sm:$0xff]  ;;  %v4237_v14 = vperm.slane %v4100_v7, 2  ;;  %v713_v15 = vmul.f32 %v4179_v40, %v4199_v49  ;;  %v4244_v20 = vld [vmem:[%s4105_s10 + $0x4a] sm:$0xff] }
  0x1e   : > { %8466 = vst [vmem:[#allocation15_spill] sm:$0xff] %v4155_v27  ;;  %v746_v16 = vmul.f32 %v4182_v41, %v4202_v50  ;;  %v4258_v32 = vperm.slane %v4110_v8, 2  ;;  %v583_v36 = vld [vmem:[%s4105_s10 + $0x1] sm:$0xff]  ;;  %v4307_v11 = vld [vmem:[%s4105_s10 + $0xaa] sm:$0xff] }
  0x1f   : > { %v470_v29 = vadd.f32 %v454_v21, %v437_v24  ;;  %8468 = vst [vmem:[#allocation17_spill] sm:$0xff] %v4168_v34  ;;  %v435_v58 = vadd.f32 %v419_v37, %v402_v46  ;;  %v4247_v21 = vld [vmem:[%s4105_s10 + $0x62] sm:$0xff]  ;;  %v4273_v46 = vmul.f32 %v4210_v53, %v4234_v10 }
  0x20   : > { %8469 = vst [vmem:[#allocation18_spill] sm:$0xff] %v4171_v35  ;;  %v4262_v37 = vld [vmem:[%s4105_s10 + $0x20] sm:$0xff]  ;;  %v4289_v27 = vmul.f32 %v4222_v57, %v4247_v21 }
  0x21   : > { %v503_v38 = vadd.f32 %v487_v25, %v470_v29  ;;  %8470 = vst [vmem:[#allocation19_spill] sm:$0xff] %v4179_v40  ;;  %v468_v24 = vadd.f32 %v452_v47, %v435_v58  ;;  %v518_v25 = vmul.f32 %v4144_v22, %v4139_v19  ;;  %v779_v29 = vmul.f32 %v4191_v44, %v4213_v54  ;;  %v4302_v19 = vld [vmem:[%s4105_s10 + $0x68] sm:$0xff] }
  0x22   : > { %8471 = vst [vmem:[#allocation20_spill] sm:$0xff] %v4182_v41  ;;  %v356_v13 = vmul.f32 %v4089_v4, %v4262_v37 }
  0x23   : > { %8472 = vst [vmem:[#allocation21_spill] sm:$0xff] %v4185_v42  ;;  %v536_v48 = vadd.f32 %v520_v30, %v503_v38  ;;  %v4255_v30 = vmul.f32 %v4194_v45, %v4216_v55  ;;  %v4265_v38 = vld [vmem:[%s4105_s10 + $0x7a] sm:$0xff]  ;;  %v501_v47 = vadd.f32 %v485_v59, %v468_v24  ;;  %v4292_v59 = vperm.slane %v4136_v18, 2  ;;  %v4295_v24 = vld [vmem:[%s4105_s10 + $0x50] sm:$0xff] }
  0x24   : > { %8473 = vst [vmem:[#allocation22_spill] sm:$0xff] %v4188_v43  ;;  %v422_v4 = vmul.f32 %v4095_v6, %v4295_v24  ;;  %v4364_v6 = vperm.slane %v4086_v3, 3 }
  0x25   : > { %8474 = vst [vmem:[#allocation23_spill] sm:$0xff] %v4191_v44  ;;  %v569_v60 = vadd.f32 %v553_v39, %v536_v48  ;;  %v4269_v39 = vmul.f32 %v4207_v52, %v4231_v63  ;;  %v551_v48 = vmul.f32 %v4152_v26, %v4147_v23  ;;  %v4298_v23 = vperm.slane %v4071_v0, 3 }
  0x26   : > { %8475 = vst [vmem:[#allocation24_spill] sm:$0xff] %v4194_v45  ;;  %v4317_v0 = vperm.slane %v4076_v1, 3 }
  0x27   : > { %8476 = vst [vmem:[#allocation25_spill] sm:$0xff] %v4199_v49  ;;  %v630_v28 = vadd.f32 %v614_v51, %v569_v60  ;;  %v4278_v51 = vld [vmem:[%s4105_s10 + $0x38] sm:$0xff] }
  0x28   : > { %8477 = vst [vmem:[#allocation26_spill] sm:$0xff] %v4202_v50  ;;  %v4281_v60 = vld [vmem:[%s4105_s10 + $0x92] sm:$0xff] }
  0x29   : > { %8478 = vst [vmem:[#allocation27_spill] sm:$0xff] %v4207_v52  ;;  %v663_v58 = vadd.f32 %v647_v61, %v630_v28  ;;  %v534_v61 = vadd.f32 %v518_v25, %v501_v47  ;;  %v612_v28 = vmul.f32 %v4161_v31, %v583_v36  ;;  %v389_v25 = vmul.f32 %v4092_v5, %v4278_v51 }
  0x2a   : > { %8479 = vst [vmem:[#allocation28_spill] sm:$0xff] %v4210_v53  ;;  %v4323_v36 = vmul.f32 %v4258_v32, %v4281_v60 }
  0x2b   : > { %8480 = vst [vmem:[#allocation29_spill] sm:$0xff] %v4213_v54  ;;  %v696_v12 = vadd.f32 %v680_v62, %v663_v58  ;;  %v4326_v62 = vld [vmem:[%s4105_s10 + $0x33] sm:$0xff]  ;;  %v567_v47 = vadd.f32 %v551_v48, %v534_v61  ;;  %v645_v58 = vmul.f32 %v4168_v34, %v4165_v33  ;;  %v405_v5 = vadd.f32 %v389_v25, %v356_v13  ;;  %v4345_v61 = vld [vmem:[%s4105_s10 + $0x4b] sm:$0xff] }
  0x2c   : > { %8481 = vst [vmem:[#allocation30_spill] sm:$0xff] %v4216_v55  ;;  %v4285_v55 = vmul.f32 %v4219_v56, %v4244_v20  ;;  %v4342_v48 = vmul.f32 %v4292_v59, %v4307_v11  ;;  %v4354_v13 = vld [vmem:[%s4105_s10 + $0x98] sm:$0xff] }
  0x2d   : > { %8482 = vst [vmem:[#allocation31_spill] sm:$0xff] %v4219_v56 }
  0x2e   : > { %8483 = vst [vmem:[#allocation32_spill] sm:$0xff] %v4222_v57 }
  0x2f   : > { %8484 = vst [vmem:[#allocation33_spill] sm:$0xff] %v4234_v10 }
  0x30   : > { %8485 = vst [vmem:[#allocation34_spill] sm:$0xff] %v4237_v14 }
  0x31   : > { %8486 = vst [vmem:[#allocation35_spill] sm:$0xff] %v4244_v20 }
  0x32   : > { %8487 = vst [vmem:[#allocation36_spill] sm:$0xff] %v4247_v21 }
  0x33   : > { %8488 = vst [vmem:[#allocation37_spill] sm:$0xff] %v4258_v32 }
  0x34   : > { %8489 = vst [vmem:[#allocation38_spill] sm:$0xff] %v4262_v37  ;;  %v4331_v37 = vld [vmem:[%s4105_s10 + $0x80] sm:$0xff] }
  0x35   : > { %8490 = vst [vmem:[#allocation39_spill] sm:$0xff] %v4265_v38 }
  0x36   : > { %8491 = vst [vmem:[#allocation40_spill] sm:$0xff] %v4278_v51  ;;  %v4336_v51 = vperm.slane %v4081_v2, 3 }
  0x37   : > { %8492 = vst [vmem:[#allocation41_spill] sm:$0xff] %v4281_v60 }
  0x38   : > { %8493 = vst [vmem:[#allocation42_spill] sm:$0xff] %v4285_v55  ;;  %v4314_v55 = vld [vmem:[%s4105_s10 + $0x1b] sm:$0xff] }
  0x39   : > { %8494 = vst [vmem:[#allocation43_spill] sm:$0xff] %v4289_v27  ;;  %v4311_v27 = vmul.f32 %v4237_v14, %v4265_v38  ;;  %v4349_v33 = vmul.f32 %v4298_v23, %v4314_v55 }
  0x3a   : > { %8495 = vst [vmem:[#allocation44_spill] sm:$0xff] %v4292_v59 }
  0x3b   : > { %8496 = vst [vmem:[#allocation45_spill] sm:$0xff] %v4295_v24  ;;  %v488_v24 = vmul.f32 %v4131_v17, %v4331_v37 }
  0x3c   : > { %8497 = vst [vmem:[#allocation46_spill] sm:$0xff] %v4298_v23 }
  0x3d   : > { %8498 = vst [vmem:[#allocation47_spill] sm:$0xff] %v4302_v19 }
  0x3e   : > { %8499 = vst [vmem:[#allocation48_spill] sm:$0xff] %v4307_v11  ;;  %v842_v11 = vld [vmem:[%s4105_s10 + $0x2] sm:$0xff] }
  0x3f   : > { %8500 = vst [vmem:[#allocation49_spill] sm:$0xff] %v4311_v27  ;;  %v729_v27 = vadd.f32 %v713_v15, %v696_v12  ;;  %v628_v12 = vadd.f32 %v612_v28, %v567_v47  ;;  %v678_v15 = vmul.f32 %v4171_v35, %v4185_v42  ;;  %v711_v47 = vmul.f32 %v4179_v40, %v4188_v43 }
  0x40   : > { %8501 = vst [vmem:[#allocation50_spill] sm:$0xff] %v4317_v0  ;;  %v777_v43 = vmul.f32 %v4191_v44, %v4202_v50 }
  0x41   : > { %8502 = vst [vmem:[#allocation51_spill] sm:$0xff] %v4323_v36  ;;  %v455_v36 = vmul.f32 %v4113_v9, %v4302_v19  ;;  %v762_v25 = vadd.f32 %v746_v16, %v729_v27  ;;  %v4358_v19 = vmul.f32 %v4317_v0, %v4326_v62  ;;  %v438_v9 = vadd.f32 %v422_v4, %v405_v5  ;;  %v4371_v16 = vld [vmem:[%s4105_s10 + $0xb0] sm:$0xff] }
  0x42   : > { %8503 = vst [vmem:[#allocation52_spill] sm:$0xff] %v4326_v62  ;;  %v661_v28 = vadd.f32 %v645_v58, %v628_v12  ;;  %v744_v27 = vmul.f32 %v4182_v41, %v4199_v49  ;;  %v4378_v4 = vmul.f32 %v4336_v51, %v4345_v61  ;;  %v521_v58 = vmul.f32 %v4144_v22, %v4354_v13  ;;  %v4477_v22 = vld [vmem:[%s4105_s10 + $0x81] sm:$0xff] }
  0x43   : > { %8504 = vst [vmem:[#allocation53_spill] sm:$0xff] %v4331_v37  ;;  %v795_v42 = vadd.f32 %v779_v29, %v762_v25  ;;  %v471_v5 = vadd.f32 %v455_v36, %v438_v9  ;;  %v810_v49 = vmul.f32 %v4194_v45, %v4213_v54  ;;  %v871_v29 = vmul.f32 %v4207_v52, %v842_v11  ;;  %v4388_v25 = vld [vmem:[%s4105_s10 + $0x21] sm:$0xff] }
  0x44   : > { %8505 = vst [vmem:[#allocation54_spill] sm:$0xff] %v4336_v51  ;;  %v694_v12 = vadd.f32 %v678_v15, %v661_v28  ;;  %v4392_v9 = vperm.slane %v4100_v7, 3  ;;  %v554_v15 = vmul.f32 %v4152_v26, %v4371_v16  ;;  %v4397_v28 = vld [vmem:[%s4105_s10 + $0x7b] sm:$0xff]  ;;  %v904_v54 = vmul.f32 %v4210_v53, %v4231_v63 }
  0x45   : > { %8506 = vst [vmem:[#allocation55_spill] sm:$0xff] %v4345_v61  ;;  %v828_v37 = vadd.f32 %v4255_v30, %v795_v42  ;;  %v504_v36 = vadd.f32 %v488_v24, %v471_v5  ;;  %v937_v42 = vmul.f32 %v4219_v56, %v4234_v10  ;;  %v4408_v30 = vld [vmem:[%s4105_s10 + $0x39] sm:$0xff]  ;;  %v4413_v5 = vmul.f32 %v4222_v57, %v4244_v20 }
  0x46   : > { %8507 = vst [vmem:[#allocation56_spill] sm:$0xff] %v4354_v13  ;;  %v727_v11 = vadd.f32 %v711_v47, %v694_v12  ;;  %v615_v47 = vmul.f32 %v4161_v31, %v4388_v25  ;;  %v4419_v12 = vperm.slane %v4110_v8, 3  ;;  %v4423_v10 = vmul.f32 %v4237_v14, %v4247_v21  ;;  %v8521_v31 = vld [vmem:[#allocation42_spill] sm:$0xff] }
  0x47   : > { %8508 = vst [vmem:[#allocation57_spill] sm:$0xff] %v4358_v19  ;;  %v4374_v19 = vld [vmem:[%s4105_s10 + $0x63] sm:$0xff]  ;;  %v889_v24 = vadd.f32 %v4269_v39, %v828_v37  ;;  %v537_v26 = vadd.f32 %v521_v58, %v504_v36  ;;  %v4427_v37 = vmul.f32 %v4258_v32, %v4265_v38  ;;  %v4430_v39 = vld [vmem:[%s4105_s10 + $0x51] sm:$0xff]  ;;  %v4438_v20 = vmul.f32 %v4392_v9, %v4397_v28 }
  0x48   : > { %8509 = vst [vmem:[#allocation58_spill] sm:$0xff] %v4364_v6  ;;  %v4401_v50 = vmul.f32 %v4364_v6, %v4374_v19  ;;  %v760_v63 = vadd.f32 %v744_v27, %v727_v11  ;;  %v4434_v36 = vld [vmem:[%s4105_s10 + $0x93] sm:$0xff]  ;;  %v648_v11 = vmul.f32 %v4168_v34, %v4408_v30  ;;  %v4443_v21 = vperm.slane %v4136_v18, 3 }
  0x49   : > { %8510 = vst [vmem:[#allocation59_spill] sm:$0xff] %v4371_v16  ;;  %v1101_v16 = vld [vmem:[%s4105_s10 + $0x3] sm:$0xff]  ;;  %v922_v58 = vadd.f32 %v4273_v46, %v889_v24  ;;  %v570_v27 = vadd.f32 %v554_v15, %v537_v26  ;;  %v4447_v46 = vmul.f32 %v4292_v59, %v4281_v60  ;;  %v4457_v15 = vld [vmem:[%s4105_s10 + $0xab] sm:$0xff]  ;;  %v4470_v60 = vperm.slane %v4076_v1, 4 }
  0x4a   : > { %8511 = vst [vmem:[#allocation60_spill] sm:$0xff] %v4374_v19  ;;  %v793_v38 = vadd.f32 %v777_v43, %v760_v63  ;;  %v4450_v24 = vmul.f32 %v4298_v23, %v1101_v16  ;;  %v681_v43 = vmul.f32 %v4171_v35, %v4430_v39  ;;  %v4466_v63 = vmul.f32 %v4419_v12, %v4434_v36  ;;  %v1362_v16 = vld [vmem:[%s4105_s10 + $0x1c] sm:$0xff] }
  0x4b   : > { %8512 = vst [vmem:[#allocation61_spill] sm:$0xff] %v4388_v25  ;;  %v4453_v25 = vld [vmem:[%s4105_s10 + $0x69] sm:$0xff]  ;;  %v955_v26 = vadd.f32 %v8521_v31, %v922_v58  ;;  %v631_v13 = vadd.f32 %v615_v47, %v570_v27  ;;  %v4474_v58 = vmul.f32 %v4317_v0, %v4314_v55  ;;  %v4485_v35 = vmul.f32 %v4336_v51, %v4326_v62 }
  0x4c   : > { %8513 = vst [vmem:[#allocation62_spill] sm:$0xff] %v4392_v9  ;;  %v826_v31 = vadd.f32 %v810_v49, %v793_v38  ;;  %v8528_v47 = vld [vmem:[#allocation43_spill] sm:$0xff]  ;;  %v4491_v49 = vmul.f32 %v4443_v21, %v4457_v15  ;;  %v4494_v55 = vperm.slane %v4081_v2, 4 }
  0x4d   : > { %8514 = vst [vmem:[#allocation63_spill] sm:$0xff] %v4397_v28  ;;  %v988_v27 = vadd.f32 %v8528_v47, %v955_v26  ;;  %v664_v17 = vadd.f32 %v648_v11, %v631_v13  ;;  %v4498_v26 = vmul.f32 %v4364_v6, %v4345_v61  ;;  %v4501_v47 = vld [vmem:[%s4105_s10 + $0x99] sm:$0xff]  ;;  %v4505_v62 = vld [vmem:[%s4105_s10 + $0x4c] sm:$0xff] }
  0x4e   : > { %8515 = vst [vmem:[#allocation64_spill] sm:$0xff] %v4408_v30  ;;  %v8523_v30 = vld [vmem:[#allocation2_spill] sm:$0xff]  ;;  %v887_v38 = vadd.f32 %v871_v29, %v826_v31  ;;  %v8532_v13 = vld [vmem:[#allocation49_spill] sm:$0xff]  ;;  %v4517_v31 = vperm.slane %v4086_v3, 4 }
  0x4f   : > { %8516 = vst [vmem:[#allocation65_spill] sm:$0xff] %v4419_v12  ;;  %v4460_v34 = vperm.slane %v8523_v30, 4  ;;  %v1021_v11 = vadd.f32 %v8532_v13, %v988_v27  ;;  %v4521_v27 = vmul.f32 %v4392_v9, %v4374_v19  ;;  %v4524_v13 = vld [vmem:[%s4105_s10 + $0xb1] sm:$0xff]  ;;  %v4541_v19 = vmul.f32 %v4494_v55, %v4505_v62 }
  0x50   : > { %8517 = vst [vmem:[#allocation66_spill] sm:$0xff] %v4430_v39  ;;  %v4481_v39 = vld [vmem:[%s4105_s10 + $0x34] sm:$0xff]  ;;  %v920_v61 = vadd.f32 %v904_v54, %v887_v38  ;;  %v780_v54 = vmul.f32 %v4191_v44, %v4501_v47  ;;  %v4537_v38 = vld [vmem:[%s4105_s10 + $0x7c] sm:$0xff] }
  0x51   : > { %8518 = vst [vmem:[#allocation67_spill] sm:$0xff] %v4434_v36  ;;  %v4514_v29 = vmul.f32 %v4470_v60, %v4481_v39 }
  0x52   : > { %8519 = vst [vmem:[#allocation68_spill] sm:$0xff] %v4443_v21 }
  0x53   : > { %8520 = vst [vmem:[#allocation69_spill] sm:$0xff] %v4453_v25 }
  0x54   : > { %8522 = vst [vmem:[#allocation42_spill] sm:$0xff] %v4457_v15  ;;  %v4508_v15 = vmul.f32 %v4460_v34, %v1362_v16 }
  0x55   : > { %8524 = vst [vmem:[#allocation2_spill] sm:$0xff] %v4460_v34 }
  0x56   : > { %8525 = vst [vmem:[#allocation70_spill] sm:$0xff] %v4466_v63  ;;  %v714_v63 = vmul.f32 %v4179_v40, %v4453_v25  ;;  %v697_v25 = vadd.f32 %v681_v43, %v664_v17  ;;  %v747_v40 = vmul.f32 %v4182_v41, %v4477_v22  ;;  %v4528_v43 = vld [vmem:[%s4105_s10 + $0x64] sm:$0xff] }
  0x57   : > { %8526 = vst [vmem:[#allocation71_spill] sm:$0xff] %v4470_v60  ;;  %v1360_v41 = vld [vmem:[%s4105_s10 + $0x4] sm:$0xff] }
  0x58   : > { %8527 = vst [vmem:[#allocation72_spill] sm:$0xff] %v4477_v22  ;;  %v4531_v22 = vperm.slane %v4100_v7, 4 }
  0x59   : > { %8529 = vst [vmem:[#allocation43_spill] sm:$0xff] %v4481_v39 }
  0x5a   : > { %8530 = vst [vmem:[#allocation73_spill] sm:$0xff] %v4494_v55 }
  0x5b   : > { %8531 = vst [vmem:[#allocation74_spill] sm:$0xff] %v4501_v47  ;;  %v4556_v47 = vperm.slane %v4110_v8, 4 }
  0x5c   : > { %8533 = vst [vmem:[#allocation49_spill] sm:$0xff] %v4505_v62 }
  0x5d   : > { %8534 = vst [vmem:[#allocation75_spill] sm:$0xff] %v4508_v15  ;;  %v8539_v15 = vld [vmem:[#allocation51_spill] sm:$0xff] }
  0x5e   : > { %8535 = vst [vmem:[#allocation76_spill] sm:$0xff] %v4514_v29  ;;  %v1054_v17 = vadd.f32 %v8539_v15, %v1021_v11  ;;  %v730_v29 = vadd.f32 %v714_v63, %v697_v25  ;;  %v953_v15 = vadd.f32 %v937_v42, %v920_v61  ;;  %v4545_v11 = vmul.f32 %v4419_v12, %v4397_v28  ;;  %v4552_v25 = vld [vmem:[%s4105_s10 + $0x22] sm:$0xff]  ;;  %v4561_v42 = vld [vmem:[%s4105_s10 + $0x3a] sm:$0xff] }
  0x5f   : > { %8536 = vst [vmem:[#allocation77_spill] sm:$0xff] %v4517_v31  ;;  %v813_v61 = vmul.f32 %v4194_v45, %v4524_v13  ;;  %v4564_v28 = vld [vmem:[%s4105_s10 + $0x94] sm:$0xff] }
  0x60   : > { %8537 = vst [vmem:[#allocation78_spill] sm:$0xff] %v4521_v27  ;;  %v4549_v27 = vmul.f32 %v4443_v21, %v4434_v36  ;;  %v1087_v63 = vadd.f32 %v4342_v48, %v1054_v17  ;;  %v763_v44 = vadd.f32 %v747_v40, %v730_v29  ;;  %v4568_v36 = vmul.f32 %v4517_v31, %v4528_v43  ;;  %v4579_v29 = vld [vmem:[%s4105_s10 + $0xac] sm:$0xff] }
  0x61   : > { %8538 = vst [vmem:[#allocation79_spill] sm:$0xff] %v4524_v13  ;;  %v986_v48 = vadd.f32 %v4413_v5, %v953_v15  ;;  %v4575_v17 = vmul.f32 %v4460_v34, %v1360_v41  ;;  %v4583_v13 = vmul.f32 %v4531_v22, %v4537_v38  ;;  %v874_v5 = vmul.f32 %v4207_v52, %v4552_v25  ;;  %v4618_v52 = vld [vmem:[%s4105_s10 + $0x9a] sm:$0xff] }
  0x62   : > { %8540 = vst [vmem:[#allocation51_spill] sm:$0xff] %v4528_v43  ;;  %v1148_v40 = vadd.f32 %v4349_v33, %v1087_v63  ;;  %v796_v45 = vadd.f32 %v780_v54, %v763_v44  ;;  %v4594_v41 = vperm.slane %v8523_v30, 5  ;;  %v4598_v15 = vmul.f32 %v4470_v60, %v1362_v16  ;;  %v8556_v44 = vld [vmem:[#allocation57_spill] sm:$0xff] }
  0x63   : > { %8541 = vst [vmem:[#allocation80_spill] sm:$0xff] %v4531_v22  ;;  %v1019_v33 = vadd.f32 %v4423_v10, %v986_v48  ;;  %v907_v63 = vmul.f32 %v4210_v53, %v4561_v42  ;;  %v4612_v10 = vmul.f32 %v4494_v55, %v4481_v39  ;;  %v4615_v48 = vld [vmem:[%s4105_s10 + $0x82] sm:$0xff] }
  0x64   : > { %8542 = vst [vmem:[#allocation81_spill] sm:$0xff] %v4537_v38  ;;  %v1181_v54 = vadd.f32 %v8556_v44, %v1148_v40  ;;  %v829_v16 = vadd.f32 %v813_v61, %v796_v45  ;;  %v4631_v45 = vperm.slane %v4076_v1, 5  ;;  %v4635_v61 = vmul.f32 %v4517_v31, %v4505_v62 }
  0x65   : > { %8543 = vst [vmem:[#allocation82_spill] sm:$0xff] %v4541_v19  ;;  %v4589_v19 = vld [vmem:[%s4105_s10 + $0x6a] sm:$0xff]  ;;  %v1052_v44 = vadd.f32 %v4427_v37, %v1019_v33  ;;  %v1039_v62 = vmul.f32 %v4258_v32, %v4618_v52 }
  0x66   : > { %8544 = vst [vmem:[#allocation83_spill] sm:$0xff] %v4549_v27  ;;  %v4571_v27 = vperm.slane %v4136_v18, 4  ;;  %v973_v53 = vmul.f32 %v4222_v57, %v4589_v19  ;;  %v1214_v39 = vadd.f32 %v4378_v4, %v1181_v54  ;;  %v890_v37 = vadd.f32 %v874_v5, %v829_v16  ;;  %v4641_v33 = vld [vmem:[%s4105_s10 + $0x23] sm:$0xff] }
  0x67   : > { %8545 = vst [vmem:[#allocation84_spill] sm:$0xff] %v4552_v25  ;;  %v4608_v25 = vld [vmem:[%s4105_s10 + $0x1d] sm:$0xff]  ;;  %v1085_v54 = vadd.f32 %v4447_v46, %v1052_v44  ;;  %v4658_v16 = vperm.slane %v4081_v2, 5  ;;  %v4662_v57 = vmul.f32 %v4531_v22, %v4528_v43  ;;  %v4668_v46 = vld [vmem:[%s4105_s10 + $0x4d] sm:$0xff] }
  0x68   : > { %8546 = vst [vmem:[#allocation85_spill] sm:$0xff] %v4556_v47  ;;  %v4622_v40 = vmul.f32 %v4571_v27, %v4579_v29  ;;  %v4649_v4 = vmul.f32 %v4594_v41, %v4608_v25  ;;  %v1247_v5 = vadd.f32 %v4401_v50, %v1214_v39  ;;  %v4674_v39 = vld [vmem:[%s4105_s10 + $0x53] sm:$0xff]  ;;  %v8569_v43 = vld [vmem:[#allocation3_spill] sm:$0xff] }
  0x69   : > { %8547 = vst [vmem:[#allocation86_spill] sm:$0xff] %v4561_v42  ;;  %v1146_v44 = vadd.f32 %v4450_v24, %v1085_v54  ;;  %v4686_v24 = vmul.f32 %v4556_v47, %v4537_v38 }
  0x6a   : > { %8548 = vst [vmem:[#allocation87_spill] sm:$0xff] %v4564_v28 }
  0x6b   : > { %8549 = vst [vmem:[#allocation88_spill] sm:$0xff] %v4568_v36  ;;  %v4586_v36 = vld [vmem:[%s4105_s10 + $0x52] sm:$0xff] }
  0x6c   : > { %8550 = vst [vmem:[#allocation89_spill] sm:$0xff] %v4571_v27  ;;  %v940_v42 = vmul.f32 %v4219_v56, %v4586_v36  ;;  %v4645_v56 = vld [vmem:[%s4105_s10 + $0x35] sm:$0xff] }
  0x6d   : > { %8551 = vst [vmem:[#allocation90_spill] sm:$0xff] %v4579_v29  ;;  %v4638_v29 = vld [vmem:[%s4105_s10 + $0xb2] sm:$0xff] }
  0x6e   : > { %8552 = vst [vmem:[#allocation91_spill] sm:$0xff] %v4583_v13  ;;  %v4605_v13 = vmul.f32 %v4556_v47, %v4564_v28  ;;  %v1072_v50 = vmul.f32 %v4292_v59, %v4638_v29  ;;  %v1179_v59 = vadd.f32 %v4474_v58, %v1146_v44  ;;  %v1619_v58 = vld [vmem:[%s4105_s10 + $0x5] sm:$0xff] }
  0x6f   : > { %8553 = vst [vmem:[#allocation92_spill] sm:$0xff] %v4586_v36  ;;  %v325_v36 = vld [vmem:[%s4105_s10 + $0x8] sm:$0xff] }
  0x70   : > { %8554 = vst [vmem:[#allocation93_spill] sm:$0xff] %v4589_v19  ;;  %v1006_v19 = vmul.f32 %v4237_v14, %v4615_v48  ;;  %v354_v32 = vmul.f32 %v8569_v43, %v325_v36  ;;  %v4696_v36 = vld [vmem:[%s4105_s10 + $0x83] sm:$0xff]  ;;  %v4708_v14 = vmul.f32 %v4658_v16, %v4668_v46  ;;  %v1199_v43 = vmul.f32 %v4336_v51, %v4674_v39 }
  0x71   : > { %8555 = vst [vmem:[#allocation94_spill] sm:$0xff] %v4594_v41 }
  0x72   : > { %8557 = vst [vmem:[#allocation57_spill] sm:$0xff] %v4615_v48  ;;  %v8576_v48 = vld [vmem:[#allocation70_spill] sm:$0xff] }
  0x73   : > { %8558 = vst [vmem:[#allocation95_spill] sm:$0xff] %v4618_v52  ;;  %v1133_v52 = vmul.f32 %v4298_v23, %v4641_v33  ;;  %v8575_v23 = vld [vmem:[#allocation4_spill] sm:$0xff] }
  0x74   : > { %8559 = vst [vmem:[#allocation96_spill] sm:$0xff] %v4631_v45 }
  0x75   : > { %8560 = vst [vmem:[#allocation97_spill] sm:$0xff] %v4635_v61  ;;  %v4665_v61 = vld [vmem:[%s4105_s10 + $0x3b] sm:$0xff] }
  0x76   : > { %8561 = vst [vmem:[#allocation98_spill] sm:$0xff] %v4638_v29  ;;  %v4689_v29 = vperm.slane %v4086_v3, 5 }
  0x77   : > { %8562 = vst [vmem:[#allocation99_spill] sm:$0xff] %v4641_v33  ;;  %v4693_v33 = vld [vmem:[%s4105_s10 + $0x6b] sm:$0xff] }
  0x78   : > { %8563 = vst [vmem:[#allocation100_spill] sm:$0xff] %v4645_v56 }
  0x79   : > { %8564 = vst [vmem:[#allocation101_spill] sm:$0xff] %v4649_v4  ;;  %v923_v4 = vadd.f32 %v907_v63, %v890_v37  ;;  %v1280_v63 = vadd.f32 %v4438_v20, %v1247_v5  ;;  %v4682_v37 = vmul.f32 %v4631_v45, %v4645_v56  ;;  %v1166_v20 = vmul.f32 %v4317_v0, %v4665_v61  ;;  %v8574_v5 = vld [vmem:[#allocation38_spill] sm:$0xff] }
  0x7a   : > { %8565 = vst [vmem:[#allocation102_spill] sm:$0xff] %v4658_v16  ;;  %v387_v38 = vmul.f32 %v8575_v23, %v8574_v5  ;;  %v4719_v5 = vmul.f32 %v4571_v27, %v4564_v28 }
  0x7b   : > { %8566 = vst [vmem:[#allocation103_spill] sm:$0xff] %v4665_v61  ;;  %v956_v54 = vadd.f32 %v940_v42, %v923_v4  ;;  %v1313_v42 = vadd.f32 %v8576_v48, %v1280_v63  ;;  %v4704_v4 = vld [vmem:[%s4105_s10 + $0x65] sm:$0xff]  ;;  %v1212_v61 = vadd.f32 %v4485_v35, %v1179_v59  ;;  %v4722_v48 = vld [vmem:[%s4105_s10 + $0x9b] sm:$0xff]  ;;  %v1232_v35 = vmul.f32 %v4364_v6, %v4693_v33  ;;  %v8592_v6 = vld [vmem:[#allocation76_spill] sm:$0xff] }
  0x7c   : > { %8567 = vst [vmem:[#allocation104_spill] sm:$0xff] %v4668_v46  ;;  %v403_v63 = vadd.f32 %v387_v38, %v354_v32  ;;  %v4735_v59 = vmul.f32 %v4392_v9, %v4696_v36  ;;  %v4739_v28 = vmul.f32 %v4689_v29, %v4704_v4  ;;  %v8583_v38 = vld [vmem:[#allocation40_spill] sm:$0xff]  ;;  %v4753_v9 = vmul.f32 %v4419_v12, %v4722_v48 }
  0x7d   : > { %8568 = vst [vmem:[#allocation105_spill] sm:$0xff] %v4674_v39  ;;  %v989_v44 = vadd.f32 %v973_v53, %v956_v54  ;;  %v1346_v0 = vadd.f32 %v4491_v49, %v1313_v42  ;;  %v4726_v53 = vld [vmem:[%s4105_s10 + $0x7d] sm:$0xff]  ;;  %v4729_v39 = vld [vmem:[%s4105_s10 + $0xb3] sm:$0xff]  ;;  %v1245_v32 = vadd.f32 %v4498_v26, %v1212_v61  ;;  %v4743_v49 = vmul.f32 %v4594_v41, %v1619_v58 }
  0x7e   : > { %8570 = vst [vmem:[#allocation106_spill] sm:$0xff] %v4686_v24  ;;  %v4714_v24 = vperm.slane %v4100_v7, 5  ;;  %v4756_v26 = vld [vmem:[%s4105_s10 + $0x24] sm:$0xff]  ;;  %v4759_v61 = vld [vmem:[%s4105_s10 + $0x3c] sm:$0xff]  ;;  %v4775_v12 = vperm.slane %v4136_v18, 5 }
  0x7f   : > { %8571 = vst [vmem:[#allocation107_spill] sm:$0xff] %v4689_v29  ;;  %v1022_v54 = vadd.f32 %v1006_v19, %v989_v44  ;;  %v8584_v19 = vld [vmem:[#allocation5_spill] sm:$0xff]  ;;  %v8585_v44 = vld [vmem:[#allocation75_spill] sm:$0xff] }
  0x80   : > { %8572 = vst [vmem:[#allocation108_spill] sm:$0xff] %v4693_v33  ;;  %v420_v42 = vmul.f32 %v8584_v19, %v8583_v38  ;;  %v1407_v51 = vadd.f32 %v8585_v44, %v1346_v0  ;;  %v4749_v33 = vperm.slane %v4110_v8, 5  ;;  %v4762_v58 = vld [vmem:[%s4105_s10 + $0x95] sm:$0xff]  ;;  %v4766_v38 = vmul.f32 %v4714_v24, %v4726_v53  ;;  %v8591_v0 = vld [vmem:[#allocation78_spill] sm:$0xff] }
  0x81   : > { %8573 = vst [vmem:[#allocation109_spill] sm:$0xff] %v4696_v36  ;;  %v1055_v36 = vadd.f32 %v1039_v62, %v1022_v54  ;;  %v1278_v44 = vadd.f32 %v8591_v0, %v1245_v32  ;;  %v4771_v62 = vmul.f32 %v4443_v21, %v4729_v39  ;;  %v4779_v19 = vmul.f32 %v4631_v45, %v4608_v25  ;;  %v4789_v0 = vld [vmem:[%s4105_s10 + $0x6c] sm:$0xff]  ;;  %v8597_v25 = vld [vmem:[#allocation45_spill] sm:$0xff] }
  0x82   : > { %8577 = vst [vmem:[#allocation38_spill] sm:$0xff] %v4704_v4  ;;  %v436_v54 = vadd.f32 %v420_v42, %v403_v63  ;;  %v8598_v63 = vld [vmem:[#allocation6_spill] sm:$0xff] }
  0x83   : > { %8578 = vst [vmem:[#allocation70_spill] sm:$0xff] %v4714_v24  ;;  %v1088_v23 = vadd.f32 %v1072_v50, %v1055_v36  ;;  %v1311_v32 = vadd.f32 %v4545_v11, %v1278_v44  ;;  %v453_v50 = vmul.f32 %v8598_v63, %v8597_v25  ;;  %v8599_v36 = vld [vmem:[#allocation82_spill] sm:$0xff]  ;;  %v4808_v11 = vmul.f32 %v4658_v16, %v4645_v56  ;;  %v8603_v25 = vld [vmem:[#allocation88_spill] sm:$0xff] }
  0x84   : > { %8579 = vst [vmem:[#allocation110_spill] sm:$0xff] %v4722_v48  ;;  %v1440_v48 = vadd.f32 %v8592_v6, %v1407_v51  ;;  %v4793_v6 = vmul.f32 %v4460_v34, %v4756_v26  ;;  %v4797_v51 = vmul.f32 %v4470_v60, %v4759_v61  ;;  %v8601_v34 = vld [vmem:[#allocation83_spill] sm:$0xff]  ;;  %v4836_v56 = vmul.f32 %v4689_v29, %v4668_v46  ;;  %v4855_v46 = vld [vmem:[%s4105_s10 + $0x36] sm:$0xff] }
  0x85   : > { %8580 = vst [vmem:[#allocation111_spill] sm:$0xff] %v4726_v53  ;;  %v1149_v44 = vadd.f32 %v1133_v52, %v1088_v23  ;;  %v4815_v60 = vld [vmem:[%s4105_s10 + $0x84] sm:$0xff] }
  0x86   : > { %8581 = vst [vmem:[#allocation112_spill] sm:$0xff] %v4729_v39  ;;  %v1473_v42 = vadd.f32 %v8599_v36, %v1440_v48  ;;  %v4804_v39 = vmul.f32 %v4749_v33, %v4762_v58  ;;  %v469_v36 = vadd.f32 %v453_v50, %v436_v54  ;;  %v4827_v52 = vld [vmem:[%s4105_s10 + $0x1e] sm:$0xff]  ;;  %v8604_v54 = vld [vmem:[#allocation47_spill] sm:$0xff] }
  0x87   : > { %8582 = vst [vmem:[#allocation113_spill] sm:$0xff] %v4743_v49  ;;  %v4782_v49 = vld [vmem:[%s4105_s10 + $0x54] sm:$0xff]  ;;  %v8605_v50 = vld [vmem:[#allocation10_spill] sm:$0xff] }
  0x88   : > { %8586 = vst [vmem:[#allocation75_spill] sm:$0xff] %v4749_v33  ;;  %v4819_v48 = vmul.f32 %v4494_v55, %v4782_v49  ;;  %v1506_v21 = vadd.f32 %v8603_v25, %v1473_v42  ;;  %v486_v25 = vmul.f32 %v8605_v50, %v8604_v54  ;;  %v8606_v42 = vld [vmem:[#allocation53_spill] sm:$0xff]  ;;  %v8608_v55 = vld [vmem:[#allocation91_spill] sm:$0xff] }
  0x89   : > { %8587 = vst [vmem:[#allocation114_spill] sm:$0xff] %v4756_v26  ;;  %v4811_v26 = vperm.slane %v8523_v30, 6  ;;  %v1182_v30 = vadd.f32 %v1166_v20, %v1149_v44  ;;  %v4844_v20 = vperm.slane %v4076_v1, 6  ;;  %v8612_v1 = vld [vmem:[#allocation56_spill] sm:$0xff] }
  0x8a   : > { %8588 = vst [vmem:[#allocation115_spill] sm:$0xff] %v4759_v61  ;;  %v1344_v61 = vadd.f32 %v8601_v34, %v1311_v32  ;;  %v4831_v34 = vmul.f32 %v4517_v31, %v4789_v0  ;;  %v1539_v63 = vadd.f32 %v8608_v55, %v1506_v21  ;;  %v502_v55 = vadd.f32 %v486_v25, %v469_v36  ;;  %v4877_v36 = vld [vmem:[%s4105_s10 + $0xb4] sm:$0xff] }
  0x8b   : > { %8589 = vst [vmem:[#allocation116_spill] sm:$0xff] %v4762_v58  ;;  %v1215_v44 = vadd.f32 %v1199_v43, %v1182_v30  ;;  %v4859_v31 = vmul.f32 %v4811_v26, %v4827_v52  ;;  %v4866_v30 = vperm.slane %v4081_v2, 6 }
  0x8c   : > { %8590 = vst [vmem:[#allocation117_spill] sm:$0xff] %v4766_v38  ;;  %v4785_v38 = vld [vmem:[%s4105_s10 + $0xad] sm:$0xff]  ;;  %v1405_v32 = vadd.f32 %v4575_v17, %v1344_v61  ;;  %v4851_v17 = vmul.f32 %v4531_v22, %v4815_v60  ;;  %v1572_v43 = vadd.f32 %v4605_v13, %v1539_v63 }
  0x8d   : > { %8593 = vst [vmem:[#allocation78_spill] sm:$0xff] %v4775_v12  ;;  %v4824_v23 = vmul.f32 %v4775_v12, %v4785_v38  ;;  %v584_v61 = vld [vmem:[%s4105_s10 + $0x9] sm:$0xff]  ;;  %v1248_v22 = vadd.f32 %v1232_v35, %v1215_v44  ;;  %v4887_v35 = vmul.f32 %v4844_v20, %v4855_v46  ;;  %v4891_v44 = vmul.f32 %v4749_v33, %v4726_v53 }
  0x8e   : > { %8594 = vst [vmem:[#allocation76_spill] sm:$0xff] %v4782_v49  ;;  %v8607_v49 = vld [vmem:[#allocation12_spill] sm:$0xff]  ;;  %v1438_v21 = vadd.f32 %v4598_v15, %v1405_v32  ;;  %v1605_v25 = vadd.f32 %v4622_v40, %v1572_v43  ;;  %v8622_v43 = vld [vmem:[#allocation17_spill] sm:$0xff] }
  0x8f   : > { %8595 = vst [vmem:[#allocation118_spill] sm:$0xff] %v4785_v38  ;;  %v519_v38 = vmul.f32 %v8607_v49, %v8606_v42  ;;  %v8613_v42 = vld [vmem:[#allocation14_spill] sm:$0xff]  ;;  %v4873_v49 = vld [vmem:[%s4105_s10 + $0x4e] sm:$0xff] }
  0x90   : > { %8596 = vst [vmem:[#allocation119_spill] sm:$0xff] %v4789_v0  ;;  %v4847_v0 = vld [vmem:[%s4105_s10 + $0x9c] sm:$0xff]  ;;  %v552_v54 = vmul.f32 %v8613_v42, %v8612_v1  ;;  %v1471_v15 = vadd.f32 %v4612_v10, %v1438_v21  ;;  %v8617_v63 = vld [vmem:[#allocation16_spill] sm:$0xff]  ;;  %v1281_v10 = vadd.f32 %v4735_v59, %v1248_v22  ;;  %v4895_v21 = vperm.slane %v4086_v3, 6 }
  0x91   : > { %8600 = vst [vmem:[#allocation82_spill] sm:$0xff] %v4811_v26  ;;  %v4881_v32 = vmul.f32 %v4556_v47, %v4847_v0  ;;  %v535_v13 = vadd.f32 %v519_v38, %v502_v55  ;;  %v613_v2 = vmul.f32 %v8617_v63, %v584_v61  ;;  %v4899_v55 = vld [vmem:[%s4105_s10 + $0x25] sm:$0xff]  ;;  %v8621_v61 = vld [vmem:[#allocation61_spill] sm:$0xff]  ;;  %v4909_v22 = vmul.f32 %v4866_v30, %v4873_v49 }
  0x92   : > { %8602 = vst [vmem:[#allocation83_spill] sm:$0xff] %v4815_v60  ;;  %v4870_v60 = vmul.f32 %v4714_v24, %v4704_v4  ;;  %v8619_v4 = vld [vmem:[#allocation97_spill] sm:$0xff]  ;;  %v4905_v63 = vld [vmem:[%s4105_s10 + $0x66] sm:$0xff]  ;;  %v1314_v3 = vadd.f32 %v4753_v9, %v1281_v10  ;;  %v4926_v9 = vperm.slane %v4100_v7, 6 }
  0x93   : > { %8609 = vst [vmem:[#allocation88_spill] sm:$0xff] %v4844_v20  ;;  %v1504_v38 = vadd.f32 %v8619_v4, %v1471_v15  ;;  %v568_v40 = vadd.f32 %v552_v54, %v535_v13  ;;  %v8623_v47 = vld [vmem:[#allocation101_spill] sm:$0xff]  ;;  %v4914_v4 = vmul.f32 %v4571_v27, %v4877_v36  ;;  %v4919_v54 = vmul.f32 %v4775_v12, %v4762_v58  ;;  %v1878_v15 = vld [vmem:[%s4105_s10 + $0x6] sm:$0xff]  ;;  %v8625_v13 = vld [vmem:[#allocation64_spill] sm:$0xff] }
  0x94   : > { %8610 = vst [vmem:[#allocation91_spill] sm:$0xff] %v4847_v0  ;;  %v646_v0 = vmul.f32 %v8622_v43, %v8621_v61  ;;  %v1666_v1 = vadd.f32 %v8623_v47, %v1605_v25  ;;  %v8626_v25 = vld [vmem:[#allocation18_spill] sm:$0xff]  ;;  %v1347_v10 = vadd.f32 %v4771_v62, %v1314_v3  ;;  %v8632_v7 = vld [vmem:[#allocation19_spill] sm:$0xff]  ;;  %v4948_v3 = vperm.slane %v4110_v8, 6  ;;  %v8636_v8 = vld [vmem:[#allocation69_spill] sm:$0xff] }
  0x95   : > { %8611 = vst [vmem:[#allocation120_spill] sm:$0xff] %v4855_v46  ;;  %v1537_v59 = vadd.f32 %v4662_v57, %v1504_v38  ;;  %v629_v47 = vadd.f32 %v613_v2, %v568_v40  ;;  %v679_v61 = vmul.f32 %v8626_v25, %v8625_v13  ;;  %v4934_v57 = vmul.f32 %v4594_v41, %v4899_v55  ;;  %v4937_v38 = vld [vmem:[%s4105_s10 + $0x7e] sm:$0xff]  ;;  %v4955_v13 = vld [vmem:[%s4105_s10 + $0x96] sm:$0xff] }
  0x96   : > { %8614 = vst [vmem:[#allocation121_spill] sm:$0xff] %v4866_v30  ;;  %v1699_v53 = vadd.f32 %v4682_v37, %v1666_v1  ;;  %v4941_v2 = vmul.f32 %v4895_v21, %v4905_v63  ;;  %v8630_v40 = vld [vmem:[#allocation106_spill] sm:$0xff]  ;;  %v1408_v41 = vadd.f32 %v4793_v6, %v1347_v10  ;;  %v4970_v6 = vmul.f32 %v4926_v9, %v4937_v38 }
  0x97   : > { %8615 = vst [vmem:[#allocation122_spill] sm:$0xff] %v4873_v49  ;;  %v1570_v37 = vadd.f32 %v8630_v40, %v1537_v59  ;;  %v662_v1 = vadd.f32 %v646_v0, %v629_v47  ;;  %v8631_v58 = vld [vmem:[#allocation66_spill] sm:$0xff]  ;;  %v4959_v0 = vld [vmem:[%s4105_s10 + $0x55] sm:$0xff] }
  0x98   : > { %8616 = vst [vmem:[#allocation123_spill] sm:$0xff] %v4877_v36  ;;  %v4930_v36 = vld [vmem:[%s4105_s10 + $0x3d] sm:$0xff]  ;;  %v712_v27 = vmul.f32 %v8632_v7, %v8631_v58  ;;  %v1732_v62 = vadd.f32 %v4708_v14, %v1699_v53  ;;  %v8637_v53 = vld [vmem:[#allocation20_spill] sm:$0xff]  ;;  %v1441_v10 = vadd.f32 %v4797_v51, %v1408_v41  ;;  %v4996_v51 = vld [vmem:[%s4105_s10 + $0x85] sm:$0xff] }
  0x99   : > { %8618 = vst [vmem:[#allocation124_spill] sm:$0xff] %v4895_v21  ;;  %v1603_v59 = vadd.f32 %v4719_v5, %v1570_v37  ;;  %v4963_v47 = vmul.f32 %v4631_v45, %v4930_v36  ;;  %v695_v14 = vadd.f32 %v679_v61, %v662_v1  ;;  %v745_v40 = vmul.f32 %v8637_v53, %v8636_v8  ;;  %v4977_v37 = vld [vmem:[%s4105_s10 + $0xae] sm:$0xff]  ;;  %v8644_v53 = vld [vmem:[#allocation117_spill] sm:$0xff] }
  0x9a   : > { %8620 = vst [vmem:[#allocation97_spill] sm:$0xff] %v4899_v55  ;;  %v4951_v55 = vmul.f32 %v4811_v26, %v1878_v15  ;;  %v1765_v15 = vadd.f32 %v4739_v28, %v1732_v62  ;;  %v4973_v5 = vperm.slane %v4136_v18, 6  ;;  %v4982_v61 = vmul.f32 %v4844_v20, %v4827_v52  ;;  %v4985_v1 = vld [vmem:[%s4105_s10 + $0x6d] sm:$0xff] }
  0x9b   : > { %8624 = vst [vmem:[#allocation61_spill] sm:$0xff] %v4905_v63  ;;  %v728_v28 = vadd.f32 %v712_v27, %v695_v14  ;;  %v8642_v62 = vld [vmem:[#allocation72_spill] sm:$0xff]  ;;  %v8643_v8 = vld [vmem:[#allocation23_spill] sm:$0xff]  ;;  %v4992_v18 = vmul.f32 %v4948_v3, %v4955_v13  ;;  %v1474_v41 = vadd.f32 %v4819_v48, %v1441_v10  ;;  %v1717_v52 = vmul.f32 %v4658_v16, %v4959_v0  ;;  %v8658_v16 = vld [vmem:[#allocation9_spill] sm:$0xff] }
  0x9c   : > { %8627 = vst [vmem:[#allocation101_spill] sm:$0xff] %v4926_v9  ;;  %v778_v58 = vmul.f32 %v8643_v8, %v8642_v62  ;;  %v1798_v7 = vadd.f32 %v8644_v53, %v1765_v15  ;;  %v5004_v27 = vmul.f32 %v4866_v30, %v4855_v46  ;;  %v8646_v53 = vld [vmem:[#allocation74_spill] sm:$0xff]  ;;  %v8647_v15 = vld [vmem:[#allocation24_spill] sm:$0xff]  ;;  %v5011_v48 = vmul.f32 %v4973_v5, %v4977_v37 }
  0x9d   : > { %8628 = vst [vmem:[#allocation125_spill] sm:$0xff] %v4930_v36  ;;  %v8640_v36 = vld [vmem:[#allocation113_spill] sm:$0xff]  ;;  %v761_v14 = vadd.f32 %v745_v40, %v728_v28  ;;  %v811_v62 = vmul.f32 %v8647_v15, %v8646_v53  ;;  %v1507_v10 = vadd.f32 %v4831_v34, %v1474_v41  ;;  %v5019_v46 = vmul.f32 %v4714_v24, %v4996_v51  ;;  %v8648_v28 = vld [vmem:[#allocation27_spill] sm:$0xff]  ;;  %v8652_v24 = vld [vmem:[#allocation84_spill] sm:$0xff] }
  0x9e   : > { %8629 = vst [vmem:[#allocation126_spill] sm:$0xff] %v4937_v38  ;;  %v1664_v45 = vadd.f32 %v8640_v36, %v1603_v59  ;;  %v843_v36 = vld [vmem:[%s4105_s10 + $0xa] sm:$0xff]  ;;  %v1831_v8 = vadd.f32 %v4804_v39, %v1798_v7  ;;  %v5025_v7 = vmul.f32 %v4895_v21, %v4873_v49  ;;  %v8656_v53 = vld [vmem:[#allocation86_spill] sm:$0xff] }
  0x9f   : > { %8633 = vst [vmem:[#allocation106_spill] sm:$0xff] %v4948_v3  ;;  %v794_v40 = vadd.f32 %v778_v58, %v761_v14  ;;  %v1540_v34 = vadd.f32 %v4851_v17, %v1507_v10  ;;  %v8649_v41 = vld [vmem:[#allocation7_spill] sm:$0xff]  ;;  %v8653_v58 = vld [vmem:[#allocation28_spill] sm:$0xff] }
  0xa0   : > { %8634 = vst [vmem:[#allocation127_spill] sm:$0xff] %v4955_v13  ;;  %v1697_v59 = vadd.f32 %v4779_v19, %v1664_v45  ;;  %v1750_v45 = vmul.f32 %v4689_v29, %v4985_v1  ;;  %v1864_v39 = vadd.f32 %v4824_v23, %v1831_v8  ;;  %v905_v14 = vmul.f32 %v8653_v58, %v8652_v24  ;;  %v8655_v29 = vld [vmem:[#allocation4_spill] sm:$0xff]  ;;  %v8657_v17 = vld [vmem:[#allocation31_spill] sm:$0xff]  ;;  %v8661_v24 = vld [vmem:[#allocation6_spill] sm:$0xff] }
  0xa1   : > { %8635 = vst [vmem:[#allocation128_spill] sm:$0xff] %v4959_v0  ;;  %v872_v0 = vmul.f32 %v8648_v28, %v843_v36  ;;  %v8654_v36 = vld [vmem:[#allocation8_spill] sm:$0xff]  ;;  %v1573_v49 = vadd.f32 %v4881_v32, %v1540_v34  ;;  %v938_v10 = vmul.f32 %v8657_v17, %v8656_v53 }
  0xa2   : > { %8638 = vst [vmem:[#allocation129_spill] sm:$0xff] %v4973_v5  ;;  %v1730_v19 = vadd.f32 %v4808_v11, %v1697_v59  ;;  %v5032_v59 = vld [vmem:[%s4105_s10 + $0x9d] sm:$0xff]  ;;  %v390_v23 = vmul.f32 %v8655_v29, %v8654_v36  ;;  %v1925_v8 = vadd.f32 %v4859_v31, %v1864_v39  ;;  %v8662_v39 = vld [vmem:[#allocation92_spill] sm:$0xff] }
  0xa3   : > { %8639 = vst [vmem:[#allocation130_spill] sm:$0xff] %v4977_v37  ;;  %v8650_v37 = vld [vmem:[#allocation3_spill] sm:$0xff]  ;;  %v1606_v31 = vadd.f32 %v4914_v4, %v1573_v49  ;;  %v1816_v32 = vmul.f32 %v4749_v33, %v5032_v59  ;;  %v8663_v34 = vld [vmem:[#allocation32_spill] sm:$0xff]  ;;  %v8665_v4 = vld [vmem:[#allocation93_spill] sm:$0xff] }
  0xa4   : > { %8641 = vst [vmem:[#allocation113_spill] sm:$0xff] %v4985_v1  ;;  %v357_v1 = vmul.f32 %v8650_v37, %v8649_v41  ;;  %v1763_v11 = vadd.f32 %v4836_v56, %v1730_v19  ;;  %v8659_v41 = vld [vmem:[#allocation5_spill] sm:$0xff]  ;;  %v1958_v36 = vadd.f32 %v4887_v35, %v1925_v8  ;;  %v971_v53 = vmul.f32 %v8663_v34, %v8662_v39 }
  0xa5   : > { %8645 = vst [vmem:[#allocation117_spill] sm:$0xff] %v4996_v51  ;;  %v827_v51 = vadd.f32 %v811_v62, %v794_v40  ;;  %v423_v37 = vmul.f32 %v8659_v41, %v8658_v16  ;;  %v8660_v40 = vld [vmem:[#allocation11_spill] sm:$0xff]  ;;  %v2039_v35 = vmul.f32 %v4926_v9, %v4905_v63  ;;  %v1667_v49 = vadd.f32 %v4934_v57, %v1606_v31  ;;  %v8671_v31 = vld [vmem:[#allocation57_spill] sm:$0xff] }
  0xa6   : > { %8651 = vst [vmem:[#allocation7_spill] sm:$0xff] %v5032_v59  ;;  %v1796_v56 = vadd.f32 %v4870_v60, %v1763_v11  ;;  %v406_v19 = vadd.f32 %v390_v23, %v357_v1  ;;  %v456_v58 = vmul.f32 %v8661_v24, %v8660_v40  ;;  %v8666_v23 = vld [vmem:[#allocation34_spill] sm:$0xff] }
  0xa7   : > { %v888_v62 = vadd.f32 %v872_v0, %v827_v51  ;;  %v8664_v0 = vld [vmem:[#allocation13_spill] sm:$0xff]  ;;  %v1991_v51 = vadd.f32 %v4909_v22, %v1958_v36  ;;  %v1004_v8 = vmul.f32 %v8666_v23, %v8665_v4  ;;  %v5063_v40 = vld [vmem:[%s4105_s10 + $0xc0] sm:$0xff]  ;;  %v1700_v57 = vadd.f32 %v4963_v47, %v1667_v49 }
  0xa8   : > { %v1829_v16 = vadd.f32 %v4891_v44, %v1796_v56  ;;  %v439_v11 = vadd.f32 %v423_v37, %v406_v19  ;;  %v489_v1 = vmul.f32 %v8605_v50, %v8664_v0  ;;  %8667 = vst [vmem:[#allocation84_spill] sm:$0xff] %v5063_v40  ;;  %v8670_v19 = vld [vmem:[#allocation12_spill] sm:$0xff]  ;;  %v8672_v0 = vld [vmem:[#allocation37_spill] sm:$0xff] }
  0xa9   : > { %v921_v60 = vadd.f32 %v905_v14, %v888_v62  ;;  %v5067_v14 = vld [vmem:[%s4105_s10 + $0xb5] sm:$0xff]  ;;  %v8669_v62 = vld [vmem:[#allocation15_spill] sm:$0xff]  ;;  %v2024_v36 = vadd.f32 %v4941_v2, %v1991_v51  ;;  %v1037_v63 = vmul.f32 %v8672_v0, %v8671_v31 }
  0xaa   : > { %v1862_v44 = vadd.f32 %v4919_v54, %v1829_v16  ;;  %8668 = vst [vmem:[#allocation8_spill] sm:$0xff] %v5067_v14  ;;  %v472_v56 = vadd.f32 %v456_v58, %v439_v11  ;;  %v522_v22 = vmul.f32 %v8670_v19, %v8669_v62  ;;  %v1102_v54 = vld [vmem:[%s4105_s10 + $0xb] sm:$0xff]  ;;  %v555_v58 = vmul.f32 %v8613_v42, %v5063_v40 }
  0xab   : > { %v954_v37 = vadd.f32 %v938_v10, %v921_v60  ;;  %v2057_v10 = vadd.f32 %v4970_v6, %v2024_v36  ;;  %v1733_v60 = vadd.f32 %v1717_v52, %v1700_v57  ;;  %v1849_v2 = vmul.f32 %v4775_v12, %v5067_v14  ;;  %v8673_v11 = vld [vmem:[#allocation95_spill] sm:$0xff]  ;;  %v8674_v51 = vld [vmem:[#allocation44_spill] sm:$0xff]  ;;  %v5094_v6 = vld [vmem:[%s7872_s2] ss:$0 sm:$0xff] }
  0xac   : > { %v1923_v4 = vadd.f32 %v4951_v55, %v1862_v44  ;;  %v505_v16 = vadd.f32 %v489_v1, %v472_v56  ;;  %v1070_v47 = vmul.f32 %v8674_v51, %v8673_v11  ;;  %v5086_v62 = vld [vmem:[%s4105_s10 + $0x26] sm:$0xff]  ;;  %v8676_v44 = vld [vmem:[#allocation21_spill] sm:$0xff]  ;;  %v8677_v1 = vld [vmem:[#allocation16_spill] sm:$0xff]  ;;  %8678 = vst [vmem:[#allocation11_spill] sm:$0xff] %v5094_v6  ;;  %v2072_v52 = vmul.f32 %v4948_v3, %v4937_v38 }
  0xad   : > { %v987_v59 = vadd.f32 %v971_v53, %v954_v37  ;;  %8675 = vst [vmem:[#allocation9_spill] sm:$0xff] %v5086_v62  ;;  %v616_v37 = vmul.f32 %v8677_v1, %v8676_v44  ;;  %v2090_v56 = vadd.f32 %v4992_v18, %v2057_v10  ;;  %v1766_v36 = vadd.f32 %v1750_v45, %v1733_v60  ;;  %v8680_v57 = vld [vmem:[#allocation22_spill] sm:$0xff]  ;;  %v8681_v14 = vld [vmem:[#allocation99_spill] sm:$0xff] }
  0xae   : > { %v1956_v49 = vadd.f32 %v4982_v61, %v1923_v4  ;;  %v538_v53 = vadd.f32 %v522_v22, %v505_v16  ;;  %v8679_v61 = vld [vmem:[#allocation46_spill] sm:$0xff]  ;;  %v649_v16 = vmul.f32 %v8622_v43, %v8680_v57  ;;  %v1910_v44 = vmul.f32 %v4811_v26, %v5086_v62  ;;  %v8719_v62 = vld [vmem:[#allocation71_spill] sm:$0xff] }
  0xaf   : > { %v1020_v55 = vadd.f32 %v1004_v8, %v987_v59  ;;  %v1131_v4 = vmul.f32 %v8679_v61, %v1102_v54  ;;  %v2123_v18 = vadd.f32 %v5011_v48, %v2090_v56  ;;  %v1799_v10 = vadd.f32 %v5019_v46, %v1766_v36  ;;  %v8682_v38 = vld [vmem:[#allocation50_spill] sm:$0xff] }
  0xb0   : > { %v1989_v59 = vadd.f32 %v5004_v27, %v1956_v49  ;;  %v571_v22 = vadd.f32 %v555_v58, %v538_v53  ;;  %v1164_v45 = vmul.f32 %v8682_v38, %v8681_v14  ;;  %v5110_v60 = vld [vmem:[%s4105_s10 + $0x3e] sm:$0xff]  ;;  %v2105_v46 = vmul.f32 %v4973_v5, %v4955_v13  ;;  %v8686_v53 = vld [vmem:[#allocation103_spill] sm:$0xff] }
  0xb1   : > { %v1053_v8 = vadd.f32 %v1037_v63, %v1020_v55  ;;  %8683 = vst [vmem:[#allocation92_spill] sm:$0xff] %v5110_v60  ;;  %v8684_v58 = vld [vmem:[#allocation25_spill] sm:$0xff]  ;;  %v5115_v48 = vadd.f32 %v5094_v6, %v2123_v18  ;;  %v1832_v55 = vadd.f32 %v1816_v32, %v1799_v10  ;;  %v8687_v56 = vld [vmem:[#allocation54_spill] sm:$0xff]  ;;  %v1943_v32 = vmul.f32 %v4844_v20, %v5110_v60 }
  0xb2   : > { %v2022_v54 = vadd.f32 %v5025_v7, %v1989_v59  ;;  %v632_v27 = vadd.f32 %v616_v37, %v571_v22  ;;  %v682_v49 = vmul.f32 %v8626_v25, %v8684_v58  ;;  %v1197_v14 = vmul.f32 %v8687_v56, %v8686_v53  ;;  %v5122_v7 = vld [vmem:[%s4105_s10 + $0x56] sm:$0xff]  ;;  %v8689_v37 = vld [vmem:[#allocation26_spill] sm:$0xff] }
  0xb3   : > { %v1086_v63 = vadd.f32 %v1070_v47, %v1053_v8  ;;  %8685 = vst [vmem:[#allocation13_spill] sm:$0xff] %v5115_v48  ;;  %v8690_v8 = vld [vmem:[#allocation19_spill] sm:$0xff]  ;;  %v2164_v57 = vsel %vm2157_vm0, %v5115_v48, 0.0  ;;  %v1865_v18 = vadd.f32 %v1849_v2, %v1832_v55  ;;  %v8691_v10 = vld [vmem:[#allocation105_spill] sm:$0xff]  ;;  %v8692_v58 = vld [vmem:[#allocation58_spill] sm:$0xff]  ;;  %v1976_v2 = vmul.f32 %v4866_v30, %v5122_v7 }
  0xb4   : > { %v2055_v36 = vadd.f32 %v2039_v35, %v2022_v54  ;;  %8688 = vst [vmem:[#allocation15_spill] sm:$0xff] %v5122_v7  ;;  %v665_v47 = vadd.f32 %v649_v16, %v632_v27  ;;  %v715_v22 = vmul.f32 %v8690_v8, %v8689_v37  ;;  %v1230_v35 = vmul.f32 %v8692_v58, %v8691_v10  ;;  %v8694_v27 = vld [vmem:[#allocation29_spill] sm:$0xff]  ;;  %v8695_v37 = vld [vmem:[#allocation20_spill] sm:$0xff]  ;;  %v8697_v48 = vld [vmem:[#allocation62_spill] sm:$0xff] }
  0xb5   : > { %v1147_v59 = vadd.f32 %v1131_v4, %v1086_v63  ;;  %2165 = vadd.xlane.f32.xlu1 %v2164_v57  ;;  %v5133_v4 = vld [vmem:[%s4105_s10 + $0x6e] sm:$0xff]  ;;  %v748_v13 = vmul.f32 %v8695_v37, %v8694_v27  ;;  %v1926_v53 = vadd.f32 %v1910_v44, %v1865_v18  ;;  %v5142_v11 = vld [vmem:[%s4105_s10 + $0xc1] sm:$0xff]  ;;  %v8703_v27 = vld [vmem:[#allocation109_spill] sm:$0xff] }
  0xb6   : > { %v2088_v54 = vadd.f32 %v2072_v52, %v2055_v36  ;;  %8693 = vst [vmem:[#allocation21_spill] sm:$0xff] %v5133_v4  ;;  %v698_v63 = vadd.f32 %v682_v49, %v665_v47  ;;  %v8696_v55 = vld [vmem:[#allocation108_spill] sm:$0xff]  ;;  %v5145_v57 = vld [vmem:[%s4105_s10 + $0x86] sm:$0xff]  ;;  %v5148_v52 = vld [vmem:[%s4105_s10 + $0x9e] sm:$0xff]  ;;  %v2009_v18 = vmul.f32 %v4895_v21, %v5133_v4 }
  0xb7   : > { %v1180_v16 = vadd.f32 %v1164_v45, %v1147_v59  ;;  %v1263_v60 = vmul.f32 %v8697_v48, %v8696_v55  ;;  %8698 = vst [vmem:[#allocation22_spill] sm:$0xff] %v5142_v11  ;;  %v8701_v36 = vld [vmem:[#allocation30_spill] sm:$0xff]  ;;  %v8702_v59 = vld [vmem:[#allocation23_spill] sm:$0xff]  ;;  %v1959_v44 = vadd.f32 %v1943_v32, %v1926_v53  ;;  %v8704_v7 = vld [vmem:[#allocation65_spill] sm:$0xff]  ;;  %v2042_v53 = vmul.f32 %v4926_v9, %v5145_v57 }
  0xb8   : > { %v2121_v10 = vadd.f32 %v2105_v46, %v2088_v54  ;;  %8699 = vst [vmem:[#allocation99_spill] sm:$0xff] %v5145_v57  ;;  %v731_v49 = vadd.f32 %v715_v22, %v698_v63  ;;  %v781_v47 = vmul.f32 %v8702_v59, %v8701_v36  ;;  %v1296_v55 = vmul.f32 %v8704_v7, %v8703_v27  ;;  %v5160_v46 = vld [vmem:[%s4105_s10 + $0xb6] sm:$0xff]  ;;  %v1361_v27 = vld [vmem:[%s4105_s10 + $0xc] sm:$0xff]  ;;  %v8713_v9 = vld [vmem:[#allocation2_spill] sm:$0xff] }
  0xb9   : > { %8700 = vst [vmem:[#allocation25_spill] sm:$0xff] %v5148_v52  ;;  %v1213_v45 = vadd.f32 %v1197_v14, %v1180_v16  ;;  %v814_v14 = vmul.f32 %v8647_v15, %v5142_v11  ;;  %v1992_v22 = vadd.f32 %v1976_v2, %v1959_v44  ;;  %v2075_v32 = vmul.f32 %v4948_v3, %v5148_v52  ;;  %v8707_v16 = vld [vmem:[#allocation110_spill] sm:$0xff]  ;;  %v8708_v63 = vld [vmem:[#allocation68_spill] sm:$0xff]  ;;  %v8711_v11 = vld [vmem:[#allocation3_spill] sm:$0xff] }
  0xba   : > { %v5157_v30 = vadd.f32 %v5094_v6, %v2121_v10  ;;  %8706 = vst [vmem:[#allocation29_spill] sm:$0xff] %v5160_v46  ;;  %v764_v20 = vadd.f32 %v748_v13, %v731_v49  ;;  %v1329_v36 = vmul.f32 %v8708_v63, %v8707_v16  ;;  %v8709_v13 = vld [vmem:[#allocation33_spill] sm:$0xff]  ;;  %v2108_v49 = vmul.f32 %v4973_v5, %v5160_v46  ;;  %v8710_v44 = vld [vmem:[#allocation40_spill] sm:$0xff]  ;;  %v8718_v5 = vld [vmem:[#allocation114_spill] sm:$0xff] }
  0xbb   : > { %v1246_v54 = vadd.f32 %v1230_v35, %v1213_v45  ;;  %v875_v45 = vmul.f32 %v8648_v28, %v8709_v13  ;;  %v2025_v2 = vadd.f32 %v2009_v18, %v1992_v22  ;;  %v358_v52 = vmul.f32 %v8711_v11, %v8710_v44  ;;  %v8712_v3 = vld [vmem:[#allocation45_spill] sm:$0xff]  ;;  %v8716_v18 = vld [vmem:[#allocation47_spill] sm:$0xff] }
  0xbc   : > { %8705 = vst [vmem:[#allocation26_spill] sm:$0xff] %v5157_v30  ;;  %v2158_v10 = vsel %vm2157_vm0, %v5157_v30, 0.0  ;;  %v797_v35 = vadd.f32 %v781_v47, %v764_v20  ;;  %v391_v16 = vmul.f32 %v8655_v29, %v8712_v3  ;;  %v1390_v21 = vmul.f32 %v8713_v9, %v1361_v27  ;;  %v8715_v20 = vld [vmem:[#allocation28_spill] sm:$0xff]  ;;  %v8717_v13 = vld [vmem:[#allocation53_spill] sm:$0xff] }
  0xbd   : > { %v1279_v4 = vadd.f32 %v1263_v60, %v1246_v54  ;;  %2159 = vadd.xlane.f32.xlu0 %v2158_v10  ;;  %v8714_v60 = vld [vmem:[#allocation35_spill] sm:$0xff]  ;;  %v2058_v54 = vadd.f32 %v2042_v53, %v2025_v2  ;;  %v424_v22 = vmul.f32 %v8659_v41, %v8716_v18  ;;  %v457_v46 = vmul.f32 %v8661_v24, %v8717_v13  ;;  %v8723_v2 = vld [vmem:[#allocation73_spill] sm:$0xff] }
  0xbe   : > { %v830_v30 = vadd.f32 %v814_v14, %v797_v35  ;;  %v908_v47 = vmul.f32 %v8715_v20, %v8714_v60  ;;  %v407_v10 = vadd.f32 %v391_v16, %v358_v52  ;;  %v1423_v3 = vmul.f32 %v8719_v62, %v8718_v5  ;;  %v8721_v60 = vld [vmem:[#allocation56_spill] sm:$0xff]  ;;  %v8722_v16 = vld [vmem:[#allocation115_spill] sm:$0xff] }
  0xbf   : > { %v1312_v57 = vadd.f32 %v1296_v55, %v1279_v4  ;;  %v8720_v55 = vld [vmem:[#allocation36_spill] sm:$0xff]  ;;  %v2091_v14 = vadd.f32 %v2075_v32, %v2058_v54  ;;  %v490_v52 = vmul.f32 %v8605_v50, %v8721_v60  ;;  %v1456_v18 = vmul.f32 %v8723_v2, %v8722_v16  ;;  %v8724_v13 = vld [vmem:[#allocation39_spill] sm:$0xff]  ;;  %v8737_v16 = vld [vmem:[#allocation85_spill] sm:$0xff] }
  0xc0   : > { %v891_v4 = vadd.f32 %v875_v45, %v830_v30  ;;  %v941_v27 = vmul.f32 %v8657_v17, %v8720_v55  ;;  %v440_v35 = vadd.f32 %v424_v22, %v407_v10  ;;  %v8726_v45 = vld [vmem:[#allocation59_spill] sm:$0xff]  ;;  %v8727_v10 = vld [vmem:[#allocation76_spill] sm:$0xff]  ;;  %v8728_v22 = vld [vmem:[#allocation77_spill] sm:$0xff] }
  0xc1   : > { %v1345_v44 = vadd.f32 %v1329_v36, %v1312_v57  ;;  %v974_v57 = vmul.f32 %v8663_v34, %v8724_v13  ;;  %v5199_v36 = vld [vmem:[%s4105_s10 + $0xc8] sm:$0xff]  ;;  %v2124_v30 = vadd.f32 %v2108_v49, %v2091_v14  ;;  %v523_v32 = vmul.f32 %v8670_v19, %v8726_v45  ;;  %v8734_v45 = vld [vmem:[#allocation48_spill] sm:$0xff] }
  0xc2   : > { %v924_v31 = vadd.f32 %v908_v47, %v891_v4  ;;  %8725 = vst [vmem:[#allocation30_spill] sm:$0xff] %v5199_v36  ;;  %v473_v5 = vadd.f32 %v457_v46, %v440_v35  ;;  %v1489_v55 = vmul.f32 %v8728_v22, %v8727_v10  ;;  %v5211_v4 = vld [vmem:[%s4105_s10 + $0xc2] sm:$0xff]  ;;  %v556_v46 = vmul.f32 %v8613_v42, %v5199_v36 }
  0xc3   : > { %v1406_v53 = vadd.f32 %v1390_v21, %v1345_v44  ;;  %v8729_v21 = vld [vmem:[#allocation41_spill] sm:$0xff]  ;;  %v5208_v47 = vadd.f32 %v5094_v6, %v2124_v30  ;;  %8731 = vst [vmem:[#allocation40_spill] sm:$0xff] %v5211_v4  ;;  %v8732_v14 = vld [vmem:[#allocation119_spill] sm:$0xff] }
  0xc4   : > { %v957_v60 = vadd.f32 %v941_v27, %v924_v31  ;;  %v1007_v44 = vmul.f32 %v8666_v23, %v8729_v21  ;;  %v506_v13 = vadd.f32 %v490_v52, %v473_v5  ;;  %v1040_v31 = vmul.f32 %v8672_v0, %v8734_v45  ;;  %v8735_v21 = vld [vmem:[#allocation64_spill] sm:$0xff]  ;;  %v8736_v5 = vld [vmem:[#allocation83_spill] sm:$0xff] }
  0xc5   : > { %v1439_v54 = vadd.f32 %v1423_v3, %v1406_v53  ;;  %8730 = vst [vmem:[#allocation33_spill] sm:$0xff] %v5208_v47  ;;  %v8733_v3 = vld [vmem:[#allocation80_spill] sm:$0xff]  ;;  %v2167_v27 = vsel %vm2157_vm0, %v5208_v47, 0.0  ;;  %v617_v10 = vmul.f32 %v8677_v1, %v8735_v21  ;;  %v1555_v36 = vmul.f32 %v8737_v16, %v8736_v5  ;;  %v8739_v47 = vld [vmem:[#allocation91_spill] sm:$0xff]  ;;  %v8743_v5 = vld [vmem:[#allocation94_spill] sm:$0xff] }
  0xc6   : > { %v1522_v35 = vmul.f32 %v8733_v3, %v8732_v14  ;;  %v990_v53 = vadd.f32 %v974_v57, %v957_v60  ;;  %v539_v30 = vadd.f32 %v523_v32, %v506_v13  ;;  %2168 = vadd.xlane.f32.xlu1 %v2167_v27  ;;  %v1620_v57 = vld [vmem:[%s4105_s10 + $0xd] sm:$0xff]  ;;  %v8738_v14 = vld [vmem:[#allocation66_spill] sm:$0xff]  ;;  %v8740_v32 = vld [vmem:[#allocation89_spill] sm:$0xff] }
  0xc7   : > { %v1472_v49 = vadd.f32 %v1456_v18, %v1439_v54  ;;  %v1073_v54 = vmul.f32 %v8674_v51, %v5211_v4  ;;  %v650_v45 = vmul.f32 %v8622_v43, %v8738_v14  ;;  %v1588_v13 = vmul.f32 %v8740_v32, %v8739_v47  ;;  %v8741_v21 = vld [vmem:[#allocation52_spill] sm:$0xff]  ;;  %v8742_v27 = vld [vmem:[#allocation69_spill] sm:$0xff]  ;;  %v8750_v47 = vld [vmem:[#allocation102_spill] sm:$0xff] }
  0xc8   : > { %v1023_v18 = vadd.f32 %v1007_v44, %v990_v53  ;;  %v572_v60 = vadd.f32 %v556_v46, %v539_v30  ;;  %v683_v44 = vmul.f32 %v8626_v25, %v8742_v27  ;;  %v1649_v4 = vmul.f32 %v8743_v5, %v1620_v57  ;;  %v8744_v30 = vld [vmem:[#allocation55_spill] sm:$0xff]  ;;  %v8749_v57 = vld [vmem:[#allocation125_spill] sm:$0xff]  ;;  %v8751_v5 = vld [vmem:[#allocation74_spill] sm:$0xff] }
  0xc9   : > { %v1505_v52 = vadd.f32 %v1489_v55, %v1472_v49  ;;  %v1134_v55 = vmul.f32 %v8679_v61, %v8741_v21  ;;  %v1167_v14 = vmul.f32 %v8682_v38, %v8744_v30  ;;  %v8746_v21 = vld [vmem:[#allocation97_spill] sm:$0xff] }
  0xca   : > { %v1056_v3 = vadd.f32 %v1040_v31, %v1023_v18  ;;  %v633_v49 = vadd.f32 %v617_v10, %v572_v60  ;;  %v8747_v10 = vld [vmem:[#allocation96_spill] sm:$0xff] }
  0xcb   : > { %v1538_v6 = vadd.f32 %v1522_v35, %v1505_v52  ;;  %v8745_v52 = vld [vmem:[#allocation72_spill] sm:$0xff]  ;;  %v1682_v60 = vmul.f32 %v8747_v10, %v8746_v21  ;;  %v3804_v21 = vld [vmem:[%s4105_s10 + $0x48] sm:$0xff] }
  0xcc   : > { %v1089_v46 = vadd.f32 %v1073_v54, %v1056_v3  ;;  %v666_v35 = vadd.f32 %v650_v45, %v633_v49  ;;  %v716_v31 = vmul.f32 %v8690_v8, %v8745_v52  ;;  %v1715_v3 = vmul.f32 %v8750_v47, %v8749_v57  ;;  %v8752_v52 = vld [vmem:[#allocation63_spill] sm:$0xff]  ;;  %v5278_v47 = vld [vmem:[%s4105_s10 + $0x90] sm:$0xff] }
  0xcd   : > { %v1571_v53 = vadd.f32 %v1555_v36, %v1538_v6  ;;  %v8748_v6 = vld [vmem:[#allocation60_spill] sm:$0xff]  ;;  %v749_v45 = vmul.f32 %v8695_v37, %v8751_v5  ;;  %v5264_v5 = vld [vmem:[%s4105_s10 + $0x78] sm:$0xff]  ;;  %8761 = vst [vmem:[#allocation114_spill] sm:$0xff] %v5278_v47 }
  0xce   : > { %v1150_v27 = vadd.f32 %v1134_v55, %v1089_v46  ;;  %v1200_v36 = vmul.f32 %v8687_v56, %v8748_v6  ;;  %v699_v54 = vadd.f32 %v683_v44, %v666_v35  ;;  %v359_v55 = vmul.f32 %v3804_v21, %v8711_v11  ;;  %v8754_v6 = vld [vmem:[#allocation79_spill] sm:$0xff]  ;;  %v5259_v44 = vld [vmem:[%s4105_s10 + $0x60] sm:$0xff]  ;;  %8756 = vst [vmem:[#allocation47_spill] sm:$0xff] %v5264_v5 }
  0xcf   : > { %v1604_v18 = vadd.f32 %v1588_v13, %v1571_v53  ;;  %v1233_v13 = vmul.f32 %v8692_v58, %v8752_v52  ;;  %v5252_v53 = vld [vmem:[%s4105_s10 + $0xc9] sm:$0xff]  ;;  %v782_v57 = vmul.f32 %v8702_v59, %v8754_v6  ;;  %8755 = vst [vmem:[#allocation35_spill] sm:$0xff] %v5259_v44 }
  0xd0   : > { %v1183_v30 = vadd.f32 %v1167_v14, %v1150_v27  ;;  %8753 = vst [vmem:[#allocation45_spill] sm:$0xff] %v5252_v53  ;;  %v732_v46 = vadd.f32 %v716_v31, %v699_v54  ;;  %v425_v14 = vmul.f32 %v5264_v5, %v8659_v41  ;;  %v8758_v27 = vld [vmem:[#allocation107_spill] sm:$0xff]  ;;  %v8762_v5 = vld [vmem:[#allocation113_spill] sm:$0xff] }
  0xd1   : > { %v1665_v49 = vadd.f32 %v1649_v4, %v1604_v18  ;;  %v392_v4 = vmul.f32 %v5259_v44, %v8655_v29  ;;  %v8757_v18 = vld [vmem:[#allocation128_spill] sm:$0xff]  ;;  %v8759_v31 = vld [vmem:[#allocation67_spill] sm:$0xff]  ;;  %v815_v44 = vmul.f32 %v8647_v15, %v5252_v53 }
  0xd2   : > { %v1748_v52 = vmul.f32 %v8758_v27, %v8757_v18  ;;  %v1216_v21 = vadd.f32 %v1200_v36, %v1183_v30  ;;  %v1266_v54 = vmul.f32 %v8697_v48, %v8759_v31  ;;  %v5273_v6 = vld [vmem:[%s4105_s10 + $0xc3] sm:$0xff]  ;;  %v765_v11 = vadd.f32 %v749_v45, %v732_v46 }
  0xd3   : > { %v1698_v35 = vadd.f32 %v1682_v60, %v1665_v49  ;;  %8760 = vst [vmem:[#allocation53_spill] sm:$0xff] %v5273_v6  ;;  %v408_v29 = vadd.f32 %v392_v4, %v359_v55  ;;  %v458_v60 = vmul.f32 %v5278_v47, %v8661_v24  ;;  %v8763_v36 = vld [vmem:[#allocation70_spill] sm:$0xff]  ;;  %v5289_v4 = vld [vmem:[%s4105_s10 + $0xa8] sm:$0xff]  ;;  %v8767_v47 = vld [vmem:[#allocation117_spill] sm:$0xff] }
  0xd4   : > { %v1781_v30 = vmul.f32 %v8763_v36, %v8762_v5  ;;  %v1249_v41 = vadd.f32 %v1233_v13, %v1216_v21  ;;  %v8764_v31 = vld [vmem:[#allocation42_spill] sm:$0xff]  ;;  %v798_v45 = vadd.f32 %v782_v57, %v765_v11  ;;  %8766 = vst [vmem:[#allocation36_spill] sm:$0xff] %v5289_v4  ;;  %v491_v27 = vmul.f32 %v5289_v4, %v8605_v50  ;;  %v5298_v21 = vld [vmem:[%s4105_s10 + $0xd8] sm:$0xff]  ;;  %v1879_v11 = vld [vmem:[%s4105_s10 + $0xe] sm:$0xff] }
  0xd5   : > { %v1731_v49 = vadd.f32 %v1715_v3, %v1698_v35  ;;  %v1299_v18 = vmul.f32 %v8704_v7, %v8764_v31  ;;  %v8765_v46 = vld [vmem:[#allocation86_spill] sm:$0xff]  ;;  %v441_v55 = vadd.f32 %v425_v14, %v408_v29  ;;  %v1814_v3 = vmul.f32 %v4749_v33, %v8767_v47  ;;  %8768 = vst [vmem:[#allocation56_spill] sm:$0xff] %v5298_v21  ;;  %v8771_v24 = vld [vmem:[#allocation93_spill] sm:$0xff] }
  0xd6   : > { %v876_v53 = vmul.f32 %v8648_v28, %v8765_v46  ;;  %v1282_v35 = vadd.f32 %v1266_v54, %v1249_v41  ;;  %v1332_v13 = vmul.f32 %v8708_v63, %v5273_v6  ;;  %v831_v57 = vadd.f32 %v815_v44, %v798_v45  ;;  %v8770_v54 = vld [vmem:[#allocation43_spill] sm:$0xff] }
  0xd7   : > { %v1764_v48 = vadd.f32 %v1748_v52, %v1731_v49  ;;  %v909_v29 = vmul.f32 %v8715_v20, %v8662_v39  ;;  %v474_v14 = vadd.f32 %v458_v60, %v441_v55  ;;  %v524_v31 = vmul.f32 %v8670_v19, %v5063_v40  ;;  %v8769_v49 = vld [vmem:[#allocation7_spill] sm:$0xff] }
  0xd8   : > { %v1847_v46 = vmul.f32 %v4775_v12, %v8769_v49  ;;  %v1315_v41 = vadd.f32 %v1299_v18, %v1282_v35  ;;  %v1393_v4 = vmul.f32 %v8713_v9, %v8770_v54  ;;  %v892_v50 = vadd.f32 %v876_v53, %v831_v57  ;;  %v8773_v35 = vld [vmem:[#allocation57_spill] sm:$0xff]  ;;  %v3809_v57 = vld [vmem:[%s4105_s10 + $0x49] sm:$0xff] }
  0xd9   : > { %v1797_v52 = vadd.f32 %v1781_v30, %v1764_v48  ;;  %v942_v44 = vmul.f32 %v8657_v17, %v8771_v24  ;;  %v507_v45 = vadd.f32 %v491_v27, %v474_v14  ;;  %v557_v39 = vmul.f32 %v8613_v42, %v5298_v21  ;;  %v8772_v30 = vld [vmem:[#allocation49_spill] sm:$0xff]  ;;  %v8775_v21 = vld [vmem:[#allocation88_spill] sm:$0xff]  ;;  %v5350_v19 = vld [vmem:[%s4105_s10 + $0xc4] sm:$0xff] }
  0xda   : > { %v1908_v55 = vmul.f32 %v4811_v26, %v1879_v11  ;;  %v1348_v48 = vadd.f32 %v1332_v13, %v1315_v41  ;;  %v1426_v40 = vmul.f32 %v8719_v62, %v8772_v30  ;;  %v925_v18 = vadd.f32 %v909_v29, %v892_v50  ;;  %v8774_v14 = vld [vmem:[#allocation9_spill] sm:$0xff]  ;;  %v8776_v11 = vld [vmem:[#allocation51_spill] sm:$0xff]  ;;  %8789 = vst [vmem:[#allocation48_spill] sm:$0xff] %v5350_v19  ;;  %v8805_v49 = vld [vmem:[#allocation108_spill] sm:$0xff] }
  0xdb   : > { %v1830_v60 = vadd.f32 %v1814_v3, %v1797_v52  ;;  %v975_v54 = vmul.f32 %v8663_v34, %v8773_v35  ;;  %v540_v53 = vadd.f32 %v524_v31, %v507_v45  ;;  %v618_v24 = vmul.f32 %v3809_v57, %v8677_v1  ;;  %v8777_v30 = vld [vmem:[#allocation95_spill] sm:$0xff]  ;;  %v8779_v45 = vld [vmem:[#allocation92_spill] sm:$0xff] }
  0xdc   : > { %v1941_v3 = vmul.f32 %v8775_v21, %v8774_v14  ;;  %v1409_v52 = vadd.f32 %v1393_v4, %v1348_v48  ;;  %v1459_v13 = vmul.f32 %v8723_v2, %v8776_v11  ;;  %v958_v41 = vadd.f32 %v942_v44, %v925_v18  ;;  %v5327_v35 = vld [vmem:[%s4105_s10 + $0x61] sm:$0xff]  ;;  %v8781_v4 = vld [vmem:[#allocation81_spill] sm:$0xff]  ;;  %v5336_v44 = vld [vmem:[%s4105_s10 + $0xca] sm:$0xff] }
  0xdd   : > { %v1863_v27 = vadd.f32 %v1847_v46, %v1830_v60  ;;  %v1008_v50 = vmul.f32 %v8666_v23, %v8777_v30  ;;  %v573_v29 = vadd.f32 %v557_v39, %v540_v53  ;;  %8778 = vst [vmem:[#allocation39_spill] sm:$0xff] %v5327_v35  ;;  %v651_v31 = vmul.f32 %v5327_v35, %v8622_v43  ;;  %v8780_v60 = vld [vmem:[#allocation121_spill] sm:$0xff]  ;;  %v8783_v11 = vld [vmem:[#allocation98_spill] sm:$0xff]  ;;  %v8785_v35 = vld [vmem:[#allocation15_spill] sm:$0xff] }
  0xde   : > { %v1974_v57 = vmul.f32 %v8780_v60, %v8779_v45  ;;  %v1442_v14 = vadd.f32 %v1426_v40, %v1409_v52  ;;  %v1492_v48 = vmul.f32 %v8728_v22, %v8781_v4  ;;  %8782 = vst [vmem:[#allocation59_spill] sm:$0xff] %v5336_v44  ;;  %v991_v18 = vadd.f32 %v975_v54, %v958_v41  ;;  %v5341_v30 = vld [vmem:[%s4105_s10 + $0x79] sm:$0xff]  ;;  %v8786_v43 = vld [vmem:[#allocation124_spill] sm:$0xff]  ;;  %v8787_v1 = vld [vmem:[#allocation87_spill] sm:$0xff] }
  0xdf   : > { %v1924_v46 = vadd.f32 %v1908_v55, %v1863_v27  ;;  %v1041_v39 = vmul.f32 %v8672_v0, %v8783_v11  ;;  %v634_v53 = vadd.f32 %v618_v24, %v573_v29  ;;  %8784 = vst [vmem:[#allocation41_spill] sm:$0xff] %v5341_v30  ;;  %v684_v55 = vmul.f32 %v5341_v30, %v8626_v25  ;;  %v8788_v4 = vld [vmem:[#allocation80_spill] sm:$0xff]  ;;  %v8791_v11 = vld [vmem:[#allocation21_spill] sm:$0xff]  ;;  %v8793_v25 = vld [vmem:[#allocation90_spill] sm:$0xff] }
  0xe0   : > { %v2007_v40 = vmul.f32 %v8786_v43, %v8785_v35  ;;  %v1475_v52 = vadd.f32 %v1459_v13, %v1442_v14  ;;  %v1525_v42 = vmul.f32 %v8788_v4, %v8787_v1  ;;  %v1024_v54 = vadd.f32 %v1008_v50, %v991_v18  ;;  %v5355_v29 = vld [vmem:[%s4105_s10 + $0x91] sm:$0xff]  ;;  %v8794_v50 = vld [vmem:[#allocation103_spill] sm:$0xff] }
  0xe1   : > { %v1957_v27 = vadd.f32 %v1941_v3, %v1924_v46  ;;  %v1074_v24 = vmul.f32 %v8674_v51, %v5336_v44  ;;  %v667_v41 = vadd.f32 %v651_v31, %v634_v53  ;;  %8790 = vst [vmem:[#allocation64_spill] sm:$0xff] %v5355_v29  ;;  %v717_v3 = vmul.f32 %v5355_v29, %v8690_v8  ;;  %v8792_v30 = vld [vmem:[#allocation101_spill] sm:$0xff]  ;;  %v5366_v31 = vld [vmem:[%s4105_s10 + $0xa9] sm:$0xff] }
  0xe2   : > { %v2040_v13 = vmul.f32 %v8792_v30, %v8791_v11  ;;  %v1508_v14 = vadd.f32 %v1492_v48, %v1475_v52  ;;  %v1558_v1 = vmul.f32 %v8737_v16, %v8793_v25  ;;  %v1057_v35 = vadd.f32 %v1041_v39, %v1024_v54  ;;  %8795 = vst [vmem:[#allocation66_spill] sm:$0xff] %v5366_v31  ;;  %v8796_v29 = vld [vmem:[#allocation99_spill] sm:$0xff]  ;;  %v5375_v52 = vld [vmem:[%s4105_s10 + $0xd9] sm:$0xff] }
  0xe3   : > { %v1990_v46 = vadd.f32 %v1974_v57, %v1957_v27  ;;  %v1135_v18 = vmul.f32 %v8679_v61, %v8794_v50  ;;  %v700_v44 = vadd.f32 %v684_v55, %v667_v41  ;;  %v750_v53 = vmul.f32 %v5366_v31, %v8695_v37  ;;  %v8797_v57 = vld [vmem:[#allocation106_spill] sm:$0xff]  ;;  %8798 = vst [vmem:[#allocation52_spill] sm:$0xff] %v5375_v52  ;;  %v8799_v39 = vld [vmem:[#allocation105_spill] sm:$0xff] }
  0xe4   : > { %v2073_v27 = vmul.f32 %v8797_v57, %v8796_v29  ;;  %v1541_v8 = vadd.f32 %v1525_v42, %v1508_v14  ;;  %v1591_v48 = vmul.f32 %v8740_v32, %v5350_v19  ;;  %v1090_v25 = vadd.f32 %v1074_v24, %v1057_v35  ;;  %v8800_v41 = vld [vmem:[#allocation22_spill] sm:$0xff]  ;;  %v8803_v42 = vld [vmem:[#allocation100_spill] sm:$0xff] }
  0xe5   : > { %v2023_v45 = vadd.f32 %v2007_v40, %v1990_v46  ;;  %v1168_v54 = vmul.f32 %v8682_v38, %v8799_v39  ;;  %v733_v55 = vadd.f32 %v717_v3, %v700_v44  ;;  %v783_v50 = vmul.f32 %v8702_v59, %v8800_v41  ;;  %v8801_v40 = vld [vmem:[#allocation25_spill] sm:$0xff]  ;;  %v8804_v14 = vld [vmem:[#allocation94_spill] sm:$0xff]  ;;  %v8806_v41 = vld [vmem:[#allocation104_spill] sm:$0xff] }
  0xe6   : > { %v8802_v46 = vld [vmem:[#allocation129_spill] sm:$0xff]  ;;  %v1574_v29 = vadd.f32 %v1558_v1, %v1541_v8  ;;  %v1652_v11 = vmul.f32 %v8804_v14, %v8803_v42  ;;  %v1151_v19 = vadd.f32 %v1135_v18, %v1090_v25  ;;  %v1201_v35 = vmul.f32 %v8687_v56, %v8805_v49  ;;  %v3814_v18 = vld [vmem:[%s4105_s10 + $0x4a] sm:$0xff]  ;;  %v8809_v42 = vld [vmem:[#allocation102_spill] sm:$0xff] }
  0xe7   : > { %v2056_v31 = vadd.f32 %v2040_v13, %v2023_v45  ;;  %v2106_v37 = vmul.f32 %v8802_v46, %v8801_v40  ;;  %v766_v24 = vadd.f32 %v750_v53, %v733_v55  ;;  %v816_v44 = vmul.f32 %v8647_v15, %v5375_v52  ;;  %v8807_v59 = vld [vmem:[#allocation109_spill] sm:$0xff]  ;;  %v8808_v55 = vld [vmem:[#allocation38_spill] sm:$0xff] }
  0xe8   : > { %v1607_v39 = vadd.f32 %v1591_v48, %v1574_v29  ;;  %v1685_v45 = vmul.f32 %v8747_v10, %v8806_v41  ;;  %v1184_v13 = vadd.f32 %v1168_v54, %v1151_v19  ;;  %v1234_v8 = vmul.f32 %v8692_v58, %v8807_v59  ;;  %v8810_v29 = vld [vmem:[#allocation110_spill] sm:$0xff]  ;;  %v8813_v54 = vld [vmem:[#allocation11_spill] sm:$0xff] }
  0xe9   : > { %v2089_v3 = vadd.f32 %v2073_v27, %v2056_v31  ;;  %v799_v1 = vadd.f32 %v783_v50, %v766_v24  ;;  %v877_v25 = vmul.f32 %v3814_v18, %v8648_v28  ;;  %v1718_v52 = vmul.f32 %v8809_v42, %v8808_v55  ;;  %v8811_v27 = vld [vmem:[#allocation62_spill] sm:$0xff] }
  0xea   : > { %v1668_v53 = vadd.f32 %v1652_v11, %v1607_v39  ;;  %v1217_v31 = vadd.f32 %v1201_v35, %v1184_v13  ;;  %v1267_v48 = vmul.f32 %v8811_v27, %v8810_v29  ;;  %v5400_v19 = vld [vmem:[%s4105_s10 + $0x62] sm:$0xff]  ;;  %v5410_v39 = vld [vmem:[%s4105_s10 + $0xcb] sm:$0xff]  ;;  %v5415_v18 = vld [vmem:[%s4105_s10 + $0x7a] sm:$0xff] }
  0xeb   : > { %v2122_v49 = vadd.f32 %v2106_v37, %v2089_v3  ;;  %v832_v41 = vadd.f32 %v816_v44, %v799_v1  ;;  %8812 = vst [vmem:[#allocation69_spill] sm:$0xff] %v5400_v19  ;;  %v910_v59 = vmul.f32 %v5400_v19, %v8715_v20  ;;  %v8815_v37 = vld [vmem:[#allocation111_spill] sm:$0xff]  ;;  %v8818_v13 = vld [vmem:[#allocation112_spill] sm:$0xff]  ;;  %v943_v55 = vmul.f32 %v5415_v18, %v8657_v17 }
  0xec   : > { %v1701_v24 = vadd.f32 %v1685_v45, %v1668_v53  ;;  %v8816_v11 = vld [vmem:[#allocation107_spill] sm:$0xff]  ;;  %8817 = vst [vmem:[#allocation72_spill] sm:$0xff] %v5410_v39  ;;  %v1250_v35 = vadd.f32 %v1234_v8, %v1217_v31  ;;  %v1300_v44 = vmul.f32 %v8704_v7, %v8818_v13  ;;  %v8820_v53 = vld [vmem:[#allocation116_spill] sm:$0xff] }
  0xed   : > { %v5405_v50 = vadd.f32 %v8813_v54, %v2122_v49  ;;  %v1751_v3 = vmul.f32 %v8816_v11, %v8815_v37  ;;  %v893_v1 = vadd.f32 %v877_v25, %v832_v41  ;;  %8819 = vst [vmem:[#allocation97_spill] sm:$0xff] %v5415_v18  ;;  %v1784_v29 = vmul.f32 %v8763_v36, %v8820_v53  ;;  %v5424_v8 = vld [vmem:[%s4105_s10 + $0xc5] sm:$0xff]  ;;  %v5429_v37 = vld [vmem:[%s4105_s10 + $0x92] sm:$0xff] }
  0xee   : > { %v1734_v49 = vadd.f32 %v1718_v52, %v1701_v24  ;;  %8821 = vst [vmem:[#allocation60_spill] sm:$0xff] %v5424_v8  ;;  %v1283_v31 = vadd.f32 %v1267_v48, %v1250_v35  ;;  %v1333_v25 = vmul.f32 %v8708_v63, %v5410_v39  ;;  %v976_v13 = vmul.f32 %v5429_v37, %v8663_v34  ;;  %v8824_v53 = vld [vmem:[#allocation115_spill] sm:$0xff] }
  0xef   : > { %8814 = vst [vmem:[#allocation55_spill] sm:$0xff] %v5405_v50  ;;  %v2161_v45 = vsel %vm2157_vm0, %v5405_v50, 0.0  ;;  %v926_v41 = vadd.f32 %v910_v59, %v893_v1  ;;  %v8823_v50 = vld [vmem:[#allocation118_spill] sm:$0xff]  ;;  %v5438_v17 = vld [vmem:[%s4105_s10 + $0xaa] sm:$0xff]  ;;  %v1850_v35 = vmul.f32 %v4775_v12, %v5424_v8 }
  0xf0   : > { %2162 = vadd.xlane.f32.xlu0 %v2161_v45  ;;  %8822 = vst [vmem:[#allocation74_spill] sm:$0xff] %v5429_v37  ;;  %v1767_v19 = vadd.f32 %v1751_v3, %v1734_v49  ;;  %v1817_v52 = vmul.f32 %v4749_v33, %v8823_v50  ;;  %v1316_v24 = vadd.f32 %v1300_v44, %v1283_v31  ;;  %v5445_v1 = vld [vmem:[%s4105_s10 + $0xda] sm:$0xff]  ;;  %v8827_v49 = vld [vmem:[#allocation76_spill] sm:$0xff] }
  0xf1   : > { %v1394_v45 = vmul.f32 %v8713_v9, %v8824_v53  ;;  %v959_v18 = vadd.f32 %v943_v55, %v926_v41  ;;  %8825 = vst [vmem:[#allocation63_spill] sm:$0xff] %v5438_v17  ;;  %v1009_v48 = vmul.f32 %v5438_v17, %v8666_v23  ;;  %v1427_v50 = vmul.f32 %v8719_v62, %v8827_v49  ;;  %v8828_v31 = vld [vmem:[#allocation40_spill] sm:$0xff]  ;;  %v8831_v23 = vld [vmem:[#allocation122_spill] sm:$0xff]  ;;  %v8832_v49 = vld [vmem:[#allocation83_spill] sm:$0xff] }
  0xf2   : > { %v1800_v59 = vadd.f32 %v1784_v29, %v1767_v19  ;;  %8826 = vst [vmem:[#allocation79_spill] sm:$0xff] %v5445_v1  ;;  %v1349_v3 = vadd.f32 %v1333_v25, %v1316_v24  ;;  %v1042_v55 = vmul.f32 %v8672_v0, %v8828_v31  ;;  %v8829_v53 = vld [vmem:[#allocation120_spill] sm:$0xff]  ;;  %v8830_v19 = vld [vmem:[#allocation119_spill] sm:$0xff]  ;;  %v1075_v25 = vmul.f32 %v8674_v51, %v5445_v1 }
  0xf3   : > { %v992_v44 = vadd.f32 %v976_v13, %v959_v18  ;;  %v1911_v39 = vmul.f32 %v4811_v26, %v8829_v53  ;;  %v1460_v29 = vmul.f32 %v8723_v2, %v8830_v19  ;;  %v1944_v18 = vmul.f32 %v8775_v21, %v8831_v23  ;;  %v8833_v19 = vld [vmem:[#allocation61_spill] sm:$0xff]  ;;  %v5468_v23 = vld [vmem:[%s4105_s10 + $0x63] sm:$0xff] }
  0xf4   : > { %v1833_v41 = vadd.f32 %v1817_v52, %v1800_v59  ;;  %v1410_v17 = vadd.f32 %v1394_v45, %v1349_v3  ;;  %v1493_v52 = vmul.f32 %v8728_v22, %v8832_v49  ;;  %v3819_v45 = vld [vmem:[%s4105_s10 + $0x4b] sm:$0xff]  ;;  %8835 = vst [vmem:[#allocation67_spill] sm:$0xff] %v5468_v23 }
  0xf5   : > { %v1025_v37 = vadd.f32 %v1009_v48, %v992_v44  ;;  %v1136_v3 = vmul.f32 %v3819_v45, %v8679_v61  ;;  %v1977_v48 = vmul.f32 %v8780_v60, %v8833_v19  ;;  %v8838_v49 = vld [vmem:[#allocation123_spill] sm:$0xff]  ;;  %v5480_v45 = vld [vmem:[%s4105_s10 + $0x7b] sm:$0xff] }
  0xf6   : > { %v1866_v24 = vadd.f32 %v1850_v35, %v1833_v41  ;;  %v1443_v13 = vadd.f32 %v1427_v50, %v1410_v17  ;;  %v8834_v35 = vld [vmem:[#allocation91_spill] sm:$0xff]  ;;  %v1169_v17 = vmul.f32 %v5468_v23, %v8682_v38  ;;  %v8836_v50 = vld [vmem:[#allocation126_spill] sm:$0xff]  ;;  %8839 = vst [vmem:[#allocation42_spill] sm:$0xff] %v5480_v45 }
  0xf7   : > { %v1058_v59 = vadd.f32 %v1042_v55, %v1025_v37  ;;  %v1526_v41 = vmul.f32 %v8788_v4, %v8834_v35  ;;  %v2010_v55 = vmul.f32 %v8786_v43, %v8836_v50  ;;  %v8840_v35 = vld [vmem:[#allocation127_spill] sm:$0xff]  ;;  %v8842_v38 = vld [vmem:[#allocation130_spill] sm:$0xff] }
  0xf8   : > { %v1927_v53 = vadd.f32 %v1911_v39, %v1866_v24  ;;  %v1476_v44 = vadd.f32 %v1460_v29, %v1443_v13  ;;  %v5475_v39 = vld [vmem:[%s4105_s10 + $0xcc] sm:$0xff]  ;;  %v1559_v29 = vmul.f32 %v8737_v16, %v8838_v49 }
  0xf9   : > { %v1091_v1 = vadd.f32 %v1075_v25, %v1058_v59  ;;  %8837 = vst [vmem:[#allocation113_spill] sm:$0xff] %v5475_v39  ;;  %v1202_v25 = vmul.f32 %v5480_v45, %v8687_v56  ;;  %v5492_v49 = vld [vmem:[%s4105_s10 + $0x93] sm:$0xff]  ;;  %v5501_v61 = vld [vmem:[%s4105_s10 + $0xab] sm:$0xff] }
  0xfa   : > { %v1960_v37 = vadd.f32 %v1944_v18, %v1927_v53  ;;  %v1509_v24 = vadd.f32 %v1493_v52, %v1476_v44  ;;  %v2043_v18 = vmul.f32 %v8792_v30, %v8840_v35  ;;  %v5487_v53 = vld [vmem:[%s4105_s10 + $0xc6] sm:$0xff]  ;;  %v1592_v52 = vmul.f32 %v8740_v32, %v5475_v39  ;;  %v8843_v45 = vld [vmem:[#allocation125_spill] sm:$0xff]  ;;  %8844 = vst [vmem:[#allocation117_spill] sm:$0xff] %v5501_v61 }
  0xfb   : > { %v1152_v13 = vadd.f32 %v1136_v3, %v1091_v1  ;;  %8841 = vst [vmem:[#allocation86_spill] sm:$0xff] %v5487_v53  ;;  %v1235_v1 = vmul.f32 %v5492_v49, %v8692_v58  ;;  %v1653_v56 = vmul.f32 %v8804_v14, %v8843_v45  ;;  %v1301_v45 = vmul.f32 %v8704_v7, %v5273_v6 }
  0xfc   : > { %v1993_v59 = vadd.f32 %v1977_v48, %v1960_v37  ;;  %v1542_v23 = vadd.f32 %v1526_v41, %v1509_v24  ;;  %v2076_v48 = vmul.f32 %v8797_v57, %v8842_v38  ;;  %v1268_v41 = vmul.f32 %v5501_v61, %v8811_v27 }
  0xfd   : > { %v1185_v44 = vadd.f32 %v1169_v17, %v1152_v13  ;;  %v2109_v24 = vmul.f32 %v8802_v46, %v5487_v53  ;;  %v5508_v13 = vld [vmem:[%s4105_s10 + $0xdb] sm:$0xff] }
  0xfe   : > { %v2026_v3 = vadd.f32 %v2010_v55, %v1993_v59  ;;  %v1575_v37 = vadd.f32 %v1559_v29, %v1542_v23  ;;  %8845 = vst [vmem:[#allocation43_spill] sm:$0xff] %v5508_v13  ;;  %v8846_v59 = vld [vmem:[#allocation128_spill] sm:$0xff]  ;;  %v1334_v39 = vmul.f32 %v8708_v63, %v5508_v13 }
  0xff   : > { %v1218_v31 = vadd.f32 %v1202_v25, %v1185_v44  ;;  %v1686_v23 = vmul.f32 %v8747_v10, %v8846_v59 }
 0x100   : > { %v2059_v17 = vadd.f32 %v2043_v18, %v2026_v3  ;;  %v1608_v55 = vadd.f32 %v1592_v52, %v1575_v37  ;;  %v1719_v18 = vmul.f32 %v8809_v42, %v8762_v5  ;;  %v1752_v37 = vmul.f32 %v8816_v11, %v8767_v47  ;;  %v8848_v5 = vld [vmem:[#allocation7_spill] sm:$0xff] }
 0x101   : > { %v1251_v29 = vadd.f32 %v1235_v1, %v1218_v31  ;;  %v3824_v1 = vld [vmem:[%s4105_s10 + $0x4c] sm:$0xff] }
 0x102   : > { %v2092_v25 = vadd.f32 %v2076_v48, %v2059_v17  ;;  %v1669_v44 = vadd.f32 %v1653_v56, %v1608_v55  ;;  %v1395_v59 = vmul.f32 %v3824_v1, %v8713_v9  ;;  %v5528_v55 = vld [vmem:[%s4105_s10 + $0x64] sm:$0xff] }
 0x103   : > { %v1284_v3 = vadd.f32 %v1268_v41, %v1251_v29  ;;  %v1785_v41 = vmul.f32 %v8763_v36, %v8848_v5  ;;  %8849 = vst [vmem:[#allocation49_spill] sm:$0xff] %v5528_v55  ;;  %v8851_v29 = vld [vmem:[#allocation8_spill] sm:$0xff]  ;;  %v5737_v9 = vld [vmem:[%s4105_s10 + $0xe1] sm:$0xff] }
 0x104   : > { %v2125_v61 = vadd.f32 %v2109_v24, %v2092_v25  ;;  %v1702_v52 = vadd.f32 %v1686_v23, %v1669_v44  ;;  %v1428_v24 = vmul.f32 %v5528_v55, %v8719_v62  ;;  %v5535_v23 = vld [vmem:[%s4105_s10 + $0xcd] sm:$0xff]  ;;  %v5540_v44 = vld [vmem:[%s4105_s10 + $0x7c] sm:$0xff]  ;;  %8904 = vst [vmem:[#allocation120_spill] sm:$0xff] %v5737_v9 }
 0x105   : > { %v1317_v31 = vadd.f32 %v1301_v45, %v1284_v3  ;;  %8850 = vst [vmem:[#allocation57_spill] sm:$0xff] %v5535_v23  ;;  %v1818_v45 = vmul.f32 %v4749_v33, %v8851_v29  ;;  %v1851_v3 = vmul.f32 %v4775_v12, %v5535_v23  ;;  %v8860_v55 = vld [vmem:[#allocation99_spill] sm:$0xff] }
 0x106   : > { %v5523_v56 = vadd.f32 %v8813_v54, %v2125_v61  ;;  %v1735_v48 = vadd.f32 %v1719_v18, %v1702_v52  ;;  %8852 = vst [vmem:[#allocation9_spill] sm:$0xff] %v5540_v44 }
 0x107   : > { %v1350_v17 = vadd.f32 %v1334_v39, %v1317_v31  ;;  %v1461_v39 = vmul.f32 %v5540_v44, %v8723_v2  ;;  %v5547_v31 = vld [vmem:[%s4105_s10 + $0x94] sm:$0xff] }
 0x108   : > { %8847 = vst [vmem:[#allocation93_spill] sm:$0xff] %v5523_v56  ;;  %v2170_v47 = vsel %vm2157_vm0, %v5523_v56, 0.0  ;;  %v1768_v61 = vadd.f32 %v1752_v37, %v1735_v48  ;;  %v1494_v1 = vmul.f32 %v5547_v31, %v8728_v22  ;;  %v8854_v48 = vld [vmem:[#allocation92_spill] sm:$0xff] }
 0x109   : > { %2171 = vadd.xlane.f32.xlu2 %v2170_v47  ;;  %v1411_v25 = vadd.f32 %v1395_v59, %v1350_v17  ;;  %8853 = vst [vmem:[#allocation51_spill] sm:$0xff] %v5547_v31  ;;  %v1912_v5 = vmul.f32 %v4811_v26, %v8854_v48  ;;  %v5554_v17 = vld [vmem:[%s4105_s10 + $0xac] sm:$0xff]  ;;  %v5559_v47 = vld [vmem:[%s4105_s10 + $0xdc] sm:$0xff] }
 0x10a   : > { %v1801_v18 = vadd.f32 %v1785_v41, %v1768_v61  ;;  %8855 = vst [vmem:[#allocation95_spill] sm:$0xff] %v5554_v17  ;;  %v1527_v41 = vmul.f32 %v5554_v17, %v8788_v4  ;;  %v8857_v61 = vld [vmem:[#allocation15_spill] sm:$0xff]  ;;  %v1593_v23 = vmul.f32 %v8740_v32, %v5559_v47  ;;  %v5608_v32 = vld [vmem:[%s4105_s10 + $0x95] sm:$0xff] }
 0x10b   : > { %v1444_v52 = vadd.f32 %v1428_v24, %v1411_v25  ;;  %8856 = vst [vmem:[#allocation81_spill] sm:$0xff] %v5559_v47  ;;  %v1945_v29 = vmul.f32 %v8775_v21, %v8857_v61  ;;  %v8858_v25 = vld [vmem:[#allocation48_spill] sm:$0xff]  ;;  %v8862_v61 = vld [vmem:[#allocation3_spill] sm:$0xff]  ;;  %v8865_v47 = vld [vmem:[#allocation29_spill] sm:$0xff] }
 0x10c   : > { %v1834_v37 = vadd.f32 %v1818_v45, %v1801_v18  ;;  %v1560_v18 = vmul.f32 %v8737_v16, %v8858_v25  ;;  %v5593_v25 = vld [vmem:[%s4105_s10 + $0xdd] sm:$0xff]  ;;  %8871 = vst [vmem:[#allocation100_spill] sm:$0xff] %v5608_v32  ;;  %v8887_v22 = vld [vmem:[#allocation84_spill] sm:$0xff] }
 0x10d   : > { %v1477_v59 = vadd.f32 %v1461_v39, %v1444_v52  ;;  %v8859_v39 = vld [vmem:[#allocation21_spill] sm:$0xff]  ;;  %8867 = vst [vmem:[#allocation103_spill] sm:$0xff] %v5593_v25  ;;  %v1852_v31 = vmul.f32 %v4775_v12, %v5593_v25  ;;  %v5641_v25 = vmul.f32 %v8786_v43, %v8840_v35  ;;  %v8882_v35 = vld [vmem:[#allocation35_spill] sm:$0xff] }
 0x10e   : > { %v1867_v24 = vadd.f32 %v1851_v3, %v1834_v37  ;;  %v1978_v52 = vmul.f32 %v8780_v60, %v8859_v39  ;;  %v2011_v3 = vmul.f32 %v8786_v43, %v8860_v55  ;;  %v5581_v39 = vld [vmem:[%s4105_s10 + $0x68] sm:$0xff] }
 0x10f   : > { %v1510_v45 = vadd.f32 %v1494_v1, %v1477_v59  ;;  %v3829_v1 = vld [vmem:[%s4105_s10 + $0x4d] sm:$0xff]  ;;  %8863 = vst [vmem:[#allocation87_spill] sm:$0xff] %v5581_v39 }
 0x110   : > { %v1928_v48 = vadd.f32 %v1912_v5, %v1867_v24  ;;  %v1654_v59 = vmul.f32 %v3829_v1, %v8804_v14  ;;  %v5574_v5 = vld [vmem:[%s4105_s10 + $0xce] sm:$0xff]  ;;  %v5588_v1 = vld [vmem:[%s4105_s10 + $0x65] sm:$0xff]  ;;  %v8870_v14 = vld [vmem:[#allocation5_spill] sm:$0xff] }
 0x111   : > { %v1543_v56 = vadd.f32 %v1527_v41, %v1510_v45  ;;  %8861 = vst [vmem:[#allocation98_spill] sm:$0xff] %v5574_v5  ;;  %v2044_v41 = vmul.f32 %v8792_v30, %v8801_v40  ;;  %v3830_v24 = vld [vmem:[%s4105_s10 + $0x50] sm:$0xff]  ;;  %v1687_v40 = vmul.f32 %v5588_v1, %v8747_v10  ;;  %v3989_v10 = vmov 32.0  }
 0x112   : > { %v1961_v17 = vadd.f32 %v1945_v29, %v1928_v48  ;;  %v360_v45 = vmul.f32 %v3830_v24, %v8862_v61  ;;  %v8864_v29 = vld [vmem:[#allocation4_spill] sm:$0xff]  ;;  %8866 = vst [vmem:[#allocation90_spill] sm:$0xff] %v5588_v1  ;;  %v5596_v24 = vld [vmem:[%s4105_s10 + $0x7d] sm:$0xff]  ;;  %3738 = vrcp.f32 %v3989_v10  ;;  %v1819_v10 = vmul.f32 %v4749_v33, %v5424_v8 }
 0x113   : > { %v1576_v37 = vadd.f32 %v1560_v18, %v1543_v56  ;;  %v393_v48 = vmul.f32 %v5581_v39, %v8864_v29  ;;  %v2077_v56 = vmul.f32 %v8797_v57, %v8865_v47  ;;  %8868 = vst [vmem:[#allocation105_spill] sm:$0xff] %v5596_v24  ;;  %v1720_v39 = vmul.f32 %v5596_v24, %v8809_v42  ;;  %v8877_v8 = vld [vmem:[#allocation30_spill] sm:$0xff] }
 0x114   : > { %v1994_v55 = vadd.f32 %v1978_v52, %v1961_v17  ;;  %v5601_v52 = vld [vmem:[%s4105_s10 + $0x80] sm:$0xff]  ;;  %v1753_v24 = vmul.f32 %v5608_v32, %v8816_v11  ;;  %v3838_v32 = vld [vmem:[%s4105_s10 + $0x4e] sm:$0xff] }
 0x115   : > { %v1609_v18 = vadd.f32 %v1593_v23, %v1576_v37  ;;  %v409_v17 = vadd.f32 %v393_v48, %v360_v45  ;;  %8869 = vst [vmem:[#allocation25_spill] sm:$0xff] %v5601_v52  ;;  %v426_v23 = vmul.f32 %v5601_v52, %v8870_v14  ;;  %v2110_v37 = vmul.f32 %v8802_v46, %v5574_v5  ;;  %v5613_v45 = vld [vmem:[%s4105_s10 + $0xad] sm:$0xff]  ;;  %v8883_v33 = vld [vmem:[#allocation14_spill] sm:$0xff] }
 0x116   : > { %v2027_v47 = vadd.f32 %v2011_v3, %v1994_v55  ;;  %8872 = vst [vmem:[#allocation108_spill] sm:$0xff] %v5613_v45  ;;  %v1786_v48 = vmul.f32 %v5613_v45, %v8763_v36  ;;  %v5618_v3 = vld [vmem:[%s4105_s10 + $0x98] sm:$0xff]  ;;  %v8874_v55 = vld [vmem:[#allocation6_spill] sm:$0xff]  ;;  %v1913_v11 = vmul.f32 %v3838_v32, %v4811_v26  ;;  %v5631_v45 = vld [vmem:[%s4105_s10 + $0xb0] sm:$0xff] }
 0x117   : > { %v1670_v1 = vadd.f32 %v1654_v59, %v1609_v18  ;;  %v442_v42 = vadd.f32 %v426_v23, %v409_v17  ;;  %8873 = vst [vmem:[#allocation104_spill] sm:$0xff] %v5618_v3  ;;  %v459_v5 = vmul.f32 %v5618_v3, %v8874_v55  ;;  %v1946_v17 = vmul.f32 %v8775_v21, %v8833_v19  ;;  %v8876_v36 = vld [vmem:[#allocation10_spill] sm:$0xff]  ;;  %v8878_v26 = vld [vmem:[#allocation12_spill] sm:$0xff] }
 0x118   : > { %v2060_v59 = vadd.f32 %v2044_v41, %v2027_v47  ;;  %8875 = vst [vmem:[#allocation109_spill] sm:$0xff] %v5631_v45  ;;  %v492_v41 = vmul.f32 %v5631_v45, %v8876_v36  ;;  %v5637_v47 = vmul.f32 %v8780_v60, %v8836_v50  ;;  %v525_v19 = vmul.f32 %v8878_v26, %v8877_v8  ;;  %v8880_v21 = vld [vmem:[#allocation114_spill] sm:$0xff] }
 0x119   : > { %v1703_v18 = vadd.f32 %v1687_v40, %v1670_v1  ;;  %v475_v23 = vadd.f32 %v459_v5, %v442_v42  ;;  %v8879_v42 = vld [vmem:[#allocation47_spill] sm:$0xff]  ;;  %v396_v12 = vmul.f32 %v8880_v21, %v8864_v29 }
 0x11a   : > { %v2093_v1 = vadd.f32 %v2077_v56, %v2060_v59  ;;  %v363_v5 = vmul.f32 %v8879_v42, %v8862_v61  ;;  %v5649_v56 = vpop.eup %3738  ;;  %v5652_v59 = vld [vmem:[%s4105_s10 + $0xe0] sm:$0xff] }
 0x11b   : > { %v1736_v40 = vadd.f32 %v1720_v39, %v1703_v18  ;;  %v508_v32 = vadd.f32 %v492_v41, %v475_v23  ;;  %8881 = vst [vmem:[#allocation38_spill] sm:$0xff] %v5652_v59  ;;  %v361_v18 = vmul.f32 %v8882_v35, %v8862_v61  ;;  %v394_v23 = vmul.f32 %v8879_v42, %v8864_v29 }
 0x11c   : > { %v2126_v39 = vadd.f32 %v2110_v37, %v2093_v1  ;;  %v5660_v41 = vmul.f32 %v8792_v30, %v8842_v38  ;;  %v2207_v43 = vmul.f32 32.0, %v5649_v56  ;;  %v558_v16 = vmul.f32 %v8883_v33, %v5652_v59  ;;  %v3840_v38 = vld [vmem:[%s4105_s10 + $0x51] sm:$0xff] }
 0x11d   : > { %v1769_v50 = vadd.f32 %v1753_v24, %v1736_v40  ;;  %v541_v60 = vadd.f32 %v525_v19, %v508_v32  ;;  %v412_v1 = vadd.f32 %v396_v12, %v363_v5  ;;  %v8885_v40 = vld [vmem:[#allocation36_spill] sm:$0xff]  ;;  %v462_v32 = vmul.f32 %v8874_v55, %v8887_v22 }
 0x11e   : > { %v5666_v24 = vadd.f32 %v8813_v54, %v2126_v39  ;;  %v429_v35 = vmul.f32 %v8885_v40, %v8870_v14  ;;  %v2208_v42 = vsub.f32 1.0, %v2207_v43  ;;  %v8886_v30 = vld [vmem:[#allocation16_spill] sm:$0xff]  ;;  %v2078_v12 = vmul.f32 %v8797_v57, %v5487_v53  ;;  %v8900_v57 = vld [vmem:[#allocation41_spill] sm:$0xff] }
 0x11f   : > { %v1802_v37 = vadd.f32 %v1786_v48, %v1769_v50  ;;  %v574_v44 = vadd.f32 %v558_v16, %v541_v60  ;;  %v619_v4 = vmul.f32 %v3840_v38, %v8886_v30  ;;  %v410_v48 = vadd.f32 %v394_v23, %v361_v18  ;;  %v5679_v16 = vld [vmem:[%s4105_s10 + $0x69] sm:$0xff]  ;;  %v8889_v60 = vld [vmem:[#allocation17_spill] sm:$0xff] }
 0x120   : > { %8884 = vst [vmem:[#allocation110_spill] sm:$0xff] %v5666_v24  ;;  %v2173_v19 = vsel %vm2157_vm0, %v5666_v24, 0.0  ;;  %v445_v2 = vadd.f32 %v429_v35, %v412_v1  ;;  %v652_v5 = vmul.f32 %v5679_v16, %v8889_v60  ;;  %v8890_v50 = vld [vmem:[#allocation56_spill] sm:$0xff]  ;;  %v427_v18 = vmul.f32 %v8880_v21, %v8870_v14  ;;  %v8893_v1 = vld [vmem:[#allocation18_spill] sm:$0xff] }
 0x121   : > { %v1835_v39 = vadd.f32 %v1819_v10, %v1802_v37  ;;  %2174 = vadd.xlane.f32.xlu2 %v2173_v19  ;;  %v635_v43 = vadd.f32 %v619_v4, %v574_v44  ;;  %8888 = vst [vmem:[#allocation11_spill] sm:$0xff] %v5679_v16  ;;  %v495_v38 = vmul.f32 %v8876_v36, %v8890_v50  ;;  %v5686_v24 = vld [vmem:[%s4105_s10 + $0xf0] sm:$0xff]  ;;  %v5694_v37 = vld [vmem:[%s4105_s10 + $0x81] sm:$0xff]  ;;  %vm2211_vm1 = vweird.f32 %v5649_v56 }
 0x122   : > { %8891 = vst [vmem:[#allocation111_spill] sm:$0xff] %v5686_v24  ;;  %v478_v10 = vadd.f32 %v462_v32, %v445_v2  ;;  %v460_v23 = vmul.f32 %v8885_v40, %v8874_v55  ;;  %v2209_v4 = vmul.f32 %v5649_v56, %v2208_v42  ;;  %v685_v35 = vmul.f32 %v5694_v37, %v8893_v1  ;;  %v5701_v2 = vld [vmem:[%s4105_s10 + $0x108] sm:$0xff] }
 0x123   : > { %v1868_v13 = vadd.f32 %v1852_v31, %v1835_v39  ;;  %v668_v44 = vadd.f32 %v652_v5, %v635_v43  ;;  %8892 = vst [vmem:[#allocation112_spill] sm:$0xff] %v5694_v37  ;;  %v528_v31 = vmul.f32 %v8878_v26, %v5686_v24  ;;  %v443_v32 = vadd.f32 %v427_v18, %v410_v48  ;;  %v5707_v39 = vld [vmem:[%s4105_s10 + $0x99] sm:$0xff]  ;;  %v8896_v43 = vld [vmem:[#allocation19_spill] sm:$0xff]  ;;  %v5720_v18 = vld [vmem:[%s4105_s10 + $0xb1] sm:$0xff] }
 0x124   : > { %8894 = vst [vmem:[#allocation116_spill] sm:$0xff] %v5701_v2  ;;  %v511_v21 = vadd.f32 %v495_v38, %v478_v10  ;;  %v493_v40 = vmul.f32 %v8876_v36, %v8887_v22  ;;  %v718_v5 = vmul.f32 %v5707_v39, %v8896_v43  ;;  %v561_v16 = vmul.f32 %v8883_v33, %v5701_v2 }
 0x125   : > { %v1929_v19 = vadd.f32 %v1913_v11, %v1868_v13  ;;  %v701_v42 = vadd.f32 %v685_v35, %v668_v44  ;;  %8895 = vst [vmem:[#allocation118_spill] sm:$0xff] %v5707_v39  ;;  %v5714_v11 = vld [vmem:[%s4105_s10 + $0xde] sm:$0xff]  ;;  %v476_v38 = vadd.f32 %v460_v23, %v443_v32  ;;  %v526_v22 = vmul.f32 %v8878_v26, %v8890_v50  ;;  %v8899_v44 = vld [vmem:[#allocation20_spill] sm:$0xff] }
 0x126   : > { %8897 = vst [vmem:[#allocation115_spill] sm:$0xff] %v5714_v11  ;;  %v544_v53 = vadd.f32 %v528_v31, %v511_v21  ;;  %v2210_v48 = vadd.f32 %v5649_v56, %v2209_v4  ;;  %v751_v35 = vmul.f32 %v5720_v18, %v8899_v44  ;;  %v622_v2 = vmul.f32 %v8900_v57, %v8886_v30  ;;  %v8902_v21 = vld [vmem:[#allocation23_spill] sm:$0xff] }
 0x127   : > { %v1962_v13 = vadd.f32 %v1946_v17, %v1929_v19  ;;  %v734_v10 = vadd.f32 %v718_v5, %v701_v42  ;;  %8898 = vst [vmem:[#allocation76_spill] sm:$0xff] %v5720_v18  ;;  %v509_v31 = vadd.f32 %v493_v40, %v476_v38  ;;  %v559_v23 = vmul.f32 %v8883_v33, %v5686_v24  ;;  %v8901_v19 = vld [vmem:[#allocation45_spill] sm:$0xff]  ;;  %v8903_v42 = vld [vmem:[#allocation64_spill] sm:$0xff] }
 0x128   : > { %v577_v17 = vadd.f32 %v561_v16, %v544_v53  ;;  %v2111_v50 = vmul.f32 %v8802_v46, %v5714_v11  ;;  %v784_v32 = vmul.f32 %v8902_v21, %v8901_v19  ;;  %v655_v5 = vmul.f32 %v8903_v42, %v8889_v60  ;;  %v8905_v16 = vld [vmem:[#allocation39_spill] sm:$0xff] }
 0x129   : > { %v1995_v62 = vadd.f32 %v5637_v47, %v1962_v13  ;;  %v767_v4 = vadd.f32 %v751_v35, %v734_v10  ;;  %v542_v47 = vadd.f32 %v526_v22, %v509_v31  ;;  %v620_v40 = vmul.f32 %v8905_v16, %v8886_v30  ;;  %v8907_v35 = vld [vmem:[#allocation66_spill] sm:$0xff]  ;;  %v3845_v31 = vld [vmem:[%s4105_s10 + $0x52] sm:$0xff] }
 0x12a   : > { %v638_v53 = vadd.f32 %v622_v2, %v577_v17  ;;  %v5744_v13 = vsel %vm2211_vm1, %v5649_v56, %v2210_v48  ;;  %v817_v10 = vmul.f32 %v8647_v15, %v5737_v9  ;;  %v688_v24 = vmul.f32 %v8907_v35, %v8893_v1  ;;  %v8908_v48 = vld [vmem:[#allocation22_spill] sm:$0xff] }
 0x12b   : > { %v2028_v6 = vadd.f32 %v5641_v25, %v1995_v62  ;;  %8906 = vst [vmem:[#allocation119_spill] sm:$0xff] %v5744_v13  ;;  %v800_v38 = vadd.f32 %v784_v32, %v767_v4  ;;  %v575_v2 = vadd.f32 %v559_v23, %v542_v47  ;;  %v653_v22 = vmul.f32 %v8900_v57, %v8889_v60  ;;  %v8910_v47 = vld [vmem:[#allocation52_spill] sm:$0xff] }
 0x12c   : > { %v671_v25 = vadd.f32 %v655_v5, %v638_v53  ;;  %v878_v56 = vmul.f32 %v3845_v31, %v8648_v28  ;;  %v721_v4 = vmul.f32 %v8896_v43, %v8908_v48  ;;  %v686_v32 = vmul.f32 %v8903_v42, %v8893_v1  ;;  %v5762_v5 = vld [vmem:[%s4105_s10 + $0x6a] sm:$0xff]  ;;  %v5770_v42 = vpop.xlane.xlu1 %2165 }
 0x12d   : > { %v2061_v62 = vadd.f32 %v5660_v41, %v2028_v6  ;;  %v833_v17 = vadd.f32 %v817_v10, %v800_v38  ;;  %v636_v6 = vadd.f32 %v620_v40, %v575_v2  ;;  %v719_v41 = vmul.f32 %v8907_v35, %v8896_v43  ;;  %8909 = vst [vmem:[#allocation122_spill] sm:$0xff] %v5762_v5  ;;  %v5774_v10 = vld [vmem:[%s4105_s10 + $0xf1] sm:$0xff]  ;;  %v5777_v2 = vld [vmem:[%s4105_s10 + $0x82] sm:$0xff] }
 0x12e   : > { %v704_v11 = vadd.f32 %v688_v24, %v671_v25  ;;  %v911_v53 = vmul.f32 %v5762_v5, %v8715_v20  ;;  %v754_v38 = vmul.f32 %v8899_v44, %v8910_v47  ;;  %8911 = vst [vmem:[#allocation83_spill] sm:$0xff] %v5774_v10 }
 0x12f   : > { %v2094_v16 = vadd.f32 %v2078_v12, %v2061_v62  ;;  %v894_v57 = vadd.f32 %v878_v56, %v833_v17  ;;  %v364_v12 = vmul.f32 %v5601_v52, %v8862_v61  ;;  %v669_v62 = vadd.f32 %v653_v22, %v636_v6  ;;  %8912 = vst [vmem:[#allocation61_spill] sm:$0xff] %v5777_v2  ;;  %v8913_v17 = vld [vmem:[#allocation31_spill] sm:$0xff] }
 0x130   : > { %v2160_v23 = vpop.xlane.xlu0 %2159  ;;  %v737_v35 = vadd.f32 %v721_v4, %v704_v11  ;;  %v944_v31 = vmul.f32 %v5777_v2, %v8913_v17  ;;  %v787_v56 = vmul.f32 %v8902_v21, %v5774_v10  ;;  %v5792_v11 = vld [vmem:[%s4105_s10 + $0x109] sm:$0xff] }
 0x131   : > { %v2127_v24 = vadd.f32 %v2111_v50, %v2094_v16  ;;  %v2213_v40 = vmul.f32 %v5744_v13, %v2160_v23  ;;  %v927_v25 = vadd.f32 %v911_v53, %v894_v57  ;;  %v752_v50 = vmul.f32 %v8899_v44, %v8908_v48  ;;  %v8915_v23 = vld [vmem:[#allocation26_spill] sm:$0xff]  ;;  %8917 = vst [vmem:[#allocation123_spill] sm:$0xff] %v5792_v11 }
 0x132   : > { %v770_v22 = vadd.f32 %v754_v38, %v737_v35  ;;  %v702_v4 = vadd.f32 %v686_v32, %v669_v62  ;;  %v5795_v57 = vld [vmem:[%s4105_s10 + $0x9a] sm:$0xff]  ;;  %v820_v48 = vmul.f32 %v8647_v15, %v5792_v11  ;;  %v5808_v62 = vld [vmem:[%s4105_s10 + $0xb2] sm:$0xff] }
 0x133   : > { %v5786_v16 = vadd.f32 %v8813_v54, %v2127_v24  ;;  %v5789_v5 = vsub.f32 %v8915_v23, %v2213_v40  ;;  %v960_v6 = vadd.f32 %v944_v31, %v927_v25  ;;  %8918 = vst [vmem:[#allocation127_spill] sm:$0xff] %v5795_v57  ;;  %v977_v53 = vmul.f32 %v5795_v57, %v8663_v34  ;;  %v8920_v25 = vld [vmem:[#allocation34_spill] sm:$0xff]  ;;  %v8921_v23 = vld [vmem:[#allocation97_spill] sm:$0xff] }
 0x134   : > { %v785_v54 = vmul.f32 %v8902_v21, %v8910_v47  ;;  %v803_v38 = vadd.f32 %v787_v56, %v770_v22  ;;  %v735_v32 = vadd.f32 %v719_v41, %v702_v4  ;;  %8919 = vst [vmem:[#allocation130_spill] sm:$0xff] %v5808_v62  ;;  %v1010_v31 = vmul.f32 %v5808_v62, %v8920_v25  ;;  %v8922_v22 = vld [vmem:[#allocation59_spill] sm:$0xff] }
 0x135   : > { %8914 = vst [vmem:[#allocation91_spill] sm:$0xff] %v5786_v16  ;;  %v2176_v24 = vsel %vm2157_vm0, %v5786_v16, 0.0  ;;  %v2245_v40 = vmul.f32 %v5789_v5, %v5789_v5  ;;  %v993_v35 = vadd.f32 %v977_v53, %v960_v6  ;;  %v881_v11 = vmul.f32 %v8921_v23, %v8648_v28  ;;  %v8923_v6 = vld [vmem:[#allocation74_spill] sm:$0xff] }
 0x136   : > { %8916 = vst [vmem:[#allocation126_spill] sm:$0xff] %v5789_v5  ;;  %2177 = vadd.xlane.f32.xlu2 %v2176_v24  ;;  %v818_v47 = vmul.f32 %v8647_v15, %v5774_v10  ;;  %v836_v52 = vadd.f32 %v820_v48, %v803_v38  ;;  %v768_v5 = vadd.f32 %v752_v50, %v735_v32  ;;  %v8924_v24 = vld [vmem:[#allocation69_spill] sm:$0xff]  ;;  %v5826_v10 = vld [vmem:[%s4105_s10 + $0xe2] sm:$0xff] }
 0x137   : > { %v2261_v16 = vsel %vm2157_vm0, %v2245_v40, 0.0  ;;  %v397_v41 = vmul.f32 %v5618_v3, %v8864_v29  ;;  %v1026_v56 = vadd.f32 %v1010_v31, %v993_v35  ;;  %v1043_v4 = vmul.f32 %v8672_v0, %v8922_v22  ;;  %8925 = vst [vmem:[#allocation125_spill] sm:$0xff] %v5826_v10  ;;  %v8926_v35 = vld [vmem:[#allocation63_spill] sm:$0xff] }
 0x138   : > { %2262 = vadd.xlane.f32.xlu0 %v2261_v16  ;;  %v914_v53 = vmul.f32 %v8923_v6, %v8715_v20  ;;  %v879_v61 = vmul.f32 %v8924_v24, %v8648_v28  ;;  %v897_v40 = vadd.f32 %v881_v11, %v836_v52  ;;  %v801_v48 = vadd.f32 %v785_v54, %v768_v5  ;;  %v3850_v11 = vld [vmem:[%s4105_s10 + $0x53] sm:$0xff]  ;;  %v8927_v54 = vld [vmem:[#allocation46_spill] sm:$0xff] }
 0x139   : > { %v413_v50 = vadd.f32 %v397_v41, %v364_v12  ;;  %v430_v38 = vmul.f32 %v5631_v45, %v8870_v14  ;;  %v1059_v16 = vadd.f32 %v1043_v4, %v1026_v56  ;;  %v1076_v32 = vmul.f32 %v8674_v51, %v5826_v10  ;;  %v2169_v24 = vpop.xlane.xlu1 %2168  ;;  %v8928_v56 = vld [vmem:[#allocation40_spill] sm:$0xff] }
 0x13a   : > { %v947_v31 = vmul.f32 %v8926_v35, %v8913_v17  ;;  %v912_v3 = vmul.f32 %v8921_v23, %v8715_v20  ;;  %v930_v29 = vadd.f32 %v914_v53, %v897_v40  ;;  %v834_v46 = vadd.f32 %v818_v47, %v801_v48 }
 0x13b   : > { %v446_v52 = vadd.f32 %v430_v38, %v413_v50  ;;  %v463_v5 = vmul.f32 %v8874_v55, %v8877_v8  ;;  %v1092_v12 = vadd.f32 %v1076_v32, %v1059_v16  ;;  %v1137_v41 = vmul.f32 %v3850_v11, %v8927_v54  ;;  %v5848_v8 = vld [vmem:[%s4105_s10 + $0x6b] sm:$0xff]  ;;  %v8930_v50 = vld [vmem:[#allocation50_spill] sm:$0xff]  ;;  %v5855_v32 = vld [vmem:[%s4105_s10 + $0xf8] sm:$0xff] }
 0x13c   : > { %v980_v4 = vmul.f32 %v8663_v34, %v8928_v56  ;;  %v963_v45 = vadd.f32 %v947_v31, %v930_v29  ;;  %v895_v23 = vadd.f32 %v879_v61, %v834_v46  ;;  %v945_v53 = vmul.f32 %v8923_v6, %v8913_v17  ;;  %8929 = vst [vmem:[#allocation128_spill] sm:$0xff] %v5848_v8  ;;  %v8931_v16 = vld [vmem:[#allocation79_spill] sm:$0xff]  ;;  %v5858_v46 = vld [vmem:[%s4105_s10 + $0xf2] sm:$0xff] }
 0x13d   : > { %v479_v47 = vadd.f32 %v463_v5, %v446_v52  ;;  %v5845_v40 = vmul.f32 %v5744_v13, %v2169_v24  ;;  %v1153_v48 = vadd.f32 %v1137_v41, %v1092_v12  ;;  %v1170_v38 = vmul.f32 %v5848_v8, %v8930_v50  ;;  %8932 = vst [vmem:[#allocation7_spill] sm:$0xff] %v5855_v32  ;;  %v5865_v5 = vld [vmem:[%s4105_s10 + $0x83] sm:$0xff] }
 0x13e   : > { %v1013_v29 = vmul.f32 %v8920_v25, %v8931_v16  ;;  %8933 = vst [vmem:[#allocation8_spill] sm:$0xff] %v5858_v46  ;;  %v996_v61 = vadd.f32 %v980_v4, %v963_v45  ;;  %v928_v6 = vadd.f32 %v912_v3, %v895_v23  ;;  %v978_v31 = vmul.f32 %v8926_v35, %v8663_v34  ;;  %v8935_v12 = vld [vmem:[#allocation54_spill] sm:$0xff]  ;;  %v5874_v4 = vld [vmem:[%s4105_s10 + $0x110] sm:$0xff] }
 0x13f   : > { %v496_v24 = vmul.f32 %v8876_v36, %v5652_v59  ;;  %v1186_v52 = vadd.f32 %v1170_v38, %v1153_v48  ;;  %8934 = vst [vmem:[#allocation92_spill] sm:$0xff] %v5865_v5  ;;  %v1203_v11 = vmul.f32 %v5865_v5, %v8935_v12  ;;  %v1046_v41 = vmul.f32 %v8672_v0, %v5858_v46  ;;  %v5877_v3 = vld [vmem:[%s4105_s10 + $0x10a] sm:$0xff]  ;;  %v5882_v59 = vld [vmem:[%s4105_s10 + $0x9b] sm:$0xff] }
 0x140   : > { %v1011_v45 = vmul.f32 %v8920_v25, %v8928_v56  ;;  %8936 = vst [vmem:[#allocation15_spill] sm:$0xff] %v5874_v4  ;;  %v1029_v35 = vadd.f32 %v1013_v29, %v996_v61  ;;  %v961_v23 = vadd.f32 %v945_v53, %v928_v6  ;;  %v529_v48 = vmul.f32 %v8878_v26, %v5855_v32  ;;  %v5893_v61 = vld [vmem:[%s4105_s10 + $0xb3] sm:$0xff] }
 0x141   : > { %8937 = vst [vmem:[#allocation21_spill] sm:$0xff] %v5877_v3  ;;  %v512_v8 = vadd.f32 %v496_v24, %v479_v47  ;;  %v1219_v38 = vadd.f32 %v1203_v11, %v1186_v52  ;;  %v1236_v36 = vmul.f32 %v5882_v59, %v8692_v58  ;;  %v1079_v56 = vmul.f32 %v8674_v51, %v5877_v3  ;;  %v8940_v24 = vld [vmem:[#allocation42_spill] sm:$0xff]  ;;  %v6091_v32 = vld [vmem:[%s4105_s10 + $0x112] sm:$0xff] }
 0x142   : > { %8938 = vst [vmem:[#allocation99_spill] sm:$0xff] %v5882_v59  ;;  %v1044_v55 = vmul.f32 %v8672_v0, %v8931_v16  ;;  %v1062_v14 = vadd.f32 %v1046_v41, %v1029_v35  ;;  %v994_v5 = vadd.f32 %v978_v31, %v961_v23  ;;  %v562_v47 = vmul.f32 %v8883_v33, %v5874_v4  ;;  %v8941_v23 = vld [vmem:[#allocation72_spill] sm:$0xff]  ;;  %v5910_v4 = vld [vmem:[%s4105_s10 + $0xe3] sm:$0xff] }
 0x143   : > { %v545_v53 = vadd.f32 %v529_v48, %v512_v8  ;;  %v1252_v29 = vadd.f32 %v1236_v36, %v1219_v38  ;;  %8939 = vst [vmem:[#allocation29_spill] sm:$0xff] %v5893_v61  ;;  %v1269_v6 = vmul.f32 %v5893_v61, %v8811_v27  ;;  %v1140_v52 = vmul.f32 %v8940_v24, %v8927_v54  ;;  %v8942_v38 = vld [vmem:[#allocation67_spill] sm:$0xff]  ;;  %v3865_v33 = vld [vmem:[%s4105_s10 + $0x56] sm:$0xff] }
 0x144   : > { %v1077_v11 = vmul.f32 %v8674_v51, %v5858_v46  ;;  %v1095_v16 = vadd.f32 %v1079_v56, %v1062_v14  ;;  %v1027_v41 = vadd.f32 %v1011_v45, %v994_v5  ;;  %v623_v8 = vmul.f32 %v5694_v37, %v8886_v30  ;;  %8990 = vst [vmem:[#allocation74_spill] sm:$0xff] %v6091_v32 }
 0x145   : > { %v578_v31 = vadd.f32 %v562_v47, %v545_v53  ;;  %v1285_v35 = vadd.f32 %v1269_v6, %v1252_v29  ;;  %v1302_v36 = vmul.f32 %v8704_v7, %v8941_v23  ;;  %v1173_v48 = vmul.f32 %v5492_v49, %v8930_v50  ;;  %v8943_v47 = vld [vmem:[#allocation117_spill] sm:$0xff] }
 0x146   : > { %v1138_v3 = vmul.f32 %v8942_v38, %v8927_v54  ;;  %v1156_v46 = vadd.f32 %v1140_v52, %v1095_v16  ;;  %v1060_v14 = vadd.f32 %v1044_v55, %v1027_v41  ;;  %v656_v45 = vmul.f32 %v5707_v39, %v8889_v60  ;;  %v3855_v16 = vld [vmem:[%s4105_s10 + $0x54] sm:$0xff]  ;;  %v8944_v41 = vld [vmem:[#allocation2_spill] sm:$0xff] }
 0x147   : > { %v639_v5 = vadd.f32 %v623_v8, %v578_v31  ;;  %v1318_v56 = vadd.f32 %v1302_v36, %v1285_v35  ;;  %v1335_v53 = vmul.f32 %v8708_v63, %v5910_v4  ;;  %v1206_v29 = vmul.f32 %v8943_v47, %v8935_v12  ;;  %v8945_v8 = vld [vmem:[#allocation53_spill] sm:$0xff] }
 0x148   : > { %v1171_v6 = vmul.f32 %v8940_v24, %v8930_v50  ;;  %v1189_v38 = vadd.f32 %v1173_v48, %v1156_v46  ;;  %v1093_v37 = vadd.f32 %v1077_v11, %v1060_v14  ;;  %v689_v55 = vmul.f32 %v5720_v18, %v8893_v1  ;;  %v5931_v14 = vld [vmem:[%s4105_s10 + $0x6c] sm:$0xff] }
 0x149   : > { %v672_v30 = vadd.f32 %v656_v45, %v639_v5  ;;  %v1351_v52 = vadd.f32 %v1335_v53, %v1318_v56  ;;  %v1396_v31 = vmul.f32 %v3855_v16, %v8944_v41  ;;  %v1239_v35 = vmul.f32 %v8692_v58, %v8945_v8  ;;  %8946 = vst [vmem:[#allocation30_spill] sm:$0xff] %v5931_v14  ;;  %v8947_v5 = vld [vmem:[#allocation71_spill] sm:$0xff]  ;;  %v8951_v16 = vld [vmem:[#allocation73_spill] sm:$0xff] }
 0x14a   : > { %v1204_v36 = vmul.f32 %v5492_v49, %v8935_v12  ;;  %v1222_v39 = vadd.f32 %v1206_v29, %v1189_v38  ;;  %v1154_v46 = vadd.f32 %v1138_v3, %v1093_v37  ;;  %v722_v11 = vmul.f32 %v8896_v43, %v8901_v19  ;;  %v8948_v56 = vld [vmem:[#allocation43_spill] sm:$0xff]  ;;  %v5940_v29 = vld [vmem:[%s4105_s10 + $0xf9] sm:$0xff]  ;;  %v5957_v18 = vld [vmem:[%s4105_s10 + $0x111] sm:$0xff] }
 0x14b   : > { %v705_v24 = vadd.f32 %v689_v55, %v672_v30  ;;  %v1412_v48 = vadd.f32 %v1396_v31, %v1351_v52  ;;  %v1429_v45 = vmul.f32 %v5931_v14, %v8947_v5  ;;  %v1272_v53 = vmul.f32 %v8811_v27, %v8948_v56  ;;  %8949 = vst [vmem:[#allocation47_spill] sm:$0xff] %v5940_v29  ;;  %v5943_v30 = vld [vmem:[%s4105_s10 + $0xf3] sm:$0xff]  ;;  %v5948_v52 = vld [vmem:[%s4105_s10 + $0x84] sm:$0xff] }
 0x14c   : > { %v1237_v49 = vmul.f32 %v8943_v47, %v8692_v58  ;;  %8950 = vst [vmem:[#allocation114_spill] sm:$0xff] %v5943_v30  ;;  %v1255_v37 = vadd.f32 %v1239_v35, %v1222_v39  ;;  %v1187_v19 = vadd.f32 %v1171_v6, %v1154_v46  ;;  %v755_v38 = vmul.f32 %v8899_v44, %v5737_v9  ;;  %v5960_v39 = vld [vmem:[%s4105_s10 + $0x10b] sm:$0xff] }
 0x14d   : > { %v738_v3 = vadd.f32 %v722_v11, %v705_v24  ;;  %v1445_v55 = vadd.f32 %v1429_v45, %v1412_v48  ;;  %v1462_v31 = vmul.f32 %v5948_v52, %v8951_v16  ;;  %v1305_v47 = vmul.f32 %v8704_v7, %v5943_v30  ;;  %8952 = vst [vmem:[#allocation35_spill] sm:$0xff] %v5957_v18  ;;  %v5965_v48 = vld [vmem:[%s4105_s10 + $0x9c] sm:$0xff] }
 0x14e   : > { %v1270_v14 = vmul.f32 %v8811_v27, %v8945_v8  ;;  %8953 = vst [vmem:[#allocation36_spill] sm:$0xff] %v5960_v39  ;;  %v1288_v6 = vadd.f32 %v1272_v53, %v1255_v37  ;;  %v1220_v35 = vadd.f32 %v1204_v36, %v1187_v19  ;;  %v788_v24 = vmul.f32 %v8902_v21, %v5940_v29  ;;  %v8954_v45 = vld [vmem:[#allocation77_spill] sm:$0xff]  ;;  %v5993_v21 = vld [vmem:[%s4105_s10 + $0xe4] sm:$0xff] }
 0x14f   : > { %v771_v46 = vadd.f32 %v755_v38, %v738_v3  ;;  %v1478_v11 = vadd.f32 %v1462_v31, %v1445_v55  ;;  %v1495_v9 = vmul.f32 %v5965_v48, %v8954_v45  ;;  %v1338_v8 = vmul.f32 %v8708_v63, %v5960_v39  ;;  %v5976_v19 = vld [vmem:[%s4105_s10 + $0xb4] sm:$0xff]  ;;  %8962 = vst [vmem:[#allocation56_spill] sm:$0xff] %v5993_v21 }
 0x150   : > { %v1303_v44 = vmul.f32 %v8704_v7, %v8948_v56  ;;  %v1321_v43 = vadd.f32 %v1305_v47, %v1288_v6  ;;  %v1253_v1 = vadd.f32 %v1237_v49, %v1220_v35  ;;  %v821_v53 = vmul.f32 %v8647_v15, %v5957_v18  ;;  %8955 = vst [vmem:[#allocation84_spill] sm:$0xff] %v5976_v19  ;;  %v8956_v3 = vld [vmem:[#allocation80_spill] sm:$0xff]  ;;  %v8957_v55 = vld [vmem:[#allocation9_spill] sm:$0xff] }
 0x151   : > { %v804_v36 = vadd.f32 %v788_v24, %v771_v46  ;;  %v1511_v37 = vadd.f32 %v1495_v9, %v1478_v11  ;;  %v1528_v38 = vmul.f32 %v5976_v19, %v8956_v3  ;;  %v1399_v31 = vmul.f32 %v8957_v55, %v8944_v41  ;;  %v8958_v46 = vld [vmem:[#allocation113_spill] sm:$0xff]  ;;  %v8960_v11 = vld [vmem:[#allocation51_spill] sm:$0xff] }
 0x152   : > { %v1336_v39 = vmul.f32 %v8708_v63, %v5943_v30  ;;  %v1354_v56 = vadd.f32 %v1338_v8, %v1321_v43  ;;  %v1286_v47 = vadd.f32 %v1270_v14, %v1253_v1  ;;  %v882_v6 = vmul.f32 %v5777_v2, %v8648_v28  ;;  %v8959_v9 = vld [vmem:[#allocation85_spill] sm:$0xff] }
 0x153   : > { %v837_v49 = vadd.f32 %v821_v53, %v804_v36  ;;  %v1544_v35 = vadd.f32 %v1528_v38, %v1511_v37  ;;  %v1561_v24 = vmul.f32 %v8959_v9, %v8958_v46  ;;  %v1432_v18 = vmul.f32 %v8960_v11, %v8947_v5  ;;  %v8961_v15 = vld [vmem:[#allocation49_spill] sm:$0xff]  ;;  %v8964_v37 = vld [vmem:[#allocation95_spill] sm:$0xff] }
 0x154   : > { %v1397_v29 = vmul.f32 %v8961_v15, %v8944_v41  ;;  %v1415_v30 = vadd.f32 %v1399_v31, %v1354_v56  ;;  %v1319_v43 = vadd.f32 %v1303_v44, %v1286_v47  ;;  %v915_v14 = vmul.f32 %v5795_v57, %v8715_v20  ;;  %v8963_v36 = vld [vmem:[#allocation89_spill] sm:$0xff] }
 0x155   : > { %v898_v1 = vadd.f32 %v882_v6, %v837_v49  ;;  %v1577_v8 = vadd.f32 %v1561_v24, %v1544_v35  ;;  %v1594_v53 = vmul.f32 %v8963_v36, %v5993_v21  ;;  %v1465_v38 = vmul.f32 %v8964_v37, %v8951_v16  ;;  %v3860_v47 = vld [vmem:[%s4105_s10 + $0x55] sm:$0xff]  ;;  %v8965_v49 = vld [vmem:[#allocation94_spill] sm:$0xff] }
 0x156   : > { %v1430_v46 = vmul.f32 %v8957_v55, %v8947_v5  ;;  %v1448_v15 = vadd.f32 %v1432_v18, %v1415_v30  ;;  %v1352_v2 = vadd.f32 %v1336_v39, %v1319_v43  ;;  %v948_v44 = vmul.f32 %v5808_v62, %v8913_v17  ;;  %v8966_v35 = vld [vmem:[#allocation48_spill] sm:$0xff] }
 0x157   : > { %v931_v31 = vadd.f32 %v915_v14, %v898_v1  ;;  %v1610_v56 = vadd.f32 %v1594_v53, %v1577_v8  ;;  %v1655_v6 = vmul.f32 %v3860_v47, %v8965_v49  ;;  %v1498_v24 = vmul.f32 %v8954_v45, %v8966_v35  ;;  %v6012_v39 = vld [vmem:[%s4105_s10 + $0x6d] sm:$0xff]  ;;  %v8969_v1 = vld [vmem:[#allocation81_spill] sm:$0xff] }
 0x158   : > { %v1481_v57 = vadd.f32 %v1465_v38, %v1448_v15  ;;  %v1413_v20 = vadd.f32 %v1397_v29, %v1352_v2  ;;  %v981_v18 = vmul.f32 %v8663_v34, %v8922_v22  ;;  %8967 = vst [vmem:[#allocation41_spill] sm:$0xff] %v6012_v39  ;;  %v8968_v55 = vld [vmem:[#allocation96_spill] sm:$0xff]  ;;  %v1531_v14 = vmul.f32 %v8956_v3, %v8969_v1  ;;  %v8970_v8 = vld [vmem:[#allocation33_spill] sm:$0xff] }
 0x159   : > { %v964_v28 = vadd.f32 %v948_v44, %v931_v31  ;;  %v1671_v30 = vadd.f32 %v1655_v6, %v1610_v56  ;;  %v1688_v43 = vmul.f32 %v6012_v39, %v8968_v55  ;;  %v6020_v53 = vsub.f32 %v8970_v8, %v5845_v40  ;;  %v6023_v2 = vld [vmem:[%s4105_s10 + $0xf4] sm:$0xff]  ;;  %v6028_v31 = vld [vmem:[%s4105_s10 + $0x85] sm:$0xff] }
 0x15a   : > { %8972 = vst [vmem:[#allocation64_spill] sm:$0xff] %v6023_v2  ;;  %v1514_v29 = vadd.f32 %v1498_v24, %v1481_v57  ;;  %v1446_v38 = vadd.f32 %v1430_v46, %v1413_v20  ;;  %v1463_v22 = vmul.f32 %v8960_v11, %v8951_v16  ;;  %v8974_v44 = vld [vmem:[#allocation102_spill] sm:$0xff]  ;;  %v6034_v40 = vmul.f32 %v5744_v13, %v5770_v42  ;;  %v6037_v47 = vld [vmem:[%s4105_s10 + $0x10c] sm:$0xff] }
 0x15b   : > { %8971 = vst [vmem:[#allocation45_spill] sm:$0xff] %v6020_v53  ;;  %v1704_v15 = vadd.f32 %v1688_v43, %v1671_v30  ;;  %v1721_v56 = vmul.f32 %v6028_v31, %v8974_v44  ;;  %v997_v6 = vadd.f32 %v981_v18, %v964_v28  ;;  %v1014_v20 = vmul.f32 %v8920_v25, %v5826_v10  ;;  %v6042_v46 = vld [vmem:[%s4105_s10 + $0x9d] sm:$0xff]  ;;  %v8977_v11 = vld [vmem:[#allocation107_spill] sm:$0xff]  ;;  %v6057_v28 = vld [vmem:[%s4105_s10 + $0xb5] sm:$0xff] }
 0x15c   : > { %8973 = vst [vmem:[#allocation39_spill] sm:$0xff] %v6028_v31  ;;  %v1754_v24 = vmul.f32 %v6042_v46, %v8977_v11  ;;  %v1547_v30 = vadd.f32 %v1531_v14, %v1514_v29  ;;  %v1564_v43 = vmul.f32 %v8959_v9, %v6023_v2  ;;  %v6049_v8 = vld [vmem:[%s4105_s10 + $0xfa] sm:$0xff]  ;;  %v2248_v42 = vmul.f32 %v6020_v53, %v6020_v53  ;;  %v6054_v39 = vld [vmem:[%s4105_s10 + $0xe5] sm:$0xff] }
 0x15d   : > { %8975 = vst [vmem:[#allocation66_spill] sm:$0xff] %v6037_v47  ;;  %v1737_v57 = vadd.f32 %v1721_v56, %v1704_v15  ;;  %v8981_v18 = vld [vmem:[#allocation70_spill] sm:$0xff]  ;;  %v1479_v56 = vadd.f32 %v1463_v22, %v1446_v38  ;;  %v1496_v10 = vmul.f32 %v8964_v37, %v8954_v45  ;;  %v8982_v29 = vld [vmem:[#allocation57_spill] sm:$0xff]  ;;  %v8983_v25 = vld [vmem:[#allocation75_spill] sm:$0xff]  ;;  %v1597_v34 = vmul.f32 %v8963_v36, %v6037_v47 }
 0x15e   : > { %8976 = vst [vmem:[#allocation22_spill] sm:$0xff] %v6042_v46  ;;  %v1787_v15 = vmul.f32 %v6057_v28, %v8981_v18  ;;  %v1820_v62 = vmul.f32 %v8983_v25, %v8982_v29  ;;  %v1529_v53 = vmul.f32 %v8956_v3, %v8966_v35  ;;  %v2270_v17 = vsel %vm2157_vm0, %v2248_v42, 0.0  ;;  %v8984_v29 = vld [vmem:[#allocation78_spill] sm:$0xff]  ;;  %v8985_v35 = vld [vmem:[#allocation105_spill] sm:$0xff] }
 0x15f   : > { %8978 = vst [vmem:[#allocation52_spill] sm:$0xff] %v6049_v8  ;;  %v1770_v14 = vadd.f32 %v1754_v24, %v1737_v57  ;;  %v1562_v38 = vmul.f32 %v8959_v9, %v8969_v1  ;;  %v1030_v22 = vadd.f32 %v1014_v20, %v997_v6  ;;  %v1047_v37 = vmul.f32 %v8672_v0, %v6049_v8  ;;  %v8986_v1 = vld [vmem:[#allocation82_spill] sm:$0xff] }
 0x160   : > { %8979 = vst [vmem:[#allocation26_spill] sm:$0xff] %v6054_v39  ;;  %2271 = vadd.xlane.f32.xlu2 %v2270_v17  ;;  %v1853_v47 = vmul.f32 %v8984_v29, %v6054_v39  ;;  %v1580_v60 = vadd.f32 %v1564_v43, %v1547_v30  ;;  %v1658_v42 = vmul.f32 %v8985_v35, %v8965_v49  ;;  %v6084_v17 = vld [vmem:[%s4105_s10 + $0x6e] sm:$0xff] }
 0x161   : > { %8980 = vst [vmem:[#allocation97_spill] sm:$0xff] %v6057_v28  ;;  %v1803_v24 = vadd.f32 %v1787_v15, %v1770_v14  ;;  %v1914_v6 = vmul.f32 %v3865_v33, %v8986_v1  ;;  %v1512_v20 = vadd.f32 %v1496_v10, %v1479_v56  ;;  %v1595_v8 = vmul.f32 %v8963_v36, %v6023_v2  ;;  %v8988_v15 = vld [vmem:[#allocation88_spill] sm:$0xff]  ;;  %v6097_v33 = vld [vmem:[%s4105_s10 + $0x86] sm:$0xff]  ;;  %v8994_v10 = vld [vmem:[#allocation121_spill] sm:$0xff] }
 0x162   : > { %8987 = vst [vmem:[#allocation59_spill] sm:$0xff] %v6084_v17  ;;  %v1947_v14 = vmul.f32 %v6084_v17, %v8988_v15  ;;  %v1613_v39 = vadd.f32 %v1597_v34, %v1580_v60  ;;  %v8989_v30 = vld [vmem:[#allocation100_spill] sm:$0xff]  ;;  %v1980_v56 = vmul.f32 %v6097_v33, %v8994_v10  ;;  %v8996_v17 = vld [vmem:[#allocation90_spill] sm:$0xff]  ;;  %v1080_v31 = vmul.f32 %v8674_v51, %v6091_v32 }
 0x163   : > { %v2163_v57 = vpop.xlane.xlu0 %2162  ;;  %v1836_v0 = vadd.f32 %v1820_v62, %v1803_v24  ;;  %v1691_v43 = vmul.f32 %v8989_v30, %v8968_v55  ;;  %8993 = vst [vmem:[#allocation63_spill] sm:$0xff] %v6097_v33  ;;  %v1545_v62 = vadd.f32 %v1529_v53, %v1512_v20  ;;  %v1063_v24 = vadd.f32 %v1047_v37, %v1030_v22  ;;  %v8995_v34 = vld [vmem:[#allocation108_spill] sm:$0xff] }
 0x164   : > { %v2214_v28 = vmul.f32 %v5744_v13, %v2163_v57  ;;  %v8991_v57 = vld [vmem:[#allocation55_spill] sm:$0xff]  ;;  %v1674_v46 = vadd.f32 %v1658_v42, %v1613_v39  ;;  %v1724_v60 = vmul.f32 %v8995_v34, %v8974_v44  ;;  %v1656_v26 = vmul.f32 %v8996_v17, %v8965_v49  ;;  %v8997_v33 = vld [vmem:[#allocation92_spill] sm:$0xff] }
 0x165   : > { %v1869_v2 = vadd.f32 %v1853_v47, %v1836_v0  ;;  %v1141_v53 = vmul.f32 %v8997_v33, %v8927_v54  ;;  %v8998_v47 = vld [vmem:[#allocation60_spill] sm:$0xff]  ;;  %v1689_v37 = vmul.f32 %v8985_v35, %v8968_v55  ;;  %v1096_v17 = vadd.f32 %v1080_v31, %v1063_v24  ;;  %v9002_v35 = vld [vmem:[#allocation103_spill] sm:$0xff] }
 0x166   : > { %v6094_v13 = vsub.f32 %v8991_v57, %v2214_v28  ;;  %v1578_v57 = vadd.f32 %v1562_v38, %v1545_v62  ;;  %v1707_v39 = vadd.f32 %v1691_v43, %v1674_v46  ;;  %v1757_v22 = vmul.f32 %v8977_v11, %v8998_v47  ;;  %v6117_v20 = vld [vmem:[%s4105_s10 + $0xf5] sm:$0xff]  ;;  %v6129_v32 = vld [vmem:[%s4105_s10 + $0x10d] sm:$0xff] }
 0x167   : > { %v1930_v0 = vadd.f32 %v1914_v6, %v1869_v2  ;;  %8999 = vst [vmem:[#allocation46_spill] sm:$0xff] %v6117_v20  ;;  %v1174_v62 = vmul.f32 %v5882_v59, %v8930_v50  ;;  %v6122_v2 = vld [vmem:[%s4105_s10 + $0x9e] sm:$0xff]  ;;  %v9001_v46 = vld [vmem:[#allocation124_spill] sm:$0xff]  ;;  %v1722_v31 = vmul.f32 %v8989_v30, %v8974_v44  ;;  %v6143_v59 = vld [vmem:[%s4105_s10 + $0xe6] sm:$0xff]  ;;  %v1755_v30 = vmul.f32 %v8995_v34, %v8977_v11 }
 0x168   : > { %8992 = vst [vmem:[#allocation69_spill] sm:$0xff] %v6094_v13  ;;  %v2246_v28 = vmul.f32 %v6094_v13, %v6094_v13  ;;  %v1611_v38 = vadd.f32 %v1595_v8, %v1578_v57  ;;  %v2013_v6 = vmul.f32 %v6122_v2, %v9001_v46  ;;  %v1740_v43 = vadd.f32 %v1724_v60, %v1707_v39  ;;  %v6136_v57 = vld [vmem:[%s4105_s10 + $0xb6] sm:$0xff] }
 0x169   : > { %v1963_v13 = vadd.f32 %v1947_v14, %v1930_v0  ;;  %9000 = vst [vmem:[#allocation40_spill] sm:$0xff] %v6122_v2  ;;  %v1157_v8 = vadd.f32 %v1141_v53, %v1096_v17  ;;  %v1207_v14 = vmul.f32 %v5893_v61, %v8935_v12  ;;  %v9005_v0 = vld [vmem:[#allocation101_spill] sm:$0xff]  ;;  %v9008_v17 = vld [vmem:[#allocation106_spill] sm:$0xff]  ;;  %v1788_v34 = vmul.f32 %v8981_v18, %v8998_v47 }
 0x16a   : > { %v2264_v42 = vsel %vm2157_vm0, %v2246_v28, 0.0  ;;  %v1790_v28 = vmul.f32 %v8981_v18, %v9002_v35  ;;  %9003 = vst [vmem:[#allocation50_spill] sm:$0xff] %v6129_v32  ;;  %v1672_v33 = vadd.f32 %v1656_v26, %v1611_v38  ;;  %v2046_v60 = vmul.f32 %v6136_v57, %v9005_v0  ;;  %v9007_v38 = vld [vmem:[#allocation98_spill] sm:$0xff] }
 0x16b   : > { %2265 = vadd.xlane.f32.xlu1 %v2264_v42  ;;  %v1996_v24 = vadd.f32 %v1980_v56, %v1963_v13  ;;  %9004 = vst [vmem:[#allocation79_spill] sm:$0xff] %v6136_v57  ;;  %v1773_v39 = vadd.f32 %v1757_v22, %v1740_v43  ;;  %v1823_v42 = vmul.f32 %v8983_v25, %v6117_v20  ;;  %v6154_v12 = vld [vmem:[%s4105_s10 + $0xfb] sm:$0xff] }
 0x16c   : > { %9006 = vst [vmem:[#allocation42_spill] sm:$0xff] %v6143_v59  ;;  %v1705_v26 = vadd.f32 %v1689_v37, %v1672_v33  ;;  %v1190_v53 = vadd.f32 %v1174_v62, %v1157_v8  ;;  %v1240_v13 = vmul.f32 %v8692_v58, %v8941_v23  ;;  %v2079_v61 = vmul.f32 %v9008_v17, %v9007_v38  ;;  %v6165_v38 = vld [vmem:[%s4105_s10 + $0x113] sm:$0xff] }
 0x16d   : > { %v2029_v56 = vadd.f32 %v2013_v6, %v1996_v24  ;;  %v1806_v22 = vadd.f32 %v1790_v28, %v1773_v39  ;;  %v1856_v43 = vmul.f32 %v8984_v29, %v6129_v32  ;;  %9009 = vst [vmem:[#allocation72_spill] sm:$0xff] %v6154_v12  ;;  %v1273_v62 = vmul.f32 %v8811_v27, %v5910_v4  ;;  %v9010_v6 = vld [vmem:[#allocation129_spill] sm:$0xff] }
 0x16e   : > { %v1738_v33 = vadd.f32 %v1722_v31, %v1705_v26  ;;  %v1223_v37 = vadd.f32 %v1207_v14, %v1190_v53  ;;  %v2112_v8 = vmul.f32 %v9010_v6, %v6143_v59  ;;  %v3870_v28 = vld [vmem:[%s4105_s10 + $0x7e] sm:$0xff]  ;;  %9011 = vst [vmem:[#allocation67_spill] sm:$0xff] %v6165_v38  ;;  %v1821_v26 = vmul.f32 %v8983_v25, %v9002_v35 }
 0x16f   : > { %v2062_v23 = vadd.f32 %v2046_v60, %v2029_v56  ;;  %v1839_v24 = vadd.f32 %v1823_v42, %v1806_v22  ;;  %v1917_v39 = vmul.f32 %v3870_v28, %v8986_v1  ;;  %v1306_v14 = vmul.f32 %v8704_v7, %v6154_v12  ;;  %v6172_v56 = vld [vmem:[%s4105_s10 + $0x96] sm:$0xff] }
 0x170   : > { %v1771_v31 = vadd.f32 %v1755_v30, %v1738_v33  ;;  %v1256_v47 = vadd.f32 %v1240_v13, %v1223_v37  ;;  %9012 = vst [vmem:[#allocation117_spill] sm:$0xff] %v6172_v56  ;;  %v1950_v42 = vmul.f32 %v6172_v56, %v8988_v15  ;;  %v1854_v32 = vmul.f32 %v8984_v29, %v6117_v20  ;;  %v6181_v37 = vld [vmem:[%s4105_s10 + $0xae] sm:$0xff] }
 0x171   : > { %v2095_v60 = vadd.f32 %v2079_v61, %v2062_v23  ;;  %v1872_v53 = vadd.f32 %v1856_v43, %v1839_v24  ;;  %v1339_v35 = vmul.f32 %v8708_v63, %v6165_v38  ;;  %9013 = vst [vmem:[#allocation53_spill] sm:$0xff] %v6181_v37  ;;  %v1983_v61 = vmul.f32 %v6181_v37, %v8994_v10  ;;  %v9014_v43 = vld [vmem:[#allocation13_spill] sm:$0xff]  ;;  %v3873_v24 = vld [vmem:[%s4105_s10 + $0x66] sm:$0xff] }
 0x172   : > { %v1804_v22 = vadd.f32 %v1788_v34, %v1771_v31  ;;  %v1289_v30 = vadd.f32 %v1273_v62, %v1256_v47  ;;  %v6187_v23 = vsub.f32 %v9014_v43, %v6034_v40  ;;  %v1915_v31 = vmul.f32 %v3873_v24, %v8986_v1  ;;  %v9020_v20 = vld [vmem:[#allocation115_spill] sm:$0xff] }
 0x173   : > { %v2128_v13 = vadd.f32 %v2112_v8, %v2095_v60  ;;  %v1933_v33 = vadd.f32 %v1917_v39, %v1872_v53  ;;  %v6194_v8 = vld [vmem:[%s7872_s2] ss:$0 sm:$0xff]  ;;  %v1400_v40 = vmul.f32 %v5948_v52, %v8944_v41 }
 0x174   : > { %9015 = vst [vmem:[#allocation43_spill] sm:$0xff] %v6187_v23  ;;  %v1837_v34 = vadd.f32 %v1821_v26, %v1804_v22  ;;  %v1322_v62 = vadd.f32 %v1306_v14, %v1289_v30  ;;  %v9018_v60 = vld [vmem:[#allocation86_spill] sm:$0xff]  ;;  %v6204_v26 = vld [vmem:[%s4105_s10 + $0xf6] sm:$0xff]  ;;  %v1948_v14 = vmul.f32 %v3870_v28, %v8988_v15  ;;  %v2247_v28 = vmul.f32 %v6187_v23, %v6187_v23 }
 0x175   : > { %9016 = vst [vmem:[#allocation9_spill] sm:$0xff] %v6194_v8  ;;  %v6197_v39 = vadd.f32 %v6194_v8, %v2128_v13  ;;  %v1966_v47 = vadd.f32 %v1950_v42, %v1933_v33  ;;  %v2016_v53 = vmul.f32 %v9001_v46, %v9018_v60  ;;  %v2049_v13 = vmul.f32 %v9005_v0, %v9020_v20  ;;  %v6214_v33 = vld [vmem:[%s4105_s10 + $0x10e] sm:$0xff] }
 0x176   : > { %9019 = vst [vmem:[#allocation51_spill] sm:$0xff] %v6204_v26  ;;  %v1870_v22 = vadd.f32 %v1854_v32, %v1837_v34  ;;  %v1355_v30 = vadd.f32 %v1339_v35, %v1322_v62  ;;  %v1433_v42 = vmul.f32 %v5965_v48, %v8947_v5  ;;  %v1981_v32 = vmul.f32 %v6172_v56, %v8994_v10  ;;  %v9029_v56 = vld [vmem:[#allocation25_spill] sm:$0xff] }
 0x177   : > { %9017 = vst [vmem:[#allocation113_spill] sm:$0xff] %v6197_v39  ;;  %v2179_v43 = vsel %vm2157_vm0, %v6197_v39, 0.0  ;;  %v1999_v24 = vadd.f32 %v1983_v61, %v1966_v47  ;;  %v2082_v61 = vmul.f32 %v9008_v17, %v6204_v26  ;;  %v1466_v62 = vmul.f32 %v5976_v19, %v8951_v16  ;;  %v6235_v39 = vld [vmem:[%s4105_s10 + $0xc6] sm:$0xff] }
 0x178   : > { %2180 = vadd.xlane.f32.xlu0 %v2179_v43  ;;  %9021 = vst [vmem:[#allocation49_spill] sm:$0xff] %v6214_v33  ;;  %v1931_v60 = vadd.f32 %v1915_v31, %v1870_v22  ;;  %v1416_v34 = vadd.f32 %v1400_v40, %v1355_v30  ;;  %v2014_v31 = vmul.f32 %v6181_v37, %v9001_v46  ;;  %v2267_v22 = vsel %vm2157_vm0, %v2247_v28, 0.0  ;;  %v9028_v37 = vld [vmem:[#allocation4_spill] sm:$0xff] }
 0x179   : > { %v2032_v35 = vadd.f32 %v2016_v53, %v1999_v24  ;;  %v2115_v23 = vmul.f32 %v9010_v6, %v6214_v33  ;;  %2268 = vadd.xlane.f32.xlu1 %v2267_v22  ;;  %v6230_v24 = vld [vmem:[%s4105_s10 + $0xcc] sm:$0xff]  ;;  %9023 = vst [vmem:[#allocation48_spill] sm:$0xff] %v6235_v39 }
 0x17a   : > { %v1964_v47 = vadd.f32 %v1948_v14, %v1931_v60  ;;  %v1449_v53 = vadd.f32 %v1433_v42, %v1416_v34  ;;  %9022 = vst [vmem:[#allocation95_spill] sm:$0xff] %v6230_v24  ;;  %v1499_v40 = vmul.f32 %v6230_v24, %v8954_v45  ;;  %v2047_v14 = vmul.f32 %v6235_v39, %v9005_v0  ;;  %v6240_v60 = vld [vmem:[%s4105_s10 + $0xfc] sm:$0xff]  ;;  %v6247_v34 = vld [vmem:[%s4105_s10 + $0x114] sm:$0xff]  ;;  %v9026_v33 = vld [vmem:[#allocation3_spill] sm:$0xff] }
 0x17b   : > { %v2065_v43 = vadd.f32 %v2049_v13, %v2032_v35  ;;  %9024 = vst [vmem:[#allocation81_spill] sm:$0xff] %v6240_v60  ;;  %v1532_v35 = vmul.f32 %v8956_v3, %v5993_v21  ;;  %v2080_v42 = vmul.f32 %v9008_v17, %v9020_v20  ;;  %v395_v39 = vmul.f32 %v9029_v56, %v9028_v37  ;;  %v9032_v21 = vld [vmem:[#allocation6_spill] sm:$0xff]  ;;  %v9033_v3 = vld [vmem:[#allocation109_spill] sm:$0xff] }
 0x17c   : > { %v1997_v30 = vadd.f32 %v1981_v32, %v1964_v47  ;;  %v1482_v13 = vadd.f32 %v1466_v62, %v1449_v53  ;;  %9025 = vst [vmem:[#allocation33_spill] sm:$0xff] %v6247_v34  ;;  %v9027_v32 = vld [vmem:[#allocation87_spill] sm:$0xff]  ;;  %v9030_v62 = vld [vmem:[#allocation5_spill] sm:$0xff]  ;;  %v2113_v20 = vmul.f32 %v9010_v6, %v6204_v26  ;;  %v461_v19 = vmul.f32 %v9033_v3, %v9032_v21  ;;  %v9039_v26 = vld [vmem:[#allocation12_spill] sm:$0xff] }
 0x17d   : > { %v2098_v28 = vadd.f32 %v2082_v61, %v2065_v43  ;;  %v362_v47 = vmul.f32 %v9027_v32, %v9026_v33  ;;  %v1565_v61 = vmul.f32 %v8959_v9, %v6240_v60  ;;  %v9031_v43 = vld [vmem:[#allocation104_spill] sm:$0xff]  ;;  %v9037_v3 = vld [vmem:[#allocation39_spill] sm:$0xff] }
 0x17e   : > { %v2030_v22 = vadd.f32 %v2014_v31, %v1997_v30  ;;  %v1515_v24 = vadd.f32 %v1499_v40, %v1482_v13  ;;  %v428_v31 = vmul.f32 %v9031_v43, %v9030_v62  ;;  %v6267_v13 = vld [vmem:[%s4105_s10 + $0xc8] sm:$0xff]  ;;  %v9036_v43 = vld [vmem:[#allocation10_spill] sm:$0xff] }
 0x17f   : > { %v2131_v38 = vadd.f32 %v2115_v23, %v2098_v28  ;;  %v411_v30 = vadd.f32 %v395_v39, %v362_v47  ;;  %v1598_v23 = vmul.f32 %v8963_v36, %v6247_v34  ;;  %9035 = vst [vmem:[#allocation105_spill] sm:$0xff] %v6267_v13  ;;  %v1659_v47 = vmul.f32 %v9037_v3, %v8965_v49  ;;  %v6318_v49 = vld [vmem:[%s4105_s10 + $0xd8] sm:$0xff]  ;;  %v9057_v36 = vld [vmem:[#allocation118_spill] sm:$0xff] }
 0x180   : > { %v2063_v53 = vadd.f32 %v2047_v14, %v2030_v22  ;;  %v1548_v56 = vadd.f32 %v1532_v35, %v1515_v24  ;;  %v494_v14 = vmul.f32 %v6267_v13, %v9036_v43  ;;  %v9038_v35 = vld [vmem:[#allocation38_spill] sm:$0xff]  ;;  %9055 = vst [vmem:[#allocation98_spill] sm:$0xff] %v6318_v49 }
 0x181   : > { %v6262_v32 = vadd.f32 %v6194_v8, %v2131_v38  ;;  %v444_v28 = vadd.f32 %v428_v31, %v411_v30 }
 0x182   : > { %v2096_v40 = vadd.f32 %v2080_v42, %v2063_v53  ;;  %v1581_v22 = vadd.f32 %v1565_v61, %v1548_v56  ;;  %v527_v42 = vmul.f32 %v9039_v26, %v9038_v35  ;;  %v9040_v53 = vld [vmem:[#allocation22_spill] sm:$0xff]  ;;  %v9042_v56 = vld [vmem:[#allocation7_spill] sm:$0xff] }
 0x183   : > { %9034 = vst [vmem:[#allocation57_spill] sm:$0xff] %v6262_v32  ;;  %v2188_v39 = vsel %vm2157_vm0, %v6262_v32, 0.0  ;;  %v477_v24 = vadd.f32 %v461_v19, %v444_v28  ;;  %v1692_v30 = vmul.f32 %v9040_v53, %v8968_v55  ;;  %v9043_v32 = vld [vmem:[#allocation14_spill] sm:$0xff]  ;;  %v9044_v19 = vld [vmem:[#allocation97_spill] sm:$0xff]  ;;  %v9045_v28 = vld [vmem:[#allocation16_spill] sm:$0xff] }
 0x184   : > { %2189 = vadd.xlane.f32.xlu2 %v2188_v39  ;;  %v2129_v38 = vadd.f32 %v2113_v20, %v2096_v40  ;;  %v1614_v31 = vadd.f32 %v1598_v23, %v1581_v22  ;;  %v560_v39 = vmul.f32 %v9043_v32, %v9042_v56  ;;  %v1725_v20 = vmul.f32 %v9044_v19, %v8974_v44  ;;  %v9046_v22 = vld [vmem:[#allocation11_spill] sm:$0xff]  ;;  %v6308_v53 = vld [vmem:[%s4105_s10 + $0xc0] sm:$0xff] }
 0x185   : > { %v510_v61 = vadd.f32 %v494_v14, %v477_v24  ;;  %v621_v35 = vmul.f32 %v9046_v22, %v9045_v28  ;;  %v6291_v14 = vld [vmem:[%s4105_s10 + $0xcd] sm:$0xff]  ;;  %9052 = vst [vmem:[#allocation60_spill] sm:$0xff] %v6308_v53  ;;  %v9054_v44 = vld [vmem:[#allocation26_spill] sm:$0xff] }
 0x186   : > { %v6280_v34 = vadd.f32 %v6194_v8, %v2129_v38  ;;  %v1675_v3 = vadd.f32 %v1659_v47, %v1614_v31  ;;  %9047 = vst [vmem:[#allocation55_spill] sm:$0xff] %v6291_v14  ;;  %v1758_v47 = vmul.f32 %v6291_v14, %v8977_v11  ;;  %v3879_v24 = vld [vmem:[%s4105_s10 + $0x90] sm:$0xff]  ;;  %v6298_v19 = vld [vmem:[%s4105_s10 + $0xa8] sm:$0xff]  ;;  %v431_v14 = vmul.f32 %v6308_v53, %v9030_v62 }
 0x187   : > { %v543_v40 = vadd.f32 %v527_v42, %v510_v61  ;;  %v365_v31 = vmul.f32 %v3879_v24, %v9026_v33  ;;  %9048 = vst [vmem:[#allocation108_spill] sm:$0xff] %v6298_v19  ;;  %v398_v42 = vmul.f32 %v6298_v19, %v9028_v37  ;;  %v2172_v61 = vpop.xlane.xlu2 %2171  ;;  %v6313_v11 = vld [vmem:[%s4105_s10 + $0x115] sm:$0xff]  ;;  %v1791_v55 = vmul.f32 %v8981_v18, %v9054_v44 }
 0x188   : > { %9041 = vst [vmem:[#allocation100_spill] sm:$0xff] %v6280_v34  ;;  %v2182_v23 = vsel %vm2157_vm0, %v6280_v34, 0.0  ;;  %v1708_v38 = vadd.f32 %v1692_v30, %v1675_v3  ;;  %v6303_v34 = vld [vmem:[%s4105_s10 + $0xfd] sm:$0xff]  ;;  %v9051_v3 = vld [vmem:[#allocation112_spill] sm:$0xff] }
 0x189   : > { %2183 = vadd.xlane.f32.xlu0 %v2182_v23  ;;  %9049 = vst [vmem:[#allocation90_spill] sm:$0xff] %v6303_v34  ;;  %v576_v22 = vadd.f32 %v560_v39, %v543_v40  ;;  %v9050_v23 = vld [vmem:[#allocation17_spill] sm:$0xff]  ;;  %v414_v19 = vadd.f32 %v398_v42, %v365_v31  ;;  %v464_v39 = vmul.f32 %v6318_v49, %v9032_v21  ;;  %v9059_v31 = vld [vmem:[#allocation119_spill] sm:$0xff]  ;;  %v9061_v18 = vld [vmem:[#allocation76_spill] sm:$0xff] }
 0x18a   : > { %v654_v30 = vmul.f32 %v9051_v3, %v9050_v23  ;;  %9053 = vst [vmem:[#allocation103_spill] sm:$0xff] %v6313_v11  ;;  %v1741_v24 = vadd.f32 %v1725_v20, %v1708_v38  ;;  %v9056_v3 = vld [vmem:[#allocation18_spill] sm:$0xff]  ;;  %v1824_v53 = vmul.f32 %v8983_v25, %v6303_v34  ;;  %v9058_v38 = vld [vmem:[#allocation111_spill] sm:$0xff]  ;;  %v2217_v42 = vmul.f32 %v9059_v31, %v2172_v61  ;;  %v9064_v25 = vld [vmem:[#allocation116_spill] sm:$0xff] }
 0x18b   : > { %v637_v40 = vadd.f32 %v621_v35, %v576_v22  ;;  %v687_v60 = vmul.f32 %v9057_v36, %v9056_v3  ;;  %v447_v20 = vadd.f32 %v431_v14, %v414_v19  ;;  %v497_v44 = vmul.f32 %v9036_v43, %v9058_v38  ;;  %v9060_v22 = vld [vmem:[#allocation19_spill] sm:$0xff]  ;;  %v6341_v61 = vld [vmem:[%s4105_s10 + $0xfe] sm:$0xff] }
 0x18c   : > { %v1774_v9 = vadd.f32 %v1758_v47, %v1741_v24  ;;  %v1857_v49 = vmul.f32 %v8984_v29, %v6313_v11  ;;  %v720_v36 = vmul.f32 %v9061_v18, %v9060_v22  ;;  %v6334_v47 = vld [vmem:[%s4105_s10 + $0x120] sm:$0xff]  ;;  %v9063_v34 = vld [vmem:[#allocation63_spill] sm:$0xff]  ;;  %v530_v38 = vmul.f32 %v9039_v26, %v9064_v25  ;;  %9065 = vst [vmem:[#allocation86_spill] sm:$0xff] %v6341_v61 }
 0x18d   : > { %v670_v35 = vadd.f32 %v654_v30, %v637_v40  ;;  %9062 = vst [vmem:[#allocation13_spill] sm:$0xff] %v6334_v47  ;;  %v1918_v19 = vmul.f32 %v9063_v34, %v8986_v1  ;;  %v480_v14 = vadd.f32 %v464_v39, %v447_v20  ;;  %v1951_v11 = vmul.f32 %v6122_v2, %v8988_v15  ;;  %v6348_v29 = vld [vmem:[%s4105_s10 + $0xc9] sm:$0xff]  ;;  %v6353_v39 = vld [vmem:[%s4105_s10 + $0x116] sm:$0xff] }
 0x18e   : > { %v1807_v24 = vadd.f32 %v1791_v55, %v1774_v9  ;;  %v1984_v30 = vmul.f32 %v6136_v57, %v8994_v10  ;;  %9066 = vst [vmem:[#allocation115_spill] sm:$0xff] %v6348_v29  ;;  %v9067_v9 = vld [vmem:[#allocation20_spill] sm:$0xff]  ;;  %v563_v57 = vmul.f32 %v9043_v32, %v6334_v47  ;;  %v2050_v10 = vmul.f32 %v9005_v0, %v6143_v59  ;;  %v9085_v0 = vld [vmem:[#allocation61_spill] sm:$0xff] }
 0x18f   : > { %v703_v40 = vadd.f32 %v687_v60, %v670_v35  ;;  %v753_v55 = vmul.f32 %v6348_v29, %v9067_v9  ;;  %9068 = vst [vmem:[#allocation87_spill] sm:$0xff] %v6353_v39  ;;  %v6356_v20 = vld [vmem:[%s4105_s10 + $0xce] sm:$0xff]  ;;  %v513_v2 = vadd.f32 %v497_v44, %v480_v14  ;;  %v9070_v60 = vld [vmem:[#allocation93_spill] sm:$0xff] }
 0x190   : > { %v1840_v34 = vadd.f32 %v1824_v53, %v1807_v24  ;;  %9069 = vst [vmem:[#allocation25_spill] sm:$0xff] %v6356_v20  ;;  %v2017_v25 = vmul.f32 %v6356_v20, %v9001_v46  ;;  %v6363_v35 = vsub.f32 %v9070_v60, %v2217_v42  ;;  %v9072_v53 = vld [vmem:[#allocation120_spill] sm:$0xff]  ;;  %v9073_v24 = vld [vmem:[#allocation23_spill] sm:$0xff]  ;;  %v2083_v20 = vmul.f32 %v9008_v17, %v6341_v61  ;;  %v6393_v17 = vld [vmem:[%s4105_s10 + $0xe0] sm:$0xff] }
 0x191   : > { %v736_v15 = vadd.f32 %v720_v36, %v703_v40  ;;  %v786_v1 = vmul.f32 %v9073_v24, %v9072_v53  ;;  %v546_v46 = vadd.f32 %v530_v38, %v513_v2  ;;  %v3885_v44 = vld [vmem:[%s4105_s10 + $0x91] sm:$0xff]  ;;  %v2116_v42 = vmul.f32 %v9010_v6, %v6353_v39  ;;  %v6384_v53 = vld [vmem:[%s4105_s10 + $0xa9] sm:$0xff]  ;;  %9080 = vst [vmem:[#allocation7_spill] sm:$0xff] %v6393_v17 }
 0x192   : > { %9071 = vst [vmem:[#allocation104_spill] sm:$0xff] %v6363_v35  ;;  %v1873_v45 = vadd.f32 %v1857_v49, %v1840_v34  ;;  %v624_v14 = vmul.f32 %v3885_v44, %v9045_v28  ;;  %v9074_v35 = vld [vmem:[#allocation47_spill] sm:$0xff]  ;;  %v9075_v36 = vld [vmem:[#allocation24_spill] sm:$0xff]  ;;  %v657_v44 = vmul.f32 %v6384_v53, %v9050_v23  ;;  %v401_v61 = vmul.f32 %v6267_v13, %v9028_v37 }
 0x193   : > { %v769_v60 = vadd.f32 %v753_v55, %v736_v15  ;;  %v819_v40 = vmul.f32 %v9075_v36, %v9074_v35  ;;  %v6378_v59 = vld [vmem:[%s4105_s10 + $0xb0] sm:$0xff]  ;;  %v579_v38 = vadd.f32 %v563_v57, %v546_v46  ;;  %9077 = vst [vmem:[#allocation38_spill] sm:$0xff] %v6384_v53  ;;  %v9078_v15 = vld [vmem:[#allocation27_spill] sm:$0xff]  ;;  %v9079_v55 = vld [vmem:[#allocation122_spill] sm:$0xff] }
 0x194   : > { %v2175_v47 = vpop.xlane.xlu2 %2174  ;;  %9076 = vst [vmem:[#allocation109_spill] sm:$0xff] %v6378_v59  ;;  %v368_v49 = vmul.f32 %v6378_v59, %v9026_v33  ;;  %v1934_v34 = vadd.f32 %v1918_v19, %v1873_v45  ;;  %v880_v6 = vmul.f32 %v9079_v55, %v9078_v15  ;;  %v434_v45 = vmul.f32 %v6393_v17, %v9030_v62  ;;  %v9081_v46 = vld [vmem:[#allocation110_spill] sm:$0xff]  ;;  %v9084_v55 = vld [vmem:[#allocation28_spill] sm:$0xff] }
 0x195   : > { %v2218_v2 = vmul.f32 %v9059_v31, %v2175_v47  ;;  %v802_v39 = vadd.f32 %v786_v1, %v769_v60  ;;  %v640_v19 = vadd.f32 %v624_v14, %v579_v38  ;;  %v6401_v53 = vld [vmem:[%s4105_s10 + $0xc1] sm:$0xff]  ;;  %v913_v31 = vmul.f32 %v9085_v0, %v9084_v55  ;;  %v6412_v14 = vld [vmem:[%s4105_s10 + $0xd9] sm:$0xff] }
 0x196   : > { %v1967_v47 = vadd.f32 %v1951_v11, %v1934_v34  ;;  %9083 = vst [vmem:[#allocation112_spill] sm:$0xff] %v6401_v53  ;;  %v690_v1 = vmul.f32 %v6401_v53, %v9056_v3  ;;  %v417_v13 = vadd.f32 %v401_v61, %v368_v49  ;;  %v467_v59 = vmul.f32 %v9032_v21, %v9042_v56  ;;  %v9088_v0 = vld [vmem:[#allocation31_spill] sm:$0xff]  ;;  %v351_v17 = vld [vmem:[%s4105_s10 + $0x140] sm:$0xff]  ;;  %v9092_v21 = vld [vmem:[#allocation32_spill] sm:$0xff] }
 0x197   : > { %v6398_v57 = vsub.f32 %v9081_v46, %v2218_v2  ;;  %v835_v60 = vadd.f32 %v819_v40, %v802_v39  ;;  %v673_v11 = vadd.f32 %v657_v44, %v640_v19  ;;  %9086 = vst [vmem:[#allocation118_spill] sm:$0xff] %v6412_v14  ;;  %v723_v34 = vmul.f32 %v6412_v14, %v9060_v22  ;;  %v6417_v39 = vld [vmem:[%s4105_s10 + $0x128] sm:$0xff] }
 0x198   : > { %v2000_v46 = vadd.f32 %v1984_v30, %v1967_v47  ;;  %9087 = vst [vmem:[#allocation111_spill] sm:$0xff] %v6417_v39  ;;  %v9089_v61 = vld [vmem:[#allocation127_spill] sm:$0xff]  ;;  %v450_v38 = vadd.f32 %v434_v45, %v417_v13  ;;  %v533_v13 = vmul.f32 %v9039_v26, %v6417_v39  ;;  %v9100_v39 = vld [vmem:[#allocation52_spill] sm:$0xff] }
 0x199   : > { %9082 = vst [vmem:[#allocation11_spill] sm:$0xff] %v6398_v57  ;;  %v2250_v2 = vmul.f32 %v6398_v57, %v6398_v57  ;;  %v896_v40 = vadd.f32 %v880_v6, %v835_v60  ;;  %v946_v49 = vmul.f32 %v9089_v61, %v9088_v0  ;;  %v9090_v56 = vld [vmem:[#allocation15_spill] sm:$0xff]  ;;  %v706_v47 = vadd.f32 %v690_v1, %v673_v11  ;;  %v9093_v6 = vld [vmem:[#allocation130_spill] sm:$0xff] }
 0x19a   : > { %v500_v53 = vmul.f32 %v9036_v43, %v9090_v56  ;;  %v2033_v44 = vadd.f32 %v2017_v25, %v2000_v46  ;;  %v9091_v19 = vld [vmem:[#allocation83_spill] sm:$0xff]  ;;  %v979_v60 = vmul.f32 %v9093_v6, %v9092_v21  ;;  %v483_v61 = vadd.f32 %v467_v59, %v450_v38  ;;  %v9096_v25 = vld [vmem:[#allocation34_spill] sm:$0xff] }
 0x19b   : > { %v2276_v30 = vsel %vm2157_vm0, %v2250_v2, 0.0  ;;  %v756_v57 = vmul.f32 %v9067_v9, %v9091_v19  ;;  %v929_v14 = vadd.f32 %v913_v31, %v896_v40  ;;  %v6430_v62 = vld [vmem:[%s4105_s10 + $0x121] sm:$0xff]  ;;  %v6435_v56 = vld [vmem:[%s4105_s10 + $0xca] sm:$0xff]  ;;  %v739_v2 = vadd.f32 %v723_v34, %v706_v47  ;;  %v9098_v40 = vld [vmem:[#allocation125_spill] sm:$0xff] }
 0x19c   : > { %2277 = vadd.xlane.f32.xlu2 %v2276_v30  ;;  %9094 = vst [vmem:[#allocation76_spill] sm:$0xff] %v6430_v62  ;;  %v2066_v45 = vadd.f32 %v2050_v10, %v2033_v44  ;;  %v1012_v1 = vmul.f32 %v6435_v56, %v9096_v25  ;;  %v9097_v46 = vld [vmem:[#allocation123_spill] sm:$0xff]  ;;  %v9099_v30 = vld [vmem:[#allocation37_spill] sm:$0xff]  ;;  %v516_v43 = vadd.f32 %v500_v53, %v483_v61  ;;  %v9101_v47 = vld [vmem:[#allocation128_spill] sm:$0xff] }
 0x19d   : > { %9095 = vst [vmem:[#allocation116_spill] sm:$0xff] %v6435_v56  ;;  %v789_v11 = vmul.f32 %v9073_v24, %v9097_v46  ;;  %v962_v31 = vadd.f32 %v946_v49, %v929_v14  ;;  %v1045_v19 = vmul.f32 %v9099_v30, %v9098_v40  ;;  %v566_v59 = vmul.f32 %v9043_v32, %v351_v17  ;;  %v9102_v17 = vld [vmem:[#allocation92_spill] sm:$0xff] }
 0x19e   : > { %v2099_v38 = vadd.f32 %v2083_v20, %v2066_v45  ;;  %v1078_v10 = vmul.f32 %v8674_v51, %v9100_v39  ;;  %v772_v44 = vadd.f32 %v756_v57, %v739_v2  ;;  %v822_v26 = vmul.f32 %v9075_v36, %v6430_v62  ;;  %v3892_v57 = vld [vmem:[%s4105_s10 + $0x92] sm:$0xff] }
 0x19f   : > { %v995_v34 = vadd.f32 %v979_v60, %v962_v31  ;;  %v1139_v46 = vmul.f32 %v9101_v47, %v8927_v54  ;;  %v549_v14 = vadd.f32 %v533_v13, %v516_v43  ;;  %v627_v49 = vmul.f32 %v9061_v18, %v9045_v28  ;;  %v9103_v60 = vld [vmem:[#allocation54_spill] sm:$0xff]  ;;  %v9104_v31 = vld [vmem:[#allocation99_spill] sm:$0xff] }
 0x1a0   : > { %v2132_v53 = vadd.f32 %v2116_v42, %v2099_v38  ;;  %v1172_v20 = vmul.f32 %v9102_v17, %v8930_v50  ;;  %v805_v61 = vadd.f32 %v789_v11, %v772_v44  ;;  %v883_v45 = vmul.f32 %v3892_v57, %v9078_v15  ;;  %v9106_v42 = vld [vmem:[#allocation29_spill] sm:$0xff]  ;;  %v6466_v38 = vld [vmem:[%s4105_s10 + $0xaa] sm:$0xff]  ;;  %v6476_v17 = vld [vmem:[%s4105_s10 + $0xe1] sm:$0xff] }
 0x1a1   : > { %v1028_v2 = vadd.f32 %v1012_v1, %v995_v34  ;;  %v1205_v40 = vmul.f32 %v9104_v31, %v9103_v60  ;;  %v582_v47 = vadd.f32 %v566_v59, %v549_v14  ;;  %v660_v43 = vmul.f32 %v6348_v29, %v9050_v23  ;;  %9107 = vst [vmem:[#allocation120_spill] sm:$0xff] %v6466_v38  ;;  %v6471_v34 = vld [vmem:[%s4105_s10 + $0xcb] sm:$0xff] }
 0x1a2   : > { %v6461_v18 = vadd.f32 %v6194_v8, %v2132_v53  ;;  %v1238_v13 = vmul.f32 %v9106_v42, %v8692_v58  ;;  %v838_v11 = vadd.f32 %v822_v26, %v805_v61  ;;  %v916_v1 = vmul.f32 %v6466_v38, %v9084_v55  ;;  %9108 = vst [vmem:[#allocation122_spill] sm:$0xff] %v6471_v34  ;;  %v6510_v8 = vld [vmem:[%s4105_s10 + $0x129] sm:$0xff] }
 0x1a3   : > { %v1061_v44 = vadd.f32 %v1045_v19, %v1028_v2  ;;  %v1271_v59 = vmul.f32 %v6471_v34, %v8811_v27  ;;  %v643_v14 = vadd.f32 %v627_v49, %v582_v47  ;;  %9109 = vst [vmem:[#allocation110_spill] sm:$0xff] %v6476_v17  ;;  %v693_v53 = vmul.f32 %v6476_v17, %v9056_v3  ;;  %v6487_v19 = vld [vmem:[%s4105_s10 + $0x122] sm:$0xff]  ;;  %v6495_v47 = vld [vmem:[%s4105_s10 + $0xda] sm:$0xff]  ;;  %v6523_v29 = vld [vmem:[%s4105_s10 + $0xab] sm:$0xff] }
 0x1a4   : > { %9105 = vst [vmem:[#allocation93_spill] sm:$0xff] %v6461_v18  ;;  %v2191_v26 = vsel %vm2157_vm0, %v6461_v18, 0.0  ;;  %v6484_v61 = vmul.f32 %v8704_v7, %v5910_v4  ;;  %v899_v57 = vadd.f32 %v883_v45, %v838_v11  ;;  %v6490_v2 = vld [vmem:[%s4105_s10 + $0xc2] sm:$0xff]  ;;  %v982_v18 = vmul.f32 %v6495_v47, %v9092_v21  ;;  %v9127_v23 = vld [vmem:[#allocation36_spill] sm:$0xff] }
 0x1a5   : > { %9110 = vst [vmem:[#allocation61_spill] sm:$0xff] %v6487_v19  ;;  %v949_v49 = vmul.f32 %v6490_v2, %v9088_v0  ;;  %2192 = vadd.xlane.f32.xlu0 %v2191_v26  ;;  %v1094_v31 = vadd.f32 %v1078_v10, %v1061_v44  ;;  %v676_v38 = vadd.f32 %v660_v43, %v643_v14  ;;  %v9114_v44 = vld [vmem:[#allocation21_spill] sm:$0xff] }
 0x1a6   : > { %9111 = vst [vmem:[#allocation127_spill] sm:$0xff] %v6490_v2  ;;  %v726_v62 = vmul.f32 %v9060_v22, %v9074_v35  ;;  %v6503_v45 = vmul.f32 %v8708_v63, %v6154_v12  ;;  %v932_v11 = vadd.f32 %v916_v1, %v899_v57  ;;  %v9113_v2 = vld [vmem:[#allocation8_spill] sm:$0xff]  ;;  %v1048_v26 = vmul.f32 %v9099_v30, %v9114_v44  ;;  %v9116_v35 = vld [vmem:[#allocation35_spill] sm:$0xff]  ;;  %v9117_v22 = vld [vmem:[#allocation30_spill] sm:$0xff] }
 0x1a7   : > { %9112 = vst [vmem:[#allocation15_spill] sm:$0xff] %v6495_v47  ;;  %v1015_v10 = vmul.f32 %v9096_v25, %v9113_v2  ;;  %v1155_v47 = vadd.f32 %v1139_v46, %v1094_v31  ;;  %v1081_v43 = vmul.f32 %v8674_v51, %v6487_v19  ;;  %v709_v14 = vadd.f32 %v693_v53, %v676_v38  ;;  %v3898_v2 = vld [vmem:[%s4105_s10 + $0x93] sm:$0xff]  ;;  %v610_v31 = vld [vmem:[%s4105_s10 + $0x141] sm:$0xff] }
 0x1a8   : > { %9115 = vst [vmem:[#allocation83_spill] sm:$0xff] %v6510_v8  ;;  %v759_v17 = vmul.f32 %v9067_v9, %v9116_v35  ;;  %v6518_v1 = vmul.f32 %v9117_v22, %v8944_v41  ;;  %v965_v57 = vadd.f32 %v949_v49, %v932_v11  ;;  %v1142_v44 = vmul.f32 %v3898_v2, %v8927_v54  ;;  %v6529_v53 = vld [vmem:[%s4105_s10 + $0xc3] sm:$0xff] }
 0x1a9   : > { %9118 = vst [vmem:[#allocation130_spill] sm:$0xff] %v6523_v29  ;;  %v1175_v46 = vmul.f32 %v6523_v29, %v8930_v50  ;;  %v1188_v38 = vadd.f32 %v1172_v20, %v1155_v47  ;;  %v1208_v19 = vmul.f32 %v6529_v53, %v9103_v60  ;;  %v742_v35 = vadd.f32 %v726_v62, %v709_v14  ;;  %v6544_v29 = vld [vmem:[%s4105_s10 + $0x123] sm:$0xff]  ;;  %v6547_v20 = vld [vmem:[%s4105_s10 + $0xdb] sm:$0xff] }
 0x1aa   : > { %9119 = vst [vmem:[#allocation34_spill] sm:$0xff] %v6529_v53  ;;  %v792_v22 = vmul.f32 %v9073_v24, %v6510_v8  ;;  %v6537_v49 = vmul.f32 %v5948_v52, %v8947_v5  ;;  %v6541_v11 = vmul.f32 %v5965_v48, %v8951_v16  ;;  %v998_v2 = vadd.f32 %v982_v18, %v965_v57  ;;  %v9122_v14 = vld [vmem:[#allocation114_spill] sm:$0xff]  ;;  %v9123_v8 = vld [vmem:[#allocation77_spill] sm:$0xff]  ;;  %v9124_v18 = vld [vmem:[#allocation84_spill] sm:$0xff] }
 0x1ab   : > { %9120 = vst [vmem:[#allocation123_spill] sm:$0xff] %v6544_v29  ;;  %v6551_v47 = vmul.f32 %v6547_v20, %v8692_v58  ;;  %v1221_v62 = vadd.f32 %v1205_v40, %v1188_v38  ;;  %v6555_v53 = vmul.f32 %v8811_v27, %v9122_v14  ;;  %v775_v52 = vadd.f32 %v759_v17, %v742_v35  ;;  %v9125_v24 = vld [vmem:[#allocation80_spill] sm:$0xff]  ;;  %v9126_v9 = vld [vmem:[#allocation95_spill] sm:$0xff] }
 0x1ac   : > { %9121 = vst [vmem:[#allocation125_spill] sm:$0xff] %v6547_v20  ;;  %v825_v48 = vmul.f32 %v9075_v36, %v610_v31  ;;  %v6560_v57 = vmul.f32 %v9124_v18, %v9123_v8  ;;  %v6564_v3 = vmul.f32 %v9126_v9, %v9125_v24  ;;  %v1031_v20 = vadd.f32 %v1015_v10, %v998_v2  ;;  %v9128_v14 = vld [vmem:[#allocation56_spill] sm:$0xff]  ;;  %v9129_v36 = vld [vmem:[#allocation85_spill] sm:$0xff] }
 0x1ad   : > { %v6568_v40 = vmul.f32 %v8704_v7, %v9127_v23  ;;  %v1254_v38 = vadd.f32 %v1238_v13, %v1221_v62  ;;  %v6572_v35 = vmul.f32 %v8708_v63, %v6544_v29  ;;  %v808_v17 = vadd.f32 %v792_v22, %v775_v52  ;;  %v9130_v9 = vld [vmem:[#allocation81_spill] sm:$0xff]  ;;  %v6589_v22 = vld [vmem:[%s4105_s10 + $0xac] sm:$0xff] }
 0x1ae   : > { %v886_v31 = vmul.f32 %v9093_v6, %v9078_v15  ;;  %v6578_v18 = vmul.f32 %v9129_v36, %v9128_v14  ;;  %v9131_v10 = vld [vmem:[#allocation89_spill] sm:$0xff]  ;;  %v1064_v23 = vadd.f32 %v1048_v26, %v1031_v20  ;;  %9132 = vst [vmem:[#allocation37_spill] sm:$0xff] %v6589_v22  ;;  %v6593_v6 = vmul.f32 %v6589_v22, %v8947_v5  ;;  %v9135_v20 = vld [vmem:[#allocation96_spill] sm:$0xff]  ;;  %v9136_v63 = vld [vmem:[#allocation39_spill] sm:$0xff] }
 0x1af   : > { %v6582_v2 = vmul.f32 %v9131_v10, %v9130_v9  ;;  %v3902_v13 = vld [vmem:[%s4105_s10 + $0x94] sm:$0xff]  ;;  %v1287_v29 = vadd.f32 %v1271_v59, %v1254_v38  ;;  %v841_v52 = vadd.f32 %v825_v48, %v808_v17  ;;  %v919_v15 = vmul.f32 %v6435_v56, %v9084_v55  ;;  %v9133_v9 = vld [vmem:[#allocation94_spill] sm:$0xff] }
 0x1b0   : > { %v6586_v62 = vmul.f32 %v3902_v13, %v8944_v41  ;;  %v9134_v14 = vld [vmem:[#allocation41_spill] sm:$0xff]  ;;  %v6603_v13 = vmul.f32 %v9136_v63, %v9135_v20  ;;  %v1097_v59 = vadd.f32 %v1081_v43, %v1064_v23  ;;  %v6606_v38 = vld [vmem:[%s4105_s10 + $0xc4] sm:$0xff]  ;;  %v2178_v43 = vpop.xlane.xlu2 %2177 }
 0x1b1   : > { %v6599_v26 = vmul.f32 %v9134_v14, %v9133_v9  ;;  %9137 = vst [vmem:[#allocation128_spill] sm:$0xff] %v6606_v38  ;;  %v6610_v22 = vmul.f32 %v6606_v38, %v8951_v16  ;;  %v1320_v48 = vadd.f32 %v6484_v61, %v1287_v29  ;;  %v6614_v17 = vld [vmem:[%s4105_s10 + $0xdc] sm:$0xff]  ;;  %v902_v14 = vadd.f32 %v886_v31, %v841_v52  ;;  %v9145_v52 = vld [vmem:[#allocation64_spill] sm:$0xff] }
 0x1b2   : > { %9138 = vst [vmem:[#allocation92_spill] sm:$0xff] %v6614_v17  ;;  %v6618_v56 = vmul.f32 %v6614_v17, %v9123_v8  ;;  %v6621_v55 = vld [vmem:[%s4105_s10 + $0xe2] sm:$0xff]  ;;  %v1158_v29 = vadd.f32 %v1142_v44, %v1097_v59  ;;  %v3907_v61 = vld [vmem:[%s4105_s10 + $0x98] sm:$0xff] }
 0x1b3   : > { %9140 = vst [vmem:[#allocation29_spill] sm:$0xff] %v6621_v55  ;;  %v952_v63 = vmul.f32 %v6621_v55, %v9088_v0  ;;  %v9141_v23 = vld [vmem:[#allocation102_spill] sm:$0xff]  ;;  %v366_v16 = vmul.f32 %v3907_v61, %v9026_v33  ;;  %v9144_v17 = vld [vmem:[#allocation109_spill] sm:$0xff]  ;;  %v1353_v31 = vadd.f32 %v6503_v45, %v1320_v48  ;;  %v935_v55 = vadd.f32 %v919_v15, %v902_v14  ;;  %v9146_v0 = vld [vmem:[#allocation107_spill] sm:$0xff] }
 0x1b4   : > { %9139 = vst [vmem:[#allocation99_spill] sm:$0xff] %v6618_v56  ;;  %v9142_v5 = vld [vmem:[#allocation22_spill] sm:$0xff]  ;;  %v399_v8 = vmul.f32 %v9144_v17, %v9028_v37  ;;  %v6636_v56 = vmul.f32 %v9125_v24, %v9145_v52  ;;  %v1191_v59 = vadd.f32 %v1175_v46, %v1158_v29  ;;  %v6645_v61 = vld [vmem:[%s4105_s10 + $0x12a] sm:$0xff]  ;;  %v9149_v17 = vld [vmem:[#allocation5_spill] sm:$0xff] }
 0x1b5   : > { %v6627_v38 = vmul.f32 %v9142_v5, %v9141_v23  ;;  %v985_v5 = vmul.f32 %v9092_v21, %v9100_v39  ;;  %9148 = vst [vmem:[#allocation21_spill] sm:$0xff] %v6645_v61  ;;  %v9150_v37 = vld [vmem:[#allocation105_spill] sm:$0xff]  ;;  %v9151_v45 = vld [vmem:[#allocation119_spill] sm:$0xff]  ;;  %v1414_v52 = vadd.f32 %v6518_v1, %v1353_v31  ;;  %v968_v14 = vadd.f32 %v952_v63, %v935_v55  ;;  %v9152_v24 = vld [vmem:[#allocation74_spill] sm:$0xff] }
 0x1b6   : > { %v415_v33 = vadd.f32 %v399_v8, %v366_v16  ;;  %v432_v23 = vmul.f32 %v9150_v37, %v9149_v17  ;;  %v2219_v48 = vmul.f32 %v9151_v45, %v2178_v43  ;;  %v869_v15 = vld [vmem:[%s4105_s10 + $0x142] sm:$0xff]  ;;  %v1018_v39 = vmul.f32 %v9096_v25, %v9152_v24 }
 0x1b7   : > { %9143 = vst [vmem:[#allocation8_spill] sm:$0xff] %v6627_v38  ;;  %v9147_v38 = vld [vmem:[#allocation97_spill] sm:$0xff]  ;;  %v1224_v21 = vadd.f32 %v1208_v19, %v1191_v59  ;;  %v9154_v46 = vld [vmem:[#allocation66_spill] sm:$0xff]  ;;  %v9156_v37 = vld [vmem:[#allocation7_spill] sm:$0xff]  ;;  %v1447_v43 = vadd.f32 %v6537_v49, %v1414_v52  ;;  %v1001_v63 = vadd.f32 %v985_v5, %v968_v14  ;;  %v1051_v19 = vmul.f32 %v9099_v30, %v6645_v61 }
 0x1b8   : > { %v6642_v44 = vmul.f32 %v9147_v38, %v9146_v0  ;;  %v6655_v38 = vld [vmem:[%s4105_s10 + $0x124] sm:$0xff]  ;;  %v6659_v29 = vmul.f32 %v9129_v36, %v9154_v46  ;;  %v448_v16 = vadd.f32 %v432_v23, %v415_v33  ;;  %v1084_v46 = vmul.f32 %v8674_v51, %v869_v15  ;;  %v3908_v33 = vld [vmem:[%s4105_s10 + $0xf8] sm:$0xff]  ;;  %v9162_v15 = vld [vmem:[#allocation12_spill] sm:$0xff] }
 0x1b9   : > { %9153 = vst [vmem:[#allocation30_spill] sm:$0xff] %v6655_v38  ;;  %v9155_v8 = vld [vmem:[#allocation6_spill] sm:$0xff]  ;;  %v9158_v31 = vld [vmem:[#allocation55_spill] sm:$0xff]  ;;  %v1257_v59 = vadd.f32 %v6551_v47, %v1224_v21  ;;  %v1480_v52 = vadd.f32 %v6541_v11, %v1447_v43  ;;  %v6680_v5 = vmul.f32 %v9131_v10, %v6655_v38  ;;  %v1034_v14 = vadd.f32 %v1018_v39, %v1001_v63  ;;  %v9167_v38 = vld [vmem:[#allocation17_spill] sm:$0xff] }
 0x1ba   : > { %v465_v17 = vmul.f32 %v9156_v37, %v9155_v8  ;;  %v9157_v1 = vld [vmem:[#allocation70_spill] sm:$0xff]  ;;  %v9160_v8 = vld [vmem:[#allocation91_spill] sm:$0xff]  ;;  %v1145_v21 = vmul.f32 %v9106_v42, %v8927_v54  ;;  %v1178_v39 = vmul.f32 %v6471_v34, %v8930_v50 }
 0x1bb   : > { %v6666_v55 = vmul.f32 %v9158_v31, %v9157_v1  ;;  %v9159_v23 = vld [vmem:[#allocation10_spill] sm:$0xff]  ;;  %v6675_v49 = vsub.f32 %v9160_v8, %v2219_v48  ;;  %v1290_v61 = vadd.f32 %v6555_v53, %v1257_v59  ;;  %v1513_v48 = vadd.f32 %v6560_v57, %v1480_v52  ;;  %v9164_v11 = vld [vmem:[#allocation75_spill] sm:$0xff]  ;;  %v3910_v53 = vld [vmem:[%s4105_s10 + $0x95] sm:$0xff] }
 0x1bc   : > { %v481_v45 = vadd.f32 %v465_v17, %v448_v16  ;;  %v498_v37 = vmul.f32 %v3908_v33, %v9159_v23  ;;  %v3909_v17 = vld [vmem:[%s4105_s10 + $0x110] sm:$0xff]  ;;  %v9163_v8 = vld [vmem:[#allocation26_spill] sm:$0xff]  ;;  %v1067_v33 = vadd.f32 %v1051_v19, %v1034_v14  ;;  %v9165_v59 = vld [vmem:[#allocation111_spill] sm:$0xff]  ;;  %v1211_v19 = vmul.f32 %v9103_v60, %v5910_v4 }
 0x1bd   : > { %9161 = vst [vmem:[#allocation114_spill] sm:$0xff] %v6675_v49  ;;  %v531_v16 = vmul.f32 %v3909_v17, %v9162_v15  ;;  %v6690_v43 = vmul.f32 %v9164_v11, %v9163_v8  ;;  %v1323_v42 = vadd.f32 %v6568_v40, %v1290_v61  ;;  %v564_v57 = vmul.f32 %v9043_v32, %v9165_v59  ;;  %v3911_v14 = vld [vmem:[%s4105_s10 + $0x99] sm:$0xff]  ;;  %v6708_v61 = vld [vmem:[%s4105_s10 + $0x12b] sm:$0xff] }
 0x1be   : > { %v514_v47 = vadd.f32 %v498_v37, %v481_v45  ;;  %v6697_v45 = vmul.f32 %v3910_v53, %v9133_v9  ;;  %v1546_v37 = vadd.f32 %v6564_v3, %v1513_v48  ;;  %v1100_v52 = vadd.f32 %v1084_v46, %v1067_v33  ;;  %9166 = vst [vmem:[#allocation36_spill] sm:$0xff] %v6708_v61  ;;  %v1128_v53 = vld [vmem:[%s4105_s10 + $0x143] sm:$0xff]  ;;  %v3912_v59 = vld [vmem:[%s4105_s10 + $0xb1] sm:$0xff] }
 0x1bf   : > { %v625_v17 = vmul.f32 %v3911_v14, %v9045_v28  ;;  %v1356_v40 = vadd.f32 %v6572_v35, %v1323_v42  ;;  %v658_v3 = vmul.f32 %v3912_v59, %v9167_v38  ;;  %v9168_v48 = vld [vmem:[#allocation90_spill] sm:$0xff]  ;;  %v9170_v14 = vld [vmem:[#allocation67_spill] sm:$0xff] }
 0x1c0   : > { %v547_v63 = vadd.f32 %v531_v16, %v514_v47  ;;  %v1244_v47 = vmul.f32 %v8692_v58, %v6154_v12  ;;  %v1579_v46 = vadd.f32 %v6578_v18, %v1546_v37  ;;  %v9169_v33 = vld [vmem:[#allocation78_spill] sm:$0xff]  ;;  %v1161_v32 = vadd.f32 %v1145_v21, %v1100_v52  ;;  %v6724_v28 = vld [vmem:[%s4105_s10 + $0xad] sm:$0xff] }
 0x1c1   : > { %v6718_v4 = vmul.f32 %v9169_v33, %v9168_v48  ;;  %v1277_v35 = vmul.f32 %v8811_v27, %v9170_v14  ;;  %v1417_v42 = vadd.f32 %v6586_v62, %v1356_v40  ;;  %9171 = vst [vmem:[#allocation89_spill] sm:$0xff] %v6724_v28  ;;  %v9172_v59 = vld [vmem:[#allocation18_spill] sm:$0xff]  ;;  %v9173_v38 = vld [vmem:[#allocation115_spill] sm:$0xff]  ;;  %v1310_v21 = vmul.f32 %v8704_v7, %v6708_v61  ;;  %v9174_v52 = vld [vmem:[#allocation68_spill] sm:$0xff] }
 0x1c2   : > { %v580_v16 = vadd.f32 %v564_v57, %v547_v63  ;;  %v6728_v63 = vmul.f32 %v6724_v28, %v9135_v20  ;;  %v691_v18 = vmul.f32 %v9173_v38, %v9172_v59  ;;  %v1612_v37 = vadd.f32 %v6582_v2, %v1579_v46  ;;  %v9175_v27 = vld [vmem:[#allocation19_spill] sm:$0xff]  ;;  %v9177_v59 = vld [vmem:[#allocation82_spill] sm:$0xff]  ;;  %v9179_v46 = vld [vmem:[#allocation84_spill] sm:$0xff] }
 0x1c3   : > { %v1194_v12 = vadd.f32 %v1178_v39, %v1161_v32  ;;  %v1343_v14 = vmul.f32 %v9174_v52, %v1128_v53  ;;  %v2251_v62 = vmul.f32 %v6675_v49, %v6675_v49  ;;  %v1450_v40 = vadd.f32 %v6593_v6, %v1417_v42  ;;  %v9178_v2 = vld [vmem:[#allocation59_spill] sm:$0xff] }
 0x1c4   : > { %v641_v57 = vadd.f32 %v625_v17, %v580_v16  ;;  %v9176_v17 = vld [vmem:[#allocation110_spill] sm:$0xff]  ;;  %v1673_v38 = vadd.f32 %v6599_v26, %v1612_v37  ;;  %v6744_v32 = vmul.f32 %v9178_v2, %v9177_v59  ;;  %v1404_v61 = vmul.f32 %v9179_v46, %v8944_v41  ;;  %v9180_v6 = vld [vmem:[#allocation47_spill] sm:$0xff]  ;;  %v9192_v41 = vld [vmem:[#allocation88_spill] sm:$0xff] }
 0x1c5   : > { %v724_v16 = vmul.f32 %v9176_v17, %v9175_v27  ;;  %v1227_v39 = vadd.f32 %v1211_v19, %v1194_v12  ;;  %v2279_v53 = vsel %vm2157_vm0, %v2251_v62, 0.0  ;;  %v1483_v49 = vadd.f32 %v6610_v22, %v1450_v40  ;;  %v6754_v26 = vld [vmem:[%s4105_s10 + $0xc5] sm:$0xff] }
 0x1c6   : > { %v674_v28 = vadd.f32 %v658_v3, %v641_v57  ;;  %v9181_v3 = vld [vmem:[#allocation20_spill] sm:$0xff]  ;;  %v1706_v57 = vadd.f32 %v6603_v13, %v1673_v38  ;;  %2280 = vadd.xlane.f32.xlu2 %v2279_v53  ;;  %9182 = vst [vmem:[#allocation94_spill] sm:$0xff] %v6754_v26  ;;  %v9183_v37 = vld [vmem:[#allocation102_spill] sm:$0xff]  ;;  %v9184_v17 = vld [vmem:[#allocation71_spill] sm:$0xff] }
 0x1c7   : > { %v757_v42 = vmul.f32 %v9181_v3, %v9180_v6  ;;  %v1726_v12 = vmul.f32 %v6754_v26, %v9183_v37  ;;  %v1260_v19 = vadd.f32 %v1244_v47, %v1227_v39  ;;  %v9185_v2 = vld [vmem:[#allocation95_spill] sm:$0xff]  ;;  %v9191_v38 = vld [vmem:[#allocation8_spill] sm:$0xff]  ;;  %v9194_v47 = vld [vmem:[#allocation81_spill] sm:$0xff] }
 0x1c8   : > { %v707_v52 = vadd.f32 %v691_v18, %v674_v28  ;;  %v1437_v62 = vmul.f32 %v9185_v2, %v9184_v17  ;;  %v9186_v46 = vld [vmem:[#allocation99_spill] sm:$0xff]  ;;  %v9187_v28 = vld [vmem:[#allocation56_spill] sm:$0xff]  ;;  %v9188_v18 = vld [vmem:[#allocation73_spill] sm:$0xff]  ;;  %v1739_v53 = vadd.f32 %v9191_v38, %v1706_v57 }
 0x1c9   : > { %v1516_v22 = vadd.f32 %v9186_v46, %v1483_v49  ;;  %v1470_v40 = vmul.f32 %v9188_v18, %v9187_v28  ;;  %v9189_v3 = vld [vmem:[#allocation35_spill] sm:$0xff]  ;;  %v1293_v26 = vadd.f32 %v1277_v35, %v1260_v19  ;;  %v9195_v39 = vld [vmem:[#allocation77_spill] sm:$0xff]  ;;  %v9199_v28 = vld [vmem:[#allocation24_spill] sm:$0xff] }
 0x1ca   : > { %v740_v6 = vadd.f32 %v724_v16, %v707_v52  ;;  %v9190_v27 = vld [vmem:[#allocation23_spill] sm:$0xff]  ;;  %v1503_v2 = vmul.f32 %v9195_v39, %v9194_v47  ;;  %v6772_v46 = vld [vmem:[%s4105_s10 + $0xdd] sm:$0xff]  ;;  %v9201_v19 = vld [vmem:[#allocation40_spill] sm:$0xff] }
 0x1cb   : > { %v790_v13 = vmul.f32 %v9190_v27, %v9189_v3  ;;  %v9193_v7 = vld [vmem:[#allocation63_spill] sm:$0xff]  ;;  %v1549_v49 = vadd.f32 %v6636_v56, %v1516_v22  ;;  %9196 = vst [vmem:[#allocation41_spill] sm:$0xff] %v6772_v46  ;;  %v1759_v52 = vmul.f32 %v6772_v46, %v9146_v0  ;;  %v9200_v35 = vld [vmem:[#allocation121_spill] sm:$0xff]  ;;  %v1326_v47 = vadd.f32 %v1310_v21, %v1293_v26  ;;  %v9203_v56 = vld [vmem:[#allocation80_spill] sm:$0xff] }
 0x1cc   : > { %v1949_v58 = vmul.f32 %v9193_v7, %v9192_v41  ;;  %v6777_v16 = vld [vmem:[%s4105_s10 + $0x12c] sm:$0xff]  ;;  %v773_v3 = vadd.f32 %v757_v42, %v740_v6  ;;  %v1772_v7 = vadd.f32 %v6642_v44, %v1739_v53  ;;  %v1982_v27 = vmul.f32 %v9201_v19, %v9200_v35  ;;  %v9202_v39 = vld [vmem:[#allocation33_spill] sm:$0xff]  ;;  %v9204_v46 = vld [vmem:[#allocation46_spill] sm:$0xff] }
 0x1cd   : > { %9197 = vst [vmem:[#allocation96_spill] sm:$0xff] %v6777_v16  ;;  %v9198_v57 = vld [vmem:[#allocation83_spill] sm:$0xff]  ;;  %v1536_v22 = vmul.f32 %v9203_v56, %v9202_v39  ;;  %v1582_v18 = vadd.f32 %v6659_v29, %v1549_v49  ;;  %v1792_v17 = vmul.f32 %v9157_v1, %v9204_v46  ;;  %v3916_v6 = vld [vmem:[%s4105_s10 + $0x9a] sm:$0xff]  ;;  %v9206_v53 = vld [vmem:[#allocation124_spill] sm:$0xff]  ;;  %v1359_v26 = vadd.f32 %v1343_v14, %v1326_v47 }
 0x1ce   : > { %v823_v38 = vmul.f32 %v9199_v28, %v9198_v57  ;;  %v1387_v15 = vld [vmem:[%s4105_s10 + $0x144] sm:$0xff]  ;;  %v806_v42 = vadd.f32 %v790_v13, %v773_v3  ;;  %v1805_v44 = vadd.f32 %v6666_v55, %v1772_v7  ;;  %v1569_v39 = vmul.f32 %v9129_v36, %v6777_v16  ;;  %v3917_v3 = vld [vmem:[%s4105_s10 + $0xb2] sm:$0xff] }
 0x1cf   : > { %v9205_v34 = vld [vmem:[#allocation27_spill] sm:$0xff]  ;;  %v1615_v29 = vadd.f32 %v6680_v5, %v1582_v18  ;;  %v9209_v49 = vld [vmem:[#allocation50_spill] sm:$0xff]  ;;  %v9210_v56 = vld [vmem:[#allocation28_spill] sm:$0xff]  ;;  %v1420_v60 = vadd.f32 %v1404_v61, %v1359_v26  ;;  %v1602_v14 = vmul.f32 %v9131_v10, %v1387_v15 }
 0x1d0   : > { %v884_v57 = vmul.f32 %v3916_v6, %v9205_v34  ;;  %v9207_v28 = vld [vmem:[#allocation79_spill] sm:$0xff]  ;;  %v1825_v46 = vmul.f32 %v9164_v11, %v9209_v49  ;;  %v839_v13 = vadd.f32 %v823_v38, %v806_v42  ;;  %v917_v6 = vmul.f32 %v3917_v3, %v9210_v56  ;;  %v9211_v7 = vld [vmem:[#allocation101_spill] sm:$0xff]  ;;  %v9214_v49 = vld [vmem:[#allocation116_spill] sm:$0xff] }
 0x1d1   : > { %v2015_v19 = vmul.f32 %v9207_v28, %v9206_v53  ;;  %v6796_v21 = vld [vmem:[%s4105_s10 + $0x125] sm:$0xff]  ;;  %v1838_v55 = vadd.f32 %v6690_v43, %v1805_v44  ;;  %v9212_v34 = vld [vmem:[#allocation25_spill] sm:$0xff]  ;;  %v1676_v47 = vadd.f32 %v6697_v45, %v1615_v29  ;;  %v1453_v44 = vadd.f32 %v1437_v62, %v1420_v60 }
 0x1d2   : > { %9208 = vst [vmem:[#allocation39_spill] sm:$0xff] %v6796_v21  ;;  %v2048_v28 = vmul.f32 %v9212_v34, %v9211_v7  ;;  %v1858_v5 = vmul.f32 %v9169_v33, %v6796_v21  ;;  %v900_v18 = vadd.f32 %v884_v57, %v839_v13  ;;  %v9213_v16 = vld [vmem:[#allocation31_spill] sm:$0xff]  ;;  %v9215_v3 = vld [vmem:[#allocation42_spill] sm:$0xff]  ;;  %v9217_v36 = vld [vmem:[#allocation97_spill] sm:$0xff]  ;;  %v1696_v60 = vmul.f32 %v9158_v31, %v9135_v20 }
 0x1d3   : > { %v950_v38 = vmul.f32 %v9214_v49, %v9213_v16  ;;  %v1871_v42 = vadd.f32 %v6718_v4, %v1838_v55  ;;  %v9216_v56 = vld [vmem:[#allocation106_spill] sm:$0xff]  ;;  %v1663_v61 = vmul.f32 %v9217_v36, %v9133_v9  ;;  %v1709_v15 = vadd.f32 %v6728_v63, %v1676_v47  ;;  %v9218_v45 = vld [vmem:[#allocation117_spill] sm:$0xff]  ;;  %v9219_v21 = vld [vmem:[#allocation32_spill] sm:$0xff] }
 0x1d4   : > { %v2081_v43 = vmul.f32 %v9216_v56, %v9215_v3  ;;  %v1919_v26 = vmul.f32 %v9218_v45, %v9177_v59  ;;  %v933_v29 = vadd.f32 %v917_v6, %v900_v18  ;;  %v9220_v57 = vld [vmem:[#allocation29_spill] sm:$0xff]  ;;  %v9221_v16 = vld [vmem:[#allocation86_spill] sm:$0xff]  ;;  %v1486_v3 = vadd.f32 %v1470_v40, %v1453_v44  ;;  %v9224_v45 = vld [vmem:[#allocation52_spill] sm:$0xff] }
 0x1d5   : > { %v983_v13 = vmul.f32 %v9220_v57, %v9219_v21  ;;  %v1932_v49 = vadd.f32 %v6744_v32, %v1871_v42  ;;  %v9222_v4 = vld [vmem:[#allocation129_spill] sm:$0xff]  ;;  %v1742_v36 = vadd.f32 %v1726_v12, %v1709_v15  ;;  %v1016_v6 = vmul.f32 %v9096_v25, %v9224_v45  ;;  %v9225_v57 = vld [vmem:[#allocation48_spill] sm:$0xff] }
 0x1d6   : > { %v2114_v55 = vmul.f32 %v9222_v4, %v9221_v16  ;;  %v9223_v63 = vld [vmem:[#allocation53_spill] sm:$0xff]  ;;  %v966_v47 = vadd.f32 %v950_v38, %v933_v29  ;;  %v1985_v32 = vmul.f32 %v9225_v57, %v9200_v35  ;;  %v1519_v42 = vadd.f32 %v1503_v2, %v1486_v3  ;;  %v9228_v3 = vld [vmem:[#allocation108_spill] sm:$0xff] }
 0x1d7   : > { %v1952_v62 = vmul.f32 %v9223_v63, %v9192_v41  ;;  %v1965_v18 = vadd.f32 %v1949_v58, %v1932_v49  ;;  %v1729_v21 = vmul.f32 %v9183_v37, %v9163_v8  ;;  %v1775_v40 = vadd.f32 %v1759_v52, %v1742_v36  ;;  %v6842_v29 = vld [vmem:[%s4105_s10 + $0xde] sm:$0xff]  ;;  %v9227_v49 = vld [vmem:[#allocation3_spill] sm:$0xff]  ;;  %v9231_v45 = vld [vmem:[#allocation60_spill] sm:$0xff] }
 0x1d8   : > { %v1762_v12 = vmul.f32 %v9146_v0, %v9168_v48  ;;  %v999_v44 = vadd.f32 %v983_v13, %v966_v47  ;;  %v1049_v38 = vmul.f32 %v9099_v30, %v9152_v24  ;;  %9226 = vst [vmem:[#allocation22_spill] sm:$0xff] %v6842_v29  ;;  %v2018_v58 = vmul.f32 %v6842_v29, %v9206_v53  ;;  %v9229_v36 = vld [vmem:[#allocation21_spill] sm:$0xff]  ;;  %v9230_v47 = vld [vmem:[#allocation4_spill] sm:$0xff] }
 0x1d9   : > { %v1998_v15 = vadd.f32 %v1982_v27, %v1965_v18  ;;  %v1552_v2 = vadd.f32 %v1536_v22, %v1519_v42  ;;  %v367_v8 = vmul.f32 %v9228_v3, %v9227_v49  ;;  %v1808_v63 = vadd.f32 %v1792_v17, %v1775_v40  ;;  %v3919_v57 = vld [vmem:[%s4105_s10 + $0x9b] sm:$0xff]  ;;  %v3920_v40 = vld [vmem:[%s4105_s10 + $0xf0] sm:$0xff] }
 0x1da   : > { %v1032_v52 = vadd.f32 %v1016_v6, %v999_v44  ;;  %v1082_v13 = vmul.f32 %v8674_v51, %v9229_v36  ;;  %v400_v24 = vmul.f32 %v9231_v45, %v9230_v47  ;;  %v1143_v48 = vmul.f32 %v3919_v57, %v8927_v54  ;;  %v9232_v29 = vld [vmem:[#allocation5_spill] sm:$0xff]  ;;  %v9233_v22 = vld [vmem:[#allocation98_spill] sm:$0xff]  ;;  %v9235_v47 = vld [vmem:[#allocation103_spill] sm:$0xff] }
 0x1db   : > { %v2031_v27 = vadd.f32 %v2015_v19, %v1998_v15  ;;  %v1585_v18 = vadd.f32 %v1569_v39, %v1552_v2  ;;  %v433_v42 = vmul.f32 %v9233_v22, %v9232_v29  ;;  %v1841_v49 = vadd.f32 %v1825_v46, %v1808_v63  ;;  %v9234_v44 = vld [vmem:[#allocation6_spill] sm:$0xff]  ;;  %v3921_v39 = vld [vmem:[%s4105_s10 + $0xb3] sm:$0xff]  ;;  %v9236_v63 = vld [vmem:[#allocation51_spill] sm:$0xff] }
 0x1dc   : > { %v1065_v17 = vadd.f32 %v1049_v38, %v1032_v52  ;;  %v416_v6 = vadd.f32 %v400_v24, %v367_v8  ;;  %v466_v3 = vmul.f32 %v3920_v40, %v9234_v44  ;;  %v1795_v19 = vmul.f32 %v9157_v1, %v9235_v47  ;;  %v6863_v45 = vld [vmem:[%s4105_s10 + $0x12d] sm:$0xff]  ;;  %v9237_v52 = vld [vmem:[#allocation54_spill] sm:$0xff]  ;;  %v9239_v40 = vld [vmem:[#allocation13_spill] sm:$0xff] }
 0x1dd   : > { %v2064_v36 = vadd.f32 %v2048_v28, %v2031_v27  ;;  %v1618_v51 = vadd.f32 %v1602_v14, %v1585_v18  ;;  %v1176_v15 = vmul.f32 %v3921_v39, %v8930_v50  ;;  %v1874_v2 = vadd.f32 %v1858_v5, %v1841_v49  ;;  %v3922_v38 = vld [vmem:[%s4105_s10 + $0x108] sm:$0xff]  ;;  %v9238_v24 = vld [vmem:[#allocation122_spill] sm:$0xff]  ;;  %v350_v18 = vld [vmem:[%s4105_s10 + $0x138] sm:$0xff] }
 0x1de   : > { %v1098_v57 = vadd.f32 %v1082_v13, %v1065_v17  ;;  %v449_v46 = vadd.f32 %v433_v42, %v416_v6  ;;  %v499_v29 = vmul.f32 %v3922_v38, %v9159_v23  ;;  %v2051_v28 = vmul.f32 %v9211_v7, %v9236_v63  ;;  %v9240_v13 = vld [vmem:[#allocation12_spill] sm:$0xff]  ;;  %v9241_v44 = vld [vmem:[#allocation58_spill] sm:$0xff] }
 0x1df   : > { %v2097_v8 = vadd.f32 %v2081_v43, %v2064_v36  ;;  %v1679_v14 = vadd.f32 %v1663_v61, %v1618_v51  ;;  %v1209_v27 = vmul.f32 %v9238_v24, %v9237_v52  ;;  %v1935_v22 = vadd.f32 %v1919_v26, %v1874_v2  ;;  %v3923_v43 = vld [vmem:[%s4105_s10 + $0xe3] sm:$0xff]  ;;  %v9245_v2 = vld [vmem:[#allocation49_spill] sm:$0xff] }
 0x1e0   : > { %v1159_v5 = vadd.f32 %v1143_v48, %v1098_v57  ;;  %v482_v49 = vadd.f32 %v466_v3, %v449_v46  ;;  %v532_v42 = vmul.f32 %v9240_v13, %v9239_v40  ;;  %v1828_v23 = vmul.f32 %v9164_v11, %v6863_v45  ;;  %v1646_v61 = vld [vmem:[%s4105_s10 + $0x145] sm:$0xff]  ;;  %v9243_v48 = vld [vmem:[#allocation9_spill] sm:$0xff] }
 0x1e1   : > { %v2130_v17 = vadd.f32 %v2114_v55, %v2097_v8  ;;  %v1712_v6 = vadd.f32 %v1696_v60, %v1679_v14  ;;  %v1242_v36 = vmul.f32 %v3923_v43, %v9241_v44  ;;  %v1968_v51 = vadd.f32 %v1952_v62, %v1935_v22  ;;  %v9242_v63 = vld [vmem:[#allocation14_spill] sm:$0xff]  ;;  %v9246_v60 = vld [vmem:[#allocation72_spill] sm:$0xff]  ;;  %v9251_v13 = vld [vmem:[#allocation67_spill] sm:$0xff] }
 0x1e2   : > { %v1192_v39 = vadd.f32 %v1176_v15, %v1159_v5  ;;  %v515_v38 = vadd.f32 %v499_v29, %v482_v49  ;;  %v565_v26 = vmul.f32 %v9242_v63, %v350_v18  ;;  %v2084_v57 = vmul.f32 %v9216_v56, %v9245_v2  ;;  %v9247_v46 = vld [vmem:[#allocation62_spill] sm:$0xff]  ;;  %v9249_v22 = vld [vmem:[#allocation16_spill] sm:$0xff] }
 0x1e3   : > { %v6881_v3 = vadd.f32 %v9243_v48, %v2130_v17  ;;  %v1745_v55 = vadd.f32 %v1729_v21, %v1712_v6  ;;  %v1275_v8 = vmul.f32 %v9247_v46, %v9246_v60  ;;  %v6888_v14 = vld [vmem:[%s4105_s10 + $0x126] sm:$0xff]  ;;  %v2001_v24 = vadd.f32 %v1985_v32, %v1968_v51  ;;  %v9252_v17 = vld [vmem:[#allocation65_spill] sm:$0xff]  ;;  %v9256_v63 = vld [vmem:[#allocation36_spill] sm:$0xff] }
 0x1e4   : > { %9248 = vst [vmem:[#allocation64_spill] sm:$0xff] %v6888_v14  ;;  %v1225_v40 = vadd.f32 %v1209_v27, %v1192_v39  ;;  %v548_v62 = vadd.f32 %v532_v42, %v515_v38  ;;  %v9250_v15 = vld [vmem:[#allocation38_spill] sm:$0xff]  ;;  %v1861_v49 = vmul.f32 %v9169_v33, %v1646_v61  ;;  %v1308_v21 = vmul.f32 %v9252_v17, %v9251_v13  ;;  %v9253_v27 = vld [vmem:[#allocation17_spill] sm:$0xff]  ;;  %v9254_v42 = vld [vmem:[#allocation112_spill] sm:$0xff] }
 0x1e5   : > { %9244 = vst [vmem:[#allocation109_spill] sm:$0xff] %v6881_v3  ;;  %v626_v29 = vmul.f32 %v9250_v15, %v9249_v22  ;;  %v2185_v18 = vsel %vm2157_vm0, %v6881_v3, 0.0  ;;  %v1778_v5 = vadd.f32 %v1762_v12, %v1745_v55  ;;  %v2034_v6 = vadd.f32 %v2018_v58, %v2001_v24  ;;  %v9255_v38 = vld [vmem:[#allocation104_spill] sm:$0xff]  ;;  %v9260_v13 = vld [vmem:[#allocation2_spill] sm:$0xff]  ;;  %v9274_v3 = vld [vmem:[#allocation27_spill] sm:$0xff] }
 0x1e6   : > { %2186 = vadd.xlane.f32.xlu1 %v2185_v18  ;;  %v1258_v43 = vadd.f32 %v1242_v36, %v1225_v40  ;;  %v581_v32 = vadd.f32 %v565_v26, %v548_v62  ;;  %v659_v51 = vmul.f32 %v9254_v42, %v9253_v27  ;;  %v2117_v39 = vmul.f32 %v9222_v4, %v6888_v14  ;;  %v9257_v2 = vld [vmem:[#allocation68_spill] sm:$0xff]  ;;  %v9258_v36 = vld [vmem:[#allocation18_spill] sm:$0xff] }
 0x1e7   : > { %v2249_v12 = vmul.f32 %v9255_v38, %v9255_v38  ;;  %v1811_v61 = vadd.f32 %v1795_v19, %v1778_v5  ;;  %v1341_v55 = vmul.f32 %v9257_v2, %v9256_v63  ;;  %v2067_v60 = vadd.f32 %v2051_v28, %v2034_v6  ;;  %v9259_v26 = vld [vmem:[#allocation118_spill] sm:$0xff]  ;;  %v6908_v62 = vld [vmem:[%s4105_s10 + $0xb6] sm:$0xff]  ;;  %v9261_v6 = vld [vmem:[#allocation19_spill] sm:$0xff] }
 0x1e8   : > { %v1291_v22 = vadd.f32 %v1275_v8, %v1258_v43  ;;  %v642_v58 = vadd.f32 %v626_v29, %v581_v32  ;;  %v692_v24 = vmul.f32 %v9259_v26, %v9258_v36  ;;  %v1922_v15 = vmul.f32 %v6908_v62, %v9177_v59  ;;  %v3925_v18 = vld [vmem:[%s4105_s10 + $0x9c] sm:$0xff]  ;;  %v3926_v8 = vld [vmem:[%s4105_s10 + $0xf1] sm:$0xff] }
 0x1e9   : > { %v1844_v40 = vadd.f32 %v1828_v23, %v1811_v61  ;;  %v1402_v19 = vmul.f32 %v3925_v18, %v9260_v13  ;;  %v2100_v5 = vadd.f32 %v2084_v57, %v2067_v60  ;;  %v725_v29 = vmul.f32 %v3926_v8, %v9261_v6  ;;  %v3927_v42 = vld [vmem:[%s4105_s10 + $0xb4] sm:$0xff]  ;;  %v9262_v61 = vld [vmem:[#allocation71_spill] sm:$0xff] }
 0x1ea   : > { %v1324_v27 = vadd.f32 %v1308_v21, %v1291_v22  ;;  %v675_v28 = vadd.f32 %v659_v51, %v642_v58  ;;  %v2273_v43 = vsel %vm2157_vm0, %v2249_v12, 0.0  ;;  %v1955_v32 = vmul.f32 %v9212_v34, %v9192_v41  ;;  %v3928_v60 = vld [vmem:[%s4105_s10 + $0x109] sm:$0xff]  ;;  %v9264_v12 = vld [vmem:[#allocation73_spill] sm:$0xff] }
 0x1eb   : > { %v1877_v23 = vadd.f32 %v1861_v49, %v1844_v40  ;;  %v1435_v63 = vmul.f32 %v3927_v42, %v9262_v61  ;;  %v2133_v36 = vadd.f32 %v2117_v39, %v2100_v5  ;;  %v9263_v21 = vld [vmem:[#allocation20_spill] sm:$0xff]  ;;  %v6924_v58 = vld [vmem:[%s4105_s10 + $0xe6] sm:$0xff]  ;;  %v609_v8 = vld [vmem:[%s4105_s10 + $0x139] sm:$0xff] }
 0x1ec   : > { %v1357_v26 = vadd.f32 %v1341_v55, %v1324_v27  ;;  %v708_v57 = vadd.f32 %v692_v24, %v675_v28  ;;  %v758_v51 = vmul.f32 %v3928_v60, %v9263_v21  ;;  %v1988_v49 = vmul.f32 %v6924_v58, %v9200_v35  ;;  %v9265_v40 = vld [vmem:[#allocation95_spill] sm:$0xff]  ;;  %v9267_v24 = vld [vmem:[#allocation76_spill] sm:$0xff]  ;;  %v9269_v42 = vld [vmem:[#allocation77_spill] sm:$0xff] }
 0x1ed   : > { %v1938_v22 = vadd.f32 %v1922_v15, %v1877_v23  ;;  %v1468_v18 = vmul.f32 %v9265_v40, %v9264_v12  ;;  %v6932_v6 = vadd.f32 %v9243_v48, %v2133_v36  ;;  %v9268_v5 = vld [vmem:[#allocation23_spill] sm:$0xff]  ;;  %v2021_v28 = vmul.f32 %v9206_v53, %v9221_v16  ;;  %v9270_v36 = vld [vmem:[#allocation24_spill] sm:$0xff] }
 0x1ee   : > { %2274 = vadd.xlane.f32.xlu1 %v2273_v43  ;;  %v1418_v39 = vadd.f32 %v1402_v19, %v1357_v26  ;;  %v741_v55 = vadd.f32 %v725_v29, %v708_v57  ;;  %v791_v27 = vmul.f32 %v9268_v5, %v9267_v24  ;;  %v3930_v23 = vld [vmem:[%s4105_s10 + $0xe4] sm:$0xff]  ;;  %v6943_v40 = vld [vmem:[%s4105_s10 + $0x12e] sm:$0xff]  ;;  %v824_v19 = vmul.f32 %v9270_v36, %v609_v8  ;;  %v9272_v24 = vld [vmem:[#allocation81_spill] sm:$0xff] }
 0x1ef   : > { %9266 = vst [vmem:[#allocation107_spill] sm:$0xff] %v6932_v6  ;;  %v1971_v15 = vadd.f32 %v1955_v32, %v1938_v22  ;;  %v1501_v60 = vmul.f32 %v3930_v23, %v9269_v42  ;;  %v2194_v21 = vsel %vm2157_vm0, %v6932_v6, 0.0  ;;  %v9271_v26 = vld [vmem:[#allocation87_spill] sm:$0xff]  ;;  %v9273_v5 = vld [vmem:[#allocation80_spill] sm:$0xff]  ;;  %v9277_v8 = vld [vmem:[#allocation85_spill] sm:$0xff] }
 0x1f0   : > { %v1451_v48 = vadd.f32 %v1435_v63, %v1418_v39  ;;  %v774_v43 = vadd.f32 %v758_v51, %v741_v55  ;;  %2195 = vadd.xlane.f32.xlu0 %v2194_v21  ;;  %v2054_v32 = vmul.f32 %v9211_v7, %v9271_v26  ;;  %v1905_v57 = vld [vmem:[%s4105_s10 + $0x146] sm:$0xff]  ;;  %v1534_v38 = vmul.f32 %v9273_v5, %v9272_v24  ;;  %v9275_v14 = vld [vmem:[#allocation120_spill] sm:$0xff] }
 0x1f1   : > { %v2004_v29 = vadd.f32 %v1988_v49, %v1971_v15  ;;  %v885_v6 = vmul.f32 %v9275_v14, %v9274_v3  ;;  %v2087_v63 = vmul.f32 %v9216_v56, %v6943_v40  ;;  %v9276_v49 = vld [vmem:[#allocation33_spill] sm:$0xff]  ;;  %v9278_v15 = vld [vmem:[#allocation28_spill] sm:$0xff] }
 0x1f2   : > { %v1484_v22 = vadd.f32 %v1468_v18, %v1451_v48  ;;  %v807_v23 = vadd.f32 %v791_v27, %v774_v43  ;;  %v1567_v39 = vmul.f32 %v9277_v8, %v9276_v49  ;;  %v9279_v18 = vld [vmem:[#allocation127_spill] sm:$0xff]  ;;  %v2120_v27 = vmul.f32 %v9222_v4, %v1905_v57  ;;  %v9280_v36 = vld [vmem:[#allocation96_spill] sm:$0xff] }
 0x1f3   : > { %v2037_v42 = vadd.f32 %v2021_v28, %v2004_v29  ;;  %v918_v21 = vmul.f32 %v9279_v18, %v9278_v15  ;;  %v1600_v3 = vmul.f32 %v9131_v10, %v9280_v36  ;;  %v9281_v28 = vld [vmem:[#allocation31_spill] sm:$0xff]  ;;  %v3932_v15 = vld [vmem:[%s4105_s10 + $0xf2] sm:$0xff] }
 0x1f4   : > { %v1517_v51 = vadd.f32 %v1501_v60, %v1484_v22  ;;  %v840_v55 = vadd.f32 %v824_v19, %v807_v23  ;;  %v9282_v29 = vld [vmem:[#allocation15_spill] sm:$0xff]  ;;  %v3931_v19 = vld [vmem:[%s4105_s10 + $0x9d] sm:$0xff] }
 0x1f5   : > { %v2070_v48 = vadd.f32 %v2054_v32, %v2037_v42  ;;  %v951_v60 = vmul.f32 %v9282_v29, %v9281_v28  ;;  %v1661_v23 = vmul.f32 %v3931_v19, %v9133_v9  ;;  %v9283_v42 = vld [vmem:[#allocation32_spill] sm:$0xff]  ;;  %v3936_v29 = vld [vmem:[%s4105_s10 + $0xe5] sm:$0xff] }
 0x1f6   : > { %v1550_v43 = vadd.f32 %v1534_v38, %v1517_v51  ;;  %v901_v14 = vadd.f32 %v885_v6, %v840_v55  ;;  %v984_v32 = vmul.f32 %v3932_v15, %v9283_v42  ;;  %v3933_v51 = vld [vmem:[%s4105_s10 + $0xb5] sm:$0xff]  ;;  %v3934_v55 = vld [vmem:[%s4105_s10 + $0x10a] sm:$0xff] }
 0x1f7   : > { %v2103_v22 = vadd.f32 %v2087_v63, %v2070_v48  ;;  %v1694_v18 = vmul.f32 %v3933_v51, %v9135_v20  ;;  %v1017_v36 = vmul.f32 %v3934_v55, %v9096_v25  ;;  %v6975_v63 = vld [vmem:[%s7872_s2] ss:$0 sm:$0xff]  ;;  %v1859_v55 = vmul.f32 %v9169_v33, %v6863_v45 }
 0x1f8   : > { %v1583_v24 = vadd.f32 %v1567_v39, %v1550_v43  ;;  %v934_v49 = vadd.f32 %v918_v21, %v901_v14  ;;  %v868_v21 = vld [vmem:[%s4105_s10 + $0x13a] sm:$0xff] }
 0x1f9   : > { %v2136_v57 = vadd.f32 %v2120_v27, %v2103_v22  ;;  %v1727_v27 = vmul.f32 %v9158_v31, %v9183_v37  ;;  %v9288_v51 = vld [vmem:[#allocation34_spill] sm:$0xff] }
 0x1fa   : > { %v1616_v38 = vadd.f32 %v1600_v3, %v1583_v24  ;;  %v967_v6 = vadd.f32 %v951_v60, %v934_v49  ;;  %v9284_v3 = vld [vmem:[#allocation61_spill] sm:$0xff]  ;;  %v1760_v60 = vmul.f32 %v3936_v29, %v9146_v0  ;;  %v9285_v24 = vld [vmem:[#allocation44_spill] sm:$0xff]  ;;  %v9286_v49 = vld [vmem:[#allocation90_spill] sm:$0xff] }
 0x1fb   : > { %v6978_v39 = vadd.f32 %v6975_v63, %v2136_v57  ;;  %v1050_v14 = vmul.f32 %v9099_v30, %v9284_v3  ;;  %v1083_v19 = vmul.f32 %v9285_v24, %v868_v21  ;;  %v1793_v31 = vmul.f32 %v9157_v1, %v9286_v49  ;;  %v9287_v30 = vld [vmem:[#allocation130_spill] sm:$0xff]  ;;  %v9289_v21 = vld [vmem:[#allocation125_spill] sm:$0xff]  ;;  %v3939_v29 = vld [vmem:[%s4105_s10 + $0x10b] sm:$0xff] }
 0x1fc   : > { %v1677_v48 = vadd.f32 %v1661_v23, %v1616_v38  ;;  %v1000_v43 = vadd.f32 %v984_v32, %v967_v6  ;;  %v1144_v42 = vmul.f32 %v9287_v30, %v8927_v54  ;;  %v1826_v57 = vmul.f32 %v9164_v11, %v9235_v47  ;;  %v3937_v54 = vld [vmem:[%s4105_s10 + $0x9e] sm:$0xff]  ;;  %v3938_v47 = vld [vmem:[%s4105_s10 + $0xf3] sm:$0xff] }
 0x1fd   : > { %v2203_v25 = vsel %vm2157_vm0, %v6978_v39, 0.0  ;;  %v1276_v45 = vmul.f32 %v3939_v29, %v9247_v46  ;;  %v2052_v46 = vmul.f32 %v9211_v7, %v9221_v16  ;;  %v9293_v16 = vld [vmem:[#allocation92_spill] sm:$0xff] }
 0x1fe   : > { %2204 = vadd.xlane.f32.xlu2 %v2203_v25  ;;  %v1710_v28 = vadd.f32 %v1694_v18, %v1677_v48  ;;  %v1033_v22 = vadd.f32 %v1017_v36, %v1000_v43  ;;  %v1177_v18 = vmul.f32 %v9288_v51, %v8930_v50  ;;  %v1210_v48 = vmul.f32 %v9289_v21, %v9237_v52  ;;  %v9294_v21 = vld [vmem:[#allocation77_spill] sm:$0xff] }
 0x1ff   : > { %v1920_v43 = vmul.f32 %v3937_v54, %v9177_v59  ;;  %v1953_v50 = vmul.f32 %v6908_v62, %v9192_v41  ;;  %v1986_v52 = vmul.f32 %v9212_v34, %v9200_v35 }
 0x200   : > { %v1743_v23 = vadd.f32 %v1727_v27, %v1710_v28  ;;  %v1066_v15 = vadd.f32 %v1050_v14, %v1033_v22  ;;  %v1243_v14 = vmul.f32 %v3938_v47, %v9241_v44  ;;  %v2019_v44 = vmul.f32 %v6924_v58, %v9206_v53  ;;  %v9292_v58 = vld [vmem:[#allocation128_spill] sm:$0xff]  ;;  %v9295_v47 = vld [vmem:[#allocation30_spill] sm:$0xff] }
 0x202   : > { %v1776_v32 = vadd.f32 %v1760_v60, %v1743_v23  ;;  %v1099_v38 = vadd.f32 %v1083_v19, %v1066_v15  ;;  %v1127_v60 = vld [vmem:[%s4105_s10 + $0x13b] sm:$0xff]  ;;  %v9290_v19 = vld [vmem:[#allocation123_spill] sm:$0xff] }
 0x203   : > { %v1309_v23 = vmul.f32 %v9252_v17, %v9290_v19  ;;  %v1342_v62 = vmul.f32 %v9257_v2, %v1127_v60  ;;  %v2085_v17 = vmul.f32 %v9216_v56, %v9271_v26  ;;  %v2118_v2 = vmul.f32 %v9222_v4, %v6943_v40  ;;  %v3941_v26 = vld [vmem:[%s4105_s10 + $0x10c] sm:$0xff]  ;;  %v9297_v60 = vld [vmem:[#allocation94_spill] sm:$0xff]  ;;  %v9298_v19 = vld [vmem:[#allocation41_spill] sm:$0xff] }
 0x204   : > { %v1809_v6 = vadd.f32 %v1793_v31, %v1776_v32  ;;  %v1160_v36 = vadd.f32 %v1144_v42, %v1099_v38  ;;  %v9291_v42 = vld [vmem:[#allocation37_spill] sm:$0xff]  ;;  %v1436_v38 = vmul.f32 %v9292_v58, %v9262_v61 }
 0x205   : > { %v1403_v34 = vmul.f32 %v9291_v42, %v9260_v13  ;;  %v3940_v13 = vld [vmem:[%s4105_s10 + $0xf4] sm:$0xff] }
 0x206   : > { %v1842_v27 = vadd.f32 %v1826_v57, %v1809_v6  ;;  %v1193_v3 = vadd.f32 %v1177_v18, %v1160_v36  ;;  %v1469_v6 = vmul.f32 %v9293_v16, %v9264_v12 }
 0x208   : > { %v1875_v25 = vadd.f32 %v1859_v55, %v1842_v27  ;;  %v1226_v28 = vadd.f32 %v1210_v48, %v1193_v3  ;;  %v1502_v48 = vmul.f32 %v3940_v13, %v9294_v21  ;;  %v1386_v3 = vld [vmem:[%s4105_s10 + $0x13c] sm:$0xff] }
 0x209   : > { %v9303_v21 = vld [vmem:[#allocation22_spill] sm:$0xff] }
 0x20a   : > { %v1936_v22 = vadd.f32 %v1920_v43, %v1875_v25  ;;  %v1259_v24 = vadd.f32 %v1243_v14, %v1226_v28  ;;  %v1535_v43 = vmul.f32 %v3941_v26, %v9273_v5  ;;  %v1568_v14 = vmul.f32 %v9277_v8, %v9295_v47  ;;  %v9296_v5 = vld [vmem:[#allocation89_spill] sm:$0xff] }
 0x20b   : > { %v1662_v29 = vmul.f32 %v9296_v5, %v9133_v9  ;;  %v9304_v5 = vld [vmem:[#allocation64_spill] sm:$0xff] }
 0x20c   : > { %v1969_v49 = vadd.f32 %v1953_v50, %v1936_v22  ;;  %v1292_v31 = vadd.f32 %v1276_v45, %v1259_v24  ;;  %v1601_v50 = vmul.f32 %v9131_v10, %v1386_v3  ;;  %v1695_v22 = vmul.f32 %v9297_v60, %v9135_v20  ;;  %v7047_v24 = vpop.xlane.xlu2 %2271  ;;  %v3942_v10 = vld [vmem:[%s4105_s10 + $0xf5] sm:$0xff]  ;;  %v9299_v20 = vld [vmem:[#allocation39_spill] sm:$0xff] }
 0x20e   : > { %v2002_v15 = vadd.f32 %v1986_v52, %v1969_v49  ;;  %v1325_v30 = vadd.f32 %v1309_v23, %v1292_v31  ;;  %v2263_v52 = vpop.xlane.xlu0 %2262  ;;  %v1728_v23 = vmul.f32 %v9298_v19, %v9183_v37 }
 0x210   : > { %v2035_v32 = vadd.f32 %v2019_v44, %v2002_v15  ;;  %v1358_v57 = vadd.f32 %v1342_v62, %v1325_v30  ;;  %v1761_v44 = vmul.f32 %v3942_v10, %v9146_v0  ;;  %v3943_v62 = vld [vmem:[%s4105_s10 + $0x10d] sm:$0xff]  ;;  %v1645_v15 = vld [vmem:[%s4105_s10 + $0x13d] sm:$0xff]  ;;  %v1827_v30 = vmul.f32 %v9164_v11, %v9299_v20 }
 0x211   : > { %v1794_v9 = vmul.f32 %v3943_v62, %v9157_v1  ;;  %v1860_v37 = vmul.f32 %v9169_v33, %v1645_v15 }
 0x212   : > { %v2068_v51 = vadd.f32 %v2052_v46, %v2035_v32  ;;  %v1419_v18 = vadd.f32 %v1403_v34, %v1358_v57 }
 0x214   : > { %v2101_v55 = vadd.f32 %v2085_v17, %v2068_v51  ;;  %v1452_v36 = vadd.f32 %v1436_v38, %v1419_v18  ;;  %v2190_v34 = vpop.xlane.xlu2 %2189  ;;  %v9300_v17 = vld [vmem:[#allocation119_spill] sm:$0xff]  ;;  %v9301_v51 = vld [vmem:[#allocation113_spill] sm:$0xff] }
 0x215   : > { %v2223_v58 = vmul.f32 %v9300_v17, %v2190_v34  ;;  %v3944_v38 = vld [vmem:[%s4105_s10 + $0xae] sm:$0xff]  ;;  %v9302_v18 = vld [vmem:[#allocation57_spill] sm:$0xff] }
 0x216   : > { %v2134_v27 = vadd.f32 %v2118_v2, %v2101_v55  ;;  %v1485_v54 = vadd.f32 %v1469_v6, %v1452_v36  ;;  %v2181_v42 = vpop.xlane.xlu0 %2180  ;;  %v1921_v1 = vmul.f32 %v3944_v38, %v9177_v59  ;;  %v3945_v6 = vld [vmem:[%s4105_s10 + $0xc6] sm:$0xff]  ;;  %v2266_v36 = vpop.xlane.xlu1 %2265  ;;  %v1987_v59 = vmul.f32 %v9303_v21, %v9200_v35  ;;  %v9306_v38 = vld [vmem:[#allocation93_spill] sm:$0xff] }
 0x217   : > { %v2220_v57 = vmul.f32 %v9300_v17, %v2181_v42  ;;  %v7067_v16 = vsub.f32 %v9302_v18, %v2223_v58  ;;  %v1954_v33 = vmul.f32 %v3945_v6, %v9192_v41  ;;  %v2310_v3 = vmul.f32 %v2266_v36, %v9300_v17  ;;  %v9307_v6 = vld [vmem:[#allocation126_spill] sm:$0xff] }
 0x218   : > { %v7036_v61 = vadd.f32 %v6975_v63, %v2134_v27  ;;  %v1518_v40 = vadd.f32 %v1502_v48, %v1485_v54  ;;  %v2309_v27 = vmul.f32 %v2263_v52, %v9300_v17 }
 0x219   : > { %v7064_v2 = vsub.f32 %v9301_v51, %v2220_v57  ;;  %v2255_v54 = vmul.f32 %v7067_v16, %v7067_v16 }
 0x21a   : > { %v2197_v12 = vsel %vm2157_vm0, %v7036_v61, 0.0  ;;  %v1551_v25 = vadd.f32 %v1535_v43, %v1518_v40  ;;  %v3946_v43 = vld [vmem:[%s4105_s10 + $0xf6] sm:$0xff] }
 0x21b   : > { %2198 = vadd.xlane.f32.xlu1 %v2197_v12  ;;  %v2252_v55 = vmul.f32 %v7064_v2, %v7064_v2  ;;  %v2020_v41 = vmul.f32 %v3946_v43, %v9206_v53  ;;  %v2291_v40 = vsel %vm2157_vm0, %v2255_v54, 0.0 }
 0x21c   : > { %v1584_v28 = vadd.f32 %v1568_v14, %v1551_v25  ;;  %v3947_v14 = vld [vmem:[%s4105_s10 + $0x10e] sm:$0xff]  ;;  %2292 = vadd.xlane.f32.xlu2 %v2291_v40  ;;  %v1904_v25 = vld [vmem:[%s4105_s10 + $0x13e] sm:$0xff] }
 0x21d   : > { %v2282_v48 = vsel %vm2157_vm0, %v2252_v55, 0.0  ;;  %v2053_v35 = vmul.f32 %v3947_v14, %v9211_v7  ;;  %v9308_v55 = vld [vmem:[#allocation69_spill] sm:$0xff] }
 0x21e   : > { %v1617_v45 = vadd.f32 %v1601_v50, %v1584_v28  ;;  %2283 = vadd.xlane.f32.xlu0 %v2282_v48  ;;  %v2184_v12 = vpop.xlane.xlu0 %2183  ;;  %v2325_v50 = vadd.f32 1e-06, %v2309_v27  ;;  %v2269_v57 = vpop.xlane.xlu1 %2268  ;;  %v9309_v27 = vld [vmem:[#allocation109_spill] sm:$0xff] }
 0x21f   : > { %v2221_v60 = vmul.f32 %v9300_v17, %v2184_v12  ;;  %v9310_v12 = vld [vmem:[#allocation107_spill] sm:$0xff] }
 0x220   : > { %v1678_v8 = vadd.f32 %v1662_v29, %v1617_v45  ;;  %v2086_v29 = vmul.f32 %v9216_v56, %v9304_v5  ;;  %v2326_v45 = vadd.f32 1e-06, %v2310_v3  ;;  %3740 = vrsqrt.f32 %v2325_v50  ;;  %v3673_v56 = vld [vmem:[%s7873_s3 + $0x8] sm:$0xff] }
 0x221   : > { %2575 = vmatpush.bf16.msra.mxu0 %v3673_v56  ;;  %3682 = vmatpush.bf16.msra.mxu3 %v3673_v56  ;;  %vm2347_vm4 = vweird.f32 %v2325_v50  ;;  %v2311_v3 = vmul.f32 %v2269_v57, %v9300_v17 }
 0x222   : > { %v1711_v49 = vadd.f32 %v1695_v22, %v1678_v8  ;;  %v2119_v22 = vmul.f32 %v9222_v4, %v1904_v25  ;;  %3742 = vrsqrt.f32 %v2326_v45  ;;  %v9305_v8 = vld [vmem:[#allocation100_spill] sm:$0xff]  ;;  %vm2357_vm6 = vweird.f32 %v2326_v45 }
 0x223   : > { %v7091_v19 = vsub.f32 %v9305_v8, %v2221_v60  ;;  %v2327_v14 = vadd.f32 1e-06, %v2311_v3 }
 0x224   : > { %v1744_v31 = vadd.f32 %v1728_v23, %v1711_v49 }
 0x225   : > { %v2253_v10 = vmul.f32 %v7091_v19, %v7091_v19  ;;  %vm2367_vm12 = vweird.f32 %v2327_v14 }
 0x226   : > { %v1777_v46 = vadd.f32 %v1761_v44, %v1744_v31  ;;  %v3741_v49 = vpop.eup %3740  ;;  %v3672_v31 = vld [vmem:[%s7873_s3] sm:$0xff]  ;;  %v2193_v42 = vpop.xlane.xlu0 %2192 }
 0x227   : > { %v2342_v62 = vmul.f32 %v3741_v49, %v2325_v50  ;;  %2576 = vmatpush.bf16.msra.mxu0 %v3672_v31  ;;  %3683 = vmatpush.bf16.msra.mxu3 %v3672_v31  ;;  %vm2348_vm2 = vweird.f32 %v3741_v49  ;;  %v2278_v50 = vpop.xlane.xlu2 %2277 }
 0x228   : > { %v1810_v32 = vadd.f32 %v1794_v9, %v1777_v46  ;;  %v3743_v44 = vpop.eup %3742  ;;  %vm2349_vm5 = vmor %vm2347_vm4, %vm2348_vm2 }
 0x229   : > { %v2352_v9 = vmul.f32 %v3743_v44, %v2326_v45  ;;  %v2343_v15 = vmul.f32 %v3741_v49, %v2342_v62  ;;  %vm2358_vm3 = vweird.f32 %v3743_v44  ;;  %v2314_v45 = vmul.f32 %v2278_v50, %v9300_v17 }
 0x22a   : > { %v1843_v0 = vadd.f32 %v1827_v30, %v1810_v32  ;;  %vm2359_vm7 = vmor %vm2357_vm6, %vm2358_vm3 }
 0x22b   : > { %v2353_v46 = vmul.f32 %v3743_v44, %v2352_v9  ;;  %v2344_v20 = vmul.f32 0.5, %v2343_v15  ;;  %v2330_v8 = vadd.f32 1e-06, %v2314_v45 }
 0x22c   : > { %v1876_v11 = vadd.f32 %v1860_v37, %v1843_v0  ;;  %v2224_v37 = vmul.f32 %v9300_v17, %v2193_v42 }
 0x22d   : > { %v2354_v30 = vmul.f32 0.5, %v2353_v46  ;;  %v2345_v34 = vsub.f32 1.5, %v2344_v20  ;;  %vm2397_vm14 = vweird.f32 %v2330_v8 }
 0x22e   : > { %v1937_v13 = vadd.f32 %v1921_v1, %v1876_v11  ;;  %v7109_v1 = vsub.f32 %v9306_v38, %v2224_v37 }
 0x22f   : > { %v2355_v32 = vsub.f32 1.5, %v2354_v30  ;;  %v2346_v58 = vmul.f32 %v3741_v49, %v2345_v34 }
 0x230   : > { %v1970_v26 = vadd.f32 %v1954_v33, %v1937_v13  ;;  %v2256_v51 = vmul.f32 %v7109_v1, %v7109_v1 }
 0x231   : > { %v2356_v0 = vmul.f32 %v3743_v44, %v2355_v32  ;;  %v2350_v18 = vsel %vm2349_vm5, %v3741_v49, %v2346_v58 }
 0x232   : > { %v2003_v47 = vadd.f32 %v1987_v59, %v1970_v26  ;;  %v2501_v33 = vmul.f32 %v2350_v18, %v9307_v6  ;;  %v2294_v13 = vsel %vm2157_vm0, %v2256_v51, 0.0  ;;  %v9312_v51 = vld [vmem:[#allocation45_spill] sm:$0xff] }
 0x233   : > { %v2360_v11 = vsel %vm2359_vm7, %v3743_v44, %v2356_v0  ;;  %v9311_v0 = vld [vmem:[#allocation43_spill] sm:$0xff] }
 0x234   : > { %v2036_v28 = vadd.f32 %v2020_v41, %v2003_v47  ;;  %v2502_v36 = vmul.f32 %v2360_v11, %v9308_v55  ;;  %v2312_v41 = vmul.f32 %v7047_v24, %v9300_v17 }
 0x236   : > { %v2069_v53 = vadd.f32 %v2053_v35, %v2036_v28  ;;  %v2517_v21 = vpack.c.bf16 %v2502_v36, %v2501_v33  ;;  %v2328_v40 = vadd.f32 1e-06, %v2312_v41 }
 0x238   : > { %v2102_v52 = vadd.f32 %v2086_v29, %v2069_v53  ;;  %3598 = vmatmul.msk.bf16.vlgmr.msra.gmra.mxu0 %vm2157_vm0, %v2517_v21  ;;  %3744 = vrsqrt.f32 %v2328_v40  ;;  %vm2377_vm8 = vweird.f32 %v2328_v40 }
 0x239   : > { %3746 = vrsqrt.f32 %v2327_v14  ;;  %v2281_v44 = vpop.xlane.xlu2 %2280 }
 0x23a   : > { %v2135_v7 = vadd.f32 %v2119_v22, %v2102_v52  ;;  %3748 = vrsqrt.f32 %v2330_v8  ;;  %v2315_v45 = vmul.f32 %v2281_v44, %v9300_v17 }
 0x23c   : > { %v7094_v23 = vadd.f32 %v6975_v63, %v2135_v7  ;;  %v2285_v63 = vsel %vm2157_vm0, %v2253_v10, 0.0 }
 0x23d   : > { %2286 = vadd.xlane.f32.xlu0 %v2285_v63 }
 0x23e   : > { %v2200_v4 = vsel %vm2157_vm0, %v7094_v23, 0.0  ;;  %v3745_v28 = vpop.eup %3744 }
 0x23f   : > { %2201 = vadd.xlane.f32.xlu1 %v2200_v4  ;;  %v3747_v29 = vpop.eup %3746  ;;  %v2372_v60 = vmul.f32 %v3745_v28, %v2328_v40  ;;  %vm2378_vm9 = vweird.f32 %v3745_v28 }
 0x240   : > { %v2362_v52 = vmul.f32 %v3747_v29, %v2327_v14  ;;  %v3749_v63 = vpop.eup %3748  ;;  %vm2379_vm10 = vmor %vm2377_vm8, %vm2378_vm9  ;;  %vm2368_vm11 = vweird.f32 %v3747_v29  ;;  %v9313_v14 = vld [vmem:[#allocation104_spill] sm:$0xff] }
 0x241   : > { %v2373_v7 = vmul.f32 %v3745_v28, %v2372_v60  ;;  %v2392_v46 = vmul.f32 %v3749_v63, %v2330_v8  ;;  %vm2369_vm13 = vmor %vm2367_vm12, %vm2368_vm11  ;;  %vm2398_vm15 = vweird.f32 %v3749_v63 }
 0x242   : > { %v2363_v49 = vmul.f32 %v3747_v29, %v2362_v52  ;;  %vm2399_vm1 = vmor %vm2397_vm14, %vm2398_vm15 }
 0x243   : > { %v2374_v10 = vmul.f32 0.5, %v2373_v7  ;;  %v2393_v34 = vmul.f32 %v3749_v63, %v2392_v46 }
 0x244   : > { %v2364_v4 = vmul.f32 0.5, %v2363_v49 }
 0x245   : > { %2295 = vadd.xlane.f32.xlu0 %v2294_v13  ;;  %v2375_v31 = vsub.f32 1.5, %v2374_v10  ;;  %v2394_v11 = vmul.f32 0.5, %v2393_v34 }
 0x246   : > { %v2365_v62 = vsub.f32 1.5, %v2364_v4 }
 0x247   : > { %v2376_v15 = vmul.f32 %v3745_v28, %v2375_v31  ;;  %v2395_v36 = vsub.f32 1.5, %v2394_v11 }
 0x248   : > { %v2366_v20 = vmul.f32 %v3747_v29, %v2365_v62 }
 0x249   : > { %v2380_v32 = vsel %vm2379_vm10, %v3745_v28, %v2376_v15 }
 0x24a   : > { %v2370_v58 = vsel %vm2369_vm13, %v3747_v29, %v2366_v20  ;;  %v2504_v18 = vmul.f32 %v2380_v32, %v9312_v51 }
 0x24b   : > { %v2503_v38 = vmul.f32 %v2370_v58, %v9311_v0 }
 0x24d   : > { %v2518_v33 = vpack.c.bf16 %v2504_v18, %v2503_v38 }
 0x24f   : > { %3599 = vmatmul.msk.bf16.gmra.mxu0 %vm2157_vm0, %v2518_v33 }
 0x259   : > { %v2187_v59 = vpop.xlane.xlu1 %2186 }
 0x25a   : > { %v2222_v48 = vmul.f32 %v9300_v17, %v2187_v59 }
 0x25c   : > { %v7119_v54 = vsub.f32 %v9309_v27, %v2222_v48 }
 0x25e   : > { %v2254_v26 = vmul.f32 %v7119_v54, %v7119_v54 }
 0x260   : > { %v2288_v43 = vsel %vm2157_vm0, %v2254_v26, 0.0  ;;  %v2396_v26 = vmul.f32 %v3749_v63, %v2395_v36 }
 0x261   : > { %2289 = vadd.xlane.f32.xlu1 %v2288_v43  ;;  %v2275_v5 = vpop.xlane.xlu1 %2274 }
 0x262   : > { %v2313_v53 = vmul.f32 %v2275_v5, %v9300_v17  ;;  %v2400_v40 = vsel %vm2399_vm1, %v3749_v63, %v2396_v26 }
 0x263   : > { %v2196_v47 = vpop.xlane.xlu0 %2195 }
 0x264   : > { %v2225_v35 = vmul.f32 %v9300_v17, %v2196_v47  ;;  %v2329_v56 = vadd.f32 1e-06, %v2313_v53 }
 0x266   : > { %v7129_v25 = vsub.f32 %v9310_v12, %v2225_v35  ;;  %3750 = vrsqrt.f32 %v2329_v56  ;;  %vm2387_vm2 = vweird.f32 %v2329_v56  ;;  %v9314_v35 = vld [vmem:[#allocation11_spill] sm:$0xff] }
 0x267   : > { %v2506_v12 = vmul.f32 %v2400_v40, %v9314_v35 }
 0x268   : > { %v2257_v24 = vmul.f32 %v7129_v25, %v7129_v25 }
 0x26a   : > { %v2297_v22 = vsel %vm2157_vm0, %v2257_v24, 0.0 }
 0x26b   : > { %2298 = vadd.xlane.f32.xlu1 %v2297_v22  ;;  %v2331_v22 = vadd.f32 1e-06, %v2315_v45 }
 0x26c   : > { %v3751_v9 = vpop.eup %3750 }
 0x26d   : > { %v2382_v30 = vmul.f32 %v3751_v9, %v2329_v56  ;;  %vm2388_vm3 = vweird.f32 %v3751_v9  ;;  %3752 = vrsqrt.f32 %v2331_v22  ;;  %vm2407_vm5 = vweird.f32 %v2331_v22 }
 0x26e   : > { %vm2389_vm4 = vmor %vm2387_vm2, %vm2388_vm3 }
 0x26f   : > { %v2383_v57 = vmul.f32 %v3751_v9, %v2382_v30 }
 0x271   : > { %v2205_v42 = vpop.xlane.xlu2 %2204  ;;  %v2384_v55 = vmul.f32 0.5, %v2383_v57 }
 0x272   : > { %v2228_v37 = vmul.f32 %v9300_v17, %v2205_v42  ;;  %v9315_v42 = vld [vmem:[#allocation114_spill] sm:$0xff] }
 0x273   : > { %v2385_v48 = vsub.f32 1.5, %v2384_v55  ;;  %v3753_v7 = vpop.eup %3752 }
 0x274   : > { %v7140_v6 = vsub.f32 %v6978_v39, %v2228_v37  ;;  %v2402_v49 = vmul.f32 %v3753_v7, %v2331_v22  ;;  %vm2408_vm6 = vweird.f32 %v3753_v7 }
 0x275   : > { %v2386_v41 = vmul.f32 %v3751_v9, %v2385_v48  ;;  %vm2409_vm7 = vmor %vm2407_vm5, %vm2408_vm6 }
 0x276   : > { %v2260_v59 = vmul.f32 %v7140_v6, %v7140_v6  ;;  %v2403_v44 = vmul.f32 %v3753_v7, %v2402_v49 }
 0x277   : > { %v2390_v47 = vsel %vm2389_vm4, %v3751_v9, %v2386_v41 }
 0x278   : > { %v2306_v39 = vsel %vm2157_vm0, %v2260_v59, 0.0 }
 0x279   : > { %2307 = vadd.xlane.f32.xlu1 %v2306_v39 }
 0x28e   : > { %v2199_v13 = vpop.xlane.xlu1 %2198 }
 0x28f   : > { %v2226_v21 = vmul.f32 %v9300_v17, %v2199_v13  ;;  %v2293_v57 = vpop.xlane.xlu2 %2292 }
 0x290   : > { %v2319_v51 = vmul.f32 %v2293_v57, %v9300_v17 }
 0x291   : > { %v7147_v27 = vsub.f32 %v7036_v61, %v2226_v21  ;;  %v2505_v61 = vmul.f32 %v2390_v47, %v9313_v14  ;;  %v2284_v29 = vpop.xlane.xlu0 %2283 }
 0x292   : > { %v2316_v60 = vmul.f32 %v2284_v29, %v9300_v17  ;;  %v2335_v55 = vadd.f32 1e-06, %v2319_v51 }
 0x293   : > { %v2258_v43 = vmul.f32 %v7147_v27, %v7147_v27  ;;  %v2519_v50 = vpack.c.bf16 %v2506_v12, %v2505_v61 }
 0x294   : > { %v2332_v8 = vadd.f32 1e-06, %v2316_v60  ;;  %vm2447_vm11 = vweird.f32 %v2335_v55 }
 0x295   : > { %v2300_v3 = vsel %vm2157_vm0, %v2258_v43, 0.0  ;;  %3600 = vmatmul.msk.bf16.gmra.mxu0 %vm2157_vm0, %v2519_v50 }
 0x296   : > { %2301 = vadd.xlane.f32.xlu2 %v2300_v3  ;;  %3754 = vrsqrt.f32 %v2332_v8  ;;  %vm2417_vm9 = vweird.f32 %v2332_v8 }
 0x29c   : > { %v3755_v56 = vpop.eup %3754 }
 0x29d   : > { %v2412_v10 = vmul.f32 %v3755_v56, %v2332_v8  ;;  %vm2418_vm8 = vweird.f32 %v3755_v56 }
 0x29e   : > { %vm2419_vm10 = vmor %vm2417_vm9, %vm2418_vm8 }
 0x29f   : > { %v2413_v4 = vmul.f32 %v3755_v56, %v2412_v10 }
 0x2a1   : > { %v2414_v31 = vmul.f32 0.5, %v2413_v4 }
 0x2a3   : > { %v2415_v62 = vsub.f32 1.5, %v2414_v31 }
 0x2a5   : > { %v2416_v15 = vmul.f32 %v3755_v56, %v2415_v62 }
 0x2a7   : > { %v2420_v30 = vsel %vm2419_vm10, %v3755_v56, %v2416_v15 }
 0x2a8   : > { %v2508_v32 = vmul.f32 %v2420_v30, %v7064_v2  ;;  %v7175_v2 = vld [vmem:[%s7874_s4] ss:$0 sm:$0xff] }
 0x2b0   : > { %v2287_v46 = vpop.xlane.xlu0 %2286 }
 0x2b1   : > { %v2317_v0 = vmul.f32 %v2287_v46, %v9300_v17 }
 0x2b2   : > { %v2202_v28 = vpop.xlane.xlu1 %2201 }
 0x2b3   : > { %v2227_v5 = vmul.f32 %v9300_v17, %v2202_v28  ;;  %v2333_v33 = vadd.f32 1e-06, %v2317_v0 }
 0x2b5   : > { %v7159_v24 = vsub.f32 %v7094_v23, %v2227_v5  ;;  %v2404_v23 = vmul.f32 0.5, %v2403_v44  ;;  %3756 = vrsqrt.f32 %v2333_v33  ;;  %v2578_v21 = vpop.f32.mrf.mxu0  ;;  %vm2427_vm13 = vweird.f32 %v2333_v33 }
 0x2b6   : > { %3758 = vrsqrt.f32 %v2335_v55  ;;  %v7178_v59 = vadd.f32 %v7175_v2, %v2578_v21 }
 0x2b7   : > { %v2259_v53 = vmul.f32 %v7159_v24, %v7159_v24  ;;  %v2405_v63 = vsub.f32 1.5, %v2404_v23 }
 0x2b8   : > { %v2296_v58 = vpop.xlane.xlu0 %2295  ;;  %v7183_v26 = vmul.f32 0.70710677, %v7178_v59 }
 0x2b9   : > { %v2303_v52 = vsel %vm2157_vm0, %v2259_v53, 0.0  ;;  %v2406_v9 = vmul.f32 %v3753_v7, %v2405_v63  ;;  %v2320_v18 = vmul.f32 %v2296_v58, %v9300_v17 }
 0x2ba   : > { %2304 = vadd.xlane.f32.xlu0 %v2303_v52  ;;  %v2650_v14 = vmul.f32 %v7183_v26, %v7183_v26 }
 0x2bb   : > { %v2410_v20 = vsel %vm2409_vm7, %v3753_v7, %v2406_v9  ;;  %v2336_v36 = vadd.f32 1e-06, %v2320_v18  ;;  %v3757_v48 = vpop.eup %3756 }
 0x2bc   : > { %v2507_v34 = vmul.f32 %v2410_v20, %v9315_v42  ;;  %v7180_v39 = vpop.eup %3758  ;;  %v2422_v3 = vmul.f32 %v3757_v48, %v2333_v33  ;;  %v7193_v5 = vmin.f32 %v2650_v14, 16.0  ;;  %vm2428_vm14 = vweird.f32 %v3757_v48 }
 0x2bd   : > { %3760 = vrsqrt.f32 %v2336_v36  ;;  %v2442_v47 = vmul.f32 %v7180_v39, %v2335_v55  ;;  %v2580_v22 = vpop.f32.mrf.mxu0  ;;  %vm2448_vm12 = vweird.f32 %v7180_v39  ;;  %vm2457_vm1 = vweird.f32 %v2336_v36  ;;  %vm2429_vm3 = vmor %vm2427_vm13, %vm2428_vm14 }
 0x2be   : > { %v2520_v37 = vpack.c.bf16 %v2508_v32, %v2507_v34  ;;  %v2423_v12 = vmul.f32 %v3757_v48, %v2422_v3  ;;  %v2652_v8 = vmul.f32 2.1237322e-06, %v7193_v5  ;;  %v7200_v7 = vadd.f32 %v7175_v2, %v2580_v22  ;;  %vm7212_vm15 = vmor %vm2447_vm11, %vm2448_vm12 }
 0x2bf   : > { %v2443_v28 = vmul.f32 %v7180_v39, %v2442_v47  ;;  %v2663_v55 = vmul.f32 3.8918573e-05, %v7193_v5 }
 0x2c0   : > { %3601 = vmatmul.msk.bf16.gmra.mxu0 %vm2157_vm0, %v2520_v37  ;;  %v2424_v60 = vmul.f32 0.5, %v2423_v12  ;;  %v7204_v44 = vmul.f32 0.70710677, %v7200_v7  ;;  %v2653_v23 = vadd.f32 0.00028619796, %v2652_v8 }
 0x2c1   : > { %v2444_v52 = vmul.f32 0.5, %v2443_v28 }
 0x2c2   : > { %v2425_v10 = vsub.f32 1.5, %v2424_v60  ;;  %v2690_v9 = vmul.f32 %v7204_v44, %v7204_v44  ;;  %v2654_v30 = vmul.f32 %v2653_v23, %v7193_v5 }
 0x2c3   : > { %v7185_v43 = vpop.eup %3760  ;;  %v2445_v4 = vsub.f32 1.5, %v2444_v52 }
 0x2c4   : > { %v2452_v35 = vmul.f32 %v7185_v43, %v2336_v36  ;;  %v2426_v62 = vmul.f32 %v3757_v48, %v2425_v10  ;;  %vm2458_vm2 = vweird.f32 %v7185_v43  ;;  %v7219_v32 = vmin.f32 %v2690_v9, 16.0 }
 0x2c5   : > { %v2446_v46 = vmul.f32 %v7180_v39, %v2445_v4  ;;  %vm2459_vm6 = vmor %vm2457_vm1, %vm2458_vm2  ;;  %v2655_v0 = vadd.f32 0.0036580483, %v2654_v30 }
 0x2c6   : > { %v2453_v45 = vmul.f32 %v7185_v43, %v2452_v35  ;;  %v2430_v37 = vsel %vm2429_vm3, %v3757_v48, %v2426_v62  ;;  %v2692_v21 = vmul.f32 2.1237322e-06, %v7219_v32  ;;  %v2703_v22 = vmul.f32 3.8918573e-05, %v7219_v32 }
 0x2c7   : > { %v2450_v51 = vsel %vm7212_vm15, %v7180_v39, %v2446_v46  ;;  %v2664_v39 = vadd.f32 0.001143296, %v2663_v55 }
 0x2c8   : > { %v2454_v49 = vmul.f32 0.5, %v2453_v45  ;;  %v2511_v47 = vmul.f32 %v2450_v51, %v7067_v16  ;;  %v2693_v35 = vadd.f32 0.00028619796, %v2692_v21  ;;  %v2704_v10 = vadd.f32 0.001143296, %v2703_v22 }
 0x2ca   : > { %v2455_v63 = vsub.f32 1.5, %v2454_v49  ;;  %v2694_v60 = vmul.f32 %v2693_v35, %v7219_v32 }
 0x2cc   : > { %v2456_v34 = vmul.f32 %v7185_v43, %v2455_v63  ;;  %v2583_v12 = vpop.f32.mrf.mxu0 }
 0x2cd   : > { %v7243_v28 = vadd.f32 %v7175_v2, %v2583_v12  ;;  %v3680_v12 = vld [vmem:[%s7875_s5 + $0x30] sm:$0xff] }
 0x2ce   : > { %v2460_v33 = vsel %vm2459_vm6, %v7185_v43, %v2456_v34 }
 0x2cf   : > { %v2512_v3 = vmul.f32 %v2460_v33, %v7109_v1 }
 0x2d1   : > { %v2522_v14 = vpack.c.bf16 %v2512_v3, %v2511_v47 }
 0x2d3   : > { %3603 = vmatmul.msk.bf16.vlgmr.msra.gmra.mxu3 %vm2157_vm0, %v2522_v14  ;;  %v3681_v14 = vld [vmem:[%s7875_s5 + $0x38] sm:$0xff] }
 0x2d4   : > { %v2290_v38 = vpop.xlane.xlu1 %2289  ;;  %3398 = vmatpush.bf16.msra.mxu1 %v3681_v14  ;;  %3684 = vmatpush.bf16.msra.mxu2 %v3681_v14 }
 0x2d5   : > { %v2318_v11 = vmul.f32 %v2290_v38, %v9300_v17 }
 0x2d7   : > { %v2334_v13 = vadd.f32 1e-06, %v2318_v11  ;;  %v2509_v11 = vmul.f32 %v2430_v37, %v7091_v19  ;;  %v2656_v19 = vmul.f32 %v2655_v0, %v7193_v5 }
 0x2d8   : > { %3399 = vmatpush.bf16.msra.mxu1 %v3680_v12  ;;  %3685 = vmatpush.bf16.msra.mxu2 %v3680_v12 }
 0x2d9   : > { %3762 = vrsqrt.f32 %v2334_v13  ;;  %vm2437_vm5 = vweird.f32 %v2334_v13 }
 0x2de   : > { %v2299_v40 = vpop.xlane.xlu1 %2298 }
 0x2df   : > { %v3763_v41 = vpop.eup %3762  ;;  %v2321_v50 = vmul.f32 %v2299_v40, %v9300_v17 }
 0x2e0   : > { %v2432_v61 = vmul.f32 %v3763_v41, %v2334_v13  ;;  %vm2438_vm4 = vweird.f32 %v3763_v41 }
 0x2e1   : > { %v7196_v53 = vadd.f32 1e-06, %v2321_v50  ;;  %vm2439_vm7 = vmor %vm2437_vm5, %vm2438_vm4  ;;  %v2657_v50 = vadd.f32 0.05243302, %v2656_v19 }
 0x2e2   : > { %v2433_v29 = vmul.f32 %v3763_v41, %v2432_v61  ;;  %v2665_v61 = vmul.f32 %v2664_v39, %v7193_v5 }
 0x2e3   : > { %3764 = vrsqrt.f32 %v7196_v53  ;;  %vm2467_vm8 = vweird.f32 %v7196_v53  ;;  %v2658_v4 = vmul.f32 %v2657_v50, %v7193_v5 }
 0x2e4   : > { %v2434_v56 = vmul.f32 0.5, %v2433_v29  ;;  %v2666_v1 = vadd.f32 0.014752088, %v2665_v61 }
 0x2e5   : > { %v2659_v0 = vadd.f32 0.18741608, %v2658_v4 }
 0x2e6   : > { %v2435_v31 = vsub.f32 1.5, %v2434_v56  ;;  %v2667_v29 = vmul.f32 %v2666_v1, %v7193_v5  ;;  %v7250_v56 = vmul.f32 0.70710677, %v7243_v28 }
 0x2e7   : > { %v2660_v19 = vmul.f32 %v2659_v0, %v7193_v5 }
 0x2e8   : > { %v2436_v42 = vmul.f32 %v3763_v41, %v2435_v31  ;;  %v2668_v49 = vadd.f32 0.112945676, %v2667_v29  ;;  %v2695_v31 = vadd.f32 0.0036580483, %v2694_v60  ;;  %v2730_v63 = vmul.f32 %v7250_v56, %v7250_v56 }
 0x2e9   : > { %v7209_v15 = vpop.eup %3764 }
 0x2ea   : > { %v2462_v57 = vmul.f32 %v7209_v15, %v7196_v53  ;;  %v2440_v18 = vsel %vm2439_vm7, %v3763_v41, %v2436_v42  ;;  %vm2468_vm9 = vweird.f32 %v7209_v15  ;;  %v2669_v62 = vmul.f32 %v2668_v49, %v7193_v5  ;;  %v2585_v42 = vpop.f32.mrf.mxu0 }
 0x2eb   : > { %v2510_v48 = vmul.f32 %v2440_v18, %v7119_v54  ;;  %v2705_v53 = vmul.f32 %v2704_v10, %v7219_v32  ;;  %vm7260_vm10 = vmor %vm2467_vm8, %vm2468_vm9  ;;  %v7264_v30 = vmin.f32 %v2730_v63, 16.0  ;;  %v3679_v63 = vld [vmem:[%s7875_s5 + $0x28] sm:$0xff] }
 0x2ec   : > { %v2308_v13 = vpop.xlane.xlu1 %2307  ;;  %v2463_v40 = vmul.f32 %v7209_v15, %v2462_v57  ;;  %v2670_v34 = vadd.f32 0.4994258, %v2669_v62  ;;  %3400 = vmatpush.bf16.msra.mxu1 %v3679_v63  ;;  %3686 = vmatpush.bf16.msra.mxu2 %v3679_v63 }
 0x2ed   : > { %v2521_v41 = vpack.c.bf16 %v2510_v48, %v2509_v11  ;;  %v2324_v43 = vmul.f32 %v2308_v13, %v9300_v17  ;;  %v2706_v37 = vadd.f32 0.014752088, %v2705_v53  ;;  %v2743_v13 = vmul.f32 3.8918573e-05, %v7264_v30 }
 0x2ee   : > { %v2464_v54 = vmul.f32 0.5, %v2463_v40  ;;  %v2671_v51 = vmul.f32 %v2670_v34, %v7193_v5  ;;  %v2732_v35 = vmul.f32 2.1237322e-06, %v7264_v30 }
 0x2ef   : > { %3602 = vmatmul.msk.bf16.gmra.mxu0 %vm2157_vm0, %v2521_v41  ;;  %v7240_v16 = vadd.f32 1e-06, %v2324_v43  ;;  %v2707_v18 = vmul.f32 %v2706_v37, %v7219_v32  ;;  %v2744_v47 = vadd.f32 0.001143296, %v2743_v13 }
 0x2f0   : > { %v2465_v52 = vsub.f32 1.5, %v2464_v54  ;;  %v7281_v21 = vadd.f32 1.0, %v2671_v51 }
 0x2f1   : > { %v2708_v48 = vadd.f32 0.112945676, %v2707_v18  ;;  %vm2497_vm3 = vweird.f32 %v7240_v16 }
 0x2f2   : > { %v2466_v9 = vmul.f32 %v7209_v15, %v2465_v52  ;;  %vm2678_vm15 = vweird.f32 %v7281_v21 }
 0x2f3   : > { %v2709_v61 = vmul.f32 %v2708_v48, %v7219_v32 }
 0x2f5   : > { %v2710_v50 = vadd.f32 0.4994258, %v2709_v61 }
 0x2f7   : > { %v2711_v49 = vmul.f32 %v2710_v50, %v7219_v32 }
 0x2f9   : > { %v7318_v62 = vadd.f32 1.0, %v2711_v49 }
 0x2fb   : > { %vm2718_vm6 = vweird.f32 %v7318_v62 }
 0x309   : > { %v2302_v58 = vpop.xlane.xlu2 %2301 }
 0x30a   : > { %v2322_v38 = vmul.f32 %v2302_v58, %v9300_v17  ;;  %v7267_v58 = vadd.f32 %v7175_v2, %v2585_v42 }
 0x30c   : > { %v2338_v36 = vadd.f32 1e-06, %v2322_v38  ;;  %v2696_v38 = vmul.f32 %v2695_v31, %v7219_v32  ;;  %v7275_v55 = vmul.f32 0.70710677, %v7267_v58 }
 0x30e   : > { %3766 = vrsqrt.f32 %v2338_v36  ;;  %vm2477_vm11 = vweird.f32 %v2338_v36  ;;  %v2770_v3 = vmul.f32 %v7275_v55, %v7275_v55  ;;  %v2697_v43 = vadd.f32 0.05243302, %v2696_v38 }
 0x30f   : > { %3768 = vrsqrt.f32 %v7240_v16  ;;  %v2682_v38 = vand.u32 2147483647, %v7281_v21 }
 0x310   : > { %3770 = vrcp.f32 %v7281_v21  ;;  %v7297_v1 = vmin.f32 %v2770_v3, 16.0  ;;  %v2698_v22 = vmul.f32 %v2697_v43, %v7219_v32 }
 0x311   : > { %3772 = vrcp.f32 %v7318_v62  ;;  %vm2683_vm2 = vcmp.eq.f32.partialorder %v2682_v38, 8.507059e+37 }
 0x312   : > { %v2772_v4 = vmul.f32 2.1237322e-06, %v7297_v1  ;;  %v2699_v34 = vadd.f32 0.18741608, %v2698_v22 }
 0x314   : > { %v3767_v45 = vpop.eup %3766  ;;  %v2773_v51 = vadd.f32 0.00028619796, %v2772_v4  ;;  %v2724_v4 = vand.u32 2147483648, %v7318_v62 }
 0x315   : > { %v2472_v8 = vmul.f32 %v3767_v45, %v2338_v36  ;;  %vm2478_vm12 = vweird.f32 %v3767_v45  ;;  %v7272_v11 = vpop.eup %3768  ;;  %v2470_v36 = vsel %vm7260_vm10, %v7209_v15, %v2466_v9  ;;  %v2783_v9 = vmul.f32 3.8918573e-05, %v7297_v1 }
 0x316   : > { %vm2479_vm13 = vmor %vm2477_vm11, %vm2478_vm12  ;;  %v2513_v39 = vmul.f32 %v2470_v36, %v7129_v25  ;;  %v2492_v15 = vmul.f32 %v7272_v11, %v7240_v16  ;;  %v2588_v25 = vpop.f32.mrf.mxu0  ;;  %v3771_v52 = vpop.eup %3770  ;;  %v2774_v14 = vmul.f32 %v2773_v51, %v7297_v1  ;;  %vm2498_vm4 = vweird.f32 %v7272_v11  ;;  %v3675_v51 = vld [vmem:[%s7875_s5 + $0x8] sm:$0xff] }
 0x317   : > { %v2473_v23 = vmul.f32 %v3767_v45, %v2472_v8  ;;  %v7300_v5 = vadd.f32 %v7175_v2, %v2588_v25  ;;  %v2733_v8 = vadd.f32 0.00028619796, %v2732_v35  ;;  %v2674_v31 = vmul.f32 %v3771_v52, %v7281_v21  ;;  %vm7382_vm7 = vmor %vm2497_vm3, %vm2498_vm4 }
 0x318   : > { %v2493_v60 = vmul.f32 %v7272_v11, %v2492_v15  ;;  %vm2679_vm14 = vweird.f32 %v3771_v52  ;;  %v2784_v48 = vadd.f32 0.001143296, %v2783_v9  ;;  %v2775_v22 = vadd.f32 0.0036580483, %v2774_v14 }
 0x319   : > { %v2474_v46 = vmul.f32 0.5, %v2473_v23  ;;  %v7312_v23 = vmul.f32 0.70710677, %v7300_v5  ;;  %v2734_v37 = vmul.f32 %v2733_v8, %v7264_v30  ;;  %v2675_v0 = vsub.f32 1.0, %v2674_v31  ;;  %vm2680_vm1 = vmor %vm2678_vm15, %vm2679_vm14  ;;  %v3676_v8 = vld [vmem:[%s7875_s5 + $0x10] sm:$0xff] }
 0x31a   : > { %v2494_v42 = vmul.f32 0.5, %v2493_v60  ;;  %v2785_v25 = vmul.f32 %v2784_v48, %v7297_v1  ;;  %v2722_v9 = vand.u32 2147483647, %v7318_v62  ;;  %v2725_v16 = vor.u32 1.1754944e-38, %v2724_v4 }
 0x31b   : > { %v2475_v57 = vsub.f32 1.5, %v2474_v46  ;;  %v7322_v46 = vmul.f32 0.5, %v7178_v59  ;;  %v2810_v18 = vmul.f32 %v7312_v23, %v7312_v23  ;;  %v3678_v59 = vld [vmem:[%s7875_s5 + $0x20] sm:$0xff]  ;;  %v2676_v36 = vmul.f32 %v3771_v52, %v2675_v0 }
 0x31c   : > { %v2495_v3 = vsub.f32 1.5, %v2494_v42  ;;  %3401 = vmatpush.bf16.msra.mxu1 %v3678_v59  ;;  %3687 = vmatpush.bf16.msra.mxu2 %v3678_v59  ;;  %v2786_v63 = vadd.f32 0.014752088, %v2785_v25  ;;  %v2776_v0 = vmul.f32 %v2775_v22, %v7297_v1  ;;  %vm2723_vm9 = vcmp.eq.f32.partialorder %v2722_v9, 8.507059e+37 }
 0x31d   : > { %v2476_v33 = vmul.f32 %v3767_v45, %v2475_v57  ;;  %v2677_v43 = vadd.f32 %v3771_v52, %v2676_v36  ;;  %v7348_v61 = vmin.f32 %v2810_v18, 16.0 }
 0x31e   : > { %v2590_v57 = vpop.f32.mrf.mxu0  ;;  %v2496_v60 = vmul.f32 %v7272_v11, %v2495_v3  ;;  %v2777_v14 = vadd.f32 0.05243302, %v2776_v0 }
 0x31f   : > { %v2480_v40 = vsel %vm2479_vm13, %v3767_v45, %v2476_v33  ;;  %v2661_v45 = vadd.f32 1.1283791, %v2660_v19  ;;  %v7331_v33 = vadd.f32 %v7175_v2, %v2590_v57  ;;  %v2735_v19 = vadd.f32 0.0036580483, %v2734_v37 }
 0x320   : > { %v2514_v41 = vmul.f32 %v2480_v40, %v7147_v27  ;;  %v2745_v27 = vmul.f32 %v2744_v47, %v7264_v30  ;;  %v7339_v40 = vmul.f32 0.5, %v7200_v7  ;;  %v2700_v47 = vmul.f32 %v2699_v34, %v7219_v32  ;;  %v3677_v7 = vld [vmem:[%s7875_s5 + $0x18] sm:$0xff] }
 0x321   : > { %v2662_v20 = vmul.f32 %v2661_v45, %v7183_v26  ;;  %v2684_v26 = vand.u32 2147483648, %v7281_v21  ;;  %v7345_v15 = vmul.f32 0.70710677, %v7331_v33  ;;  %v2681_v35 = vsel %vm2680_vm1, %v3771_v52, %v2677_v43  ;;  %3402 = vmatpush.bf16.msra.mxu1 %v3677_v7  ;;  %3688 = vmatpush.bf16.msra.mxu2 %v3677_v7 }
 0x322   : > { %v2523_v54 = vpack.c.bf16 %v2514_v41, %v2513_v39  ;;  %v2746_v29 = vadd.f32 0.014752088, %v2745_v27  ;;  %v2701_v50 = vadd.f32 1.1283791, %v2700_v47  ;;  %v2812_v52 = vmul.f32 2.1237322e-06, %v7348_v61 }
 0x323   : > { %v2685_v32 = vor.u32 1.1754944e-38, %v2684_v26  ;;  %v2850_v45 = vmul.f32 %v7345_v15, %v7345_v15  ;;  %v2823_v42 = vmul.f32 3.8918573e-05, %v7348_v61 }
 0x324   : > { %3604 = vmatmul.msk.bf16.gmra.mxu3 %vm2157_vm0, %v2523_v54  ;;  %v2747_v10 = vmul.f32 %v2746_v29, %v7264_v30  ;;  %v2736_v29 = vmul.f32 %v2735_v19, %v7264_v30  ;;  %v2813_v38 = vadd.f32 0.00028619796, %v2812_v52 }
 0x325   : > { %v2686_v27 = vsel %vm2683_vm2, %v2685_v32, %v2681_v35  ;;  %v7373_v37 = vmin.f32 %v2850_v45, 16.0  ;;  %3403 = vmatpush.bf16.msra.mxu1 %v3676_v8  ;;  %3689 = vmatpush.bf16.msra.mxu2 %v3676_v8  ;;  %v2824_v36 = vadd.f32 0.001143296, %v2823_v42 }
 0x326   : > { %v2748_v53 = vadd.f32 0.112945676, %v2747_v10  ;;  %v2687_v10 = vmul.f32 %v2686_v27, %v2662_v20  ;;  %v2737_v34 = vadd.f32 0.05243302, %v2736_v29  ;;  %v2778_v20 = vmul.f32 %v2777_v14, %v7297_v1 }
 0x328   : > { %v2749_v13 = vmul.f32 %v2748_v53, %v7264_v30  ;;  %v3606_v26 = vclamps-f32 %v2687_v10, 1.0  ;;  %v2738_v47 = vmul.f32 %v2737_v34, %v7264_v30 }
 0x329   : > { %3404 = vmatpush.bf16.msra.mxu1 %v3675_v51  ;;  %3690 = vmatpush.bf16.msra.mxu2 %v3675_v51 }
 0x32a   : > { %v2750_v54 = vadd.f32 0.4994258, %v2749_v13  ;;  %v2702_v13 = vmul.f32 %v2701_v50, %v7204_v44  ;;  %v3674_v44 = vld [vmem:[%s7875_s5] sm:$0xff]  ;;  %v3290_v35 = vadd.f32 1.0, %v3606_v26  ;;  %v2739_v52 = vadd.f32 0.18741608, %v2738_v47 }
 0x32c   : > { %v2751_v31 = vmul.f32 %v2750_v54, %v7264_v30  ;;  %v2825_v54 = vmul.f32 %v2824_v36, %v7348_v61  ;;  %v2740_v47 = vmul.f32 %v2739_v52, %v7264_v30 }
 0x32d   : > { %v2305_v39 = vpop.xlane.xlu0 %2304  ;;  %3405 = vmatpush.bf16.msra.mxu1 %v3674_v44  ;;  %3691 = vmatpush.bf16.msra.mxu2 %v3674_v44 }
 0x32e   : > { %v2323_v41 = vmul.f32 %v2305_v39, %v9300_v17  ;;  %v3773_v17 = vpop.eup %3772  ;;  %v7376_v57 = vadd.f32 1.0, %v2751_v31  ;;  %v2852_v39 = vmul.f32 2.1237322e-06, %v7373_v37  ;;  %v2826_v45 = vadd.f32 0.014752088, %v2825_v54 }
 0x32f   : > { %v2714_v12 = vmul.f32 %v3773_v17, %v7318_v62  ;;  %vm2719_vm5 = vweird.f32 %v3773_v17  ;;  %v2787_v62 = vmul.f32 %v2786_v63, %v7297_v1 }
 0x330   : > { %v7354_v21 = vadd.f32 1e-06, %v2323_v41  ;;  %vm2720_vm8 = vmor %vm2718_vm6, %vm2719_vm5  ;;  %v2500_v41 = vsel %vm7382_vm7, %v7272_v11, %v2496_v60  ;;  %v2853_v50 = vadd.f32 0.00028619796, %v2852_v39  ;;  %v2863_v60 = vmul.f32 3.8918573e-05, %v7373_v37 }
 0x331   : > { %v2715_v49 = vsub.f32 1.0, %v2714_v12  ;;  %v2788_v32 = vadd.f32 0.112945676, %v2787_v62  ;;  %v2516_v29 = vmul.f32 %v2500_v41, %v7140_v6  ;;  %v3306_v6 = vmul.f32 %v3290_v35, %v7322_v46 }
 0x332   : > { %3774 = vrsqrt.f32 %v7354_v21  ;;  %vm2487_vm10 = vweird.f32 %v7354_v21  ;;  %v2827_v63 = vmul.f32 %v2826_v45, %v7348_v61  ;;  %v2864_v34 = vadd.f32 0.001143296, %v2863_v60 }
 0x333   : > { %v2716_v53 = vmul.f32 %v3773_v17, %v2715_v49  ;;  %3776 = vrcp.f32 %v7376_v57  ;;  %v2789_v27 = vmul.f32 %v2788_v32, %v7297_v1  ;;  %v2854_v0 = vmul.f32 %v2853_v50, %v7373_v37 }
 0x334   : > { %v2865_v62 = vmul.f32 %v2864_v34, %v7373_v37  ;;  %v2779_v41 = vadd.f32 0.18741608, %v2778_v20  ;;  %vm2758_vm14 = vweird.f32 %v7376_v57  ;;  %v2762_v14 = vand.u32 2147483647, %v7376_v57 }
 0x335   : > { %v2717_v18 = vadd.f32 %v3773_v17, %v2716_v53  ;;  %v2790_v31 = vadd.f32 0.4994258, %v2789_v27  ;;  %v2741_v32 = vadd.f32 1.1283791, %v2740_v47  ;;  %v2621_v47 = vmul.f32 0.5, %v7267_v58 }
 0x336   : > { %vm2763_vm1 = vcmp.eq.f32.partialorder %v2762_v14, 8.507059e+37 }
 0x337   : > { %v2721_v3 = vsel %vm2720_vm8, %v3773_v17, %v2717_v18  ;;  %v2814_v17 = vmul.f32 %v2813_v38, %v7348_v61  ;;  %v2828_v38 = vadd.f32 0.112945676, %v2827_v63 }
 0x338   : > { %v3775_v59 = vpop.eup %3774  ;;  %v2726_v19 = vsel %vm2723_vm9, %v2725_v16, %v2721_v3 }
 0x339   : > { %v2482_v48 = vmul.f32 %v3775_v59, %v7354_v21  ;;  %v2727_v7 = vmul.f32 %v2726_v19, %v2702_v13  ;;  %vm2488_vm11 = vweird.f32 %v3775_v59  ;;  %v7407_v12 = vpop.eup %3776  ;;  %v2815_v4 = vadd.f32 0.0036580483, %v2814_v17 }
 0x33a   : > { %v2754_v49 = vmul.f32 %v7407_v12, %v7376_v57  ;;  %vm7415_vm12 = vmor %vm2487_vm10, %vm2488_vm11  ;;  %v2791_v21 = vmul.f32 %v2790_v31, %v7297_v1  ;;  %v2829_v36 = vmul.f32 %v2828_v38, %v7348_v61  ;;  %v2866_v13 = vadd.f32 0.014752088, %v2865_v62 }
 0x33b   : > { %v2483_v43 = vmul.f32 %v3775_v59, %v2482_v48  ;;  %v3607_v11 = vclamps-f32 %v2727_v7, 1.0  ;;  %v2816_v26 = vmul.f32 %v2815_v4, %v7348_v61  ;;  %v2855_v48 = vadd.f32 0.0036580483, %v2854_v0 }
 0x33c   : > { %v2755_v42 = vsub.f32 1.0, %v2754_v49  ;;  %v2792_v16 = vadd.f32 1.0, %v2791_v21  ;;  %vm2759_vm13 = vweird.f32 %v7407_v12  ;;  %v2830_v39 = vadd.f32 0.4994258, %v2829_v36 }
 0x33d   : > { %v2484_v25 = vmul.f32 0.5, %v2483_v43  ;;  %v3291_v8 = vadd.f32 1.0, %v3607_v11  ;;  %v2817_v19 = vadd.f32 0.05243302, %v2816_v26  ;;  %v2867_v43 = vmul.f32 %v2866_v13, %v7373_v37  ;;  %vm2760_vm15 = vmor %vm2758_vm14, %vm2759_vm13 }
 0x33e   : > { %v2756_v46 = vmul.f32 %v7407_v12, %v2755_v42  ;;  %3778 = vrcp.f32 %v2792_v16  ;;  %v2831_v44 = vmul.f32 %v2830_v39, %v7348_v61  ;;  %v2856_v30 = vmul.f32 %v2855_v48, %v7373_v37 }
 0x33f   : > { %v2485_v22 = vsub.f32 1.5, %v2484_v25  ;;  %v3307_v9 = vmul.f32 %v3291_v8, %v7339_v40  ;;  %v2868_v7 = vadd.f32 0.112945676, %v2867_v43  ;;  %v2780_v25 = vmul.f32 %v2779_v41, %v7297_v1 }
 0x340   : > { %v2832_v35 = vadd.f32 1.0, %v2831_v44  ;;  %v2818_v11 = vmul.f32 %v2817_v19, %v7348_v61  ;;  %v2804_v49 = vand.u32 2147483648, %v2792_v16  ;;  %vm2798_vm3 = vweird.f32 %v2792_v16 }
 0x341   : > { %v2486_v53 = vmul.f32 %v3775_v59, %v2485_v22  ;;  %v3322_v18 = vpack.c.bf16 %v3307_v9, %v3306_v6  ;;  %v2869_v50 = vmul.f32 %v2868_v7, %v7373_v37  ;;  %v2742_v22 = vmul.f32 %v2741_v32, %v7250_v56 }
 0x342   : > { %3780 = vrcp.f32 %v2832_v35  ;;  %v2781_v8 = vadd.f32 1.1283791, %v2780_v25  ;;  %v2802_v6 = vand.u32 2147483647, %v2792_v16  ;;  %v2805_v56 = vor.u32 1.1754944e-38, %v2804_v49 }
 0x343   : > { %v2490_v51 = vsel %vm7415_vm12, %v3775_v59, %v2486_v53  ;;  %3406 = vmatmul.bf16.vlgmr.msra.gmra.mxu1 %v3322_v18  ;;  %v2757_v59 = vadd.f32 %v7407_v12, %v2756_v46  ;;  %v2870_v60 = vadd.f32 0.4994258, %v2869_v50  ;;  %v2844_v62 = vand.u32 2147483648, %v2832_v35 }
 0x344   : > { %v2515_v40 = vmul.f32 %v2490_v51, %v7159_v24  ;;  %v2764_v24 = vand.u32 2147483648, %v7376_v57  ;;  %v3779_v54 = vpop.eup %3778  ;;  %v2782_v20 = vmul.f32 %v2781_v8, %v7275_v55  ;;  %vm2803_vm5 = vcmp.eq.f32.partialorder %v2802_v6, 8.507059e+37 }
 0x345   : > { %v2761_v17 = vsel %vm2760_vm15, %v7407_v12, %v2757_v59  ;;  %v2794_v57 = vmul.f32 %v3779_v54, %v2792_v16  ;;  %v2819_v12 = vadd.f32 0.18741608, %v2818_v11  ;;  %v2871_v10 = vmul.f32 %v2870_v60, %v7373_v37 }
 0x346   : > { %v2524_v3 = vpack.c.bf16 %v2516_v29, %v2515_v40  ;;  %v2765_v27 = vor.u32 1.1754944e-38, %v2764_v24  ;;  %v2857_v29 = vadd.f32 0.05243302, %v2856_v30  ;;  %vm2799_vm2 = vweird.f32 %v3779_v54 }
 0x347   : > { %v2795_v52 = vsub.f32 1.0, %v2794_v57  ;;  %v2872_v63 = vadd.f32 1.0, %v2871_v10  ;;  %v2820_v42 = vmul.f32 %v2819_v12, %v7348_v61  ;;  %vm2800_vm4 = vmor %vm2798_vm3, %vm2799_vm2  ;;  %v2842_v16 = vand.u32 2147483647, %v2832_v35  ;;  %v2593_v12 = vpop.f32.mrf.mxu0 }
 0x348   : > { %3605 = vmatmul.msk.bf16.gmra.mxu3 %vm2157_vm0, %v2524_v3  ;;  %v2766_v45 = vsel %vm2763_vm1, %v2765_v27, %v2761_v17  ;;  %v2858_v31 = vmul.f32 %v2857_v29, %v7373_v37  ;;  %v3781_v53 = vpop.eup %3780  ;;  %v2620_v48 = vmul.f32 0.5, %v7243_v28  ;;  %vm2838_vm7 = vweird.f32 %v2832_v35 }
 0x349   : > { %v2767_v1 = vmul.f32 %v2766_v45, %v2742_v22  ;;  %v2796_v4 = vmul.f32 %v3779_v54, %v2795_v52  ;;  %v2834_v34 = vmul.f32 %v3781_v53, %v2832_v35  ;;  %3782 = vrcp.f32 %v2872_v63 }
 0x34a   : > { %v2859_v38 = vadd.f32 0.18741608, %v2858_v31  ;;  %v2821_v26 = vadd.f32 1.1283791, %v2820_v42  ;;  %vm2839_vm6 = vweird.f32 %v3781_v53  ;;  %v2845_v39 = vor.u32 1.1754944e-38, %v2844_v62 }
 0x34b   : > { %v2797_v9 = vadd.f32 %v3779_v54, %v2796_v4  ;;  %v3608_v0 = vclamps-f32 %v2767_v1, 1.0  ;;  %v2835_v18 = vsub.f32 1.0, %v2834_v34  ;;  %vm2840_vm8 = vmor %vm2838_vm7, %vm2839_vm6  ;;  %vm2843_vm9 = vcmp.eq.f32.partialorder %v2842_v16, 8.507059e+37 }
 0x34c   : > { %v2860_v3 = vmul.f32 %v2859_v38, %v7373_v37  ;;  %v2822_v19 = vmul.f32 %v2821_v26, %v7312_v23  ;;  %v2882_v28 = vand.u32 2147483647, %v2872_v63  ;;  %v2884_v32 = vand.u32 2147483648, %v2872_v63 }
 0x34d   : > { %v2801_v21 = vsel %vm2800_vm4, %v3779_v54, %v2797_v9  ;;  %v2836_v40 = vmul.f32 %v3781_v53, %v2835_v18  ;;  %v3292_v61 = vadd.f32 1.0, %v3608_v0  ;;  %vm2878_vm11 = vweird.f32 %v2872_v63 }
 0x34e   : > { %v2806_v51 = vsel %vm2803_vm5, %v2805_v56, %v2801_v21  ;;  %v2861_v7 = vadd.f32 1.1283791, %v2860_v3  ;;  %v2885_v54 = vor.u32 1.1754944e-38, %v2884_v32  ;;  %vm2883_vm13 = vcmp.eq.f32.partialorder %v2882_v28, 8.507059e+37 }
 0x34f   : > { %v2807_v46 = vmul.f32 %v2806_v51, %v2782_v20  ;;  %v3783_v13 = vpop.eup %3782  ;;  %v2837_v55 = vadd.f32 %v3781_v53, %v2836_v40  ;;  %v3308_v43 = vmul.f32 %v3292_v61, %v2620_v48  ;;  %v2622_v45 = vmul.f32 0.5, %v7300_v5 }
 0x350   : > { %v2874_v41 = vmul.f32 %v3783_v13, %v2872_v63  ;;  %vm2879_vm10 = vweird.f32 %v3783_v13  ;;  %v2862_v23 = vmul.f32 %v2861_v7, %v7345_v15  ;;  %v2623_v60 = vmul.f32 0.5, %v7331_v33  ;;  %v2595_v15 = vpop.f32.mrf.mxu0 }
 0x351   : > { %v3609_v36 = vclamps-f32 %v2807_v46, 1.0  ;;  %v2841_v24 = vsel %vm2840_vm8, %v3781_v53, %v2837_v55  ;;  %vm2880_vm12 = vmor %vm2878_vm11, %vm2879_vm10  ;;  %v7459_v10 = vadd.f32 %v7175_v2, %v2593_v12  ;;  %v7465_v4 = vadd.f32 %v7175_v2, %v2595_v15 }
 0x352   : > { %v2846_v44 = vsel %vm2843_vm9, %v2845_v39, %v2841_v24  ;;  %v2875_v30 = vsub.f32 1.0, %v2874_v41 }
 0x353   : > { %v3293_v59 = vadd.f32 1.0, %v3609_v36  ;;  %v2847_v17 = vmul.f32 %v2846_v44, %v2822_v19  ;;  %v7462_v1 = vmul.f32 0.70710677, %v7459_v10  ;;  %v7470_v33 = vmul.f32 0.70710677, %v7465_v4 }
 0x354   : > { %v2876_v35 = vmul.f32 %v3783_v13, %v2875_v30 }
 0x355   : > { %v3309_v14 = vmul.f32 %v3293_v59, %v2621_v47  ;;  %v3610_v25 = vclamps-f32 %v2847_v17, 1.0  ;;  %v2890_v5 = vmul.f32 %v7462_v1, %v7462_v1  ;;  %v2930_v31 = vmul.f32 %v7470_v33, %v7470_v33 }
 0x356   : > { %v2877_v58 = vadd.f32 %v3783_v13, %v2876_v35  ;;  %v2603_v59 = vpop.f32.mrf.mxu3 }
 0x357   : > { %v3323_v37 = vpack.c.bf16 %v3309_v14, %v3308_v43  ;;  %v3294_v29 = vadd.f32 1.0, %v3610_v25  ;;  %v7472_v6 = vmin.f32 %v2890_v5, 16.0  ;;  %v7477_v53 = vmin.f32 %v2930_v31, 16.0 }
 0x358   : > { %v2881_v11 = vsel %vm2880_vm12, %v3783_v13, %v2877_v58  ;;  %v7500_v19 = vadd.f32 %v7175_v2, %v2603_v59 }
 0x359   : > { %3411 = vmatmul.bf16.gmra.mxu1 %v3323_v37  ;;  %v2886_v27 = vsel %vm2883_vm13, %v2885_v54, %v2881_v11  ;;  %v3310_v52 = vmul.f32 %v3294_v29, %v2622_v45  ;;  %v2892_v63 = vmul.f32 2.1237322e-06, %v7472_v6  ;;  %v2903_v9 = vmul.f32 3.8918573e-05, %v7472_v6 }
 0x35a   : > { %v2887_v50 = vmul.f32 %v2886_v27, %v2862_v23  ;;  %v2932_v34 = vmul.f32 2.1237322e-06, %v7477_v53  ;;  %v2943_v62 = vmul.f32 3.8918573e-05, %v7477_v53  ;;  %v7509_v32 = vmul.f32 0.70710677, %v7500_v19 }
 0x35b   : > { %v2893_v42 = vadd.f32 0.00028619796, %v2892_v63  ;;  %v2904_v56 = vadd.f32 0.001143296, %v2903_v9 }
 0x35c   : > { %v3611_v57 = vclamps-f32 %v2887_v50, 1.0  ;;  %v2933_v38 = vadd.f32 0.00028619796, %v2932_v34  ;;  %v2944_v61 = vadd.f32 0.001143296, %v2943_v62  ;;  %v3050_v23 = vmul.f32 %v7509_v32, %v7509_v32 }
 0x35d   : > { %v2905_v20 = vmul.f32 %v2904_v56, %v7472_v6  ;;  %v2894_v0 = vmul.f32 %v2893_v42, %v7472_v6 }
 0x35e   : > { %v3295_v22 = vadd.f32 1.0, %v3611_v57  ;;  %v2934_v36 = vmul.f32 %v2933_v38, %v7477_v53  ;;  %v2945_v55 = vmul.f32 %v2944_v61, %v7477_v53  ;;  %v7523_v45 = vmin.f32 %v3050_v23, 16.0 }
 0x35f   : > { %v2906_v21 = vadd.f32 0.014752088, %v2905_v20  ;;  %v2895_v26 = vadd.f32 0.0036580483, %v2894_v0 }
 0x360   : > { %v3311_v8 = vmul.f32 %v3295_v22, %v2623_v60  ;;  %v2935_v41 = vadd.f32 0.0036580483, %v2934_v36  ;;  %v2946_v43 = vadd.f32 0.014752088, %v2945_v55  ;;  %v3052_v63 = vmul.f32 2.1237322e-06, %v7523_v45 }
 0x361   : > { %v2907_v46 = vmul.f32 %v2906_v21, %v7472_v6  ;;  %v2896_v3 = vmul.f32 %v2895_v26, %v7472_v6 }
 0x362   : > { %v3324_v49 = vpack.c.bf16 %v3311_v8, %v3310_v52  ;;  %v2947_v37 = vmul.f32 %v2946_v43, %v7477_v53  ;;  %v2936_v54 = vmul.f32 %v2935_v41, %v7477_v53  ;;  %v2605_v8 = vpop.f32.mrf.mxu3  ;;  %v3053_v26 = vadd.f32 0.00028619796, %v3052_v63  ;;  %v7551_v43 = vld [vmem:[%s7874_s4] ss:$0 sm:$0xff] }
 0x363   : > { %v2908_v16 = vadd.f32 0.112945676, %v2907_v46  ;;  %v2897_v28 = vadd.f32 0.05243302, %v2896_v3  ;;  %v7530_v9 = vadd.f32 %v7175_v2, %v2605_v8 }
 0x364   : > { %v2948_v25 = vadd.f32 0.112945676, %v2947_v37  ;;  %v2937_v22 = vadd.f32 0.05243302, %v2936_v54 }
 0x365   : > { %v2909_v48 = vmul.f32 %v2908_v16, %v7472_v6  ;;  %v2898_v57 = vmul.f32 %v2897_v28, %v7472_v6 }
 0x366   : > { %v2949_v29 = vmul.f32 %v2948_v25, %v7477_v53  ;;  %v2938_v0 = vmul.f32 %v2937_v22, %v7477_v53 }
 0x367   : > { %v2910_v39 = vadd.f32 0.4994258, %v2909_v48  ;;  %v2899_v5 = vadd.f32 0.18741608, %v2898_v57 }
 0x369   : > { %3416 = vmatmul.bf16.gmra.mxu1 %v3324_v49  ;;  %v2911_v30 = vmul.f32 %v2910_v39, %v7472_v6  ;;  %v2950_v49 = vadd.f32 0.4994258, %v2949_v29  ;;  %v2900_v62 = vmul.f32 %v2899_v5, %v7472_v6  ;;  %v3054_v6 = vmul.f32 %v3053_v26, %v7523_v45 }
 0x36b   : > { %v2912_v58 = vadd.f32 1.0, %v2911_v30  ;;  %v2951_v42 = vmul.f32 %v2950_v49, %v7477_v53  ;;  %v2901_v41 = vadd.f32 1.1283791, %v2900_v62 }
 0x36c   : > { %v2598_v51 = vpop.f32.mrf.mxu0 }
 0x36d   : > { %v7484_v18 = vadd.f32 %v7175_v2, %v2598_v51  ;;  %3784 = vrcp.f32 %v2912_v58  ;;  %v7537_v38 = vadd.f32 1.0, %v2951_v42  ;;  %v2924_v61 = vand.u32 2147483648, %v2912_v58 }
 0x36e   : > { %v2922_v3 = vand.u32 2147483647, %v2912_v58  ;;  %vm2918_vm15 = vweird.f32 %v2912_v58 }
 0x36f   : > { %v7489_v40 = vmul.f32 0.70710677, %v7484_v18  ;;  %3786 = vrcp.f32 %v7537_v38  ;;  %v2925_v28 = vor.u32 1.1754944e-38, %v2924_v61  ;;  %v2964_v5 = vand.u32 2147483648, %v7537_v38 }
 0x370   : > { %vm2923_vm2 = vcmp.eq.f32.partialorder %v2922_v3, 8.507059e+37  ;;  %v2962_v63 = vand.u32 2147483647, %v7537_v38  ;;  %vm2958_vm4 = vweird.f32 %v7537_v38 }
 0x371   : > { %v2970_v13 = vmul.f32 %v7489_v40, %v7489_v40  ;;  %v2965_v26 = vor.u32 1.1754944e-38, %v2964_v5 }
 0x372   : > { %vm2963_vm6 = vcmp.eq.f32.partialorder %v2962_v63, 8.507059e+37 }
 0x373   : > { %v7497_v47 = vmin.f32 %v2970_v13, 16.0  ;;  %v3785_v31 = vpop.eup %3784  ;;  %v2939_v13 = vadd.f32 0.18741608, %v2938_v0 }
 0x374   : > { %v2600_v24 = vpop.f32.mrf.mxu0  ;;  %v2914_v20 = vmul.f32 %v3785_v31, %v2912_v58  ;;  %vm2919_vm14 = vweird.f32 %v3785_v31 }
 0x375   : > { %v2972_v14 = vmul.f32 2.1237322e-06, %v7497_v47  ;;  %v7504_v44 = vadd.f32 %v7175_v2, %v2600_v24  ;;  %v2983_v7 = vmul.f32 3.8918573e-05, %v7497_v47  ;;  %v7541_v2 = vmul.f32 0.70710677, %v7530_v9  ;;  %vm2920_vm1 = vmor %vm2918_vm15, %vm2919_vm14 }
 0x376   : > { %v2915_v46 = vsub.f32 1.0, %v2914_v20  ;;  %v2940_v58 = vmul.f32 %v2939_v13, %v7477_v53 }
 0x377   : > { %v2973_v17 = vadd.f32 0.00028619796, %v2972_v14  ;;  %v7513_v35 = vmul.f32 0.70710677, %v7504_v44  ;;  %v2984_v11 = vadd.f32 0.001143296, %v2983_v7  ;;  %v3090_v24 = vmul.f32 %v7541_v2, %v7541_v2 }
 0x378   : > { %v2916_v36 = vmul.f32 %v3785_v31, %v2915_v46 }
 0x379   : > { %v2974_v27 = vmul.f32 %v2973_v17, %v7497_v47  ;;  %v3010_v50 = vmul.f32 %v7513_v35, %v7513_v35  ;;  %v2985_v60 = vmul.f32 %v2984_v11, %v7497_v47  ;;  %v3787_v17 = vpop.eup %3786  ;;  %v7564_v57 = vmin.f32 %v3090_v24, 16.0 }
 0x37a   : > { %v2917_v39 = vadd.f32 %v3785_v31, %v2916_v36  ;;  %v2954_v11 = vmul.f32 %v3787_v17, %v7537_v38  ;;  %vm2959_vm3 = vweird.f32 %v3787_v17 }
 0x37b   : > { %v7526_v52 = vmin.f32 %v3010_v50, 16.0  ;;  %v2975_v12 = vadd.f32 0.0036580483, %v2974_v27  ;;  %v2986_v15 = vadd.f32 0.014752088, %v2985_v60  ;;  %v2902_v27 = vmul.f32 %v2901_v41, %v7462_v1  ;;  %vm2960_vm5 = vmor %vm2958_vm4, %vm2959_vm3 }
 0x37c   : > { %v2921_v7 = vsel %vm2920_vm1, %v3785_v31, %v2917_v39  ;;  %v3055_v50 = vadd.f32 0.0036580483, %v3054_v6  ;;  %v2955_v22 = vsub.f32 1.0, %v2954_v11  ;;  %v3063_v6 = vmul.f32 3.8918573e-05, %v7523_v45 }
 0x37d   : > { %v2987_v56 = vmul.f32 %v2986_v15, %v7497_v47  ;;  %v3012_v34 = vmul.f32 2.1237322e-06, %v7526_v52  ;;  %v2976_v21 = vmul.f32 %v2975_v12, %v7497_v47  ;;  %v2926_v25 = vsel %vm2923_vm2, %v2925_v28, %v2921_v7 }
 0x37e   : > { %v3023_v8 = vmul.f32 3.8918573e-05, %v7526_v52  ;;  %v2941_v12 = vadd.f32 1.1283791, %v2940_v58  ;;  %v2927_v15 = vmul.f32 %v2926_v25, %v2902_v27  ;;  %v2956_v1 = vmul.f32 %v3787_v17, %v2955_v22 }
 0x37f   : > { %v2988_v51 = vadd.f32 0.112945676, %v2987_v56  ;;  %v3013_v16 = vadd.f32 0.00028619796, %v3012_v34  ;;  %v2977_v48 = vadd.f32 0.05243302, %v2976_v21  ;;  %v3056_v56 = vmul.f32 %v3055_v50, %v7523_v45 }
 0x380   : > { %v3092_v34 = vmul.f32 2.1237322e-06, %v7564_v57  ;;  %v2957_v21 = vadd.f32 %v3787_v17, %v2956_v1  ;;  %v3612_v62 = vclamps-f32 %v2927_v15, 1.0  ;;  %v2625_v28 = vmul.f32 0.5, %v7465_v4 }
 0x381   : > { %v2989_v55 = vmul.f32 %v2988_v51, %v7497_v47  ;;  %v3014_v30 = vmul.f32 %v3013_v16, %v7526_v52  ;;  %v2978_v54 = vmul.f32 %v2977_v48, %v7497_v47  ;;  %v3024_v51 = vadd.f32 0.001143296, %v3023_v8 }
 0x382   : > { %v2942_v16 = vmul.f32 %v2941_v12, %v7470_v33  ;;  %v2961_v36 = vsel %vm2960_vm5, %v3787_v17, %v2957_v21  ;;  %v3093_v61 = vadd.f32 0.00028619796, %v3092_v34  ;;  %v3057_v3 = vadd.f32 0.05243302, %v3056_v56 }
 0x383   : > { %v2990_v37 = vadd.f32 0.4994258, %v2989_v55  ;;  %v3015_v60 = vadd.f32 0.0036580483, %v3014_v30  ;;  %v2979_v49 = vadd.f32 0.18741608, %v2978_v54  ;;  %v2966_v48 = vsel %vm2963_vm6, %v2965_v26, %v2961_v36 }
 0x384   : > { %v3025_v39 = vmul.f32 %v3024_v51, %v7526_v52  ;;  %v3296_v33 = vadd.f32 1.0, %v3612_v62  ;;  %v3058_v27 = vmul.f32 %v3057_v3, %v7523_v45  ;;  %v3103_v8 = vmul.f32 3.8918573e-05, %v7564_v57  ;;  %v7630_v51 = vld [vmem:[%s7876_s6] ss:$0 sm:$0xff] }
 0x385   : > { %v2991_v53 = vmul.f32 %v2990_v37, %v7497_v47  ;;  %v3016_v0 = vmul.f32 %v3015_v60, %v7526_v52  ;;  %v2980_v38 = vmul.f32 %v2979_v49, %v7497_v47  ;;  %v2624_v47 = vmul.f32 0.5, %v7459_v10 }
 0x386   : > { %v3026_v7 = vadd.f32 0.014752088, %v3025_v39  ;;  %v3094_v37 = vmul.f32 %v3093_v61, %v7564_v57  ;;  %v3064_v10 = vadd.f32 0.001143296, %v3063_v6  ;;  %v3104_v56 = vadd.f32 0.001143296, %v3103_v8 }
 0x387   : > { %v7572_v42 = vadd.f32 1.0, %v2991_v53  ;;  %v3017_v55 = vadd.f32 0.05243302, %v3016_v0  ;;  %v2981_v54 = vadd.f32 1.1283791, %v2980_v38  ;;  %v7623_v34 = vmul.f32 0.5, %v7484_v18 }
 0x388   : > { %v3027_v11 = vmul.f32 %v3026_v7, %v7526_v52  ;;  %v3065_v53 = vmul.f32 %v3064_v10, %v7523_v45  ;;  %v3095_v12 = vadd.f32 0.0036580483, %v3094_v37  ;;  %v3059_v0 = vadd.f32 0.18741608, %v3058_v27 }
 0x389   : > { %3788 = vrcp.f32 %v7572_v42  ;;  %v3018_v4 = vmul.f32 %v3017_v55, %v7526_v52  ;;  %v7635_v38 = vmul.f32 %v2981_v54, %v7489_v40  ;;  %vm2998_vm8 = vweird.f32 %v7572_v42 }
 0x38a   : > { %v3028_v22 = vadd.f32 0.112945676, %v3027_v11  ;;  %v3066_v63 = vadd.f32 0.014752088, %v3065_v53  ;;  %v3096_v61 = vmul.f32 %v3095_v12, %v7564_v57  ;;  %v3060_v39 = vmul.f32 %v3059_v0, %v7523_v45 }
 0x38b   : > { %v3019_v18 = vadd.f32 0.18741608, %v3018_v4 }
 0x38c   : > { %v3029_v1 = vmul.f32 %v3028_v22, %v7526_v52  ;;  %v3067_v26 = vmul.f32 %v3066_v63, %v7523_v45  ;;  %v3061_v12 = vadd.f32 1.1283791, %v3060_v39 }
 0x38d   : > { %v3020_v4 = vmul.f32 %v3019_v18, %v7526_v52 }
 0x38e   : > { %v3030_v62 = vadd.f32 0.4994258, %v3029_v1  ;;  %v3068_v55 = vadd.f32 0.112945676, %v3067_v26  ;;  %v3655_v26 = vld [vmem:[%s4105_s10 + $0x53] sm:$0xff] }
 0x38f   : > { %v7597_v24 = vpop.eup %3788 }
 0x390   : > { %v2994_v58 = vmul.f32 %v7597_v24, %v7572_v42  ;;  %v3031_v3 = vmul.f32 %v3030_v62, %v7526_v52  ;;  %v3069_v37 = vmul.f32 %v3068_v55, %v7523_v45  ;;  %vm2999_vm7 = vweird.f32 %v7597_v24 }
 0x391   : > { %vm7668_vm9 = vmor %vm2998_vm8, %vm2999_vm7 }
 0x392   : > { %v2995_v15 = vsub.f32 1.0, %v2994_v58  ;;  %v3097_v58 = vadd.f32 0.05243302, %v3096_v61 }
 0x3a7   : > { %v2608_v59 = vpop.f32.mrf.mxu3 }
 0x3a8   : > { %v7554_v14 = vadd.f32 %v7551_v43, %v2608_v59  ;;  %v2967_v59 = vmul.f32 %v2966_v48, %v2942_v16  ;;  %v3105_v16 = vmul.f32 %v3104_v56, %v7564_v57  ;;  %v2996_v48 = vmul.f32 %v7597_v24, %v2995_v15 }
 0x3a9   : > { %v3021_v56 = vadd.f32 1.1283791, %v3020_v4 }
 0x3aa   : > { %v7560_v23 = vmul.f32 0.70710677, %v7554_v14  ;;  %v3613_v30 = vclamps-f32 %v2967_v59, 1.0  ;;  %v3106_v59 = vadd.f32 0.014752088, %v3105_v16  ;;  %v2997_v27 = vadd.f32 %v7597_v24, %v2996_v48 }
 0x3ac   : > { %v3130_v29 = vmul.f32 %v7560_v23, %v7560_v23  ;;  %v3297_v25 = vadd.f32 1.0, %v3613_v30 }
 0x3ae   : > { %v7576_v20 = vmin.f32 %v3130_v29, 16.0  ;;  %v3312_v29 = vmul.f32 %v3296_v33, %v2624_v47  ;;  %v3313_v60 = vmul.f32 %v3297_v25, %v2625_v28  ;;  %v3654_v47 = vld [vmem:[%s4105_s10 + $0x4b] sm:$0xff]  ;;  %v7647_v28 = vadd.f32 1.0, %v3031_v3 }
 0x3af   : > { %v2610_v31 = vpop.f32.mrf.mxu3  ;;  %v3002_v25 = vand.u32 2147483647, %v7572_v42 }
 0x3b0   : > { %v7583_v46 = vadd.f32 %v7551_v43, %v2610_v31  ;;  %v3132_v13 = vmul.f32 2.1237322e-06, %v7576_v20  ;;  %v3143_v5 = vmul.f32 3.8918573e-05, %v7576_v20  ;;  %v3325_v31 = vpack.c.bf16 %v3313_v60, %v3312_v29 }
 0x3b1   : > { %3790 = vrcp.f32 %v7647_v28  ;;  %v3004_v29 = vand.u32 2147483648, %v7572_v42  ;;  %v3070_v60 = vadd.f32 0.4994258, %v3069_v37  ;;  %vm3003_vm10 = vcmp.eq.f32.partialorder %v3002_v25, 8.507059e+37 }
 0x3b2   : > { %v7593_v41 = vmul.f32 0.70710677, %v7583_v46  ;;  %v3133_v17 = vadd.f32 0.00028619796, %v3132_v13  ;;  %3421 = vmatmul.bf16.gmra.mxu1 %v3325_v31  ;;  %v3144_v36 = vadd.f32 0.001143296, %v3143_v5  ;;  %v3001_v31 = vsel %vm7668_vm9, %v7597_v24, %v2997_v27 }
 0x3b3   : > { %v3071_v52 = vmul.f32 %v3070_v60, %v7523_v45  ;;  %v3005_v16 = vor.u32 1.1754944e-38, %v3004_v29  ;;  %v3022_v25 = vmul.f32 %v3021_v56, %v7513_v35  ;;  %vm3038_vm12 = vweird.f32 %v7647_v28 }
 0x3b4   : > { %v3170_v50 = vmul.f32 %v7593_v41, %v7593_v41  ;;  %v3134_v49 = vmul.f32 %v3133_v17, %v7576_v20  ;;  %v3145_v40 = vmul.f32 %v3144_v36, %v7576_v20  ;;  %v3107_v17 = vmul.f32 %v3106_v59, %v7564_v57 }
 0x3b5   : > { %v7680_v36 = vadd.f32 1.0, %v3071_v52  ;;  %v3006_v55 = vsel %vm3003_vm10, %v3005_v16, %v3001_v31  ;;  %v3062_v52 = vmul.f32 %v3061_v12, %v7509_v32 }
 0x3b6   : > { %v7625_v21 = vmin.f32 %v3170_v50, 16.0  ;;  %v3135_v13 = vadd.f32 0.0036580483, %v3134_v49  ;;  %v3146_v11 = vadd.f32 0.014752088, %v3145_v40  ;;  %v3098_v49 = vmul.f32 %v3097_v58, %v7564_v57 }
 0x3b7   : > { %v3108_v22 = vadd.f32 0.112945676, %v3107_v17  ;;  %v3791_v18 = vpop.eup %3790  ;;  %3792 = vrcp.f32 %v7680_v36  ;;  %v3007_v37 = vmul.f32 %v3006_v55, %v7635_v38  ;;  %v3044_v17 = vand.u32 2147483648, %v7647_v28 }
 0x3b8   : > { %v3172_v33 = vmul.f32 2.1237322e-06, %v7625_v21  ;;  %v3183_v30 = vmul.f32 3.8918573e-05, %v7625_v21  ;;  %v3136_v54 = vmul.f32 %v3135_v13, %v7576_v20  ;;  %v3147_v53 = vmul.f32 %v3146_v11, %v7576_v20 }
 0x3b9   : > { %v3109_v42 = vmul.f32 %v3108_v22, %v7564_v57  ;;  %v3099_v48 = vadd.f32 0.18741608, %v3098_v49  ;;  %v3034_v59 = vmul.f32 %v3791_v18, %v7647_v28  ;;  %vm3039_vm11 = vweird.f32 %v3791_v18 }
 0x3ba   : > { %v3173_v50 = vadd.f32 0.00028619796, %v3172_v33  ;;  %v3184_v8 = vadd.f32 0.001143296, %v3183_v30  ;;  %v3137_v15 = vadd.f32 0.05243302, %v3136_v54  ;;  %vm3040_vm13 = vmor %vm3038_vm12, %vm3039_vm11  ;;  %vm3078_vm1 = vweird.f32 %v7680_v36 }
 0x3bb   : > { %v3148_v1 = vadd.f32 0.112945676, %v3147_v53  ;;  %v3110_v24 = vadd.f32 0.4994258, %v3109_v42  ;;  %v3614_v53 = vclamps-f32 %v3007_v37, 1.0 }
 0x3bc   : > { %v3185_v63 = vmul.f32 %v3184_v8, %v7625_v21  ;;  %v3174_v0 = vmul.f32 %v3173_v50, %v7625_v21  ;;  %v3138_v39 = vmul.f32 %v3137_v15, %v7576_v20  ;;  %v3045_v8 = vor.u32 1.1754944e-38, %v3044_v17 }
 0x3bd   : > { %v3149_v13 = vmul.f32 %v3148_v1, %v7576_v20  ;;  %v3111_v58 = vmul.f32 %v3110_v24, %v7564_v57  ;;  %v3793_v35 = vpop.eup %3792 }
 0x3be   : > { %v3175_v40 = vadd.f32 0.0036580483, %v3174_v0  ;;  %v3139_v27 = vadd.f32 0.18741608, %v3138_v39  ;;  %v3074_v5 = vmul.f32 %v3793_v35, %v7680_v36  ;;  %vm3079_vm15 = vweird.f32 %v3793_v35 }
 0x3bf   : > { %v3150_v54 = vadd.f32 0.4994258, %v3149_v13  ;;  %v7704_v4 = vadd.f32 1.0, %v3111_v58  ;;  %vm3080_vm3 = vmor %vm3078_vm1, %vm3079_vm15 }
 0x3c0   : > { %v3407_v6 = vpop.f32.mrf.mxu1  ;;  %v3176_v38 = vmul.f32 %v3175_v40, %v7625_v21 }
 0x3c1   : > { %v3408_v7 = vadd.f32 %v7630_v51, %v3407_v6  ;;  %v3186_v6 = vadd.f32 0.014752088, %v3185_v63  ;;  %3794 = vrcp.f32 %v7704_v4  ;;  %v3122_v17 = vand.u32 2147483647, %v7704_v4 }
 0x3c2   : > { %v3177_v63 = vadd.f32 0.05243302, %v3176_v38  ;;  %v3124_v58 = vand.u32 2147483648, %v7704_v4  ;;  %vm3118_vm5 = vweird.f32 %v7704_v4 }
 0x3c3   : > { %v3464_v10 = vadd.f32 %v3654_v47, %v3408_v7  ;;  %v7691_v47 = vmul.f32 0.5, %v7500_v19  ;;  %v3035_v7 = vsub.f32 1.0, %v3034_v59  ;;  %v3042_v19 = vand.u32 2147483647, %v7647_v28 }
 0x3c4   : > { %v3187_v50 = vmul.f32 %v3186_v6, %v7625_v21  ;;  %v2627_v28 = vmul.f32 0.5, %v7504_v44  ;;  %v3084_v44 = vand.u32 2147483648, %v7680_v36  ;;  %v3178_v13 = vmul.f32 %v3177_v63, %v7625_v21 }
 0x3c5   : > { %3480 = vst.msk [vmem:[%s7655_s22] sm:$0xff] %vm2157_vm0, %v3464_v10  ;;  %v3036_v11 = vmul.f32 %v3791_v18, %v3035_v7  ;;  %v3100_v10 = vmul.f32 %v3099_v48, %v7564_v57  ;;  %v3151_v57 = vmul.f32 %v3150_v54, %v7576_v20  ;;  %vm3043_vm14 = vcmp.eq.f32.partialorder %v3042_v19, 8.507059e+37  ;;  %v3656_v19 = vld [vmem:[%s4105_s10 + $0x63] sm:$0xff] }
 0x3c6   : > { %v3188_v42 = vadd.f32 0.112945676, %v3187_v50  ;;  %v3085_v40 = vor.u32 1.1754944e-38, %v3084_v44  ;;  %vm3123_vm7 = vcmp.eq.f32.partialorder %v3122_v17, 8.507059e+37 }
 0x3c7   : > { %v3037_v60 = vadd.f32 %v3791_v18, %v3036_v11  ;;  %v3101_v1 = vadd.f32 1.1283791, %v3100_v10  ;;  %v7722_v16 = vadd.f32 1.0, %v3151_v57  ;;  %v3795_v12 = vpop.eup %3794 }
 0x3c8   : > { %v3409_v62 = vpop.f32.mrf.mxu1  ;;  %v3189_v24 = vmul.f32 %v3188_v42, %v7625_v21  ;;  %v3114_v55 = vmul.f32 %v3795_v12, %v7704_v4  ;;  %vm3119_vm4 = vweird.f32 %v3795_v12 }
 0x3c9   : > { %v3410_v45 = vadd.f32 %v7630_v51, %v3409_v62  ;;  %v3041_v15 = vsel %vm3040_vm13, %v3791_v18, %v3037_v60  ;;  %v3298_v62 = vadd.f32 1.0, %v3614_v53  ;;  %v3140_v18 = vmul.f32 %v3139_v27, %v7576_v20  ;;  %vm3120_vm6 = vmor %vm3118_vm5, %vm3119_vm4 }
 0x3ca   : > { %v3046_v31 = vsel %vm3043_vm14, %v3045_v8, %v3041_v15  ;;  %3796 = vrcp.f32 %v7722_v16  ;;  %v3115_v7 = vsub.f32 1.0, %v3114_v55  ;;  %v3190_v54 = vadd.f32 0.4994258, %v3189_v24  ;;  %v3657_v24 = vld [vmem:[%s4105_s10 + $0x6b] sm:$0xff] }
 0x3cb   : > { %v2613_v61 = vpop.f32.mrf.mxu3  ;;  %v3465_v33 = vadd.f32 %v3655_v26, %v3410_v45  ;;  %v3047_v0 = vmul.f32 %v3046_v31, %v3022_v25  ;;  %v3075_v26 = vsub.f32 1.0, %v3074_v5  ;;  %v3314_v59 = vmul.f32 %v3298_v62, %v7623_v34 }
 0x3cc   : > { %v7685_v3 = vadd.f32 %v7551_v43, %v2613_v61  ;;  %v3116_v38 = vmul.f32 %v3795_v12, %v3115_v7  ;;  %v3179_v60 = vadd.f32 0.18741608, %v3178_v13  ;;  %v3102_v63 = vmul.f32 %v3101_v1, %v7541_v2 }
 0x3cd   : > { %3481 = vst.msk [vmem:[%s7655_s22 + $0x8] sm:$0xff] %vm2157_vm0, %v3465_v33  ;;  %v3615_v32 = vclamps-f32 %v3047_v0, 1.0  ;;  %v3076_v45 = vmul.f32 %v3793_v35, %v3075_v26  ;;  %vm3158_vm9 = vweird.f32 %v7722_v16 }
 0x3ce   : > { %v7694_v30 = vmul.f32 0.70710677, %v7685_v3  ;;  %v3117_v57 = vadd.f32 %v3795_v12, %v3116_v38  ;;  %v3180_v44 = vmul.f32 %v3179_v60, %v7625_v21 }
 0x3cf   : > { %v3299_v48 = vadd.f32 1.0, %v3615_v32  ;;  %v3077_v39 = vadd.f32 %v3793_v35, %v3076_v45  ;;  %v3141_v32 = vadd.f32 1.1283791, %v3140_v18 }
 0x3d0   : > { %v3210_v29 = vmul.f32 %v7694_v30, %v7694_v30  ;;  %v7742_v27 = vpop.eup %3796  ;;  %v3181_v17 = vadd.f32 1.1283791, %v3180_v44 }
 0x3d1   : > { %v3315_v6 = vmul.f32 %v3299_v48, %v2627_v28  ;;  %v3081_v37 = vsel %vm3080_vm3, %v3793_v35, %v3077_v39  ;;  %v3154_v53 = vmul.f32 %v7742_v27, %v7722_v16  ;;  %v3125_v28 = vor.u32 1.1754944e-38, %v3124_v58 }
 0x3d2   : > { %v7719_v56 = vmin.f32 %v3210_v29, 16.0  ;;  %v3191_v29 = vmul.f32 %v3190_v54, %v7625_v21  ;;  %vm3159_vm8 = vweird.f32 %v7742_v27 }
 0x3d3   : > { %v2615_v22 = vpop.f32.mrf.mxu3  ;;  %v3326_v25 = vpack.c.bf16 %v3315_v6, %v3314_v59  ;;  %v3155_v31 = vsub.f32 1.0, %v3154_v53  ;;  %vm7772_vm10 = vmor %vm3158_vm9, %vm3159_vm8  ;;  %v3658_v53 = vld [vmem:[%s4105_s10 + $0x7b] sm:$0xff] }
 0x3d4   : > { %v7714_v49 = vadd.f32 %v7551_v43, %v2615_v22  ;;  %v3082_v43 = vand.u32 2147483647, %v7680_v36  ;;  %v3223_v20 = vmul.f32 3.8918573e-05, %v7719_v56  ;;  %v3212_v34 = vmul.f32 2.1237322e-06, %v7719_v56 }
 0x3d5   : > { %3426 = vmatmul.bf16.vlgmr.msra.gmra.mxu2 %v3326_v25  ;;  %v7751_v15 = vadd.f32 1.0, %v3191_v29  ;;  %v3156_v26 = vmul.f32 %v7742_v27, %v3155_v31 }
 0x3d6   : > { %v7726_v61 = vmul.f32 0.70710677, %v7714_v49  ;;  %vm3083_vm2 = vcmp.eq.f32.partialorder %v3082_v43, 8.507059e+37  ;;  %v3412_v11 = vpop.f32.mrf.mxu1  ;;  %v3224_v10 = vadd.f32 0.001143296, %v3223_v20  ;;  %v2629_v43 = vmul.f32 0.5, %v7530_v9 }
 0x3d7   : > { %v3086_v36 = vsel %vm3083_vm2, %v3085_v40, %v3081_v37  ;;  %v3413_v50 = vadd.f32 %v7630_v51, %v3412_v11  ;;  %v3213_v5 = vadd.f32 0.00028619796, %v3212_v34  ;;  %3798 = vrcp.f32 %v7751_v15 }
 0x3d8   : > { %v3250_v33 = vmul.f32 %v7726_v61, %v7726_v61  ;;  %v3087_v22 = vmul.f32 %v3086_v36, %v3062_v52  ;;  %v3225_v42 = vmul.f32 %v3224_v10, %v7719_v56  ;;  %v3121_v52 = vsel %vm3120_vm6, %v3795_v12, %v3117_v57 }
 0x3d9   : > { %v3466_v8 = vadd.f32 %v3656_v19, %v3413_v50  ;;  %v3126_v62 = vsel %vm3123_vm7, %v3125_v28, %v3121_v52  ;;  %v3214_v2 = vmul.f32 %v3213_v5, %v7719_v56  ;;  %v3157_v12 = vadd.f32 %v7742_v27, %v3156_v26 }
 0x3da   : > { %v7746_v35 = vmin.f32 %v3250_v33, 16.0  ;;  %v3616_v4 = vclamps-f32 %v3087_v22, 1.0  ;;  %v3127_v45 = vmul.f32 %v3126_v62, %v3102_v63  ;;  %v3226_v13 = vadd.f32 0.014752088, %v3225_v42 }
 0x3db   : > { %3482 = vst.msk [vmem:[%s7655_s22 + $0x10] sm:$0xff] %vm2157_vm0, %v3466_v8  ;;  %v3164_v9 = vand.u32 2147483648, %v7722_v16  ;;  %v3162_v20 = vand.u32 2147483647, %v7722_v16  ;;  %v3142_v33 = vmul.f32 %v3141_v32, %v7560_v23  ;;  %v3215_v58 = vadd.f32 0.0036580483, %v3214_v2 }
 0x3dc   : > { %v3252_v0 = vmul.f32 2.1237322e-06, %v7746_v35  ;;  %v3617_v55 = vclamps-f32 %v3127_v45, 1.0  ;;  %v3300_v21 = vadd.f32 1.0, %v3616_v4  ;;  %v3227_v59 = vmul.f32 %v3226_v13, %v7719_v56 }
 0x3dd   : > { %v3799_v39 = vpop.eup %3798  ;;  %v3263_v37 = vmul.f32 3.8918573e-05, %v7746_v35  ;;  %v3161_v54 = vsel %vm7772_vm10, %v7742_v27, %v3157_v12  ;;  %v3165_v34 = vor.u32 1.1754944e-38, %v3164_v9  ;;  %vm3163_vm11 = vcmp.eq.f32.partialorder %v3162_v20, 8.507059e+37 }
 0x3de   : > { %v3414_v1 = vpop.f32.mrf.mxu1  ;;  %v3253_v18 = vadd.f32 0.00028619796, %v3252_v0  ;;  %v3301_v40 = vadd.f32 1.0, %v3617_v55  ;;  %v3194_v16 = vmul.f32 %v3799_v39, %v7751_v15  ;;  %v3228_v25 = vadd.f32 0.112945676, %v3227_v59 }
 0x3df   : > { %v3415_v48 = vadd.f32 %v7630_v51, %v3414_v1  ;;  %v3264_v11 = vadd.f32 0.001143296, %v3263_v37  ;;  %v3316_v36 = vmul.f32 %v3300_v21, %v7691_v47  ;;  %v3166_v50 = vsel %vm3163_vm11, %v3165_v34, %v3161_v54 }
 0x3e0   : > { %v3317_v23 = vmul.f32 %v3301_v40, %v2629_v43  ;;  %v3254_v19 = vmul.f32 %v3253_v18, %v7746_v35  ;;  %v3195_v10 = vsub.f32 1.0, %v3194_v16  ;;  %v3204_v38 = vand.u32 2147483648, %v7751_v15 }
 0x3e1   : > { %v3467_v6 = vadd.f32 %v3657_v24, %v3415_v48  ;;  %v3229_v27 = vmul.f32 %v3228_v25, %v7719_v56  ;;  %v3265_v29 = vmul.f32 %v3264_v11, %v7746_v35  ;;  %vm3199_vm12 = vweird.f32 %v3799_v39  ;;  %v3659_v48 = vld [vmem:[%s4105_s10 + $0x83] sm:$0xff] }
 0x3e2   : > { %v3327_v60 = vpack.c.bf16 %v3317_v23, %v3316_v36  ;;  %v3196_v8 = vmul.f32 %v3799_v39, %v3195_v10  ;;  %v3202_v57 = vand.u32 2147483647, %v7751_v15  ;;  %v3216_v5 = vmul.f32 %v3215_v58, %v7719_v56 }
 0x3e3   : > { %3483 = vst.msk [vmem:[%s7655_s22 + $0x18] sm:$0xff] %vm2157_vm0, %v3467_v6  ;;  %v3230_v28 = vadd.f32 0.4994258, %v3229_v27  ;;  %v3266_v31 = vadd.f32 0.014752088, %v3265_v29  ;;  %v3167_v63 = vmul.f32 %v3166_v50, %v3142_v33  ;;  %vm3198_vm13 = vweird.f32 %v7751_v15 }
 0x3e4   : > { %v3255_v42 = vadd.f32 0.0036580483, %v3254_v19  ;;  %v3197_v52 = vadd.f32 %v3799_v39, %v3196_v8  ;;  %vm3200_vm14 = vmor %vm3198_vm13, %vm3199_vm12  ;;  %v3205_v4 = vor.u32 1.1754944e-38, %v3204_v38  ;;  %v3182_v43 = vmul.f32 %v3181_v17, %v7593_v41 }
 0x3e5   : > { %3431 = vmatmul.bf16.gmra.mxu2 %v3327_v60  ;;  %v3231_v62 = vmul.f32 %v3230_v28, %v7719_v56  ;;  %v3267_v26 = vmul.f32 %v3266_v31, %v7746_v35  ;;  %vm3203_vm15 = vcmp.eq.f32.partialorder %v3202_v57, 8.507059e+37  ;;  %v3217_v44 = vadd.f32 0.05243302, %v3216_v5 }
 0x3e6   : > { %v3417_v22 = vpop.f32.mrf.mxu1  ;;  %v3201_v32 = vsel %vm3200_vm14, %v3799_v39, %v3197_v52  ;;  %v3256_v15 = vmul.f32 %v3255_v42, %v7746_v35  ;;  %v3618_v24 = vclamps-f32 %v3167_v63, 1.0  ;;  %v2631_v41 = vmul.f32 0.5, %v7583_v46 }
 0x3e7   : > { %v3418_v47 = vadd.f32 %v7630_v51, %v3417_v22  ;;  %v3206_v45 = vsel %vm3203_vm15, %v3205_v4, %v3201_v32  ;;  %v3232_v2 = vadd.f32 1.0, %v3231_v62  ;;  %v3268_v1 = vadd.f32 0.112945676, %v3267_v26 }
 0x3e8   : > { %v3207_v12 = vmul.f32 %v3206_v45, %v3182_v43  ;;  %v3218_v18 = vmul.f32 %v3217_v44, %v7719_v56  ;;  %v3257_v20 = vadd.f32 0.05243302, %v3256_v15  ;;  %v3302_v59 = vadd.f32 1.0, %v3618_v24  ;;  %v3660_v24 = vld [vmem:[%s4105_s10 + $0x93] sm:$0xff] }
 0x3e9   : > { %v3468_v0 = vadd.f32 %v3658_v53, %v3418_v47  ;;  %3800 = vrcp.f32 %v3232_v2  ;;  %v3269_v9 = vmul.f32 %v3268_v1, %v7746_v35  ;;  %v2630_v40 = vmul.f32 0.5, %v7554_v14 }
 0x3ea   : > { %v3619_v55 = vclamps-f32 %v3207_v12, 1.0  ;;  %v3219_v58 = vadd.f32 0.18741608, %v3218_v18  ;;  %v3258_v46 = vmul.f32 %v3257_v20, %v7746_v35  ;;  %v3244_v36 = vand.u32 2147483648, %v3232_v2 }
 0x3eb   : > { %3484 = vst.msk [vmem:[%s7655_s22 + $0x20] sm:$0xff] %vm2157_vm0, %v3468_v0  ;;  %v3270_v33 = vadd.f32 0.4994258, %v3269_v9  ;;  %v3318_v54 = vmul.f32 %v3302_v59, %v2630_v40  ;;  %v3242_v10 = vand.u32 2147483647, %v3232_v2  ;;  %vm3238_vm2 = vweird.f32 %v3232_v2  ;;  %v3663_v59 = vld [vmem:[%s4105_s10 + $0xb3] sm:$0xff] }
 0x3ec   : > { %v3303_v39 = vadd.f32 1.0, %v3619_v55  ;;  %v3220_v11 = vmul.f32 %v3219_v58, %v7719_v56  ;;  %v3259_v19 = vadd.f32 0.18741608, %v3258_v46  ;;  %v3245_v22 = vor.u32 1.1754944e-38, %v3244_v36  ;;  %v3664_v40 = vld [vmem:[%s4105_s10 + $0xc3] sm:$0xff]  ;;  %v3665_v58 = vld [vmem:[%s4105_s10 + $0xcb] sm:$0xff] }
 0x3ed   : > { %v3271_v37 = vmul.f32 %v3270_v33, %v7746_v35  ;;  %vm3243_vm4 = vcmp.eq.f32.partialorder %v3242_v10, 8.507059e+37  ;;  %v2632_v32 = vmul.f32 0.5, %v7685_v3  ;;  %v2633_v44 = vmul.f32 0.5, %v7714_v49 }
 0x3ee   : > { %v3419_v13 = vpop.f32.mrf.mxu1  ;;  %v3319_v7 = vmul.f32 %v3303_v39, %v2631_v41  ;;  %v3221_v38 = vadd.f32 1.1283791, %v3220_v11  ;;  %v3260_v29 = vmul.f32 %v3259_v19, %v7746_v35  ;;  %v3662_v41 = vld [vmem:[%s4105_s10 + $0xab] sm:$0xff]  ;;  %v3667_v19 = vld [vmem:[%s4105_s10 + $0xe3] sm:$0xff] }
 0x3ef   : > { %v3420_v21 = vadd.f32 %v7630_v51, %v3419_v13  ;;  %v3801_v17 = vpop.eup %3800  ;;  %v3272_v23 = vadd.f32 1.0, %v3271_v37 }
 0x3f0   : > { %v3234_v16 = vmul.f32 %v3801_v17, %v3232_v2  ;;  %v3328_v34 = vpack.c.bf16 %v3319_v7, %v3318_v54  ;;  %vm3239_vm1 = vweird.f32 %v3801_v17  ;;  %v3222_v56 = vmul.f32 %v3221_v38, %v7694_v30 }
 0x3f1   : > { %v3469_v6 = vadd.f32 %v3659_v48, %v3420_v21  ;;  %3802 = vrcp.f32 %v3272_v23  ;;  %vm3240_vm3 = vmor %vm3238_vm2, %vm3239_vm1  ;;  %v3261_v5 = vadd.f32 1.1283791, %v3260_v29  ;;  %v3284_v47 = vand.u32 2147483648, %v3272_v23  ;;  %v3661_v48 = vld [vmem:[%s4105_s10 + $0x9b] sm:$0xff] }
 0x3f2   : > { %v3235_v25 = vsub.f32 1.0, %v3234_v16  ;;  %v3282_v42 = vand.u32 2147483647, %v3272_v23  ;;  %vm3278_vm6 = vweird.f32 %v3272_v23 }
 0x3f3   : > { %3485 = vst.msk [vmem:[%s7655_s22 + $0x28] sm:$0xff] %vm2157_vm0, %v3469_v6  ;;  %v3285_v52 = vor.u32 1.1754944e-38, %v3284_v47  ;;  %v3262_v35 = vmul.f32 %v3261_v5, %v7726_v61 }
 0x3f4   : > { %v3236_v14 = vmul.f32 %v3801_v17, %v3235_v25  ;;  %vm3283_vm8 = vcmp.eq.f32.partialorder %v3282_v42, 8.507059e+37 }
 0x3f5   : > { %3436 = vmatmul.bf16.gmra.mxu2 %v3328_v34 }
 0x3f6   : > { %v3237_v50 = vadd.f32 %v3801_v17, %v3236_v14 }
 0x3f7   : > { %v3803_v27 = vpop.eup %3802 }
 0x3f8   : > { %v3241_v60 = vsel %vm3240_vm3, %v3801_v17, %v3237_v50  ;;  %v3274_v53 = vmul.f32 %v3803_v27, %v3272_v23  ;;  %vm3279_vm5 = vweird.f32 %v3803_v27  ;;  %v3666_v23 = vld [vmem:[%s4105_s10 + $0xdb] sm:$0xff]  ;;  %v3668_v50 = vld [vmem:[%s4105_s10 + $0xf3] sm:$0xff] }
 0x3f9   : > { %v3246_v8 = vsel %vm3243_vm4, %v3245_v22, %v3241_v60  ;;  %vm3280_vm7 = vmor %vm3278_vm6, %vm3279_vm5  ;;  %v3669_v60 = vld [vmem:[%s4105_s10 + $0xfb] sm:$0xff] }
 0x3fa   : > { %v3275_v57 = vsub.f32 1.0, %v3274_v53  ;;  %v3247_v28 = vmul.f32 %v3246_v8, %v3222_v56 }
 0x3fc   : > { %v3276_v31 = vmul.f32 %v3803_v27, %v3275_v57  ;;  %v3620_v0 = vclamps-f32 %v3247_v28, 1.0 }
 0x3fe   : > { %v3277_v63 = vadd.f32 %v3803_v27, %v3276_v31  ;;  %v3304_v43 = vadd.f32 1.0, %v3620_v0 }
 0x400   : > { %v3281_v4 = vsel %vm3280_vm7, %v3803_v27, %v3277_v63  ;;  %v3320_v2 = vmul.f32 %v3304_v43, %v2632_v32 }
 0x401   : > { %v3286_v62 = vsel %vm3283_vm8, %v3285_v52, %v3281_v4 }
 0x402   : > { %v3287_v30 = vmul.f32 %v3286_v62, %v3262_v35 }
 0x404   : > { %v3621_v26 = vclamps-f32 %v3287_v30, 1.0 }
 0x406   : > { %v3305_v45 = vadd.f32 1.0, %v3621_v26 }
 0x408   : > { %v3321_v1 = vmul.f32 %v3305_v45, %v2633_v44 }
 0x40a   : > { %v3329_v61 = vpack.c.bf16 %v3321_v1, %v3320_v2 }
 0x40c   : > { %3441 = vmatmul.bf16.gmra.mxu2 %v3329_v61 }
 0x42f   : > { %v3422_v15 = vpop.f32.mrf.mxu1 }
 0x430   : > { %v3423_v12 = vadd.f32 %v7630_v51, %v3422_v15 }
 0x432   : > { %v3470_v13 = vadd.f32 %v3660_v24, %v3423_v12 }
 0x434   : > { %3486 = vst.msk [vmem:[%s7655_s22 + $0x30] sm:$0xff] %vm2157_vm0, %v3470_v13 }
 0x437   : > { %v3424_v3 = vpop.f32.mrf.mxu1 }
 0x438   : > { %v3425_v49 = vadd.f32 %v7630_v51, %v3424_v3 }
 0x43a   : > { %v3471_v55 = vadd.f32 %v3661_v48, %v3425_v49 }
 0x43c   : > { %3487 = vst.msk [vmem:[%s7655_s22 + $0x38] sm:$0xff] %vm2157_vm0, %v3471_v55 }
 0x458   : > { %v3427_v9 = vpop.f32.mrf.mxu2 }
 0x459   : > { %v3428_v18 = vadd.f32 %v7630_v51, %v3427_v9 }
 0x45b   : > { %v3472_v21 = vadd.f32 %v3662_v41, %v3428_v18 }
 0x45d   : > { %3488 = vst.msk [vmem:[%s7655_s22 + $0x40] sm:$0xff] %vm2157_vm0, %v3472_v21 }
 0x460   : > { %v3429_v20 = vpop.f32.mrf.mxu2 }
 0x461   : > { %v3430_v39 = vadd.f32 %v7630_v51, %v3429_v20 }
 0x463   : > { %v3473_v33 = vadd.f32 %v3663_v59, %v3430_v39 }
 0x465   : > { %3489 = vst.msk [vmem:[%s7655_s22 + $0x48] sm:$0xff] %vm2157_vm0, %v3473_v33 }
 0x468   : > { %v3432_v6 = vpop.f32.mrf.mxu2 }
 0x469   : > { %v3433_v7 = vadd.f32 %v7630_v51, %v3432_v6 }
 0x46b   : > { %v3474_v37 = vadd.f32 %v3664_v40, %v3433_v7 }
 0x46d   : > { %3490 = vst.msk [vmem:[%s7655_s22 + $0x50] sm:$0xff] %vm2157_vm0, %v3474_v37 }
 0x470   : > { %v3434_v17 = vpop.f32.mrf.mxu2 }
 0x471   : > { %v3435_v46 = vadd.f32 %v7630_v51, %v3434_v17 }
 0x473   : > { %v3475_v54 = vadd.f32 %v3665_v58, %v3435_v46 }
 0x475   : > { %3491 = vst.msk [vmem:[%s7655_s22 + $0x58] sm:$0xff] %vm2157_vm0, %v3475_v54 }
 0x478   : > { %v3437_v16 = vpop.f32.mrf.mxu2 }
 0x479   : > { %v3438_v34 = vadd.f32 %v7630_v51, %v3437_v16 }
 0x47b   : > { %v3476_v25 = vadd.f32 %v3666_v23, %v3438_v34 }
 0x47d   : > { %3492 = vst.msk [vmem:[%s7655_s22 + $0x60] sm:$0xff] %vm2157_vm0, %v3476_v25 }
 0x480   : > { %v3439_v11 = vpop.f32.mrf.mxu2 }
 0x481   : > { %v3440_v14 = vadd.f32 %v7630_v51, %v3439_v11 }
 0x483   : > { %v3477_v36 = vadd.f32 %v3667_v19, %v3440_v14 }
 0x485   : > { %3493 = vst.msk [vmem:[%s7655_s22 + $0x68] sm:$0xff] %vm2157_vm0, %v3477_v36 }
 0x48f   : > { %v3442_v10 = vpop.f32.mrf.mxu2 }
 0x490   : > { %v3443_v38 = vadd.f32 %v7630_v51, %v3442_v10 }
 0x492   : > { %v3478_v27 = vadd.f32 %v3668_v50, %v3443_v38 }
 0x494   : > { %3494 = vst.msk [vmem:[%s7655_s22 + $0x70] sm:$0xff] %vm2157_vm0, %v3478_v27 }
 0x497   : > { %v3444_v29 = vpop.f32.mrf.mxu2 }
 0x498   : > { %v3445_v22 = vadd.f32 %v7630_v51, %v3444_v29 }
 0x49a   : > { %v3479_v53 = vadd.f32 %v3669_v60, %v3445_v22 }
 0x49c   : > { %3495 = vst.msk [vmem:[%s7655_s22 + $0x78] sm:$0xff] %vm2157_vm0, %v3479_v53 }
 0x49d PF: > { %s17_s28 = sadd.s32 1, %s3987_s28   ;;  %s9329_s24 = smov %s3979_s26 }
 0x49e   : > { %p14_p8 = scmp.ge.s32.totalorder %s17_s28, 6   ;;  %s9330_s25 = smov %s3983_s27 }
 0x49f   : > { %s9331_s26 = smov %s9334_s29  ;;  %s9332_s27 = smov %s9338_s30 }
 0x4a0   :  { %16 = sbr.rel (!%p14_p8) target bundleno = 3 (0x3), region = 79 }

</bundles_post_ra>
